<compile_context>
chip_gen: v7x
topology: tpu7x:2x2x1
jax: 0.10.0
libtpu: 0.0.40
codegen_flags: <defaults>
</compile_context>

<pallas_src>
import functools

import jax
import jax.numpy as jnp
import numpy as np
from jax.experimental import pallas as pl
from jax.experimental.pallas import tpu as pltpu

BN_EPS = 1e-5
LANE = 128


# ------------------------------ small helpers --------------------------------

def _round_up(c, m=LANE):
    return ((c + m - 1) // m) * m


def _pad_vec(v, cpad):
    return jnp.zeros((cpad,), jnp.float32).at[: v.shape[0]].set(v)


@functools.lru_cache(maxsize=None)
def _budgets():
    """(conv slab budget, vmem_limit_bytes), derived from physical VMEM."""
    cap = 64 << 20                                  # conservative default (v7x)
    try:
        info = pltpu.get_tpu_info()
        cap = int(getattr(info, "vmem_capacity_bytes", cap) or cap)
    except Exception:
        pass
    vmem_limit = max(16 << 20, min(96 << 20, (cap * 7) // 10))
    slab_budget = max(1 << 20, min(12 << 20, cap // 10))
    return slab_budget, vmem_limit


def _row_tile(R, cap):
    """Row tile for flat (R, C) kernels: prefer an exact divisor (mult of 8);
    otherwise a capped tile with a cdiv grid + masked tail (no giant blocks)."""
    cap = min(cap, R)
    for d in range(cap, 0, -1):
        if R % d == 0 and (d % 8 == 0 or d == R):
            return d
    return cap


def _pick_row_tile(H, W, cins, cout, budget_bytes):
    """Largest divisor of H whose per-step working set fits the slab budget."""
    per_row = 0
    for cb in cins:
        per_row += (W + 2) * cb * 2 * 2    # double-buffered bf16 input rows
        per_row += W * 3 * cb * 2 * 2      # dx-fused slab + shifted pieces (bf16)
    per_row += W * cout * (4 + 2 * 2)      # f32 accumulator + dbl-buffered bf16 out
    cap = max(1, budget_bytes // per_row)
    best = 1
    for th in range(1, H + 1):
        if H % th == 0 and th <= cap:
            best = th
    return best


def _conv_taps_dxfused(w_oihw, ci_lo, ci_hi, cin_pad, cout_pad):
    """PyTorch OIHW 3x3 weight slice -> (3, 3*cin_pad, cout_pad) bf16 taps,
    rows ordered (dx, ci) to match the in-kernel dx-fused patch columns."""
    co = w_oihw.shape[0]
    sub = jnp.transpose(w_oihw[:, ci_lo:ci_hi], (2, 3, 1, 0))      # (3,3,ci,co)
    full = jnp.zeros((3, 3, cin_pad, cout_pad), jnp.float32)
    full = full.at[:, :, : ci_hi - ci_lo, :co].set(sub)
    return full.reshape(3, 3 * cin_pad, cout_pad).astype(jnp.bfloat16)


def _bn_finalize(stats, gamma_pad, beta_pad, count):
    # TODO(synk): E[z^2]-E[z]^2 in f32 can cancel for large-mean channels; a
    # centered second pass would be more robust if that regime matters.
    sums = jnp.sum(stats, axis=(0, 1))                  # (2, C)
    mean = sums[0] / count
    var = jnp.maximum(sums[1] / count - mean * mean, 0.0)
    scale = gamma_pad * jax.lax.rsqrt(var + BN_EPS)
    shift = beta_pad - mean * scale
    return scale, shift


# ------------------------------- Pallas kernels -------------------------------

def _matmul_bias_kernel(x_ref, w_ref, b_ref, o_ref):
    # (TR, K) @ (K, Nout) on the MXU (bf16 in, f32 accumulate) + f32 bias.
    o_ref[...] = (jnp.dot(x_ref[...], w_ref[...],
                          preferred_element_type=jnp.float32)
                  + b_ref[...]).astype(o_ref.dtype)


def _bn_relu_kernel(z_ref, s_ref, t_ref, o_ref):
    # y = max(z * scale + shift, 0); bf16 in, f32 math + f32 out.
    o_ref[...] = jnp.maximum(
        z_ref[...].astype(jnp.float32) * s_ref[...] + t_ref[...], 0.0)


def _conv3x3_fused_kernel(*refs, nb, TH, W, H, affine):
    """Fused 3x3 conv over `nb` channel-split branches (torch.cat == sum of
    per-branch contributions), with optional fused BN-apply+ReLU on a branch's
    input slab (border-masked), plus per-tile BN partial output statistics."""
    Wp2 = W + 2
    n_aff = sum(affine)
    i0, i1, i2 = 3 * nb, 3 * nb + 2 * n_aff, 3 * nb + 2 * n_aff + nb
    act_refs, aff_refs, w_refs = refs[:i0], refs[i0:i1], refs[i1:i2]
    bias_ref, z_ref, st_ref = refs[i2], refs[i2 + 1], refs[i2 + 2]

    cout = bias_ref.shape[-1]
    row0 = pl.program_id(1) * TH          # first padded row covered by this tile

    acc = jnp.zeros((TH * W, cout), jnp.float32)
    ai = 0
    for b in range(nb):
        m_ref, ha_ref, hb_ref = act_refs[3 * b: 3 * b + 3]
        cb = m_ref.shape[-1]
        if affine[b]:
            sc = aff_refs[2 * ai][0]       # (cb,) f32
            sh = aff_refs[2 * ai + 1][0]   # (cb,) f32
            ai += 1

        pieces = ((m_ref[0], 0, TH), (ha_ref[0], TH, 1), (hb_ref[0], TH + 1, 1))
        proc = []
        for x, roff, nr in pieces:                       # x: (nr, Wp2, cb) bf16
            if affine[b]:
                # Fused BatchNorm-apply + ReLU of the previous conv; mask so
                # the zero halo border stays exactly zero.
                v = jnp.maximum(x.astype(jnp.float32) * sc + sh, 0.0)
                rid = (jax.lax.broadcasted_iota(jnp.int32, (nr, Wp2), 0)
                       + (row0 + roff))
                cid = jax.lax.broadcasted_iota(jnp.int32, (nr, Wp2), 1)
                ok = (rid >= 1) & (rid <= H) & (cid >= 1) & (cid <= W)
                v = v * ok.astype(jnp.float32)[:, :, None]
                x = v.astype(jnp.bfloat16)
            # dx-fused patch rows: lanes ordered (dx, c) -> (nr, W, 3*cb).
            proc.append(jnp.concatenate(
                [x[:, 0:W, :], x[:, 1:W + 1, :], x[:, 2:W + 2, :]], axis=-1))
        slab3 = jnp.concatenate(proc, axis=0)            # (TH+2, W, 3*cb) bf16

        for dy in range(3):                              # one fat MXU dot per dy
            patch = slab3[dy:dy + TH].reshape(TH * W, 3 * cb)
            acc = acc + jnp.dot(patch, w_refs[b][dy],
                                preferred_element_type=jnp.float32)

    z = acc + bias_ref[...]                              # (TH*W, cout) f32
    z_ref[0] = z.reshape(TH, W, cout).astype(z_ref.dtype)
    # BN partial statistics from the f32 accumulator (before the bf16 cast).
    s1 = jnp.sum(z, axis=0, keepdims=True)
    s2 = jnp.sum(z * z, axis=0, keepdims=True)
    st_ref[0, 0] = jnp.concatenate([s1, s2], axis=0)     # (2, cout)


# -------------------------------- wrappers ------------------------------------

def _upconv_matmul(x_flat, w_bf16, bias_row):
    """Matmul core of ConvTranspose2d(k=2, s=2): (R, CU) @ (CU, 4*CU) -> bf16."""
    R, K = x_flat.shape
    Nout = w_bf16.shape[1]
    _, vmem_limit = _budgets()
    TR = _row_tile(R, 1024)
    return pl.pallas_call(
        _matmul_bias_kernel,
        out_shape=jax.ShapeDtypeStruct((R, Nout), jnp.bfloat16),
        grid=(pl.cdiv(R, TR),),
        in_specs=[
            pl.BlockSpec((TR, K), lambda i: (i, 0)),
            pl.BlockSpec((K, Nout), lambda i: (0, 0)),
            pl.BlockSpec((1, Nout), lambda i: (0, 0)),
        ],
        out_specs=pl.BlockSpec((TR, Nout), lambda i: (i, 0)),
        compiler_params=pltpu.CompilerParams(
            dimension_semantics=("parallel",), vmem_limit_bytes=vmem_limit),
    )(x_flat, w_bf16, bias_row)


def _bn_relu(z_flat, scale_row, shift_row):
    R, C = z_flat.shape
    _, vmem_limit = _budgets()
    TR = _row_tile(R, 2048)
    return pl.pallas_call(
        _bn_relu_kernel,
        out_shape=jax.ShapeDtypeStruct((R, C), jnp.float32),
        grid=(pl.cdiv(R, TR),),
        in_specs=[
            pl.BlockSpec((TR, C), lambda i: (i, 0)),
            pl.BlockSpec((1, C), lambda i: (0, 0)),
            pl.BlockSpec((1, C), lambda i: (0, 0)),
        ],
        out_specs=pl.BlockSpec((TR, C), lambda i: (i, 0)),
        compiler_params=pltpu.CompilerParams(
            dimension_semantics=("parallel",), vmem_limit_bytes=vmem_limit),
    )(z_flat, scale_row, shift_row)


def _conv3x3_stats(branches, w_taps, bias_row, affines, H, W):
    """branches: list of (N, H+2, W+2, Cb) bf16 halo-padded inputs (channel-split
    concat).  w_taps: per-branch (3, 3*Cb, CoutP) bf16.  affines: per-branch None
    or (scale, shift) rows applied (with ReLU + border mask) to that branch's
    slab before the conv.  Returns (z bf16 (N,H,W,CoutP), stats f32)."""
    N = branches[0].shape[0]
    Wp2 = W + 2
    nb = len(branches)
    cins = [int(b.shape[-1]) for b in branches]
    CoutP = int(w_taps[0].shape[-1])
    slab_budget, vmem_limit = _budgets()
    TH = _pick_row_tile(H, W, cins, CoutP, slab_budget)
    T = H // TH

    operands, in_specs = [], []
    for br, cb in zip(branches, cins):
        operands += [br, br, br]
        in_specs += [
            pl.BlockSpec((1, TH, Wp2, cb), lambda n, t: (n, t, 0, 0)),
            pl.BlockSpec((1, 1, Wp2, cb), lambda n, t: (n, t * TH + TH, 0, 0)),
            pl.BlockSpec((1, 1, Wp2, cb), lambda n, t: (n, t * TH + TH + 1, 0, 0)),
        ]
    for aff, cb in zip(affines, cins):
        if aff is not None:
            sc, sh = aff
            operands += [sc.reshape(1, cb), sh.reshape(1, cb)]
            in_specs += [pl.BlockSpec((1, cb), lambda n, t: (0, 0)),
                         pl.BlockSpec((1, cb), lambda n, t: (0, 0))]
    for wt_b, cb in zip(w_taps, cins):
        operands.append(wt_b)
        in_specs.append(pl.BlockSpec((3, 3 * cb, CoutP), lambda n, t: (0, 0, 0)))
    operands.append(bias_row)
    in_specs.append(pl.BlockSpec((1, CoutP), lambda n, t: (0, 0)))

    kernel = functools.partial(
        _conv3x3_fused_kernel, nb=nb, TH=TH, W=W, H=H,
        affine=tuple(a is not None for a in affines))

    z, stats = pl.pallas_call(
        kernel,
        out_shape=(
            jax.ShapeDtypeStruct((N, H, W, CoutP), jnp.bfloat16),
            jax.ShapeDtypeStruct((N, T, 2, CoutP), jnp.float32),
        ),
        grid=(N, T),
        in_specs=in_specs,
        out_specs=(
            pl.BlockSpec((1, TH, W, CoutP), lambda n, t: (n, t, 0, 0)),
            pl.BlockSpec((1, 1, 2, CoutP), lambda n, t: (n, t, 0, 0)),
        ),
        compiler_params=pltpu.CompilerParams(
            dimension_semantics=("parallel", "parallel"),
            vmem_limit_bytes=vmem_limit),
    )(*operands)
    return z, stats


# --------------------------------- forward ------------------------------------

def up_forward(x1_nchw, x2_nchw, params):
    (wt, bt, w1, b1, g1, be1, w2, b2, g2, be2) = params

    N, Cm, H1, W1 = x1_nchw.shape
    _, Cx2, H2, W2 = x2_nchw.shape
    Cout = w1.shape[0]

    CU = _round_up(Cm)        # padded channels of each concat branch
    CO = _round_up(Cout)      # padded conv output channels

    # --- ConvTranspose2d(Cm, Cm, k=2, s=2) as one lane-dense bf16 matmul ---
    x1_flat = jnp.pad(jnp.transpose(x1_nchw, (0, 2, 3, 1)),
                      ((0, 0), (0, 0), (0, 0), (0, CU - Cm))
                      ).astype(jnp.bfloat16).reshape(N * H1 * W1, CU)
    wt_cols = jnp.zeros((CU, 2, 2, CU), jnp.float32)
    wt_cols = wt_cols.at[:Cm, :, :, :Cm].set(jnp.transpose(wt, (0, 2, 3, 1)))
    wt_cols = wt_cols.reshape(CU, 4 * CU).astype(jnp.bfloat16)
    bt_row = jnp.tile(_pad_vec(bt, CU), 4)[None, :]

    z_up = _upconv_matmul(x1_flat, wt_cols, bt_row)          # (N*H1*W1, 4*CU) bf16

    # Stride-2 (ky,kx) spatial interleave, in bf16.
    # TODO(synk): could be folded into the upconv via strided out_specs; kept as
    # one bf16 XLA pass (half the previous f32 traffic).
    y = (z_up.reshape(N, H1, W1, 2, 2, CU)
             .transpose(0, 1, 3, 2, 4, 5)
             .reshape(N, 2 * H1, 2 * W1, CU))

    # F.pad to x2's spatial size fused with the +1 conv halo pad (bf16).
    # TODO(synk): assumes diffY, diffX >= 0 as in the UNet Up usage.
    dY, dX = H2 - 2 * H1, W2 - 2 * W1
    yp = jnp.pad(y, ((0, 0), (1 + dY // 2, 1 + dY - dY // 2),
                     (1 + dX // 2, 1 + dX - dX // 2), (0, 0)))

    # x2 branch: NHWC bf16, halo + channel pad to CU only (no 2*Cm over-padding).
    x2h = jnp.pad(jnp.transpose(x2_nchw, (0, 2, 3, 1)).astype(jnp.bfloat16),
                  ((0, 0), (1, 1), (1, 1), (0, CU - Cx2)))

    # --- conv1: split-K over the two concat branches, emits BN partial stats ---
    w1_x2 = _conv_taps_dxfused(w1, 0, Cx2, CU, CO)
    w1_up = _conv_taps_dxfused(w1, Cx2, Cx2 + Cm, CU, CO)
    z1, st1 = _conv3x3_stats([x2h, yp], [w1_x2, w1_up],
                             _pad_vec(b1, CO)[None, :],
                             affines=[None, None], H=H2, W=W2)
    scale1, shift1 = _bn_finalize(st1, _pad_vec(g1, CO), _pad_vec(be1, CO),
                                  float(N * H2 * W2))

    # --- conv2: BN1-apply + ReLU fused into the conv input path ---
    z1p = jnp.pad(z1, ((0, 0), (1, 1), (1, 1), (0, 0)))      # bf16 halo pad
    w2_t = _conv_taps_dxfused(w2, 0, Cout, CO, CO)
    z2, st2 = _conv3x3_stats([z1p], [w2_t], _pad_vec(b2, CO)[None, :],
                             affines=[(scale1, shift1)], H=H2, W=W2)
    scale2, shift2 = _bn_finalize(st2, _pad_vec(g2, CO), _pad_vec(be2, CO),
                                  float(N * H2 * W2))

    # --- final BN + ReLU (no downstream conv to fuse into) ---
    a2 = _bn_relu(z2.reshape(N * H2 * W2, CO), scale2[None, :], shift2[None, :])
    return jnp.transpose(a2.reshape(N, H2, W2, CO)[..., :Cout], (0, 3, 1, 2))


# ------------------------------ pure-JAX reference ----------------------------

def up_reference(x1, x2, params):
    (wt, bt, w1, b1, g1, be1, w2, b2, g2, be2) = params
    # ConvTranspose2d(k=2,s=2): out[n,co,2i+ky,2j+kx] = sum_ci x[n,ci,i,j]*W[ci,co,ky,kx]
    y = jnp.einsum('ncij,cokl->noijkl', x1, wt)
    N, Co, H1, W1, _, _ = y.shape
    y = (y.transpose(0, 1, 2, 4, 3, 5).reshape(N, Co, 2 * H1, 2 * W1)
         + bt[None, :, None, None])
    dY, dX = x2.shape[2] - y.shape[2], x2.shape[3] - y.shape[3]
    y = jnp.pad(y, ((0, 0), (0, 0), (dY // 2, dY - dY // 2),
                    (dX // 2, dX - dX // 2)))
    x = jnp.concatenate([x2, y], axis=1)

    def block(x, w, b, g, be):
        z = jax.lax.conv_general_dilated(
            x, w, (1, 1), ((1, 1), (1, 1)),
            dimension_numbers=('NCHW', 'OIHW', 'NCHW')) + b[None, :, None, None]
        m = jnp.mean(z, axis=(0, 2, 3), keepdims=True)
        v = jnp.mean(jnp.square(z - m), axis=(0, 2, 3), keepdims=True)
        zn = (g[None, :, None, None] * (z - m) * jax.lax.rsqrt(v + BN_EPS)
              + be[None, :, None, None])
        return jnp.maximum(zn, 0.0)

    return block(block(x, w1, b1, g1, be1), w2, b2, g2, be2)


# ---------------------------------- main --------------------------------------

if __name__ == "__main__":
    in_channels, out_channels = 8, 4
    N, H1, W1 = 2, 8, 8          # x1 spatial; x2 spatial = 2*H1 x 2*W1
    Cm = in_channels // 2

    key = jax.random.PRNGKey(0)
    keys = jax.random.split(key, 12)

    x1 = jax.random.normal(keys[0], (N, Cm, H1, W1), jnp.float32)
    x2 = jax.random.normal(keys[1], (N, Cm, 2 * H1, 2 * W1), jnp.float32)

    wt = 0.2 * jax.random.normal(keys[2], (Cm, Cm, 2, 2), jnp.float32)   # (in,out,kH,kW)
    bt = 0.1 * jax.random.normal(keys[3], (Cm,), jnp.float32)
    w1 = 0.2 * jax.random.normal(keys[4], (out_channels, in_channels, 3, 3), jnp.float32)
    b1 = 0.1 * jax.random.normal(keys[5], (out_channels,), jnp.float32)
    g1 = 1.0 + 0.1 * jax.random.normal(keys[6], (out_channels,), jnp.float32)
    be1 = 0.1 * jax.random.normal(keys[7], (out_channels,), jnp.float32)
    w2 = 0.2 * jax.random.normal(keys[8], (out_channels, out_channels, 3, 3), jnp.float32)
    b2 = 0.1 * jax.random.normal(keys[9], (out_channels,), jnp.float32)
    g2 = 1.0 + 0.1 * jax.random.normal(keys[10], (out_channels,), jnp.float32)
    be2 = 0.1 * jax.random.normal(keys[11], (out_channels,), jnp.float32)

    params = (wt, bt, w1, b1, g1, be1, w2, b2, g2, be2)

    out = jax.jit(up_forward)(x1, x2, params)
    out = jax.block_until_ready(out)

    ref = jax.block_until_ready(up_reference(x1, x2, params))

    assert out.shape == (N, out_channels, 2 * H1, 2 * W1), out.shape
    assert np.all(np.isfinite(np.asarray(out)))
    # bf16 MXU operands + bf16 inter-kernel activations (f32 accumulation/BN math).
    np.testing.assert_allclose(np.asarray(out), np.asarray(ref), rtol=5e-2, atol=5e-2)

    print("KERNEL_OK")
</pallas_src>

<mosaic_0001>
module attributes {stable_mosaic.version = 11 : i64} {
  func.func @_matmul_bias_kernel(%arg0: i32, %arg1: memref<128x128xbf16, #tpu.memory_space<vmem>>, %arg2: memref<128x512xbf16, #tpu.memory_space<vmem>>, %arg3: memref<1x512xf32, #tpu.memory_space<vmem>>, %arg4: memref<128x512xbf16, #tpu.memory_space<vmem>>) attributes {dimension_semantics = [#tpu.dimension_semantics<parallel>], iteration_bounds = array<i64: 1>, scalar_prefetch = 0 : i64, scratch_operands = 0 : i64, tpu.core_type = #tpu.core_type<tc>, window_params = [{transform_indices = @transform_0, window_bounds = array<i64: 128, 128>}, {pipeline_mode = #tpu.pipeline_mode<synchronous>, transform_indices = @transform_1, window_bounds = array<i64: 128, 512>}, {pipeline_mode = #tpu.pipeline_mode<synchronous>, transform_indices = @transform_2, window_bounds = array<i64: 1, 512>}, {transform_indices = @transform_3, window_bounds = array<i64: 128, 512>}]} {
    %c0 = arith.constant 0 : index
    %c0_0 = arith.constant 0 : index
    %0 = vector.load %arg1[%c0, %c0_0] : memref<128x128xbf16, #tpu.memory_space<vmem>>, vector<128x128xbf16>
    %c0_1 = arith.constant 0 : index
    %c0_2 = arith.constant 0 : index
    %1 = vector.load %arg2[%c0_1, %c0_2] : memref<128x512xbf16, #tpu.memory_space<vmem>>, vector<128x512xbf16>
    %cst = arith.constant dense<0.000000e+00> : vector<128x512xf32>
    %2 = tpu.matmul %0, %1, %cst {dimension_numbers = #tpu.dot_dimension_numbers<[1], [0], [0], [1], [0, 0, 1, 1], [], []>} : vector<128x128xbf16>, vector<128x512xbf16>, vector<128x512xf32> -> vector<128x512xf32>
    %c0_3 = arith.constant 0 : index
    %c0_4 = arith.constant 0 : index
    %3 = vector.load %arg3[%c0_3, %c0_4] : memref<1x512xf32, #tpu.memory_space<vmem>>, vector<1x512xf32>
    %4 = vector.broadcast %3 : vector<1x512xf32> to vector<128x512xf32>
    %5 = arith.addf %2, %4 : vector<128x512xf32>
    %6 = arith.truncf %5 : vector<128x512xf32> to vector<128x512xbf16>
    %c0_5 = arith.constant 0 : index
    %c0_6 = arith.constant 0 : index
    %7 = vector.load %arg4[%c0_5, %c0_6] : memref<128x512xbf16, #tpu.memory_space<vmem>>, vector<128x512xbf16>
    tpu.vector_store %arg4[%c0_5, %c0_6], %6 {strides = array<i32>} : memref<128x512xbf16, #tpu.memory_space<vmem>>, vector<128x512xbf16>,
    return
  }
  func.func @transform_0(%arg0: i32) -> (i32, i32) {
    %c0_i32 = arith.constant 0 : i32
    %c0_i32_0 = arith.constant 0 : i32
    return %arg0, %c0_i32 : i32, i32
  }
  func.func @transform_1(%arg0: i32) -> (i32, i32) {
    %c0_i32 = arith.constant 0 : i32
    %c0_i32_0 = arith.constant 0 : i32
    %c0_i32_1 = arith.constant 0 : i32
    return %c0_i32, %c0_i32_0 : i32, i32
  }
  func.func @transform_2(%arg0: i32) -> (i32, i32) {
    %c0_i32 = arith.constant 0 : i32
    %c0_i32_0 = arith.constant 0 : i32
    %c0_i32_1 = arith.constant 0 : i32
    return %c0_i32, %c0_i32_0 : i32, i32
  }
  func.func @transform_3(%arg0: i32) -> (i32, i32) {
    %c0_i32 = arith.constant 0 : i32
    %c0_i32_0 = arith.constant 0 : i32
    return %arg0, %c0_i32 : i32, i32
  }
}

module attributes {stable_mosaic.version = 11 : i64} {
  func.func @_conv3x3_fused_kernel(%arg0: i32, %arg1: i32, %arg2: memref<1x16x18x128xbf16, #tpu.memory_space<vmem>>, %arg3: memref<1x1x18x128xbf16, #tpu.memory_space<vmem>>, %arg4: memref<1x1x18x128xbf16, #tpu.memory_space<vmem>>, %arg5: memref<1x16x18x128xbf16, #tpu.memory_space<vmem>>, %arg6: memref<1x1x18x128xbf16, #tpu.memory_space<vmem>>, %arg7: memref<1x1x18x128xbf16, #tpu.memory_space<vmem>>, %arg8: memref<3x384x128xbf16, #tpu.memory_space<vmem>>, %arg9: memref<3x384x128xbf16, #tpu.memory_space<vmem>>, %arg10: memref<1x128xf32, #tpu.memory_space<vmem>>, %arg11: memref<1x16x16x128xbf16, #tpu.memory_space<vmem>>, %arg12: memref<1x1x2x128xf32, #tpu.memory_space<vmem>>) attributes {dimension_semantics = [#tpu.dimension_semantics<parallel>, #tpu.dimension_semantics<parallel>], iteration_bounds = array<i64: 2, 1>, scalar_prefetch = 0 : i64, scratch_operands = 0 : i64, tpu.core_type = #tpu.core_type<tc>, window_params = [{transform_indices = @transform_0, window_bounds = array<i64: 1, 16, 18, 128>}, {transform_indices = @transform_1, window_bounds = array<i64: 1, 1, 18, 128>}, {transform_indices = @transform_2, window_bounds = array<i64: 1, 1, 18, 128>}, {transform_indices = @transform_3, window_bounds = array<i64: 1, 16, 18, 128>}, {transform_indices = @transform_4, window_bounds = array<i64: 1, 1, 18, 128>}, {transform_indices = @transform_5, window_bounds = array<i64: 1, 1, 18, 128>}, {pipeline_mode = #tpu.pipeline_mode<synchronous>, transform_indices = @transform_6, window_bounds = array<i64: 3, 384, 128>}, {pipeline_mode = #tpu.pipeline_mode<synchronous>, transform_indices = @transform_7, window_bounds = array<i64: 3, 384, 128>}, {pipeline_mode = #tpu.pipeline_mode<synchronous>, transform_indices = @transform_8, window_bounds = array<i64: 1, 128>}, {transform_indices = @transform_9, window_bounds = array<i64: 1, 16, 16, 128>}, {transform_indices = @transform_10, window_bounds = array<i64: 1, 1, 2, 128>}]} {
    %cst = arith.constant 0.000000e+00 : f32
    %0 = vector.broadcast %cst : f32 to vector<256x128xf32>
    %c0 = arith.constant 0 : index
    %c0_0 = arith.constant 0 : index
    %c0_1 = arith.constant 0 : index
    %c0_2 = arith.constant 0 : index
    %1 = vector.load %arg2[%c0, %c0_0, %c0_1, %c0_2] : memref<1x16x18x128xbf16, #tpu.memory_space<vmem>>, vector<1x16x18x128xbf16>
    %2 = vector.shape_cast %1 : vector<1x16x18x128xbf16> to vector<16x18x128xbf16>
    %c0_3 = arith.constant 0 : index
    %c0_4 = arith.constant 0 : index
    %c0_5 = arith.constant 0 : index
    %c0_6 = arith.constant 0 : index
    %3 = vector.load %arg3[%c0_3, %c0_4, %c0_5, %c0_6] : memref<1x1x18x128xbf16, #tpu.memory_space<vmem>>, vector<1x1x18x128xbf16>
    %4 = vector.shape_cast %3 : vector<1x1x18x128xbf16> to vector<1x18x128xbf16>
    %c0_7 = arith.constant 0 : index
    %c0_8 = arith.constant 0 : index
    %c0_9 = arith.constant 0 : index
    %c0_10 = arith.constant 0 : index
    %5 = vector.load %arg4[%c0_7, %c0_8, %c0_9, %c0_10] : memref<1x1x18x128xbf16, #tpu.memory_space<vmem>>, vector<1x1x18x128xbf16>
    %6 = vector.shape_cast %5 : vector<1x1x18x128xbf16> to vector<1x18x128xbf16>
    %7 = vector.extract_strided_slice %2 {offsets = [0, 0, 0], sizes = [16, 16, 128], strides = [1, 1, 1]} : vector<16x18x128xbf16> to vector<16x16x128xbf16>
    %8 = vector.extract_strided_slice %2 {offsets = [0, 1, 0], sizes = [16, 16, 128], strides = [1, 1, 1]} : vector<16x18x128xbf16> to vector<16x16x128xbf16>
    %9 = vector.extract_strided_slice %2 {offsets = [0, 2, 0], sizes = [16, 16, 128], strides = [1, 1, 1]} : vector<16x18x128xbf16> to vector<16x16x128xbf16>
    %10 = tpu.concatenate %7, %8, %9 in 2 : vector<16x16x128xbf16>, vector<16x16x128xbf16>, vector<16x16x128xbf16> -> vector<16x16x384xbf16>
    %11 = vector.extract_strided_slice %4 {offsets = [0, 0, 0], sizes = [1, 16, 128], strides = [1, 1, 1]} : vector<1x18x128xbf16> to vector<1x16x128xbf16>
    %12 = vector.extract_strided_slice %4 {offsets = [0, 1, 0], sizes = [1, 16, 128], strides = [1, 1, 1]} : vector<1x18x128xbf16> to vector<1x16x128xbf16>
    %13 = vector.extract_strided_slice %4 {offsets = [0, 2, 0], sizes = [1, 16, 128], strides = [1, 1, 1]} : vector<1x18x128xbf16> to vector<1x16x128xbf16>
    %14 = tpu.concatenate %11, %12, %13 in 2 : vector<1x16x128xbf16>, vector<1x16x128xbf16>, vector<1x16x128xbf16> -> vector<1x16x384xbf16>
    %15 = vector.extract_strided_slice %6 {offsets = [0, 0, 0], sizes = [1, 16, 128], strides = [1, 1, 1]} : vector<1x18x128xbf16> to vector<1x16x128xbf16>
    %16 = vector.extract_strided_slice %6 {offsets = [0, 1, 0], sizes = [1, 16, 128], strides = [1, 1, 1]} : vector<1x18x128xbf16> to vector<1x16x128xbf16>
    %17 = vector.extract_strided_slice %6 {offsets = [0, 2, 0], sizes = [1, 16, 128], strides = [1, 1, 1]} : vector<1x18x128xbf16> to vector<1x16x128xbf16>
    %18 = tpu.concatenate %15, %16, %17 in 2 : vector<1x16x128xbf16>, vector<1x16x128xbf16>, vector<1x16x128xbf16> -> vector<1x16x384xbf16>
    %19 = tpu.concatenate %10, %14, %18 in 0 : vector<16x16x384xbf16>, vector<1x16x384xbf16>, vector<1x16x384xbf16> -> vector<18x16x384xbf16>
    %20 = vector.extract_strided_slice %19 {offsets = [0, 0, 0], sizes = [16, 16, 384], strides = [1, 1, 1]} : vector<18x16x384xbf16> to vector<16x16x384xbf16>
    %21 = vector.shape_cast %20 : vector<16x16x384xbf16> to vector<256x384xbf16>
    %c0_11 = arith.constant 0 : index
    %c0_12 = arith.constant 0 : index
    %c0_13 = arith.constant 0 : index
    %22 = vector.load %arg8[%c0_11, %c0_12, %c0_13] : memref<3x384x128xbf16, #tpu.memory_space<vmem>>, vector<1x384x128xbf16>
    %23 = vector.shape_cast %22 : vector<1x384x128xbf16> to vector<384x128xbf16>
    %cst_14 = arith.constant dense<0.000000e+00> : vector<256x128xf32>
    %24 = tpu.matmul %21, %23, %cst_14 {dimension_numbers = #tpu.dot_dimension_numbers<[1], [0], [0], [1], [0, 0, 1, 1], [], []>} : vector<256x384xbf16>, vector<384x128xbf16>, vector<256x128xf32> -> vector<256x128xf32>
    %25 = arith.addf %0, %24 : vector<256x128xf32>
    %26 = vector.extract_strided_slice %19 {offsets = [1, 0, 0], sizes = [16, 16, 384], strides = [1, 1, 1]} : vector<18x16x384xbf16> to vector<16x16x384xbf16>
    %27 = vector.shape_cast %26 : vector<16x16x384xbf16> to vector<256x384xbf16>
    %c1 = arith.constant 1 : index
    %c0_15 = arith.constant 0 : index
    %c0_16 = arith.constant 0 : index
    %28 = vector.load %arg8[%c1, %c0_15, %c0_16] : memref<3x384x128xbf16, #tpu.memory_space<vmem>>, vector<1x384x128xbf16>
    %29 = vector.shape_cast %28 : vector<1x384x128xbf16> to vector<384x128xbf16>
    %cst_17 = arith.constant dense<0.000000e+00> : vector<256x128xf32>
    %30 = tpu.matmul %27, %29, %cst_17 {dimension_numbers = #tpu.dot_dimension_numbers<[1], [0], [0], [1], [0, 0, 1, 1], [], []>} : vector<256x384xbf16>, vector<384x128xbf16>, vector<256x128xf32> -> vector<256x128xf32>
    %31 = arith.addf %25, %30 : vector<256x128xf32>
    %32 = vector.extract_strided_slice %19 {offsets = [2, 0, 0], sizes = [16, 16, 384], strides = [1, 1, 1]} : vector<18x16x384xbf16> to vector<16x16x384xbf16>
    %33 = vector.shape_cast %32 : vector<16x16x384xbf16> to vector<256x384xbf16>
    %c2 = arith.constant 2 : index
    %c0_18 = arith.constant 0 : index
    %c0_19 = arith.constant 0 : index
    %34 = vector.load %arg8[%c2, %c0_18, %c0_19] : memref<3x384x128xbf16, #tpu.memory_space<vmem>>, vector<1x384x128xbf16>
    %35 = vector.shape_cast %34 : vector<1x384x128xbf16> to vector<384x128xbf16>
    %cst_20 = arith.constant dense<0.000000e+00> : vector<256x128xf32>
    %36 = tpu.matmul %33, %35, %cst_20 {dimension_numbers = #tpu.dot_dimension_numbers<[1], [0], [0], [1], [0, 0, 1, 1], [], []>} : vector<256x384xbf16>, vector<384x128xbf16>, vector<256x128xf32> -> vector<256x128xf32>
    %37 = arith.addf %31, %36 : vector<256x128xf32>
    %c0_21 = arith.constant 0 : index
    %c0_22 = arith.constant 0 : index
    %c0_23 = arith.constant 0 : index
    %c0_24 = arith.constant 0 : index
    %38 = vector.load %arg5[%c0_21, %c0_22, %c0_23, %c0_24] : memref<1x16x18x128xbf16, #tpu.memory_space<vmem>>, vector<1x16x18x128xbf16>
    %39 = vector.shape_cast %38 : vector<1x16x18x128xbf16> to vector<16x18x128xbf16>
    %c0_25 = arith.constant 0 : index
    %c0_26 = arith.constant 0 : index
    %c0_27 = arith.constant 0 : index
    %c0_28 = arith.constant 0 : index
    %40 = vector.load %arg6[%c0_25, %c0_26, %c0_27, %c0_28] : memref<1x1x18x128xbf16, #tpu.memory_space<vmem>>, vector<1x1x18x128xbf16>
    %41 = vector.shape_cast %40 : vector<1x1x18x128xbf16> to vector<1x18x128xbf16>
    %c0_29 = arith.constant 0 : index
    %c0_30 = arith.constant 0 : index
    %c0_31 = arith.constant 0 : index
    %c0_32 = arith.constant 0 : index
    %42 = vector.load %arg7[%c0_29, %c0_30, %c0_31, %c0_32] : memref<1x1x18x128xbf16, #tpu.memory_space<vmem>>, vector<1x1x18x128xbf16>
    %43 = vector.shape_cast %42 : vector<1x1x18x128xbf16> to vector<1x18x128xbf16>
    %44 = vector.extract_strided_slice %39 {offsets = [0, 0, 0], sizes = [16, 16, 128], strides = [1, 1, 1]} : vector<16x18x128xbf16> to vector<16x16x128xbf16>
    %45 = vector.extract_strided_slice %39 {offsets = [0, 1, 0], sizes = [16, 16, 128], strides = [1, 1, 1]} : vector<16x18x128xbf16> to vector<16x16x128xbf16>
    %46 = vector.extract_strided_slice %39 {offsets = [0, 2, 0], sizes = [16, 16, 128], strides = [1, 1, 1]} : vector<16x18x128xbf16> to vector<16x16x128xbf16>
    %47 = tpu.concatenate %44, %45, %46 in 2 : vector<16x16x128xbf16>, vector<16x16x128xbf16>, vector<16x16x128xbf16> -> vector<16x16x384xbf16>
    %48 = vector.extract_strided_slice %41 {offsets = [0, 0, 0], sizes = [1, 16, 128], strides = [1, 1, 1]} : vector<1x18x128xbf16> to vector<1x16x128xbf16>
    %49 = vector.extract_strided_slice %41 {offsets = [0, 1, 0], sizes = [1, 16, 128], strides = [1, 1, 1]} : vector<1x18x128xbf16> to vector<1x16x128xbf16>
    %50 = vector.extract_strided_slice %41 {offsets = [0, 2, 0], sizes = [1, 16, 128], strides = [1, 1, 1]} : vector<1x18x128xbf16> to vector<1x16x128xbf16>
    %51 = tpu.concatenate %48, %49, %50 in 2 : vector<1x16x128xbf16>, vector<1x16x128xbf16>, vector<1x16x128xbf16> -> vector<1x16x384xbf16>
    %52 = vector.extract_strided_slice %43 {offsets = [0, 0, 0], sizes = [1, 16, 128], strides = [1, 1, 1]} : vector<1x18x128xbf16> to vector<1x16x128xbf16>
    %53 = vector.extract_strided_slice %43 {offsets = [0, 1, 0], sizes = [1, 16, 128], strides = [1, 1, 1]} : vector<1x18x128xbf16> to vector<1x16x128xbf16>
    %54 = vector.extract_strided_slice %43 {offsets = [0, 2, 0], sizes = [1, 16, 128], strides = [1, 1, 1]} : vector<1x18x128xbf16> to vector<1x16x128xbf16>
    %55 = tpu.concatenate %52, %53, %54 in 2 : vector<1x16x128xbf16>, vector<1x16x128xbf16>, vector<1x16x128xbf16> -> vector<1x16x384xbf16>
    %56 = tpu.concatenate %47, %51, %55 in 0 : vector<16x16x384xbf16>, vector<1x16x384xbf16>, vector<1x16x384xbf16> -> vector<18x16x384xbf16>
    %57 = vector.extract_strided_slice %56 {offsets = [0, 0, 0], sizes = [16, 16, 384], strides = [1, 1, 1]} : vector<18x16x384xbf16> to vector<16x16x384xbf16>
    %58 = vector.shape_cast %57 : vector<16x16x384xbf16> to vector<256x384xbf16>
    %c0_33 = arith.constant 0 : index
    %c0_34 = arith.constant 0 : index
    %c0_35 = arith.constant 0 : index
    %59 = vector.load %arg9[%c0_33, %c0_34, %c0_35] : memref<3x384x128xbf16, #tpu.memory_space<vmem>>, vector<1x384x128xbf16>
    %60 = vector.shape_cast %59 : vector<1x384x128xbf16> to vector<384x128xbf16>
    %cst_36 = arith.constant dense<0.000000e+00> : vector<256x128xf32>
    %61 = tpu.matmul %58, %60, %cst_36 {dimension_numbers = #tpu.dot_dimension_numbers<[1], [0], [0], [1], [0, 0, 1, 1], [], []>} : vector<256x384xbf16>, vector<384x128xbf16>, vector<256x128xf32> -> vector<256x128xf32>
    %62 = arith.addf %37, %61 : vector<256x128xf32>
    %63 = vector.extract_strided_slice %56 {offsets = [1, 0, 0], sizes = [16, 16, 384], strides = [1, 1, 1]} : vector<18x16x384xbf16> to vector<16x16x384xbf16>
    %64 = vector.shape_cast %63 : vector<16x16x384xbf16> to vector<256x384xbf16>
    %c1_37 = arith.constant 1 : index
    %c0_38 = arith.constant 0 : index
    %c0_39 = arith.constant 0 : index
    %65 = vector.load %arg9[%c1_37, %c0_38, %c0_39] : memref<3x384x128xbf16, #tpu.memory_space<vmem>>, vector<1x384x128xbf16>
    %66 = vector.shape_cast %65 : vector<1x384x128xbf16> to vector<384x128xbf16>
    %cst_40 = arith.constant dense<0.000000e+00> : vector<256x128xf32>
    %67 = tpu.matmul %64, %66, %cst_40 {dimension_numbers = #tpu.dot_dimension_numbers<[1], [0], [0], [1], [0, 0, 1, 1], [], []>} : vector<256x384xbf16>, vector<384x128xbf16>, vector<256x128xf32> -> vector<256x128xf32>
    %68 = arith.addf %62, %67 : vector<256x128xf32>
    %69 = vector.extract_strided_slice %56 {offsets = [2, 0, 0], sizes = [16, 16, 384], strides = [1, 1, 1]} : vector<18x16x384xbf16> to vector<16x16x384xbf16>
    %70 = vector.shape_cast %69 : vector<16x16x384xbf16> to vector<256x384xbf16>
    %c2_41 = arith.constant 2 : index
    %c0_42 = arith.constant 0 : index
    %c0_43 = arith.constant 0 : index
    %71 = vector.load %arg9[%c2_41, %c0_42, %c0_43] : memref<3x384x128xbf16, #tpu.memory_space<vmem>>, vector<1x384x128xbf16>
    %72 = vector.shape_cast %71 : vector<1x384x128xbf16> to vector<384x128xbf16>
    %cst_44 = arith.constant dense<0.000000e+00> : vector<256x128xf32>
    %73 = tpu.matmul %70, %72, %cst_44 {dimension_numbers = #tpu.dot_dimension_numbers<[1], [0], [0], [1], [0, 0, 1, 1], [], []>} : vector<256x384xbf16>, vector<384x128xbf16>, vector<256x128xf32> -> vector<256x128xf32>
    %74 = arith.addf %68, %73 : vector<256x128xf32>
    %c0_45 = arith.constant 0 : index
    %c0_46 = arith.constant 0 : index
    %75 = vector.load %arg10[%c0_45, %c0_46] : memref<1x128xf32, #tpu.memory_space<vmem>>, vector<1x128xf32>
    %76 = vector.broadcast %75 : vector<1x128xf32> to vector<256x128xf32>
    %77 = arith.addf %74, %76 : vector<256x128xf32>
    %78 = vector.shape_cast %77 : vector<256x128xf32> to vector<16x16x128xf32>
    %79 = arith.truncf %78 : vector<16x16x128xf32> to vector<16x16x128xbf16>
    %c0_47 = arith.constant 0 : index
    %c0_48 = arith.constant 0 : index
    %c0_49 = arith.constant 0 : index
    %c0_50 = arith.constant 0 : index
    %80 = vector.load %arg11[%c0_47, %c0_48, %c0_49, %c0_50] : memref<1x16x16x128xbf16, #tpu.memory_space<vmem>>, vector<1x16x16x128xbf16>
    %81 = vector.shape_cast %80 : vector<1x16x16x128xbf16> to vector<16x16x128xbf16>
    %82 = vector.shape_cast %79 : vector<16x16x128xbf16> to vector<1x16x16x128xbf16>
    tpu.vector_store %arg11[%c0_47, %c0_48, %c0_49, %c0_50], %82 {strides = array<i32>} : memref<1x16x16x128xbf16, #tpu.memory_space<vmem>>, vector<1x16x16x128xbf16>,
    %cst_51 = arith.constant dense<0.000000e+00> : vector<128xf32>
    %83 = vector.multi_reduction <add>, %77, %cst_51 [0] : vector<256x128xf32> to vector<128xf32>
    %84 = vector.shape_cast %83 : vector<128xf32> to vector<1x128xf32>
    %85 = arith.mulf %77, %77 : vector<256x128xf32>
    %cst_52 = arith.constant dense<0.000000e+00> : vector<128xf32>
    %86 = vector.multi_reduction <add>, %85, %cst_52 [0] : vector<256x128xf32> to vector<128xf32>
    %87 = vector.shape_cast %86 : vector<128xf32> to vector<1x128xf32>
    %88 = tpu.concatenate %84, %87 in 0 : vector<1x128xf32>, vector<1x128xf32> -> vector<2x128xf32>
    %c0_53 = arith.constant 0 : index
    %c0_54 = arith.constant 0 : index
    %c0_55 = arith.constant 0 : index
    %c0_56 = arith.constant 0 : index
    %89 = vector.load %arg12[%c0_53, %c0_54, %c0_55, %c0_56] : memref<1x1x2x128xf32, #tpu.memory_space<vmem>>, vector<1x1x2x128xf32>
    %90 = vector.shape_cast %89 : vector<1x1x2x128xf32> to vector<2x128xf32>
    %91 = vector.shape_cast %88 : vector<2x128xf32> to vector<1x1x2x128xf32>
    tpu.vector_store %arg12[%c0_53, %c0_54, %c0_55, %c0_56], %91 {strides = array<i32>} : memref<1x1x2x128xf32, #tpu.memory_space<vmem>>, vector<1x1x2x128xf32>,
    return
  }
  func.func @transform_0(%arg0: i32, %arg1: i32) -> (i32, i32, i32, i32) {
    %c0_i32 = arith.constant 0 : i32
    %c0_i32_0 = arith.constant 0 : i32
    %c0_i32_1 = arith.constant 0 : i32
    return %arg0, %arg1, %c0_i32, %c0_i32_0 : i32, i32, i32, i32
  }
  func.func @transform_1(%arg0: i32, %arg1: i32) -> (i32, i32, i32, i32) {
    %c16_i32 = arith.constant 16 : i32
    %0 = arith.muli %arg1, %c16_i32 : i32
    %c16_i32_0 = arith.constant 16 : i32
    %1 = arith.addi %0, %c16_i32_0 : i32
    %c0_i32 = arith.constant 0 : i32
    %c0_i32_1 = arith.constant 0 : i32
    %c0_i32_2 = arith.constant 0 : i32
    return %arg0, %1, %c0_i32, %c0_i32_1 : i32, i32, i32, i32
  }
  func.func @transform_2(%arg0: i32, %arg1: i32) -> (i32, i32, i32, i32) {
    %c16_i32 = arith.constant 16 : i32
    %0 = arith.muli %arg1, %c16_i32 : i32
    %c16_i32_0 = arith.constant 16 : i32
    %1 = arith.addi %0, %c16_i32_0 : i32
    %c1_i32 = arith.constant 1 : i32
    %2 = arith.addi %1, %c1_i32 : i32
    %c0_i32 = arith.constant 0 : i32
    %c0_i32_1 = arith.constant 0 : i32
    %c0_i32_2 = arith.constant 0 : i32
    return %arg0, %2, %c0_i32, %c0_i32_1 : i32, i32, i32, i32
  }
  func.func @transform_3(%arg0: i32, %arg1: i32) -> (i32, i32, i32, i32) {
    %c0_i32 = arith.constant 0 : i32
    %c0_i32_0 = arith.constant 0 : i32
    %c0_i32_1 = arith.constant 0 : i32
    return %arg0, %arg1, %c0_i32, %c0_i32_0 : i32, i32, i32, i32
  }
  func.func @transform_4(%arg0: i32, %arg1: i32) -> (i32, i32, i32, i32) {
    %c16_i32 = arith.constant 16 : i32
    %0 = arith.muli %arg1, %c16_i32 : i32
    %c16_i32_0 = arith.constant 16 : i32
    %1 = arith.addi %0, %c16_i32_0 : i32
    %c0_i32 = arith.constant 0 : i32
    %c0_i32_1 = arith.constant 0 : i32
    %c0_i32_2 = arith.constant 0 : i32
    return %arg0, %1, %c0_i32, %c0_i32_1 : i32, i32, i32, i32
  }
  func.func @transform_5(%arg0: i32, %arg1: i32) -> (i32, i32, i32, i32) {
    %c16_i32 = arith.constant 16 : i32
    %0 = arith.muli %arg1, %c16_i32 : i32
    %c16_i32_0 = arith.constant 16 : i32
    %1 = arith.addi %0, %c16_i32_0 : i32
    %c1_i32 = arith.constant 1 : i32
    %2 = arith.addi %1, %c1_i32 : i32
    %c0_i32 = arith.constant 0 : i32
    %c0_i32_1 = arith.constant 0 : i32
    %c0_i32_2 = arith.constant 0 : i32
    return %arg0, %2, %c0_i32, %c0_i32_1 : i32, i32, i32, i32
  }
  func.func @transform_6(%arg0: i32, %arg1: i32) -> (i32, i32, i32) {
    %c0_i32 = arith.constant 0 : i32
    %c0_i32_0 = arith.constant 0 : i32
    %c0_i32_1 = arith.constant 0 : i32
    %c0_i32_2 = arith.constant 0 : i32
    return %c0_i32, %c0_i32_0, %c0_i32_1 : i32, i32, i32
  }
  func.func @transform_7(%arg0: i32, %arg1: i32) -> (i32, i32, i32) {
    %c0_i32 = arith.constant 0 : i32
    %c0_i32_0 = arith.constant 0 : i32
    %c0_i32_1 = arith.constant 0 : i32
    %c0_i32_2 = arith.constant 0 : i32
    return %c0_i32, %c0_i32_0, %c0_i32_1 : i32, i32, i32
  }
  func.func @transform_8(%arg0: i32, %arg1: i32) -> (i32, i32) {
    %c0_i32 = arith.constant 0 : i32
    %c0_i32_0 = arith.constant 0 : i32
    %c0_i32_1 = arith.constant 0 : i32
    return %c0_i32, %c0_i32_0 : i32, i32
  }
  func.func @transform_9(%arg0: i32, %arg1: i32) -> (i32, i32, i32, i32) {
    %c0_i32 = arith.constant 0 : i32
    %c0_i32_0 = arith.constant 0 : i32
    %c0_i32_1 = arith.constant 0 : i32
    return %arg0, %arg1, %c0_i32, %c0_i32_0 : i32, i32, i32, i32
  }
  func.func @transform_10(%arg0: i32, %arg1: i32) -> (i32, i32, i32, i32) {
    %c0_i32 = arith.constant 0 : i32
    %c0_i32_0 = arith.constant 0 : i32
    %c0_i32_1 = arith.constant 0 : i32
    return %arg0, %arg1, %c0_i32, %c0_i32_0 : i32, i32, i32, i32
  }
}

module attributes {stable_mosaic.version = 11 : i64} {
  func.func @_conv3x3_fused_kernel(%arg0: i32, %arg1: i32, %arg2: memref<1x16x18x128xbf16, #tpu.memory_space<vmem>>, %arg3: memref<1x1x18x128xbf16, #tpu.memory_space<vmem>>, %arg4: memref<1x1x18x128xbf16, #tpu.memory_space<vmem>>, %arg5: memref<1x128xf32, #tpu.memory_space<vmem>>, %arg6: memref<1x128xf32, #tpu.memory_space<vmem>>, %arg7: memref<3x384x128xbf16, #tpu.memory_space<vmem>>, %arg8: memref<1x128xf32, #tpu.memory_space<vmem>>, %arg9: memref<1x16x16x128xbf16, #tpu.memory_space<vmem>>, %arg10: memref<1x1x2x128xf32, #tpu.memory_space<vmem>>) attributes {dimension_semantics = [#tpu.dimension_semantics<parallel>, #tpu.dimension_semantics<parallel>], iteration_bounds = array<i64: 2, 1>, scalar_prefetch = 0 : i64, scratch_operands = 0 : i64, tpu.core_type = #tpu.core_type<tc>, window_params = [{transform_indices = @transform_0, window_bounds = array<i64: 1, 16, 18, 128>}, {transform_indices = @transform_1, window_bounds = array<i64: 1, 1, 18, 128>}, {transform_indices = @transform_2, window_bounds = array<i64: 1, 1, 18, 128>}, {pipeline_mode = #tpu.pipeline_mode<synchronous>, transform_indices = @transform_3, window_bounds = array<i64: 1, 128>}, {pipeline_mode = #tpu.pipeline_mode<synchronous>, transform_indices = @transform_4, window_bounds = array<i64: 1, 128>}, {pipeline_mode = #tpu.pipeline_mode<synchronous>, transform_indices = @transform_5, window_bounds = array<i64: 3, 384, 128>}, {pipeline_mode = #tpu.pipeline_mode<synchronous>, transform_indices = @transform_6, window_bounds = array<i64: 1, 128>}, {transform_indices = @transform_7, window_bounds = array<i64: 1, 16, 16, 128>}, {transform_indices = @transform_8, window_bounds = array<i64: 1, 1, 2, 128>}]} {
    %c16_i32 = arith.constant 16 : i32
    %0 = arith.muli %arg1, %c16_i32 : i32
    %cst = arith.constant 0.000000e+00 : f32
    %1 = vector.broadcast %cst : f32 to vector<256x128xf32>
    %c0 = arith.constant 0 : index
    %c0_0 = arith.constant 0 : index
    %2 = vector.load %arg5[%c0, %c0_0] : memref<1x128xf32, #tpu.memory_space<vmem>>, vector<1x128xf32>
    %3 = vector.shape_cast %2 : vector<1x128xf32> to vector<128xf32>
    %c0_1 = arith.constant 0 : index
    %c0_2 = arith.constant 0 : index
    %4 = vector.load %arg6[%c0_1, %c0_2] : memref<1x128xf32, #tpu.memory_space<vmem>>, vector<1x128xf32>
    %5 = vector.shape_cast %4 : vector<1x128xf32> to vector<128xf32>
    %c0_3 = arith.constant 0 : index
    %c0_4 = arith.constant 0 : index
    %c0_5 = arith.constant 0 : index
    %c0_6 = arith.constant 0 : index
    %6 = vector.load %arg2[%c0_3, %c0_4, %c0_5, %c0_6] : memref<1x16x18x128xbf16, #tpu.memory_space<vmem>>, vector<1x16x18x128xbf16>
    %7 = vector.shape_cast %6 : vector<1x16x18x128xbf16> to vector<16x18x128xbf16>
    %c0_7 = arith.constant 0 : index
    %c0_8 = arith.constant 0 : index
    %c0_9 = arith.constant 0 : index
    %c0_10 = arith.constant 0 : index
    %8 = vector.load %arg3[%c0_7, %c0_8, %c0_9, %c0_10] : memref<1x1x18x128xbf16, #tpu.memory_space<vmem>>, vector<1x1x18x128xbf16>
    %9 = vector.shape_cast %8 : vector<1x1x18x128xbf16> to vector<1x18x128xbf16>
    %c0_11 = arith.constant 0 : index
    %c0_12 = arith.constant 0 : index
    %c0_13 = arith.constant 0 : index
    %c0_14 = arith.constant 0 : index
    %10 = vector.load %arg4[%c0_11, %c0_12, %c0_13, %c0_14] : memref<1x1x18x128xbf16, #tpu.memory_space<vmem>>, vector<1x1x18x128xbf16>
    %11 = vector.shape_cast %10 : vector<1x1x18x128xbf16> to vector<1x18x128xbf16>
    %12 = arith.extf %7 : vector<16x18x128xbf16> to vector<16x18x128xf32>
    %13 = vector.shape_cast %3 : vector<128xf32> to vector<1x1x128xf32>
    %14 = vector.broadcast %13 : vector<1x1x128xf32> to vector<16x18x128xf32>
    %15 = arith.mulf %12, %14 : vector<16x18x128xf32>
    %16 = vector.shape_cast %5 : vector<128xf32> to vector<1x1x128xf32>
    %17 = vector.broadcast %16 : vector<1x1x128xf32> to vector<16x18x128xf32>
    %18 = arith.addf %15, %17 : vector<16x18x128xf32>
    %cst_15 = arith.constant 0.000000e+00 : f32
    %19 = vector.broadcast %cst_15 : f32 to vector<16x18x128xf32>
    %20 = arith.maximumf %18, %19 : vector<16x18x128xf32>
    %21 = tpu.iota {dimensions = array<i32: 0>} : vector<16x18xi32>
    %c0_i32 = arith.constant 0 : i32
    %22 = arith.addi %0, %c0_i32 : i32
    %23 = vector.broadcast %22 : i32 to vector<16x18xi32>
    %24 = arith.addi %21, %23 : vector<16x18xi32>
    %25 = tpu.iota {dimensions = array<i32: 1>} : vector<16x18xi32>
    %c1_i32 = arith.constant 1 : i32
    %26 = vector.broadcast %c1_i32 : i32 to vector<16x18xi32>
    %27 = arith.cmpi sge, %24, %26 : vector<16x18xi32>
    %c16_i32_16 = arith.constant 16 : i32
    %28 = vector.broadcast %c16_i32_16 : i32 to vector<16x18xi32>
    %29 = arith.cmpi sle, %24, %28 : vector<16x18xi32>
    %30 = arith.andi %27, %29 : vector<16x18xi1>
    %c1_i32_17 = arith.constant 1 : i32
    %31 = vector.broadcast %c1_i32_17 : i32 to vector<16x18xi32>
    %32 = arith.cmpi sge, %25, %31 : vector<16x18xi32>
    %33 = arith.andi %30, %32 : vector<16x18xi1>
    %c16_i32_18 = arith.constant 16 : i32
    %34 = vector.broadcast %c16_i32_18 : i32 to vector<16x18xi32>
    %35 = arith.cmpi sle, %25, %34 : vector<16x18xi32>
    %36 = arith.andi %33, %35 : vector<16x18xi1>
    %37 = arith.extui %36 : vector<16x18xi1> to vector<16x18xi32>
    %38 = arith.sitofp %37 : vector<16x18xi32> to vector<16x18xf32>
    %39 = vector.shape_cast %38 : vector<16x18xf32> to vector<16x18x1xf32>
    %40 = vector.broadcast %39 : vector<16x18x1xf32> to vector<16x18x128xf32>
    %41 = arith.mulf %20, %40 : vector<16x18x128xf32>
    %42 = arith.truncf %41 : vector<16x18x128xf32> to vector<16x18x128xbf16>
    %43 = vector.extract_strided_slice %42 {offsets = [0, 0, 0], sizes = [16, 16, 128], strides = [1, 1, 1]} : vector<16x18x128xbf16> to vector<16x16x128xbf16>
    %44 = vector.extract_strided_slice %42 {offsets = [0, 1, 0], sizes = [16, 16, 128], strides = [1, 1, 1]} : vector<16x18x128xbf16> to vector<16x16x128xbf16>
    %45 = vector.extract_strided_slice %42 {offsets = [0, 2, 0], sizes = [16, 16, 128], strides = [1, 1, 1]} : vector<16x18x128xbf16> to vector<16x16x128xbf16>
    %46 = tpu.concatenate %43, %44, %45 in 2 : vector<16x16x128xbf16>, vector<16x16x128xbf16>, vector<16x16x128xbf16> -> vector<16x16x384xbf16>
    %47 = arith.extf %9 : vector<1x18x128xbf16> to vector<1x18x128xf32>
    %48 = vector.shape_cast %3 : vector<128xf32> to vector<1x1x128xf32>
    %49 = vector.broadcast %48 : vector<1x1x128xf32> to vector<1x18x128xf32>
    %50 = arith.mulf %47, %49 : vector<1x18x128xf32>
    %51 = vector.shape_cast %5 : vector<128xf32> to vector<1x1x128xf32>
    %52 = vector.broadcast %51 : vector<1x1x128xf32> to vector<1x18x128xf32>
    %53 = arith.addf %50, %52 : vector<1x18x128xf32>
    %cst_19 = arith.constant 0.000000e+00 : f32
    %54 = vector.broadcast %cst_19 : f32 to vector<1x18x128xf32>
    %55 = arith.maximumf %53, %54 : vector<1x18x128xf32>
    %56 = tpu.iota {dimensions = array<i32: 0>} : vector<1x18xi32>
    %c16_i32_20 = arith.constant 16 : i32
    %57 = arith.addi %0, %c16_i32_20 : i32
    %58 = vector.broadcast %57 : i32 to vector<1x18xi32>
    %59 = arith.addi %56, %58 : vector<1x18xi32>
    %60 = tpu.iota {dimensions = array<i32: 1>} : vector<1x18xi32>
    %c1_i32_21 = arith.constant 1 : i32
    %61 = vector.broadcast %c1_i32_21 : i32 to vector<1x18xi32>
    %62 = arith.cmpi sge, %59, %61 : vector<1x18xi32>
    %c16_i32_22 = arith.constant 16 : i32
    %63 = vector.broadcast %c16_i32_22 : i32 to vector<1x18xi32>
    %64 = arith.cmpi sle, %59, %63 : vector<1x18xi32>
    %65 = arith.andi %62, %64 : vector<1x18xi1>
    %c1_i32_23 = arith.constant 1 : i32
    %66 = vector.broadcast %c1_i32_23 : i32 to vector<1x18xi32>
    %67 = arith.cmpi sge, %60, %66 : vector<1x18xi32>
    %68 = arith.andi %65, %67 : vector<1x18xi1>
    %c16_i32_24 = arith.constant 16 : i32
    %69 = vector.broadcast %c16_i32_24 : i32 to vector<1x18xi32>
    %70 = arith.cmpi sle, %60, %69 : vector<1x18xi32>
    %71 = arith.andi %68, %70 : vector<1x18xi1>
    %72 = arith.extui %71 : vector<1x18xi1> to vector<1x18xi32>
    %73 = arith.sitofp %72 : vector<1x18xi32> to vector<1x18xf32>
    %74 = vector.shape_cast %73 : vector<1x18xf32> to vector<1x18x1xf32>
    %75 = vector.broadcast %74 : vector<1x18x1xf32> to vector<1x18x128xf32>
    %76 = arith.mulf %55, %75 : vector<1x18x128xf32>
    %77 = arith.truncf %76 : vector<1x18x128xf32> to vector<1x18x128xbf16>
    %78 = vector.extract_strided_slice %77 {offsets = [0, 0, 0], sizes = [1, 16, 128], strides = [1, 1, 1]} : vector<1x18x128xbf16> to vector<1x16x128xbf16>
    %79 = vector.extract_strided_slice %77 {offsets = [0, 1, 0], sizes = [1, 16, 128], strides = [1, 1, 1]} : vector<1x18x128xbf16> to vector<1x16x128xbf16>
    %80 = vector.extract_strided_slice %77 {offsets = [0, 2, 0], sizes = [1, 16, 128], strides = [1, 1, 1]} : vector<1x18x128xbf16> to vector<1x16x128xbf16>
    %81 = tpu.concatenate %78, %79, %80 in 2 : vector<1x16x128xbf16>, vector<1x16x128xbf16>, vector<1x16x128xbf16> -> vector<1x16x384xbf16>
    %82 = arith.extf %11 : vector<1x18x128xbf16> to vector<1x18x128xf32>
    %83 = vector.shape_cast %3 : vector<128xf32> to vector<1x1x128xf32>
    %84 = vector.broadcast %83 : vector<1x1x128xf32> to vector<1x18x128xf32>
    %85 = arith.mulf %82, %84 : vector<1x18x128xf32>
    %86 = vector.shape_cast %5 : vector<128xf32> to vector<1x1x128xf32>
    %87 = vector.broadcast %86 : vector<1x1x128xf32> to vector<1x18x128xf32>
    %88 = arith.addf %85, %87 : vector<1x18x128xf32>
    %cst_25 = arith.constant 0.000000e+00 : f32
    %89 = vector.broadcast %cst_25 : f32 to vector<1x18x128xf32>
    %90 = arith.maximumf %88, %89 : vector<1x18x128xf32>
    %91 = tpu.iota {dimensions = array<i32: 0>} : vector<1x18xi32>
    %c17_i32 = arith.constant 17 : i32
    %92 = arith.addi %0, %c17_i32 : i32
    %93 = vector.broadcast %92 : i32 to vector<1x18xi32>
    %94 = arith.addi %91, %93 : vector<1x18xi32>
    %95 = tpu.iota {dimensions = array<i32: 1>} : vector<1x18xi32>
    %c1_i32_26 = arith.constant 1 : i32
    %96 = vector.broadcast %c1_i32_26 : i32 to vector<1x18xi32>
    %97 = arith.cmpi sge, %94, %96 : vector<1x18xi32>
    %c16_i32_27 = arith.constant 16 : i32
    %98 = vector.broadcast %c16_i32_27 : i32 to vector<1x18xi32>
    %99 = arith.cmpi sle, %94, %98 : vector<1x18xi32>
    %100 = arith.andi %97, %99 : vector<1x18xi1>
    %c1_i32_28 = arith.constant 1 : i32
    %101 = vector.broadcast %c1_i32_28 : i32 to vector<1x18xi32>
    %102 = arith.cmpi sge, %95, %101 : vector<1x18xi32>
    %103 = arith.andi %100, %102 : vector<1x18xi1>
    %c16_i32_29 = arith.constant 16 : i32
    %104 = vector.broadcast %c16_i32_29 : i32 to vector<1x18xi32>
    %105 = arith.cmpi sle, %95, %104 : vector<1x18xi32>
    %106 = arith.andi %103, %105 : vector<1x18xi1>
    %107 = arith.extui %106 : vector<1x18xi1> to vector<1x18xi32>
    %108 = arith.sitofp %107 : vector<1x18xi32> to vector<1x18xf32>
    %109 = vector.shape_cast %108 : vector<1x18xf32> to vector<1x18x1xf32>
    %110 = vector.broadcast %109 : vector<1x18x1xf32> to vector<1x18x128xf32>
    %111 = arith.mulf %90, %110 : vector<1x18x128xf32>
    %112 = arith.truncf %111 : vector<1x18x128xf32> to vector<1x18x128xbf16>
    %113 = vector.extract_strided_slice %112 {offsets = [0, 0, 0], sizes = [1, 16, 128], strides = [1, 1, 1]} : vector<1x18x128xbf16> to vector<1x16x128xbf16>
    %114 = vector.extract_strided_slice %112 {offsets = [0, 1, 0], sizes = [1, 16, 128], strides = [1, 1, 1]} : vector<1x18x128xbf16> to vector<1x16x128xbf16>
    %115 = vector.extract_strided_slice %112 {offsets = [0, 2, 0], sizes = [1, 16, 128], strides = [1, 1, 1]} : vector<1x18x128xbf16> to vector<1x16x128xbf16>
    %116 = tpu.concatenate %113, %114, %115 in 2 : vector<1x16x128xbf16>, vector<1x16x128xbf16>, vector<1x16x128xbf16> -> vector<1x16x384xbf16>
    %117 = tpu.concatenate %46, %81, %116 in 0 : vector<16x16x384xbf16>, vector<1x16x384xbf16>, vector<1x16x384xbf16> -> vector<18x16x384xbf16>
    %118 = vector.extract_strided_slice %117 {offsets = [0, 0, 0], sizes = [16, 16, 384], strides = [1, 1, 1]} : vector<18x16x384xbf16> to vector<16x16x384xbf16>
    %119 = vector.shape_cast %118 : vector<16x16x384xbf16> to vector<256x384xbf16>
    %c0_30 = arith.constant 0 : index
    %c0_31 = arith.constant 0 : index
    %c0_32 = arith.constant 0 : index
    %120 = vector.load %arg7[%c0_30, %c0_31, %c0_32] : memref<3x384x128xbf16, #tpu.memory_space<vmem>>, vector<1x384x128xbf16>
    %121 = vector.shape_cast %120 : vector<1x384x128xbf16> to vector<384x128xbf16>
    %cst_33 = arith.constant dense<0.000000e+00> : vector<256x128xf32>
    %122 = tpu.matmul %119, %121, %cst_33 {dimension_numbers = #tpu.dot_dimension_numbers<[1], [0], [0], [1], [0, 0, 1, 1], [], []>} : vector<256x384xbf16>, vector<384x128xbf16>, vector<256x128xf32> -> vector<256x128xf32>
    %123 = arith.addf %1, %122 : vector<256x128xf32>
    %124 = vector.extract_strided_slice %117 {offsets = [1, 0, 0], sizes = [16, 16, 384], strides = [1, 1, 1]} : vector<18x16x384xbf16> to vector<16x16x384xbf16>
    %125 = vector.shape_cast %124 : vector<16x16x384xbf16> to vector<256x384xbf16>
    %c1 = arith.constant 1 : index
    %c0_34 = arith.constant 0 : index
    %c0_35 = arith.constant 0 : index
    %126 = vector.load %arg7[%c1, %c0_34, %c0_35] : memref<3x384x128xbf16, #tpu.memory_space<vmem>>, vector<1x384x128xbf16>
    %127 = vector.shape_cast %126 : vector<1x384x128xbf16> to vector<384x128xbf16>
    %cst_36 = arith.constant dense<0.000000e+00> : vector<256x128xf32>
    %128 = tpu.matmul %125, %127, %cst_36 {dimension_numbers = #tpu.dot_dimension_numbers<[1], [0], [0], [1], [0, 0, 1, 1], [], []>} : vector<256x384xbf16>, vector<384x128xbf16>, vector<256x128xf32> -> vector<256x128xf32>
    %129 = arith.addf %123, %128 : vector<256x128xf32>
    %130 = vector.extract_strided_slice %117 {offsets = [2, 0, 0], sizes = [16, 16, 384], strides = [1, 1, 1]} : vector<18x16x384xbf16> to vector<16x16x384xbf16>
    %131 = vector.shape_cast %130 : vector<16x16x384xbf16> to vector<256x384xbf16>
    %c2 = arith.constant 2 : index
    %c0_37 = arith.constant 0 : index
    %c0_38 = arith.constant 0 : index
    %132 = vector.load %arg7[%c2, %c0_37, %c0_38] : memref<3x384x128xbf16, #tpu.memory_space<vmem>>, vector<1x384x128xbf16>
    %133 = vector.shape_cast %132 : vector<1x384x128xbf16> to vector<384x128xbf16>
    %cst_39 = arith.constant dense<0.000000e+00> : vector<256x128xf32>
    %134 = tpu.matmul %131, %133, %cst_39 {dimension_numbers = #tpu.dot_dimension_numbers<[1], [0], [0], [1], [0, 0, 1, 1], [], []>} : vector<256x384xbf16>, vector<384x128xbf16>, vector<256x128xf32> -> vector<256x128xf32>
    %135 = arith.addf %129, %134 : vector<256x128xf32>
    %c0_40 = arith.constant 0 : index
    %c0_41 = arith.constant 0 : index
    %136 = vector.load %arg8[%c0_40, %c0_41] : memref<1x128xf32, #tpu.memory_space<vmem>>, vector<1x128xf32>
    %137 = vector.broadcast %136 : vector<1x128xf32> to vector<256x128xf32>
    %138 = arith.addf %135, %137 : vector<256x128xf32>
    %139 = vector.shape_cast %138 : vector<256x128xf32> to vector<16x16x128xf32>
    %140 = arith.truncf %139 : vector<16x16x128xf32> to vector<16x16x128xbf16>
    %c0_42 = arith.constant 0 : index
    %c0_43 = arith.constant 0 : index
    %c0_44 = arith.constant 0 : index
    %c0_45 = arith.constant 0 : index
    %141 = vector.load %arg9[%c0_42, %c0_43, %c0_44, %c0_45] : memref<1x16x16x128xbf16, #tpu.memory_space<vmem>>, vector<1x16x16x128xbf16>
    %142 = vector.shape_cast %141 : vector<1x16x16x128xbf16> to vector<16x16x128xbf16>
    %143 = vector.shape_cast %140 : vector<16x16x128xbf16> to vector<1x16x16x128xbf16>
    tpu.vector_store %arg9[%c0_42, %c0_43, %c0_44, %c0_45], %143 {strides = array<i32>} : memref<1x16x16x128xbf16, #tpu.memory_space<vmem>>, vector<1x16x16x128xbf16>,
    %cst_46 = arith.constant dense<0.000000e+00> : vector<128xf32>
    %144 = vector.multi_reduction <add>, %138, %cst_46 [0] : vector<256x128xf32> to vector<128xf32>
    %145 = vector.shape_cast %144 : vector<128xf32> to vector<1x128xf32>
    %146 = arith.mulf %138, %138 : vector<256x128xf32>
    %cst_47 = arith.constant dense<0.000000e+00> : vector<128xf32>
    %147 = vector.multi_reduction <add>, %146, %cst_47 [0] : vector<256x128xf32> to vector<128xf32>
    %148 = vector.shape_cast %147 : vector<128xf32> to vector<1x128xf32>
    %149 = tpu.concatenate %145, %148 in 0 : vector<1x128xf32>, vector<1x128xf32> -> vector<2x128xf32>
    %c0_48 = arith.constant 0 : index
    %c0_49 = arith.constant 0 : index
    %c0_50 = arith.constant 0 : index
    %c0_51 = arith.constant 0 : index
    %150 = vector.load %arg10[%c0_48, %c0_49, %c0_50, %c0_51] : memref<1x1x2x128xf32, #tpu.memory_space<vmem>>, vector<1x1x2x128xf32>
    %151 = vector.shape_cast %150 : vector<1x1x2x128xf32> to vector<2x128xf32>
    %152 = vector.shape_cast %149 : vector<2x128xf32> to vector<1x1x2x128xf32>
    tpu.vector_store %arg10[%c0_48, %c0_49, %c0_50, %c0_51], %152 {strides = array<i32>} : memref<1x1x2x128xf32, #tpu.memory_space<vmem>>, vector<1x1x2x128xf32>,
    return
  }
  func.func @transform_0(%arg0: i32, %arg1: i32) -> (i32, i32, i32, i32) {
    %c0_i32 = arith.constant 0 : i32
    %c0_i32_0 = arith.constant 0 : i32
    %c0_i32_1 = arith.constant 0 : i32
    return %arg0, %arg1, %c0_i32, %c0_i32_0 : i32, i32, i32, i32
  }
  func.func @transform_1(%arg0: i32, %arg1: i32) -> (i32, i32, i32, i32) {
    %c16_i32 = arith.constant 16 : i32
    %0 = arith.muli %arg1, %c16_i32 : i32
    %c16_i32_0 = arith.constant 16 : i32
    %1 = arith.addi %0, %c16_i32_0 : i32
    %c0_i32 = arith.constant 0 : i32
    %c0_i32_1 = arith.constant 0 : i32
    %c0_i32_2 = arith.constant 0 : i32
    return %arg0, %1, %c0_i32, %c0_i32_1 : i32, i32, i32, i32
  }
  func.func @transform_2(%arg0: i32, %arg1: i32) -> (i32, i32, i32, i32) {
    %c16_i32 = arith.constant 16 : i32
    %0 = arith.muli %arg1, %c16_i32 : i32
    %c16_i32_0 = arith.constant 16 : i32
    %1 = arith.addi %0, %c16_i32_0 : i32
    %c1_i32 = arith.constant 1 : i32
    %2 = arith.addi %1, %c1_i32 : i32
    %c0_i32 = arith.constant 0 : i32
    %c0_i32_1 = arith.constant 0 : i32
    %c0_i32_2 = arith.constant 0 : i32
    return %arg0, %2, %c0_i32, %c0_i32_1 : i32, i32, i32, i32
  }
  func.func @transform_3(%arg0: i32, %arg1: i32) -> (i32, i32) {
    %c0_i32 = arith.constant 0 : i32
    %c0_i32_0 = arith.constant 0 : i32
    %c0_i32_1 = arith.constant 0 : i32
    return %c0_i32, %c0_i32_0 : i32, i32
  }
  func.func @transform_4(%arg0: i32, %arg1: i32) -> (i32, i32) {
    %c0_i32 = arith.constant 0 : i32
    %c0_i32_0 = arith.constant 0 : i32
    %c0_i32_1 = arith.constant 0 : i32
    return %c0_i32, %c0_i32_0 : i32, i32
  }
  func.func @transform_5(%arg0: i32, %arg1: i32) -> (i32, i32, i32) {
    %c0_i32 = arith.constant 0 : i32
    %c0_i32_0 = arith.constant 0 : i32
    %c0_i32_1 = arith.constant 0 : i32
    %c0_i32_2 = arith.constant 0 : i32
    return %c0_i32, %c0_i32_0, %c0_i32_1 : i32, i32, i32
  }
  func.func @transform_6(%arg0: i32, %arg1: i32) -> (i32, i32) {
    %c0_i32 = arith.constant 0 : i32
    %c0_i32_0 = arith.constant 0 : i32
    %c0_i32_1 = arith.constant 0 : i32
    return %c0_i32, %c0_i32_0 : i32, i32
  }
  func.func @transform_7(%arg0: i32, %arg1: i32) -> (i32, i32, i32, i32) {
    %c0_i32 = arith.constant 0 : i32
    %c0_i32_0 = arith.constant 0 : i32
    %c0_i32_1 = arith.constant 0 : i32
    return %arg0, %arg1, %c0_i32, %c0_i32_0 : i32, i32, i32, i32
  }
  func.func @transform_8(%arg0: i32, %arg1: i32) -> (i32, i32, i32, i32) {
    %c0_i32 = arith.constant 0 : i32
    %c0_i32_0 = arith.constant 0 : i32
    %c0_i32_1 = arith.constant 0 : i32
    return %arg0, %arg1, %c0_i32, %c0_i32_0 : i32, i32, i32, i32
  }
}

module attributes {stable_mosaic.version = 11 : i64} {
  func.func @_bn_relu_kernel(%arg0: i32, %arg1: memref<512x128xbf16, #tpu.memory_space<vmem>>, %arg2: memref<1x128xf32, #tpu.memory_space<vmem>>, %arg3: memref<1x128xf32, #tpu.memory_space<vmem>>, %arg4: memref<512x128xf32, #tpu.memory_space<vmem>>) attributes {dimension_semantics = [#tpu.dimension_semantics<parallel>], iteration_bounds = array<i64: 1>, scalar_prefetch = 0 : i64, scratch_operands = 0 : i64, tpu.core_type = #tpu.core_type<tc>, window_params = [{transform_indices = @transform_0, window_bounds = array<i64: 512, 128>}, {pipeline_mode = #tpu.pipeline_mode<synchronous>, transform_indices = @transform_1, window_bounds = array<i64: 1, 128>}, {pipeline_mode = #tpu.pipeline_mode<synchronous>, transform_indices = @transform_2, window_bounds = array<i64: 1, 128>}, {transform_indices = @transform_3, window_bounds = array<i64: 512, 128>}]} {
    %c0 = arith.constant 0 : index
    %c0_0 = arith.constant 0 : index
    %0 = vector.load %arg1[%c0, %c0_0] : memref<512x128xbf16, #tpu.memory_space<vmem>>, vector<512x128xbf16>
    %1 = arith.extf %0 : vector<512x128xbf16> to vector<512x128xf32>
    %c0_1 = arith.constant 0 : index
    %c0_2 = arith.constant 0 : index
    %2 = vector.load %arg2[%c0_1, %c0_2] : memref<1x128xf32, #tpu.memory_space<vmem>>, vector<1x128xf32>
    %3 = vector.broadcast %2 : vector<1x128xf32> to vector<512x128xf32>
    %4 = arith.mulf %1, %3 : vector<512x128xf32>
    %c0_3 = arith.constant 0 : index
    %c0_4 = arith.constant 0 : index
    %5 = vector.load %arg3[%c0_3, %c0_4] : memref<1x128xf32, #tpu.memory_space<vmem>>, vector<1x128xf32>
    %6 = vector.broadcast %5 : vector<1x128xf32> to vector<512x128xf32>
    %7 = arith.addf %4, %6 : vector<512x128xf32>
    %cst = arith.constant 0.000000e+00 : f32
    %8 = vector.broadcast %cst : f32 to vector<512x128xf32>
    %9 = arith.maximumf %7, %8 : vector<512x128xf32>
    %c0_5 = arith.constant 0 : index
    %c0_6 = arith.constant 0 : index
    %10 = vector.load %arg4[%c0_5, %c0_6] : memref<512x128xf32, #tpu.memory_space<vmem>>, vector<512x128xf32>
    tpu.vector_store %arg4[%c0_5, %c0_6], %9 {strides = array<i32>} : memref<512x128xf32, #tpu.memory_space<vmem>>, vector<512x128xf32>,
    return
  }
  func.func @transform_0(%arg0: i32) -> (i32, i32) {
    %c0_i32 = arith.constant 0 : i32
    %c0_i32_0 = arith.constant 0 : i32
    return %arg0, %c0_i32 : i32, i32
  }
  func.func @transform_1(%arg0: i32) -> (i32, i32) {
    %c0_i32 = arith.constant 0 : i32
    %c0_i32_0 = arith.constant 0 : i32
    %c0_i32_1 = arith.constant 0 : i32
    return %c0_i32, %c0_i32_0 : i32, i32
  }
  func.func @transform_2(%arg0: i32) -> (i32, i32) {
    %c0_i32 = arith.constant 0 : i32
    %c0_i32_0 = arith.constant 0 : i32
    %c0_i32_1 = arith.constant 0 : i32
    return %c0_i32, %c0_i32_0 : i32, i32
  }
  func.func @transform_3(%arg0: i32) -> (i32, i32) {
    %c0_i32 = arith.constant 0 : i32
    %c0_i32_0 = arith.constant 0 : i32
    return %arg0, %c0_i32 : i32, i32
  }
}

</mosaic_0001>

<bundles_post_ra>
// kernel: tile.8
= control target key start
LH: loop header
LB: loop body
LE: loop exit
PB: predicated region body
PF: predicated region fallthrough
CT: control target
= control target key end

     0   :  { %s22_s0 = inlined_call_operand.vmem [shape: f32[128], index: 0, kind: input, shape index: {}]   ;;  %s23_s1 = inlined_call_operand.vmem [shape: f32[4,128], index: 1, kind: output, shape index: {}]  }
   0x1   :  { %v4_v0 = vld [vmem:[%s22_s0] ss:$0 sm:$0xff] }
   0x2   :  { %5 = vst [vmem:[%s23_s1] sm:$0xf] %v4_v0 }

// kernel: up_forward.4
= control target key start
LH: loop header
LB: loop body
LE: loop exit
PB: predicated region body
PF: predicated region fallthrough
CT: control target
= control target key end

     0   :  { %v908_v1 = vmov 0   ;;  %v65_v41 = vlaneseq  ;;  %s1236_s1 = inlined_call_operand.vmem [shape: bf16[128,512], index: 1, kind: input, shape index: {}]   ;;  %s1237_s0 = inlined_call_operand.vmem [shape: bf16[128,128], index: 0, kind: input, shape index: {}]   ;;  %s1238_s2 = inlined_call_operand.vmem [shape: f32[1,512], index: 2, kind: input, shape index: {}]   ;;  %s1239_s3 = inlined_call_operand.vmem [shape: bf16[128,512], index: 3, kind: output, shape index: {}]  }
   0x1   :  { %v852_v0 = vld [vmem:[%s1236_s1 + $0x4] ss:$16 sps:$4 sm:$0xff]   ;;  %325 = vmatprep.mubr.bf16.mxu0 %v908_v1  ;;  %438 = vmatprep.mubr.bf16.mxu1 %v908_v1  ;;  %v854_v2 = vld [vmem:[%s1236_s1 + $0xc] ss:$16 sps:$4 sm:$0xff]   ;;  %v856_v3 = vld [vmem:[%s1236_s1] ss:$16 sps:$4 sm:$0xff]  }
   0x2   :  { %293 = vmatprep.subr.bf16.mxu0 %v852_v0  ;;  %v857_v4 = vld [vmem:[%s1236_s1 + $0x8] ss:$16 sps:$4 sm:$0xff]   ;;  %406 = vmatprep.subr.bf16.mxu1 %v854_v2  ;;  %v858_v5 = vld [vmem:[%s1236_s1 + $0x24] ss:$16 sps:$4 sm:$0xff]   ;;  %v860_v6 = vld [vmem:[%s1236_s1 + $0x2c] ss:$16 sps:$4 sm:$0xff]  }
   0x3   :  { %294 = vmatpush1.bf16.msra.mxu0 %v856_v3  ;;  %407 = vmatpush1.bf16.msra.mxu1 %v857_v4  ;;  %v862_v7 = vld [vmem:[%s1236_s1 + $0x20] ss:$16 sps:$4 sm:$0xff]   ;;  %v863_v8 = vld [vmem:[%s1236_s1 + $0x28] ss:$16 sps:$4 sm:$0xff]   ;;  %v864_v9 = vld [vmem:[%s1236_s1 + $0x44] ss:$16 sps:$4 sm:$0xff]  }
   0x4   :  { %295 = vmatprep.subr.bf16.mxu0 %v858_v5  ;;  %408 = vmatprep.subr.bf16.mxu1 %v860_v6  ;;  %v866_v10 = vld [vmem:[%s1236_s1 + $0x4c] ss:$16 sps:$4 sm:$0xff]   ;;  %v868_v11 = vld [vmem:[%s1236_s1 + $0x40] ss:$16 sps:$4 sm:$0xff]   ;;  %v869_v12 = vld [vmem:[%s1236_s1 + $0x48] ss:$16 sps:$4 sm:$0xff]  }
   0x5   :  { %v870_v13 = vld [vmem:[%s1236_s1 + $0x64] ss:$16 sps:$4 sm:$0xff]   ;;  %v872_v14 = vld [vmem:[%s1236_s1 + $0x6c] ss:$16 sps:$4 sm:$0xff]   ;;  %v874_v15 = vld [vmem:[%s1236_s1 + $0x60] ss:$16 sps:$4 sm:$0xff]  }
   0x6   :  { %v875_v16 = vld [vmem:[%s1236_s1 + $0x68] ss:$16 sps:$4 sm:$0xff]   ;;  %v876_v17 = vld [vmem:[%s1236_s1 + $0x84] ss:$16 sps:$4 sm:$0xff]   ;;  %v878_v18 = vld [vmem:[%s1236_s1 + $0x8c] ss:$16 sps:$4 sm:$0xff]  }
   0x7   :  { %296 = vmatpush1.bf16.msra.mxu0 %v862_v7  ;;  %409 = vmatpush1.bf16.msra.mxu1 %v863_v8  ;;  %v880_v19 = vld [vmem:[%s1236_s1 + $0x80] ss:$16 sps:$4 sm:$0xff]   ;;  %v881_v20 = vld [vmem:[%s1236_s1 + $0x88] ss:$16 sps:$4 sm:$0xff]   ;;  %v882_v21 = vld [vmem:[%s1236_s1 + $0xa4] ss:$16 sps:$4 sm:$0xff]  }
   0x8   :  { %297 = vmatprep.subr.bf16.mxu0 %v864_v9  ;;  %410 = vmatprep.subr.bf16.mxu1 %v866_v10  ;;  %v884_v22 = vld [vmem:[%s1236_s1 + $0xac] ss:$16 sps:$4 sm:$0xff]   ;;  %v886_v23 = vld [vmem:[%s1236_s1 + $0xa0] ss:$16 sps:$4 sm:$0xff]   ;;  %v887_v24 = vld [vmem:[%s1236_s1 + $0xa8] ss:$16 sps:$4 sm:$0xff]  }
   0x9   :  { %v888_v25 = vld [vmem:[%s1236_s1 + $0xc4] ss:$16 sps:$4 sm:$0xff]   ;;  %v890_v26 = vld [vmem:[%s1236_s1 + $0xcc] ss:$16 sps:$4 sm:$0xff]   ;;  %v892_v27 = vld [vmem:[%s1236_s1 + $0xc0] ss:$16 sps:$4 sm:$0xff]  }
   0xa   :  { %v893_v28 = vld [vmem:[%s1236_s1 + $0xc8] ss:$16 sps:$4 sm:$0xff]   ;;  %v894_v29 = vld [vmem:[%s1236_s1 + $0xe4] ss:$16 sps:$4 sm:$0xff]   ;;  %v896_v30 = vld [vmem:[%s1236_s1 + $0xec] ss:$16 sps:$4 sm:$0xff]  }
   0xb   :  { %298 = vmatpush1.bf16.msra.mxu0 %v868_v11  ;;  %411 = vmatpush1.bf16.msra.mxu1 %v869_v12  ;;  %v898_v31 = vld [vmem:[%s1236_s1 + $0xe0] ss:$16 sps:$4 sm:$0xff]   ;;  %v899_v32 = vld [vmem:[%s1236_s1 + $0xe8] ss:$16 sps:$4 sm:$0xff]   ;;  %v66_v42 = vshrl.u32 %v65_v41, 7 }
   0xc   :  { %299 = vmatprep.subr.bf16.mxu0 %v870_v13  ;;  %412 = vmatprep.subr.bf16.mxu1 %v872_v14  ;;  %v900_v33 = vld [vmem:[%s1237_s0] sm:$0xff]   ;;  %v901_v34 = vld [vmem:[%s1237_s0 + $0x8] sm:$0xff]   ;;  %v902_v35 = vld [vmem:[%s1237_s0 + $0x10] sm:$0xff]  }
   0xd   :  { %v903_v36 = vld [vmem:[%s1237_s0 + $0x18] sm:$0xff]   ;;  %v904_v37 = vld [vmem:[%s1237_s0 + $0x20] sm:$0xff]   ;;  %v905_v38 = vld [vmem:[%s1237_s0 + $0x28] sm:$0xff]   ;;  %v67_v43 = vsub.s32 0, %v66_v42  ;;  %v75_v44 = vsub.s32 2, %v66_v42  ;;  %v71_v46 = vsub.s32 1, %v66_v42 }
   0xe   :  { %v906_v39 = vld [vmem:[%s1237_s0 + $0x30] sm:$0xff]   ;;  %v907_v40 = vld [vmem:[%s1237_s0 + $0x38] sm:$0xff]   ;;  %v63_v45 = vld [vmem:[%s1238_s2] sm:$0xf]  ;;  %v79_v47 = vsub.s32 3, %v66_v42 }
   0xf   :  { %300 = vmatpush1.bf16.msra.mxu0 %v874_v15  ;;  %413 = vmatpush1.bf16.msra.mxu1 %v875_v16  ;;  %v1068_v48 = vrot.slane %v63_v45, %v67_v43  ;;  %v1070_v49 = vrot.slane %v63_v45, %v75_v44  ;;  %v1072_v50 = vrot.slane %v63_v45, %v71_v46 }
  0x10   :  { %301 = vmatprep.subr.bf16.mxu0 %v876_v17  ;;  %414 = vmatprep.subr.bf16.mxu1 %v878_v18  ;;  %v1074_v51 = vrot.slane %v63_v45, %v79_v47 }
  0x13   :  { %302 = vmatpush1.bf16.msra.mxu0 %v880_v19  ;;  %415 = vmatpush1.bf16.msra.mxu1 %v881_v20 }
  0x14   :  { %303 = vmatprep.subr.bf16.mxu0 %v882_v21  ;;  %416 = vmatprep.subr.bf16.mxu1 %v884_v22 }
  0x17   :  { %304 = vmatpush1.bf16.msra.mxu0 %v886_v23  ;;  %417 = vmatpush1.bf16.msra.mxu1 %v887_v24 }
  0x18   :  { %305 = vmatprep.subr.bf16.mxu0 %v888_v25  ;;  %418 = vmatprep.subr.bf16.mxu1 %v890_v26 }
  0x1b   :  { %306 = vmatpush1.bf16.msra.mxu0 %v892_v27  ;;  %419 = vmatpush1.bf16.msra.mxu1 %v893_v28 }
  0x1c   :  { %307 = vmatprep.subr.bf16.mxu0 %v894_v29  ;;  %420 = vmatprep.subr.bf16.mxu1 %v896_v30 }
  0x1f   :  { %308 = vmatpush1.bf16.msra.mxu0 %v898_v31  ;;  %421 = vmatpush1.bf16.msra.mxu1 %v899_v32 }
  0x22   :  { %326 = vmatmul.mubr.bf16.vlgmr.msra.gmra.mrb[0].mxu0 %v900_v33  ;;  %439 = vmatmul.mubr.bf16.vlgmr.msra.gmra.mrb[0].mxu1 %v900_v33 }
  0x23   :  { %335 = vmatprep.mubr.bf16.mxu0 %v908_v1  ;;  %448 = vmatprep.mubr.bf16.mxu1 %v908_v1 }
  0x2a   :  { %336 = vmatmul.mubr.bf16.gmra.mrb[4].mxu0 %v901_v34  ;;  %449 = vmatmul.mubr.bf16.gmra.mrb[4].mxu1 %v901_v34 }
  0x2b   :  { %345 = vmatprep.mubr.bf16.mxu0 %v908_v1  ;;  %458 = vmatprep.mubr.bf16.mxu1 %v908_v1 }
  0x32   :  { %346 = vmatmul.mubr.bf16.gmra.mrb[8].mxu0 %v902_v35  ;;  %459 = vmatmul.mubr.bf16.gmra.mrb[8].mxu1 %v902_v35 }
  0x33   :  { %355 = vmatprep.mubr.bf16.mxu0 %v908_v1  ;;  %468 = vmatprep.mubr.bf16.mxu1 %v908_v1 }
  0x3a   :  { %356 = vmatmul.mubr.bf16.gmra.mrb[12].mxu0 %v903_v36  ;;  %469 = vmatmul.mubr.bf16.gmra.mrb[12].mxu1 %v903_v36 }
  0x3b   :  { %365 = vmatprep.mubr.bf16.mxu0 %v908_v1  ;;  %478 = vmatprep.mubr.bf16.mxu1 %v908_v1 }
  0x42   :  { %366 = vmatmul.mubr.bf16.gmra.mrb[16].mxu0 %v904_v37  ;;  %479 = vmatmul.mubr.bf16.gmra.mrb[16].mxu1 %v904_v37 }
  0x43   :  { %375 = vmatprep.mubr.bf16.mxu0 %v908_v1  ;;  %488 = vmatprep.mubr.bf16.mxu1 %v908_v1 }
  0x4a   :  { %376 = vmatmul.mubr.bf16.gmra.mrb[20].mxu0 %v905_v38  ;;  %489 = vmatmul.mubr.bf16.gmra.mrb[20].mxu1 %v905_v38 }
  0x4b   :  { %385 = vmatprep.mubr.bf16.mxu0 %v908_v1  ;;  %498 = vmatprep.mubr.bf16.mxu1 %v908_v1 }
  0x52   :  { %386 = vmatmul.mubr.bf16.gmra.mrb[24].mxu0 %v906_v39  ;;  %499 = vmatmul.mubr.bf16.gmra.mrb[24].mxu1 %v906_v39 }
  0x53   :  { %395 = vmatprep.mubr.bf16.mxu0 %v908_v1  ;;  %508 = vmatprep.mubr.bf16.mxu1 %v908_v1 }
  0x5a   :  { %396 = vmatmul.mubr.bf16.gmra.mrb[28].mxu0 %v907_v40  ;;  %509 = vmatmul.mubr.bf16.gmra.mrb[28].mxu1 %v907_v40 }
  0xf5   :  { %v327_v52 = vpop.f32.mrb[0].mxu0  ;;  %v440_v53 = vpop.f32.mrb[0].mxu1 }
  0xf6   :  { %v328_v54 = vadd.f32 %v327_v52, %v1068_v48  ;;  %v441_v55 = vadd.f32 %v440_v53, %v1070_v49  ;;  %v329_v56 = vpop.f32.mrb[1].mxu0  ;;  %v442_v57 = vpop.f32.mrb[1].mxu1 }
  0xf7   :  { %v330_v58 = vadd.f32 %v329_v56, %v1072_v50  ;;  %v443_v59 = vadd.f32 %v442_v57, %v1074_v51  ;;  %v331_v60 = vpop.f32.mrb[2].mxu0  ;;  %v444_v61 = vpop.f32.mrb[2].mxu1 }
  0xf8   :  { %v332_v62 = vadd.f32 %v331_v60, %v1068_v48  ;;  %v445_v63 = vadd.f32 %v444_v61, %v1070_v49  ;;  %v333_v0 = vpop.f32.mrb[3].mxu0  ;;  %v446_v1 = vpop.f32.mrb[3].mxu1 }
  0xf9   :  { %v819_v2 = vpack.c.bf16 %v330_v58, %v328_v54  ;;  %v820_v3 = vpack.c.bf16 %v443_v59, %v441_v55  ;;  %v334_v4 = vadd.f32 %v333_v0, %v1072_v50  ;;  %v447_v5 = vadd.f32 %v446_v1, %v1074_v51 }
  0xfb   :  { %711 = vst [vmem:[%s1239_s3] sm:$0xff] %v819_v2  ;;  %712 = vst [vmem:[%s1239_s3 + $0x8] sm:$0xff] %v820_v3  ;;  %v821_v6 = vpack.c.bf16 %v334_v4, %v332_v62  ;;  %v822_v7 = vpack.c.bf16 %v447_v5, %v445_v63 }
  0xfd   :  { %713 = vst [vmem:[%s1239_s3 + $0x10] sm:$0xff] %v821_v6  ;;  %714 = vst [vmem:[%s1239_s3 + $0x18] sm:$0xff] %v822_v7  ;;  %v337_v8 = vpop.f32.mrb[4].mxu0  ;;  %v450_v9 = vpop.f32.mrb[4].mxu1 }
  0xfe   :  { %v338_v10 = vadd.f32 %v337_v8, %v1068_v48  ;;  %v451_v11 = vadd.f32 %v450_v9, %v1070_v49  ;;  %v339_v12 = vpop.f32.mrb[5].mxu0  ;;  %v452_v13 = vpop.f32.mrb[5].mxu1 }
  0xff   :  { %v340_v14 = vadd.f32 %v339_v12, %v1072_v50  ;;  %v453_v15 = vadd.f32 %v452_v13, %v1074_v51  ;;  %v341_v16 = vpop.f32.mrb[6].mxu0  ;;  %v454_v17 = vpop.f32.mrb[6].mxu1 }
 0x100   :  { %v342_v18 = vadd.f32 %v341_v16, %v1068_v48  ;;  %v455_v19 = vadd.f32 %v454_v17, %v1070_v49  ;;  %v343_v20 = vpop.f32.mrb[7].mxu0  ;;  %v456_v21 = vpop.f32.mrb[7].mxu1 }
 0x101   :  { %v823_v22 = vpack.c.bf16 %v340_v14, %v338_v10  ;;  %v824_v23 = vpack.c.bf16 %v453_v15, %v451_v11  ;;  %v344_v24 = vadd.f32 %v343_v20, %v1072_v50  ;;  %v457_v25 = vadd.f32 %v456_v21, %v1074_v51 }
 0x103   :  { %715 = vst [vmem:[%s1239_s3 + $0x20] sm:$0xff] %v823_v22  ;;  %716 = vst [vmem:[%s1239_s3 + $0x28] sm:$0xff] %v824_v23  ;;  %v825_v26 = vpack.c.bf16 %v344_v24, %v342_v18  ;;  %v826_v27 = vpack.c.bf16 %v457_v25, %v455_v19 }
 0x105   :  { %717 = vst [vmem:[%s1239_s3 + $0x30] sm:$0xff] %v825_v26  ;;  %718 = vst [vmem:[%s1239_s3 + $0x38] sm:$0xff] %v826_v27  ;;  %v347_v28 = vpop.f32.mrb[8].mxu0  ;;  %v460_v29 = vpop.f32.mrb[8].mxu1 }
 0x106   :  { %v348_v30 = vadd.f32 %v347_v28, %v1068_v48  ;;  %v461_v31 = vadd.f32 %v460_v29, %v1070_v49  ;;  %v349_v32 = vpop.f32.mrb[9].mxu0  ;;  %v462_v33 = vpop.f32.mrb[9].mxu1 }
 0x107   :  { %v350_v34 = vadd.f32 %v349_v32, %v1072_v50  ;;  %v463_v35 = vadd.f32 %v462_v33, %v1074_v51  ;;  %v351_v36 = vpop.f32.mrb[10].mxu0  ;;  %v464_v37 = vpop.f32.mrb[10].mxu1 }
 0x108   :  { %v352_v38 = vadd.f32 %v351_v36, %v1068_v48  ;;  %v465_v39 = vadd.f32 %v464_v37, %v1070_v49  ;;  %v353_v40 = vpop.f32.mrb[11].mxu0  ;;  %v466_v41 = vpop.f32.mrb[11].mxu1 }
 0x109   :  { %v827_v42 = vpack.c.bf16 %v350_v34, %v348_v30  ;;  %v828_v43 = vpack.c.bf16 %v463_v35, %v461_v31  ;;  %v354_v44 = vadd.f32 %v353_v40, %v1072_v50  ;;  %v467_v45 = vadd.f32 %v466_v41, %v1074_v51 }
 0x10b   :  { %719 = vst [vmem:[%s1239_s3 + $0x40] sm:$0xff] %v827_v42  ;;  %720 = vst [vmem:[%s1239_s3 + $0x48] sm:$0xff] %v828_v43  ;;  %v829_v46 = vpack.c.bf16 %v354_v44, %v352_v38  ;;  %v830_v47 = vpack.c.bf16 %v467_v45, %v465_v39 }
 0x10d   :  { %721 = vst [vmem:[%s1239_s3 + $0x50] sm:$0xff] %v829_v46  ;;  %722 = vst [vmem:[%s1239_s3 + $0x58] sm:$0xff] %v830_v47  ;;  %v357_v52 = vpop.f32.mrb[12].mxu0  ;;  %v470_v53 = vpop.f32.mrb[12].mxu1 }
 0x10e   :  { %v358_v54 = vadd.f32 %v357_v52, %v1068_v48  ;;  %v471_v55 = vadd.f32 %v470_v53, %v1070_v49  ;;  %v359_v56 = vpop.f32.mrb[13].mxu0  ;;  %v472_v57 = vpop.f32.mrb[13].mxu1 }
 0x10f   :  { %v360_v58 = vadd.f32 %v359_v56, %v1072_v50  ;;  %v473_v59 = vadd.f32 %v472_v57, %v1074_v51  ;;  %v361_v60 = vpop.f32.mrb[14].mxu0  ;;  %v474_v61 = vpop.f32.mrb[14].mxu1 }
 0x110   :  { %v362_v62 = vadd.f32 %v361_v60, %v1068_v48  ;;  %v475_v63 = vadd.f32 %v474_v61, %v1070_v49  ;;  %v363_v0 = vpop.f32.mrb[15].mxu0  ;;  %v476_v1 = vpop.f32.mrb[15].mxu1 }
 0x111   :  { %v831_v2 = vpack.c.bf16 %v360_v58, %v358_v54  ;;  %v832_v3 = vpack.c.bf16 %v473_v59, %v471_v55  ;;  %v364_v4 = vadd.f32 %v363_v0, %v1072_v50  ;;  %v477_v5 = vadd.f32 %v476_v1, %v1074_v51 }
 0x113   :  { %723 = vst [vmem:[%s1239_s3 + $0x60] sm:$0xff] %v831_v2  ;;  %724 = vst [vmem:[%s1239_s3 + $0x68] sm:$0xff] %v832_v3  ;;  %v833_v6 = vpack.c.bf16 %v364_v4, %v362_v62  ;;  %v834_v7 = vpack.c.bf16 %v477_v5, %v475_v63 }
 0x115   :  { %725 = vst [vmem:[%s1239_s3 + $0x70] sm:$0xff] %v833_v6  ;;  %726 = vst [vmem:[%s1239_s3 + $0x78] sm:$0xff] %v834_v7  ;;  %v367_v8 = vpop.f32.mrb[16].mxu0  ;;  %v480_v9 = vpop.f32.mrb[16].mxu1 }
 0x116   :  { %v368_v10 = vadd.f32 %v367_v8, %v1068_v48  ;;  %v481_v11 = vadd.f32 %v480_v9, %v1070_v49  ;;  %v369_v12 = vpop.f32.mrb[17].mxu0  ;;  %v482_v13 = vpop.f32.mrb[17].mxu1 }
 0x117   :  { %v370_v14 = vadd.f32 %v369_v12, %v1072_v50  ;;  %v483_v15 = vadd.f32 %v482_v13, %v1074_v51  ;;  %v371_v16 = vpop.f32.mrb[18].mxu0  ;;  %v484_v17 = vpop.f32.mrb[18].mxu1 }
 0x118   :  { %v372_v18 = vadd.f32 %v371_v16, %v1068_v48  ;;  %v485_v19 = vadd.f32 %v484_v17, %v1070_v49  ;;  %v373_v20 = vpop.f32.mrb[19].mxu0  ;;  %v486_v21 = vpop.f32.mrb[19].mxu1 }
 0x119   :  { %v835_v22 = vpack.c.bf16 %v370_v14, %v368_v10  ;;  %v836_v23 = vpack.c.bf16 %v483_v15, %v481_v11  ;;  %v374_v24 = vadd.f32 %v373_v20, %v1072_v50  ;;  %v487_v25 = vadd.f32 %v486_v21, %v1074_v51 }
 0x11b   :  { %727 = vst [vmem:[%s1239_s3 + $0x80] sm:$0xff] %v835_v22  ;;  %728 = vst [vmem:[%s1239_s3 + $0x88] sm:$0xff] %v836_v23  ;;  %v837_v26 = vpack.c.bf16 %v374_v24, %v372_v18  ;;  %v838_v27 = vpack.c.bf16 %v487_v25, %v485_v19 }
 0x11d   :  { %729 = vst [vmem:[%s1239_s3 + $0x90] sm:$0xff] %v837_v26  ;;  %730 = vst [vmem:[%s1239_s3 + $0x98] sm:$0xff] %v838_v27  ;;  %v377_v28 = vpop.f32.mrb[20].mxu0  ;;  %v490_v29 = vpop.f32.mrb[20].mxu1 }
 0x11e   :  { %v378_v30 = vadd.f32 %v377_v28, %v1068_v48  ;;  %v491_v31 = vadd.f32 %v490_v29, %v1070_v49  ;;  %v379_v32 = vpop.f32.mrb[21].mxu0  ;;  %v492_v33 = vpop.f32.mrb[21].mxu1 }
 0x11f   :  { %v380_v34 = vadd.f32 %v379_v32, %v1072_v50  ;;  %v493_v35 = vadd.f32 %v492_v33, %v1074_v51  ;;  %v381_v36 = vpop.f32.mrb[22].mxu0  ;;  %v494_v37 = vpop.f32.mrb[22].mxu1 }
 0x120   :  { %v382_v38 = vadd.f32 %v381_v36, %v1068_v48  ;;  %v495_v39 = vadd.f32 %v494_v37, %v1070_v49  ;;  %v383_v40 = vpop.f32.mrb[23].mxu0  ;;  %v496_v41 = vpop.f32.mrb[23].mxu1 }
 0x121   :  { %v839_v42 = vpack.c.bf16 %v380_v34, %v378_v30  ;;  %v840_v43 = vpack.c.bf16 %v493_v35, %v491_v31  ;;  %v384_v44 = vadd.f32 %v383_v40, %v1072_v50  ;;  %v497_v45 = vadd.f32 %v496_v41, %v1074_v51 }
 0x123   :  { %731 = vst [vmem:[%s1239_s3 + $0xa0] sm:$0xff] %v839_v42  ;;  %732 = vst [vmem:[%s1239_s3 + $0xa8] sm:$0xff] %v840_v43  ;;  %v841_v46 = vpack.c.bf16 %v384_v44, %v382_v38  ;;  %v842_v47 = vpack.c.bf16 %v497_v45, %v495_v39 }
 0x125   :  { %733 = vst [vmem:[%s1239_s3 + $0xb0] sm:$0xff] %v841_v46  ;;  %734 = vst [vmem:[%s1239_s3 + $0xb8] sm:$0xff] %v842_v47  ;;  %v387_v52 = vpop.f32.mrb[24].mxu0  ;;  %v500_v53 = vpop.f32.mrb[24].mxu1 }
 0x126   :  { %v388_v54 = vadd.f32 %v387_v52, %v1068_v48  ;;  %v501_v55 = vadd.f32 %v500_v53, %v1070_v49  ;;  %v389_v56 = vpop.f32.mrb[25].mxu0  ;;  %v502_v57 = vpop.f32.mrb[25].mxu1 }
 0x127   :  { %v390_v58 = vadd.f32 %v389_v56, %v1072_v50  ;;  %v503_v59 = vadd.f32 %v502_v57, %v1074_v51  ;;  %v391_v60 = vpop.f32.mrb[26].mxu0  ;;  %v504_v61 = vpop.f32.mrb[26].mxu1 }
 0x128   :  { %v392_v62 = vadd.f32 %v391_v60, %v1068_v48  ;;  %v505_v63 = vadd.f32 %v504_v61, %v1070_v49  ;;  %v393_v0 = vpop.f32.mrb[27].mxu0  ;;  %v506_v1 = vpop.f32.mrb[27].mxu1 }
 0x129   :  { %v843_v2 = vpack.c.bf16 %v390_v58, %v388_v54  ;;  %v844_v3 = vpack.c.bf16 %v503_v59, %v501_v55  ;;  %v394_v4 = vadd.f32 %v393_v0, %v1072_v50  ;;  %v507_v5 = vadd.f32 %v506_v1, %v1074_v51 }
 0x12b   :  { %735 = vst [vmem:[%s1239_s3 + $0xc0] sm:$0xff] %v843_v2  ;;  %736 = vst [vmem:[%s1239_s3 + $0xc8] sm:$0xff] %v844_v3  ;;  %v845_v6 = vpack.c.bf16 %v394_v4, %v392_v62  ;;  %v846_v7 = vpack.c.bf16 %v507_v5, %v505_v63 }
 0x12d   :  { %737 = vst [vmem:[%s1239_s3 + $0xd0] sm:$0xff] %v845_v6  ;;  %738 = vst [vmem:[%s1239_s3 + $0xd8] sm:$0xff] %v846_v7  ;;  %v397_v8 = vpop.f32.mrb[28].mxu0  ;;  %v510_v9 = vpop.f32.mrb[28].mxu1 }
 0x12e   :  { %v398_v10 = vadd.f32 %v397_v8, %v1068_v48  ;;  %v511_v11 = vadd.f32 %v510_v9, %v1070_v49  ;;  %v399_v12 = vpop.f32.mrb[29].mxu0  ;;  %v512_v13 = vpop.f32.mrb[29].mxu1 }
 0x12f   :  { %v400_v14 = vadd.f32 %v399_v12, %v1072_v50  ;;  %v513_v15 = vadd.f32 %v512_v13, %v1074_v51  ;;  %v401_v16 = vpop.f32.mrb[30].mxu0  ;;  %v514_v17 = vpop.f32.mrb[30].mxu1 }
 0x130   :  { %v402_v18 = vadd.f32 %v401_v16, %v1068_v48  ;;  %v515_v19 = vadd.f32 %v514_v17, %v1070_v49  ;;  %v403_v20 = vpop.f32.mrb[31].mxu0  ;;  %v516_v21 = vpop.f32.mrb[31].mxu1 }
 0x131   :  { %v847_v22 = vpack.c.bf16 %v400_v14, %v398_v10  ;;  %v848_v23 = vpack.c.bf16 %v513_v15, %v511_v11  ;;  %v404_v24 = vadd.f32 %v403_v20, %v1072_v50  ;;  %v517_v25 = vadd.f32 %v516_v21, %v1074_v51 }
 0x133   :  { %739 = vst [vmem:[%s1239_s3 + $0xe0] sm:$0xff] %v847_v22  ;;  %740 = vst [vmem:[%s1239_s3 + $0xe8] sm:$0xff] %v848_v23  ;;  %v849_v26 = vpack.c.bf16 %v404_v24, %v402_v18  ;;  %v850_v48 = vpack.c.bf16 %v517_v25, %v515_v19 }
 0x135   :  { %741 = vst [vmem:[%s1239_s3 + $0xf0] sm:$0xff] %v849_v26  ;;  %742 = vst [vmem:[%s1239_s3 + $0xf8] sm:$0xff] %v850_v48 }

// kernel: up_forward.7
= control target key start
LH: loop header
LB: loop body
LE: loop exit
PB: predicated region body
PF: predicated region fallthrough
CT: control target
= control target key end

     0   :  { %s1023_s0 = inlined_call_operand.vmem [shape: bf16[512,128], index: 0, kind: input, shape index: {}]   ;;  %s1024_s1 = inlined_call_operand.vmem [shape: f32[1,128], index: 1, kind: input, shape index: {}]   ;;  %s1025_s2 = inlined_call_operand.vmem [shape: f32[1,128], index: 2, kind: input, shape index: {}]   ;;  %s1026_s3 = inlined_call_operand.vmem [shape: f32[512,128], index: 3, kind: output, shape index: {}]  }
   0x1   :  { %v419_v0 = vld [vmem:[%s1023_s0] sm:$0xff]   ;;  %v546_v4 = vld [vmem:[%s1023_s0 + $0x8] sm:$0xff]   ;;  %v547_v5 = vld [vmem:[%s1023_s0 + $0x10] sm:$0xff]  }
   0x2   :  { %v603_v1 = vld [vmem:[%s1024_s1] ss:$0 sm:$0xff]  ;;  %v420_v2 = vunpack.c.l.bf16 %v419_v0  ;;  %v421_v3 = vunpack.c.h.bf16 %v419_v0  ;;  %v548_v6 = vld [vmem:[%s1023_s0 + $0x18] sm:$0xff]   ;;  %v424_v8 = vunpack.c.l.bf16 %v546_v4  ;;  %v425_v9 = vunpack.c.h.bf16 %v546_v4  ;;  %v550_v33 = vld [vmem:[%s1023_s0 + $0x28] sm:$0xff]  }
   0x3   :  { %v617_v7 = vld [vmem:[%s1025_s2] ss:$0 sm:$0xff]  ;;  %v428_v10 = vunpack.c.l.bf16 %v547_v5  ;;  %v429_v11 = vunpack.c.h.bf16 %v547_v5  ;;  %v432_v14 = vunpack.c.l.bf16 %v548_v6  ;;  %v433_v15 = vunpack.c.h.bf16 %v548_v6  ;;  %v551_v34 = vld [vmem:[%s1023_s0 + $0x30] sm:$0xff]   ;;  %v552_v39 = vld [vmem:[%s1023_s0 + $0x38] sm:$0xff]  }
   0x4   :  { %v149_v12 = vmul.f32 %v420_v2, %v603_v1  ;;  %v150_v13 = vmul.f32 %v421_v3, %v603_v1  ;;  %v151_v16 = vmul.f32 %v424_v8, %v603_v1  ;;  %v152_v17 = vmul.f32 %v425_v9, %v603_v1  ;;  %v549_v28 = vld [vmem:[%s1023_s0 + $0x20] sm:$0xff]   ;;  %v554_v6 = vld [vmem:[%s1023_s0 + $0x48] sm:$0xff]   ;;  %v555_v8 = vld [vmem:[%s1023_s0 + $0x50] sm:$0xff]  }
   0x5   :  { %v153_v18 = vmul.f32 %v428_v10, %v603_v1  ;;  %v154_v19 = vmul.f32 %v429_v11, %v603_v1  ;;  %v155_v22 = vmul.f32 %v432_v14, %v603_v1  ;;  %v156_v23 = vmul.f32 %v433_v15, %v603_v1  ;;  %v553_v0 = vld [vmem:[%s1023_s0 + $0x40] sm:$0xff]  }
   0x6   :  { %v220_v20 = vadd.f32 %v617_v7, %v149_v12  ;;  %v221_v21 = vadd.f32 %v617_v7, %v150_v13  ;;  %v222_v24 = vadd.f32 %v617_v7, %v151_v16  ;;  %v223_v25 = vadd.f32 %v617_v7, %v152_v17  ;;  %v556_v13 = vld [vmem:[%s1023_s0 + $0x58] sm:$0xff]  }
   0x7   :  { %v224_v26 = vadd.f32 %v617_v7, %v153_v18  ;;  %v225_v27 = vadd.f32 %v617_v7, %v154_v19  ;;  %v226_v31 = vadd.f32 %v617_v7, %v155_v22  ;;  %v227_v32 = vadd.f32 %v617_v7, %v156_v23 }
   0x8   :  { %v284_v29 = vmax.f32 %v220_v20, 0.0  ;;  %v285_v30 = vmax.f32 %v221_v21, 0.0  ;;  %v286_v35 = vmax.f32 %v222_v24, 0.0  ;;  %v287_v36 = vmax.f32 %v223_v25, 0.0 }
   0x9   :  { %v288_v37 = vmax.f32 %v224_v26, 0.0  ;;  %v289_v38 = vmax.f32 %v225_v27, 0.0  ;;  %v290_v40 = vmax.f32 %v226_v31, 0.0  ;;  %v291_v41 = vmax.f32 %v227_v32, 0.0 }
   0xa   :  { %348 = vst [vmem:[%s1026_s3] sm:$0xff] %v284_v29  ;;  %349 = vst [vmem:[%s1026_s3 + $0x8] sm:$0xff] %v285_v30  ;;  %v436_v42 = vunpack.c.l.bf16 %v549_v28  ;;  %v437_v43 = vunpack.c.h.bf16 %v549_v28  ;;  %v440_v44 = vunpack.c.l.bf16 %v550_v33  ;;  %v441_v45 = vunpack.c.h.bf16 %v550_v33 }
   0xb   :  { %350 = vst [vmem:[%s1026_s3 + $0x10] sm:$0xff] %v286_v35  ;;  %351 = vst [vmem:[%s1026_s3 + $0x18] sm:$0xff] %v287_v36  ;;  %v444_v46 = vunpack.c.l.bf16 %v551_v34  ;;  %v445_v47 = vunpack.c.h.bf16 %v551_v34  ;;  %v448_v50 = vunpack.c.l.bf16 %v552_v39  ;;  %v449_v51 = vunpack.c.h.bf16 %v552_v39 }
   0xc   :  { %352 = vst [vmem:[%s1026_s3 + $0x20] sm:$0xff] %v288_v37  ;;  %353 = vst [vmem:[%s1026_s3 + $0x28] sm:$0xff] %v289_v38  ;;  %v157_v48 = vmul.f32 %v436_v42, %v603_v1  ;;  %v158_v49 = vmul.f32 %v437_v43, %v603_v1  ;;  %v159_v52 = vmul.f32 %v440_v44, %v603_v1  ;;  %v452_v16 = vunpack.c.l.bf16 %v553_v0  ;;  %v557_v38 = vld [vmem:[%s1023_s0 + $0x60] sm:$0xff]   ;;  %v558_v43 = vld [vmem:[%s1023_s0 + $0x68] sm:$0xff]  }
   0xd   :  { %354 = vst [vmem:[%s1026_s3 + $0x30] sm:$0xff] %v290_v40  ;;  %355 = vst [vmem:[%s1026_s3 + $0x38] sm:$0xff] %v291_v41  ;;  %v160_v53 = vmul.f32 %v441_v45, %v603_v1  ;;  %v161_v54 = vmul.f32 %v444_v46, %v603_v1  ;;  %v162_v55 = vmul.f32 %v445_v47, %v603_v1  ;;  %v453_v17 = vunpack.c.h.bf16 %v553_v0  ;;  %v559_v44 = vld [vmem:[%s1023_s0 + $0x70] sm:$0xff]  }
   0xe   :  { %v228_v56 = vadd.f32 %v617_v7, %v157_v48  ;;  %v229_v57 = vadd.f32 %v617_v7, %v158_v49  ;;  %v163_v58 = vmul.f32 %v448_v50, %v603_v1  ;;  %v164_v59 = vmul.f32 %v449_v51, %v603_v1  ;;  %v560_v49 = vld [vmem:[%s1023_s0 + $0x78] sm:$0xff]  }
   0xf   :  { %v230_v60 = vadd.f32 %v617_v7, %v159_v52  ;;  %v231_v61 = vadd.f32 %v617_v7, %v160_v53  ;;  %v232_v62 = vadd.f32 %v617_v7, %v161_v54  ;;  %v233_v63 = vadd.f32 %v617_v7, %v162_v55 }
  0x10   :  { %v292_v2 = vmax.f32 %v228_v56, 0.0  ;;  %v293_v3 = vmax.f32 %v229_v57, 0.0  ;;  %v234_v4 = vadd.f32 %v617_v7, %v163_v58  ;;  %v235_v5 = vadd.f32 %v617_v7, %v164_v59 }
  0x11   :  { %v294_v9 = vmax.f32 %v230_v60, 0.0  ;;  %v295_v10 = vmax.f32 %v231_v61, 0.0  ;;  %v296_v11 = vmax.f32 %v232_v62, 0.0  ;;  %v297_v12 = vmax.f32 %v233_v63, 0.0 }
  0x12   :  { %356 = vst [vmem:[%s1026_s3 + $0x40] sm:$0xff] %v292_v2  ;;  %357 = vst [vmem:[%s1026_s3 + $0x48] sm:$0xff] %v293_v3  ;;  %v298_v14 = vmax.f32 %v234_v4, 0.0  ;;  %v299_v15 = vmax.f32 %v235_v5, 0.0  ;;  %v456_v18 = vunpack.c.l.bf16 %v554_v6  ;;  %v457_v19 = vunpack.c.h.bf16 %v554_v6 }
  0x13   :  { %358 = vst [vmem:[%s1026_s3 + $0x50] sm:$0xff] %v294_v9  ;;  %359 = vst [vmem:[%s1026_s3 + $0x58] sm:$0xff] %v295_v10  ;;  %v460_v20 = vunpack.c.l.bf16 %v555_v8  ;;  %v461_v21 = vunpack.c.h.bf16 %v555_v8  ;;  %v165_v22 = vmul.f32 %v452_v16, %v603_v1  ;;  %v166_v23 = vmul.f32 %v453_v17, %v603_v1  ;;  %v562_v17 = vld [vmem:[%s1023_s0 + $0x88] sm:$0xff]  }
  0x14   :  { %360 = vst [vmem:[%s1026_s3 + $0x60] sm:$0xff] %v296_v11  ;;  %361 = vst [vmem:[%s1026_s3 + $0x68] sm:$0xff] %v297_v12  ;;  %v464_v24 = vunpack.c.l.bf16 %v556_v13  ;;  %v465_v25 = vunpack.c.h.bf16 %v556_v13  ;;  %v167_v26 = vmul.f32 %v456_v18, %v603_v1  ;;  %v168_v27 = vmul.f32 %v457_v19, %v603_v1  ;;  %v561_v12 = vld [vmem:[%s1023_s0 + $0x80] sm:$0xff]   ;;  %v563_v18 = vld [vmem:[%s1023_s0 + $0x90] sm:$0xff]  }
  0x15   :  { %362 = vst [vmem:[%s1026_s3 + $0x70] sm:$0xff] %v298_v14  ;;  %363 = vst [vmem:[%s1026_s3 + $0x78] sm:$0xff] %v299_v15  ;;  %v169_v28 = vmul.f32 %v460_v20, %v603_v1  ;;  %v170_v29 = vmul.f32 %v461_v21, %v603_v1  ;;  %v236_v30 = vadd.f32 %v617_v7, %v165_v22  ;;  %v468_v52 = vunpack.c.l.bf16 %v557_v38 }
  0x16   :  { %v237_v31 = vadd.f32 %v617_v7, %v166_v23  ;;  %v171_v32 = vmul.f32 %v464_v24, %v603_v1  ;;  %v172_v33 = vmul.f32 %v465_v25, %v603_v1  ;;  %v238_v34 = vadd.f32 %v617_v7, %v167_v26  ;;  %v564_v23 = vld [vmem:[%s1023_s0 + $0x98] sm:$0xff]  }
  0x17   :  { %v239_v35 = vadd.f32 %v617_v7, %v168_v27  ;;  %v240_v36 = vadd.f32 %v617_v7, %v169_v28  ;;  %v241_v37 = vadd.f32 %v617_v7, %v170_v29  ;;  %v300_v39 = vmax.f32 %v236_v30, 0.0 }
  0x18   :  { %v301_v40 = vmax.f32 %v237_v31, 0.0  ;;  %v242_v41 = vadd.f32 %v617_v7, %v171_v32  ;;  %v243_v42 = vadd.f32 %v617_v7, %v172_v33  ;;  %v302_v45 = vmax.f32 %v238_v34, 0.0 }
  0x19   :  { %v303_v46 = vmax.f32 %v239_v35, 0.0  ;;  %v304_v47 = vmax.f32 %v240_v36, 0.0  ;;  %v305_v48 = vmax.f32 %v241_v37, 0.0  ;;  %364 = vst [vmem:[%s1026_s3 + $0x80] sm:$0xff] %v300_v39  ;;  %v469_v53 = vunpack.c.h.bf16 %v557_v38 }
  0x1a   :  { %365 = vst [vmem:[%s1026_s3 + $0x88] sm:$0xff] %v301_v40  ;;  %v306_v50 = vmax.f32 %v242_v41, 0.0  ;;  %v307_v51 = vmax.f32 %v243_v42, 0.0  ;;  %366 = vst [vmem:[%s1026_s3 + $0x90] sm:$0xff] %v302_v45  ;;  %v472_v54 = vunpack.c.l.bf16 %v558_v43  ;;  %v473_v55 = vunpack.c.h.bf16 %v558_v43 }
  0x1b   :  { %367 = vst [vmem:[%s1026_s3 + $0x98] sm:$0xff] %v303_v46  ;;  %368 = vst [vmem:[%s1026_s3 + $0xa0] sm:$0xff] %v304_v47  ;;  %v476_v56 = vunpack.c.l.bf16 %v559_v44  ;;  %v477_v57 = vunpack.c.h.bf16 %v559_v44  ;;  %v173_v58 = vmul.f32 %v468_v52, %v603_v1  ;;  %v174_v59 = vmul.f32 %v469_v53, %v603_v1  ;;  %v566_v53 = vld [vmem:[%s1023_s0 + $0xa8] sm:$0xff]  }
  0x1c   :  { %369 = vst [vmem:[%s1026_s3 + $0xa8] sm:$0xff] %v305_v48  ;;  %370 = vst [vmem:[%s1026_s3 + $0xb0] sm:$0xff] %v306_v50  ;;  %v480_v60 = vunpack.c.l.bf16 %v560_v49  ;;  %v481_v61 = vunpack.c.h.bf16 %v560_v49  ;;  %v175_v62 = vmul.f32 %v472_v54, %v603_v1  ;;  %v176_v63 = vmul.f32 %v473_v55, %v603_v1  ;;  %v565_v48 = vld [vmem:[%s1023_s0 + $0xa0] sm:$0xff]   ;;  %v567_v54 = vld [vmem:[%s1023_s0 + $0xb0] sm:$0xff]  }
  0x1d   :  { %371 = vst [vmem:[%s1026_s3 + $0xb8] sm:$0xff] %v307_v51  ;;  %v177_v0 = vmul.f32 %v476_v56, %v603_v1  ;;  %v178_v2 = vmul.f32 %v477_v57, %v603_v1  ;;  %v244_v3 = vadd.f32 %v617_v7, %v173_v58  ;;  %v245_v4 = vadd.f32 %v617_v7, %v174_v59  ;;  %v568_v59 = vld [vmem:[%s1023_s0 + $0xb8] sm:$0xff]  }
  0x1e   :  { %v179_v5 = vmul.f32 %v480_v60, %v603_v1  ;;  %v180_v6 = vmul.f32 %v481_v61, %v603_v1  ;;  %v246_v8 = vadd.f32 %v617_v7, %v175_v62  ;;  %v247_v9 = vadd.f32 %v617_v7, %v176_v63 }
  0x1f   :  { %v248_v10 = vadd.f32 %v617_v7, %v177_v0  ;;  %v249_v11 = vadd.f32 %v617_v7, %v178_v2  ;;  %v308_v13 = vmax.f32 %v244_v3, 0.0  ;;  %v309_v14 = vmax.f32 %v245_v4, 0.0 }
  0x20   :  { %v250_v15 = vadd.f32 %v617_v7, %v179_v5  ;;  %v251_v16 = vadd.f32 %v617_v7, %v180_v6  ;;  %v310_v19 = vmax.f32 %v246_v8, 0.0  ;;  %v311_v20 = vmax.f32 %v247_v9, 0.0 }
  0x21   :  { %v312_v21 = vmax.f32 %v248_v10, 0.0  ;;  %v313_v22 = vmax.f32 %v249_v11, 0.0  ;;  %372 = vst [vmem:[%s1026_s3 + $0xc0] sm:$0xff] %v308_v13  ;;  %373 = vst [vmem:[%s1026_s3 + $0xc8] sm:$0xff] %v309_v14  ;;  %v484_v26 = vunpack.c.l.bf16 %v561_v12  ;;  %v485_v27 = vunpack.c.h.bf16 %v561_v12 }
  0x22   :  { %v314_v24 = vmax.f32 %v250_v15, 0.0  ;;  %v315_v25 = vmax.f32 %v251_v16, 0.0  ;;  %374 = vst [vmem:[%s1026_s3 + $0xd0] sm:$0xff] %v310_v19  ;;  %375 = vst [vmem:[%s1026_s3 + $0xd8] sm:$0xff] %v311_v20  ;;  %v488_v28 = vunpack.c.l.bf16 %v562_v17  ;;  %v489_v29 = vunpack.c.h.bf16 %v562_v17 }
  0x23   :  { %376 = vst [vmem:[%s1026_s3 + $0xe0] sm:$0xff] %v312_v21  ;;  %377 = vst [vmem:[%s1026_s3 + $0xe8] sm:$0xff] %v313_v22  ;;  %v492_v30 = vunpack.c.l.bf16 %v563_v18  ;;  %v493_v31 = vunpack.c.h.bf16 %v563_v18  ;;  %v181_v32 = vmul.f32 %v484_v26, %v603_v1  ;;  %v182_v33 = vmul.f32 %v485_v27, %v603_v1  ;;  %v569_v22 = vld [vmem:[%s1023_s0 + $0xc0] sm:$0xff]   ;;  %v570_v27 = vld [vmem:[%s1023_s0 + $0xc8] sm:$0xff]  }
  0x24   :  { %378 = vst [vmem:[%s1026_s3 + $0xf0] sm:$0xff] %v314_v24  ;;  %379 = vst [vmem:[%s1026_s3 + $0xf8] sm:$0xff] %v315_v25  ;;  %v496_v34 = vunpack.c.l.bf16 %v564_v23  ;;  %v497_v35 = vunpack.c.h.bf16 %v564_v23  ;;  %v183_v36 = vmul.f32 %v488_v28, %v603_v1  ;;  %v184_v37 = vmul.f32 %v489_v29, %v603_v1  ;;  %v571_v28 = vld [vmem:[%s1023_s0 + $0xd0] sm:$0xff]  }
  0x25   :  { %v185_v38 = vmul.f32 %v492_v30, %v603_v1  ;;  %v186_v39 = vmul.f32 %v493_v31, %v603_v1  ;;  %v252_v40 = vadd.f32 %v617_v7, %v181_v32  ;;  %v253_v41 = vadd.f32 %v617_v7, %v182_v33  ;;  %v572_v33 = vld [vmem:[%s1023_s0 + $0xd8] sm:$0xff]  }
  0x26   :  { %v187_v42 = vmul.f32 %v496_v34, %v603_v1  ;;  %v188_v43 = vmul.f32 %v497_v35, %v603_v1  ;;  %v254_v44 = vadd.f32 %v617_v7, %v183_v36  ;;  %v255_v45 = vadd.f32 %v617_v7, %v184_v37 }
  0x27   :  { %v256_v46 = vadd.f32 %v617_v7, %v185_v38  ;;  %v257_v47 = vadd.f32 %v617_v7, %v186_v39  ;;  %v316_v49 = vmax.f32 %v252_v40, 0.0  ;;  %v317_v50 = vmax.f32 %v253_v41, 0.0 }
  0x28   :  { %v258_v51 = vadd.f32 %v617_v7, %v187_v42  ;;  %v259_v52 = vadd.f32 %v617_v7, %v188_v43  ;;  %v318_v55 = vmax.f32 %v254_v44, 0.0  ;;  %v319_v56 = vmax.f32 %v255_v45, 0.0 }
  0x29   :  { %v320_v57 = vmax.f32 %v256_v46, 0.0  ;;  %v321_v58 = vmax.f32 %v257_v47, 0.0  ;;  %380 = vst [vmem:[%s1026_s3 + $0x100] sm:$0xff] %v316_v49  ;;  %381 = vst [vmem:[%s1026_s3 + $0x108] sm:$0xff] %v317_v50  ;;  %v500_v62 = vunpack.c.l.bf16 %v565_v48  ;;  %v501_v63 = vunpack.c.h.bf16 %v565_v48 }
  0x2a   :  { %v322_v60 = vmax.f32 %v258_v51, 0.0  ;;  %v323_v61 = vmax.f32 %v259_v52, 0.0  ;;  %382 = vst [vmem:[%s1026_s3 + $0x110] sm:$0xff] %v318_v55  ;;  %383 = vst [vmem:[%s1026_s3 + $0x118] sm:$0xff] %v319_v56  ;;  %v504_v0 = vunpack.c.l.bf16 %v566_v53  ;;  %v505_v2 = vunpack.c.h.bf16 %v566_v53 }
  0x2b   :  { %384 = vst [vmem:[%s1026_s3 + $0x120] sm:$0xff] %v320_v57  ;;  %385 = vst [vmem:[%s1026_s3 + $0x128] sm:$0xff] %v321_v58  ;;  %v508_v3 = vunpack.c.l.bf16 %v567_v54  ;;  %v509_v4 = vunpack.c.h.bf16 %v567_v54  ;;  %v189_v5 = vmul.f32 %v500_v62, %v603_v1  ;;  %v190_v6 = vmul.f32 %v501_v63, %v603_v1  ;;  %v573_v58 = vld [vmem:[%s1023_s0 + $0xe0] sm:$0xff]   ;;  %v574_v63 = vld [vmem:[%s1023_s0 + $0xe8] sm:$0xff]  }
  0x2c   :  { %386 = vst [vmem:[%s1026_s3 + $0x130] sm:$0xff] %v322_v60  ;;  %387 = vst [vmem:[%s1026_s3 + $0x138] sm:$0xff] %v323_v61  ;;  %v512_v8 = vunpack.c.l.bf16 %v568_v59  ;;  %v513_v9 = vunpack.c.h.bf16 %v568_v59  ;;  %v191_v10 = vmul.f32 %v504_v0, %v603_v1  ;;  %v192_v11 = vmul.f32 %v505_v2, %v603_v1  ;;  %v575_v0 = vld [vmem:[%s1023_s0 + $0xf0] sm:$0xff]  }
  0x2d   :  { %v193_v12 = vmul.f32 %v508_v3, %v603_v1  ;;  %v194_v13 = vmul.f32 %v509_v4, %v603_v1  ;;  %v260_v14 = vadd.f32 %v617_v7, %v189_v5  ;;  %v261_v15 = vadd.f32 %v617_v7, %v190_v6  ;;  %v576_v6 = vld [vmem:[%s1023_s0 + $0xf8] sm:$0xff]  }
  0x2e   :  { %v195_v16 = vmul.f32 %v512_v8, %v603_v1  ;;  %v196_v17 = vmul.f32 %v513_v9, %v603_v1  ;;  %v262_v18 = vadd.f32 %v617_v7, %v191_v10  ;;  %v263_v19 = vadd.f32 %v617_v7, %v192_v11 }
  0x2f   :  { %v264_v20 = vadd.f32 %v617_v7, %v193_v12  ;;  %v265_v21 = vadd.f32 %v617_v7, %v194_v13  ;;  %v324_v23 = vmax.f32 %v260_v14, 0.0  ;;  %v325_v24 = vmax.f32 %v261_v15, 0.0 }
  0x30   :  { %v266_v25 = vadd.f32 %v617_v7, %v195_v16  ;;  %v267_v26 = vadd.f32 %v617_v7, %v196_v17  ;;  %v326_v29 = vmax.f32 %v262_v18, 0.0  ;;  %v327_v30 = vmax.f32 %v263_v19, 0.0 }
  0x31   :  { %v328_v31 = vmax.f32 %v264_v20, 0.0  ;;  %v329_v32 = vmax.f32 %v265_v21, 0.0  ;;  %388 = vst [vmem:[%s1026_s3 + $0x140] sm:$0xff] %v324_v23  ;;  %389 = vst [vmem:[%s1026_s3 + $0x148] sm:$0xff] %v325_v24  ;;  %v516_v36 = vunpack.c.l.bf16 %v569_v22  ;;  %v517_v37 = vunpack.c.h.bf16 %v569_v22 }
  0x32   :  { %v330_v34 = vmax.f32 %v266_v25, 0.0  ;;  %v331_v35 = vmax.f32 %v267_v26, 0.0  ;;  %390 = vst [vmem:[%s1026_s3 + $0x150] sm:$0xff] %v326_v29  ;;  %391 = vst [vmem:[%s1026_s3 + $0x158] sm:$0xff] %v327_v30  ;;  %v520_v38 = vunpack.c.l.bf16 %v570_v27  ;;  %v521_v39 = vunpack.c.h.bf16 %v570_v27 }
  0x33   :  { %392 = vst [vmem:[%s1026_s3 + $0x160] sm:$0xff] %v328_v31  ;;  %393 = vst [vmem:[%s1026_s3 + $0x168] sm:$0xff] %v329_v32  ;;  %v524_v40 = vunpack.c.l.bf16 %v571_v28  ;;  %v525_v41 = vunpack.c.h.bf16 %v571_v28  ;;  %v197_v42 = vmul.f32 %v516_v36, %v603_v1  ;;  %v198_v43 = vmul.f32 %v517_v37, %v603_v1 }
  0x34   :  { %394 = vst [vmem:[%s1026_s3 + $0x170] sm:$0xff] %v330_v34  ;;  %395 = vst [vmem:[%s1026_s3 + $0x178] sm:$0xff] %v331_v35  ;;  %v528_v44 = vunpack.c.l.bf16 %v572_v33  ;;  %v529_v45 = vunpack.c.h.bf16 %v572_v33  ;;  %v199_v46 = vmul.f32 %v520_v38, %v603_v1  ;;  %v200_v47 = vmul.f32 %v521_v39, %v603_v1 }
  0x35   :  { %v201_v48 = vmul.f32 %v524_v40, %v603_v1  ;;  %v202_v49 = vmul.f32 %v525_v41, %v603_v1  ;;  %v268_v50 = vadd.f32 %v617_v7, %v197_v42  ;;  %v269_v51 = vadd.f32 %v617_v7, %v198_v43 }
  0x36   :  { %v203_v52 = vmul.f32 %v528_v44, %v603_v1  ;;  %v204_v53 = vmul.f32 %v529_v45, %v603_v1  ;;  %v270_v54 = vadd.f32 %v617_v7, %v199_v46  ;;  %v271_v55 = vadd.f32 %v617_v7, %v200_v47 }
  0x37   :  { %v272_v56 = vadd.f32 %v617_v7, %v201_v48  ;;  %v273_v57 = vadd.f32 %v617_v7, %v202_v49  ;;  %v332_v59 = vmax.f32 %v268_v50, 0.0  ;;  %v333_v60 = vmax.f32 %v269_v51, 0.0 }
  0x38   :  { %v274_v61 = vadd.f32 %v617_v7, %v203_v52  ;;  %v275_v62 = vadd.f32 %v617_v7, %v204_v53  ;;  %v334_v2 = vmax.f32 %v270_v54, 0.0  ;;  %v335_v3 = vmax.f32 %v271_v55, 0.0 }
  0x39   :  { %v336_v4 = vmax.f32 %v272_v56, 0.0  ;;  %v337_v5 = vmax.f32 %v273_v57, 0.0  ;;  %396 = vst [vmem:[%s1026_s3 + $0x180] sm:$0xff] %v332_v59  ;;  %397 = vst [vmem:[%s1026_s3 + $0x188] sm:$0xff] %v333_v60  ;;  %v532_v10 = vunpack.c.l.bf16 %v573_v58  ;;  %v533_v11 = vunpack.c.h.bf16 %v573_v58 }
  0x3a   :  { %v338_v8 = vmax.f32 %v274_v61, 0.0  ;;  %v339_v9 = vmax.f32 %v275_v62, 0.0  ;;  %398 = vst [vmem:[%s1026_s3 + $0x190] sm:$0xff] %v334_v2  ;;  %399 = vst [vmem:[%s1026_s3 + $0x198] sm:$0xff] %v335_v3  ;;  %v536_v12 = vunpack.c.l.bf16 %v574_v63  ;;  %v537_v13 = vunpack.c.h.bf16 %v574_v63 }
  0x3b   :  { %400 = vst [vmem:[%s1026_s3 + $0x1a0] sm:$0xff] %v336_v4  ;;  %401 = vst [vmem:[%s1026_s3 + $0x1a8] sm:$0xff] %v337_v5  ;;  %v540_v14 = vunpack.c.l.bf16 %v575_v0  ;;  %v541_v15 = vunpack.c.h.bf16 %v575_v0  ;;  %v205_v16 = vmul.f32 %v532_v10, %v603_v1  ;;  %v206_v17 = vmul.f32 %v533_v11, %v603_v1 }
  0x3c   :  { %402 = vst [vmem:[%s1026_s3 + $0x1b0] sm:$0xff] %v338_v8  ;;  %403 = vst [vmem:[%s1026_s3 + $0x1b8] sm:$0xff] %v339_v9  ;;  %v544_v18 = vunpack.c.l.bf16 %v576_v6  ;;  %v545_v19 = vunpack.c.h.bf16 %v576_v6  ;;  %v207_v20 = vmul.f32 %v536_v12, %v603_v1  ;;  %v208_v21 = vmul.f32 %v537_v13, %v603_v1 }
  0x3d   :  { %v209_v22 = vmul.f32 %v540_v14, %v603_v1  ;;  %v210_v23 = vmul.f32 %v541_v15, %v603_v1  ;;  %v276_v24 = vadd.f32 %v617_v7, %v205_v16  ;;  %v277_v25 = vadd.f32 %v617_v7, %v206_v17 }
  0x3e   :  { %v211_v26 = vmul.f32 %v544_v18, %v603_v1  ;;  %v212_v27 = vmul.f32 %v545_v19, %v603_v1  ;;  %v278_v28 = vadd.f32 %v617_v7, %v207_v20  ;;  %v279_v29 = vadd.f32 %v617_v7, %v208_v21 }
  0x3f   :  { %v280_v30 = vadd.f32 %v617_v7, %v209_v22  ;;  %v281_v31 = vadd.f32 %v617_v7, %v210_v23  ;;  %v340_v32 = vmax.f32 %v276_v24, 0.0  ;;  %v341_v33 = vmax.f32 %v277_v25, 0.0 }
  0x40   :  { %v282_v34 = vadd.f32 %v617_v7, %v211_v26  ;;  %v283_v35 = vadd.f32 %v617_v7, %v212_v27  ;;  %v342_v36 = vmax.f32 %v278_v28, 0.0  ;;  %v343_v37 = vmax.f32 %v279_v29, 0.0 }
  0x41   :  { %v344_v38 = vmax.f32 %v280_v30, 0.0  ;;  %v345_v39 = vmax.f32 %v281_v31, 0.0  ;;  %404 = vst [vmem:[%s1026_s3 + $0x1c0] sm:$0xff] %v340_v32  ;;  %405 = vst [vmem:[%s1026_s3 + $0x1c8] sm:$0xff] %v341_v33 }
  0x42   :  { %v346_v1 = vmax.f32 %v282_v34, 0.0  ;;  %v347_v40 = vmax.f32 %v283_v35, 0.0  ;;  %406 = vst [vmem:[%s1026_s3 + $0x1d0] sm:$0xff] %v342_v36  ;;  %407 = vst [vmem:[%s1026_s3 + $0x1d8] sm:$0xff] %v343_v37 }
  0x43   :  { %408 = vst [vmem:[%s1026_s3 + $0x1e0] sm:$0xff] %v344_v38  ;;  %409 = vst [vmem:[%s1026_s3 + $0x1e8] sm:$0xff] %v345_v39 }
  0x44   :  { %410 = vst [vmem:[%s1026_s3 + $0x1f0] sm:$0xff] %v346_v1  ;;  %411 = vst [vmem:[%s1026_s3 + $0x1f8] sm:$0xff] %v347_v40 }

// kernel: up_forward.6
= control target key start
LH: loop header
LB: loop body
LE: loop exit
PB: predicated region body
PF: predicated region fallthrough
CT: control target
= control target key end

     0   :  { %s4885_s27 = smov 0   ;;  %s4887_s28 = smov 0   ;;  %s6150_s0 = inlined_call_operand.vmem [shape: bf16[2,18,18,128], index: 0, kind: input, shape index: {}, may-alias: {0,1,2}]   ;;  %s6151_s1 = inlined_call_operand.vmem [shape: bf16[2,18,18,128], index: 1, kind: input, shape index: {}, may-alias: {0,1,2}]   ;;  %s6152_s2 = inlined_call_operand.vmem [shape: bf16[2,18,18,128], index: 2, kind: input, shape index: {}, may-alias: {0,1,2}]   ;;  %s6153_s3 = inlined_call_operand.vmem [shape: f32[1,128], index: 3, kind: input, shape index: {}]   ;;  %s6154_s4 = inlined_call_operand.vmem [shape: f32[1,128], index: 4, kind: input, shape index: {}]   ;;  %s6155_s5 = inlined_call_operand.vmem [shape: bf16[3,384,128], index: 5, kind: input, shape index: {}]   ;;  %s6156_s6 = inlined_call_operand.vmem [shape: f32[1,128], index: 6, kind: input, shape index: {}]   ;;  %s6157_s7 = inlined_call_operand.vmem [shape: bf16[2,16,16,128], index: 7, kind: output, shape index: {0}]   ;;  %s6158_s8 = inlined_call_operand.vmem [shape: f32[2,1,2,128], index: 8, kind: output, shape index: {1}]  }
   0x1   :  { %s4889_s29 = smov 0  }
   0x2 LB: > { %s31_s30 = sadd.s32 1, %s4833_s28  ;;  %p3591_p0 = scmp.ge.s32.totalorder %s4837_s29, 1  ;;  %s4837_s29 = sphi %s4889_s29, %s19_s29   ;;  %s4833_s28 = sphi %s4887_s28, %s6209_s28   ;;  %s4829_s27 = sphi %s4885_s27, %s6208_s27  }
   0x3   : > { %p33_p1 = scmp.ge.s32.totalorder %s31_s30, 2  ;;  %p347_p2 = scmp.lt.s32.totalorder %s4837_s29, 3 }
   0x5   : > { %s6211_s30 = smov (%p33_p1, %s31_s30), 0  ;;  %p348_p3 = pnand %p3591_p0, %p347_p2 }
   0x7   : > { %351 = sbr.rel (%p348_p3) target bundleno = 718 (0x2ce), region = 48 }
   0xe   : > { %v752_v0 = vlaneseq  ;;  %v4741_v1 = vld [vmem:[%s6155_s5 + $0x100] sm:$0xff]   ;;  %p431_p4 = scmp.lt.s32.totalorder %s4829_s27, 1  ;;  %v4744_v7 = vld [vmem:[%s6155_s5 + $0x108] sm:$0xff]   ;;  %v6159_v9 = vmov 0.0   ;;  %v4747_v15 = vld [vmem:[%s6155_s5 + $0x110] sm:$0xff]   ;;  %vm1337_vm9 = vcmask 1046528  }
   0xf   : > { %v4742_v2 = vld [vmem:[%s6155_s5 + $0xc0] sm:$0xff]   ;;  %3985 = vmatprep.subr.bf16.mxu0 %v4741_v1  ;;  %v4745_v8 = vld [vmem:[%s6155_s5 + $0xc8] sm:$0xff]   ;;  %v4748_v16 = vld [vmem:[%s6155_s5 + $0xd0] sm:$0xff]   ;;  %vm1096_vm10 = vsmask.f32 7424  ;;  %vm3405_vm11 = vcmask 1040384  }
  0x10   : > { %v4911_v3 = vshrl.u32 %v752_v0, 7  ;;  %v4913_v4 = vand.u32 127, %v752_v0  ;;  %3986 = vmatpush3.bf16.msra.mxu0 %v4742_v2  ;;  %v4918_v5 = vld [vmem:[%s6155_s5 + $0x140] sm:$0xff]   ;;  %s6213_s27 = smov (!%p431_p4, %s4829_s27), 1  ;;  %v4956_v13 = vld [vmem:[%s6155_s5 + $0x148] sm:$0xff]   ;;  %v4970_v17 = vld [vmem:[%s6155_s5 + $0x150] sm:$0xff]  }
  0x11   : > { %4537 = vmatprep.subr.bf16.mxu1 %v4918_v5  ;;  %3987 = vmatprep.subr.bf16.mxu0 %v4744_v7  ;;  %v4750_v19 = vld [vmem:[%s6155_s5 + $0x118] sm:$0xff]   ;;  %v4753_v23 = vld [vmem:[%s6155_s5 + $0x120] sm:$0xff]   ;;  %v4756_v27 = vld [vmem:[%s6155_s5 + $0x128] sm:$0xff]   ;;  %s5074_s23 = smul.u32 216, %s6213_s27  ;;  %s3810_s19 = sshll.u32 %s6213_s27, 7 }
  0x12   : > { %vm766_vm0 = vcmp.ge.s32.totalorder %v4913_v4, 1  ;;  %vm769_vm1 = vcmp.le.s32.totalorder %v4913_v4, 16  ;;  %v793_v6 = vsub.s32 1, %v4911_v3  ;;  %vm760_vm2 = vcmp.ge.s32.totalorder %v4911_v3, 1  ;;  %4545 = vmatpush3.bf16.msra.mxu1 %v4918_v5  ;;  %v4751_v20 = vld [vmem:[%s6155_s5 + $0xd8] sm:$0xff]   ;;  %v4754_v24 = vld [vmem:[%s6155_s5 + $0xe0] sm:$0xff]   ;;  %s6047_s22 = scalar_lea.vmem %s6157_s7, %s3810_s19 }
  0x13   : > { %vm771_vm3 = vmand %vm766_vm0, %vm769_vm1  ;;  %4538 = vmatprep.subr.bf16.mxu1 %v4956_v13  ;;  %v808_v18 = vsub.s32 2, %v4911_v3  ;;  %v4984_v21 = vld [vmem:[%s6155_s5 + $0x158] sm:$0xff]   ;;  %v4998_v25 = vld [vmem:[%s6155_s5 + $0x160] sm:$0xff]   ;;  %v823_v30 = vsub.s32 3, %v4911_v3  ;;  %v838_v34 = vsub.s32 4, %v4911_v3  ;;  %v853_v40 = vsub.s32 5, %v4911_v3  ;;  %s5082_s26 = scalar_lea.vmem %s6150_s0, %s5074_s23 }
  0x14   : > { %v4937_v10 = vsel %vm771_vm3, 1.0, %v6159_v9  ;;  %vm767_vm4 = vmand %vm760_vm2, %vm766_vm0  ;;  %3988 = vmatpush3.bf16.msra.mxu0 %v4745_v8  ;;  %v4757_v28 = vld [vmem:[%s6155_s5 + $0xe8] sm:$0xff]   ;;  %v4759_v31 = vld [vmem:[%s6155_s5 + $0x130] sm:$0xff]   ;;  %v868_v43 = vsub.s32 6, %v4911_v3  ;;  %v1416_v45 = vadd.s32 16, %v4911_v3  ;;  %v883_v48 = vsub.s32 7, %v4911_v3 }
  0x15   : > { %v914_v11 = vrot.slane %v4937_v10, %v793_v6  ;;  %vm770_vm5 = vmand %vm767_vm4, %vm769_vm1  ;;  %3989 = vmatprep.subr.bf16.mxu0 %v4747_v15  ;;  %v929_v22 = vrot.slane %v4937_v10, %v808_v18  ;;  %v5012_v29 = vld [vmem:[%s6155_s5 + $0x168] sm:$0xff]   ;;  %v4760_v32 = vld [vmem:[%s6155_s5 + $0xf0] sm:$0xff]   ;;  %v944_v36 = vrot.slane %v4937_v10, %v823_v30  ;;  %v959_v39 = vrot.slane %v4937_v10, %v838_v34  ;;  %s3807_s17 = sadd.s32 192, %s5074_s23  ;;  %s3809_s11 = sadd.s32 204, %s5074_s23 }
  0x16   : > { %v4951_v12 = vsel %vm770_vm5, 1.0, %v6159_v9  ;;  %4546 = vmatpush3.bf16.msra.mxu1 %v4956_v13  ;;  %v5026_v33 = vld [vmem:[%s6155_s5 + $0x170] sm:$0xff]   ;;  %v4762_v35 = vld [vmem:[%s6155_s5 + $0x138] sm:$0xff]   ;;  %v974_v42 = vrot.slane %v4937_v10, %v853_v40  ;;  %v989_v44 = vrot.slane %v4937_v10, %v868_v43  ;;  %v4765_v46 = vld [vmem:[%s6155_s5 + $0x40] sm:$0xff]   ;;  %vm1418_vm6 = vcmp.le.s32.totalorder %v1416_v45, 16  ;;  %s456_s25 = scalar_lea.vmem %s6151_s1, %s3807_s17  ;;  %s469_s14 = scalar_lea.vmem %s6152_s2, %s3809_s11 }
  0x17   : > { %920 = vbcast.lane.b32.xlu0 %v914_v11, 264  ;;  %916 = vbcast.lane.b32.xlu1 %v914_v11, 256  ;;  %v794_v14 = vrot.slane %v4951_v12, %v793_v6  ;;  %v809_v26 = vrot.slane %v4951_v12, %v808_v18  ;;  %v4763_v37 = vld [vmem:[%s6155_s5 + $0xf8] sm:$0xff]   ;;  %v824_v41 = vrot.slane %v4951_v12, %v823_v30  ;;  %vm1420_vm7 = vmand %vm1418_vm6, %vm766_vm0  ;;  %v5064_v50 = vsub.s32 0, %v4911_v3  ;;  %v522_v58 = vld [vmem:[%s5082_s26 + $0x6c] sm:$0xff]   ;;  %s3597_s24 = sshll.u32 %s6213_s27, 1 }
  0x18   : > { %3990 = vmatpush3.bf16.msra.mxu0 %v4748_v16  ;;  %4539 = vmatprep.subr.bf16.mxu1 %v4970_v17  ;;  %v5040_v38 = vld [vmem:[%s6155_s5 + $0x178] sm:$0xff]   ;;  %v839_v47 = vrot.slane %v4951_v12, %v838_v34  ;;  %vm1421_vm8 = vmand %vm1420_vm7, %vm769_vm1  ;;  %v1004_v49 = vrot.slane %v4937_v10, %v883_v48  ;;  %v854_v54 = vrot.slane %v4951_v12, %v853_v40  ;;  %v576_v59 = vunpack.c.h.bf16 %v522_v58  ;;  %v5088_v61 = vld [vmem:[%s6153_s3] ss:$0 sm:$0xff]  ;;  %s489_s10 = scalar_lea.vmem %s6158_s8, %s3597_s24 }
  0x19   : > { %3991 = vmatprep.subr.bf16.mxu0 %v4750_v19  ;;  %v3602_v51 = vsel %vm1421_vm8, 1.0, %v6159_v9  ;;  %v779_v53 = vrot.slane %v4951_v12, %v5064_v50  ;;  %v869_v55 = vrot.slane %v4951_v12, %v868_v43  ;;  %v884_v56 = vrot.slane %v4951_v12, %v883_v48  ;;  %v523_v62 = vld [vmem:[%s5082_s26 + $0x74] sm:$0x1]  ;;  %v497_v2 = vld [vmem:[%s5082_s26 + $0xc] sm:$0xff]   ;;  %v5097_v3 = vld [vmem:[%s6154_s4] ss:$0 sm:$0xff] }
  0x1a   : > { %4547 = vmatpush3.bf16.msra.mxu1 %v4970_v17  ;;  %v1427_v52 = vrot.slane %v3602_v51, %v5064_v50  ;;  %v899_v57 = vrot.slane %v4937_v10, %v5064_v50  ;;  %v575_v60 = vunpack.c.l.bf16 %v522_v58  ;;  %v630_v63 = vmul.f32 %v5088_v61, %v576_v59  ;;  %v499_v4 = vld [vmem:[%s5082_s26 + $0x14] sm:$0x1]  ;;  %v3967_v6 = vld [vmem:[%s5082_s26 + $0x78] sm:$0xff]  }
  0x1b   : > { %924 = vbcast.lane.b32.xlu1 %v914_v11, 272  ;;  %796 = vbcast.lane.b32.xlu0 %v794_v14, 256  ;;  %v577_v1 = vunpack.c.l.bf16 %v523_v62  ;;  %v551_v7 = vunpack.c.l.bf16 %v497_v2  ;;  %v552_v8 = vunpack.c.h.bf16 %v497_v2  ;;  %v3866_v15 = vunpack.c.h.bf16 %v3967_v6  ;;  %v3963_v30 = vld [vmem:[%s5082_s26 + $0x18] sm:$0xff]  }
  0x1c   : > { %3992 = vmatpush3.bf16.msra.mxu0 %v4751_v20  ;;  %4540 = vmatprep.subr.bf16.mxu1 %v4984_v21  ;;  %v629_v0 = vmul.f32 %v5088_v61, %v575_v60  ;;  %v684_v10 = vadd.f32 %v5097_v3, %v630_v63  ;;  %v3865_v16 = vunpack.c.l.bf16 %v3967_v6 }
  0x1d   : > { %3993 = vmatprep.subr.bf16.mxu0 %v4753_v23  ;;  %v631_v12 = vmul.f32 %v5088_v61, %v577_v1  ;;  %v605_v18 = vmul.f32 %v5088_v61, %v551_v7  ;;  %v606_v19 = vmul.f32 %v5088_v61, %v552_v8  ;;  %v529_v1 = vld [vmem:[%s5082_s26 + $0x8c] sm:$0x1] }
  0x1e   : > { %4548 = vmatpush3.bf16.msra.mxu1 %v4984_v21  ;;  %v683_v11 = vadd.f32 %v5097_v3, %v629_v0  ;;  %v732_v20 = vmax.f32 %v684_v10, 0.0 }
  0x1f   : > { %804 = vbcast.lane.b32.xlu1 %v794_v14, 272  ;;  %800 = vbcast.lane.b32.xlu0 %v794_v14, 264  ;;  %v553_v14 = vunpack.c.l.bf16 %v499_v4  ;;  %v685_v23 = vadd.f32 %v5097_v3, %v631_v12  ;;  %v659_v34 = vadd.f32 %v5097_v3, %v605_v18 }
  0x20   : > { %3994 = vmatpush3.bf16.msra.mxu0 %v4754_v24  ;;  %4541 = vmatprep.subr.bf16.mxu1 %v4998_v25 }
  0x21   : > { %3995 = vmatprep.subr.bf16.mxu0 %v4756_v27  ;;  %v607_v24 = vmul.f32 %v5088_v61, %v553_v14  ;;  %v633_v27 = vmul.f32 %v3866_v15, %v5088_v61  ;;  %v733_v40 = vmax.f32 %v685_v23, 0.0 }
  0x22   : > { %4549 = vmatpush3.bf16.msra.mxu1 %v4998_v25 }
  0x23   : > { %935 = vbcast.lane.b32.xlu1 %v929_v22, 264  ;;  %931 = vbcast.lane.b32.xlu0 %v929_v22, 256  ;;  %v687_v43 = vadd.f32 %v5097_v3, %v633_v27 }
  0x24   : > { %3996 = vmatpush3.bf16.msra.mxu0 %v4757_v28  ;;  %4542 = vmatprep.subr.bf16.mxu1 %v5012_v29  ;;  %v632_v28 = vmul.f32 %v3865_v16, %v5088_v61  ;;  %v3968_v16 = vld [vmem:[%s5082_s26 + $0x90] sm:$0xff]  }
  0x25   : > { %3997 = vmatprep.subr.bf16.mxu0 %v4759_v31  ;;  %v735_v58 = vmax.f32 %v687_v43, 0.0 }
  0x26   : > { %4550 = vmatpush3.bf16.msra.mxu1 %v5012_v29  ;;  %v686_v45 = vadd.f32 %v5097_v3, %v632_v28 }
  0x27   : > { %811 = vbcast.lane.b32.xlu1 %v809_v26, 256  ;;  %939 = vbcast.lane.b32.xlu0 %v929_v22, 272  ;;  %v731_v22 = vmax.f32 %v683_v11, 0.0 }
  0x28   : > { %3998 = vmatpush3.bf16.msra.mxu0 %v4760_v32  ;;  %4543 = vmatprep.subr.bf16.mxu1 %v5026_v33  ;;  %v734_v62 = vmax.f32 %v686_v45, 0.0  ;;  %v3870_v45 = vunpack.c.h.bf16 %v3968_v16 }
  0x29   : > { %3999 = vmatprep.subr.bf16.mxu0 %v4762_v35  ;;  %v660_v35 = vadd.f32 %v5097_v3, %v606_v19  ;;  %v583_v19 = vunpack.c.l.bf16 %v529_v1 }
  0x2a   : > { %4551 = vmatpush3.bf16.msra.mxu1 %v5026_v33 }
  0x2b   : > { %819 = vbcast.lane.b32.xlu1 %v809_v26, 272  ;;  %815 = vbcast.lane.b32.xlu0 %v809_v26, 264  ;;  %v526_v26 = vld [vmem:[%s5082_s26 + $0x80] sm:$0x1] }
  0x2c   : > { %4544 = vmatprep.subr.bf16.mxu1 %v5040_v38  ;;  %4000 = vmatpush3.bf16.msra.mxu0 %v4763_v37 }
  0x2d   : > { %4393 = vmatprep.subr.bf16.mxu0 %v4918_v5 }
  0x2e   : > { %4552 = vmatpush3.bf16.msra.mxu1 %v5040_v38 }
  0x2f   : > { %950 = vbcast.lane.b32.xlu1 %v944_v36, 264  ;;  %946 = vbcast.lane.b32.xlu0 %v944_v36, 256 }
  0x30   : > { %4121 = vmatprep.subr.bf16.mxu1 %v4765_v46  ;;  %v3850_v46 = vunpack.c.h.bf16 %v3963_v30 }
  0x32   : > { %v609_v63 = vmul.f32 %v3850_v46, %v5088_v61  ;;  %v504_v46 = vld [vmem:[%s5082_s26 + $0x24] sm:$0xff]  }
  0x33   : > { %961 = vbcast.lane.b32.xlu1 %v959_v39, 256  ;;  %954 = vbcast.lane.b32.xlu0 %v944_v36, 272  ;;  %v580_v36 = vunpack.c.l.bf16 %v526_v26 }
  0x34   : > { %v663_v28 = vadd.f32 %v5097_v3, %v609_v63 }
  0x35   : > { %v634_v51 = vmul.f32 %v5088_v61, %v580_v36 }
  0x37   : > { %969 = vbcast.lane.b32.xlu1 %v959_v39, 272  ;;  %965 = vbcast.lane.b32.xlu0 %v959_v39, 264  ;;  %v688_v7 = vadd.f32 %v5097_v3, %v634_v51 }
  0x39   : > { %v736_v36 = vmax.f32 %v688_v7, 0.0 }
  0x3b   : > { %830 = vbcast.lane.b32.xlu1 %v824_v41, 264  ;;  %826 = vbcast.lane.b32.xlu0 %v824_v41, 256 }
  0x3f   : > { %976 = vbcast.lane.b32.xlu1 %v974_v42, 256  ;;  %834 = vbcast.lane.b32.xlu0 %v824_v41, 272  ;;  %v661_v41 = vadd.f32 %v5097_v3, %v607_v24 }
  0x43   : > { %984 = vbcast.lane.b32.xlu1 %v974_v42, 272  ;;  %980 = vbcast.lane.b32.xlu0 %v974_v42, 264  ;;  %v502_v42 = vld [vmem:[%s5082_s26 + $0x20] sm:$0x1] }
  0x47   : > { %995 = vbcast.lane.b32.xlu1 %v989_v44, 264  ;;  %991 = vbcast.lane.b32.xlu0 %v989_v44, 256 }
  0x4b   : > { %841 = vbcast.lane.b32.xlu1 %v839_v47, 256  ;;  %999 = vbcast.lane.b32.xlu0 %v989_v44, 272  ;;  %v3849_v44 = vunpack.c.l.bf16 %v3963_v30 }
  0x4d   : > { %v608_v59 = vmul.f32 %v3849_v44, %v5088_v61 }
  0x4f   : > { %849 = vbcast.lane.b32.xlu1 %v839_v47, 272  ;;  %845 = vbcast.lane.b32.xlu0 %v839_v47, 264  ;;  %v662_v18 = vadd.f32 %v5097_v3, %v608_v59 }
  0x53   : > { %1010 = vbcast.lane.b32.xlu1 %v1004_v49, 264  ;;  %1006 = vbcast.lane.b32.xlu0 %v1004_v49, 256 }
  0x57   : > { %1429 = vbcast.lane.b32.xlu1 %v1427_v52, 256  ;;  %1014 = vbcast.lane.b32.xlu0 %v1004_v49, 272  ;;  %v707_v49 = vmax.f32 %v659_v34, 0.0 }
  0x5b   : > { %1437 = vbcast.lane.b32.xlu1 %v1427_v52, 272  ;;  %1433 = vbcast.lane.b32.xlu0 %v1427_v52, 264  ;;  %v556_v52 = vunpack.c.l.bf16 %v502_v42  ;;  %v710_v42 = vmax.f32 %v662_v18, 0.0 }
  0x5d   : > { %v610_v8 = vmul.f32 %v5088_v61, %v556_v52 }
  0x5f   : > { %785 = vbcast.lane.b32.xlu1 %v779_v53, 264  ;;  %781 = vbcast.lane.b32.xlu0 %v779_v53, 256 }
  0x63   : > { %860 = vbcast.lane.b32.xlu1 %v854_v54, 264  ;;  %856 = vbcast.lane.b32.xlu0 %v854_v54, 256 }
  0x67   : > { %864 = vbcast.lane.b32.xlu1 %v854_v54, 272  ;;  %789 = vbcast.lane.b32.xlu0 %v779_v53, 272  ;;  %v528_v53 = vld [vmem:[%s5082_s26 + $0x84] sm:$0xff]  }
  0x68   : > { %v582_v0 = vunpack.c.h.bf16 %v528_v53  ;;  %v581_v10 = vunpack.c.l.bf16 %v528_v53 }
  0x6a   : > { %v636_v24 = vmul.f32 %v5088_v61, %v582_v0  ;;  %v635_v30 = vmul.f32 %v5088_v61, %v581_v10  ;;  %v558_v0 = vunpack.c.h.bf16 %v504_v46 }
  0x6b   : > { %875 = vbcast.lane.b32.xlu1 %v869_v55, 264  ;;  %871 = vbcast.lane.b32.xlu0 %v869_v55, 256 }
  0x6c   : > { %v690_v43 = vadd.f32 %v5097_v3, %v636_v24  ;;  %v689_v53 = vadd.f32 %v5097_v3, %v635_v30  ;;  %v505_v24 = vld [vmem:[%s5082_s26 + $0x2c] sm:$0x1]  ;;  %v533_v30 = vld [vmem:[%s5082_s26 + $0x9c] sm:$0xff]  }
  0x6f   : > { %886 = vbcast.lane.b32.xlu1 %v884_v56, 256  ;;  %879 = vbcast.lane.b32.xlu0 %v869_v55, 272 }
  0x73   : > { %894 = vbcast.lane.b32.xlu1 %v884_v56, 272  ;;  %890 = vbcast.lane.b32.xlu0 %v884_v56, 264  ;;  %v709_v56 = vmax.f32 %v661_v41, 0.0  ;;  %v637_v41 = vmul.f32 %v5088_v61, %v583_v19 }
  0x75   : > { %v5157_v63 = vadd.f32 %v5097_v3, %v637_v41 }
  0x77   : > { %901 = vbcast.lane.b32.xlu0 %v899_v57, 256  ;;  %905 = vbcast.lane.b32.xlu1 %v899_v57, 264 }
  0x7b   : > { %909 = vbcast.lane.b32.xlu0 %v899_v57, 272  ;;  %v708_v57 = vmax.f32 %v660_v35, 0.0 }
  0x89   : > { %v921_v31 = vpop.permute.xlu0 %920  ;;  %v917_v32 = vpop.permute.xlu1 %916 }
  0x8a   : > { %v1044_v37 = vmul.f32 %v921_v31, %v732_v20  ;;  %v1043_v39 = vmul.f32 %v917_v32, %v731_v22  ;;  %v3869_v31 = vunpack.c.l.bf16 %v3968_v16  ;;  %v532_v32 = vld [vmem:[%s5082_s26 + $0x98] sm:$0x1] }
  0x8b   : > { %v586_v44 = vunpack.c.l.bf16 %v532_v32 }
  0x8c   : > { %v5120_v54 = vpack.c.bf16 %v1044_v37, %v1043_v39  ;;  %v664_v37 = vadd.f32 %v5097_v3, %v610_v8 }
  0x8d   : > { %v925_v47 = vpop.permute.xlu1 %924  ;;  %v797_v48 = vpop.permute.xlu0 %796 }
  0x8e   : > { %v1045_v55 = vmul.f32 %v925_v47, %v733_v40  ;;  %v1019_v2 = vmul.f32 %v797_v48, %v707_v49  ;;  %v1365_v15 = vrot.slane %v5120_v54, 1  ;;  %v711_v49 = vmax.f32 %v663_v28, 0.0 }
  0x8f   : > { %v612_v28 = vmul.f32 %v5088_v61, %v558_v0 }
  0x90   : > { %v5123_v60 = vpack.c.bf16 %v1045_v55, %v1045_v55 }
  0x91   : > { %v805_v4 = vpop.permute.xlu1 %804  ;;  %v801_v6 = vpop.permute.xlu0 %800 }
  0x92   : > { %v1366_v11 = vrot.slane %v5123_v60, 1  ;;  %v1021_v12 = vmul.f32 %v805_v4, %v709_v56  ;;  %v1020_v14 = vmul.f32 %v801_v6, %v708_v57  ;;  %v712_v57 = vmax.f32 %v664_v37, 0.0 }
  0x93   : > { %v640_v4 = vmul.f32 %v5088_v61, %v586_v44  ;;  %v639_v6 = vmul.f32 %v3870_v45, %v5088_v61 }
  0x94   : > { %v5133_v20 = vpack.c.bf16 %v1021_v12, %v1021_v12  ;;  %v5135_v22 = vpack.c.bf16 %v1020_v14, %v1019_v2  ;;  %v5138_v23 = vsel %vm1337_vm9, %v1365_v15, %v1366_v11  ;;  %v738_v2 = vmax.f32 %v690_v43, 0.0  ;;  %v535_v43 = vld [vmem:[%s5082_s26 + $0xa4] sm:$0x1] }
  0x95   : > { %6179 = vst [vmem:[#allocation2_spill] sm:$0xff] %v5138_v23  ;;  %v936_v26 = vpop.permute.xlu1 %935  ;;  %v932_v27 = vpop.permute.xlu0 %931  ;;  %4425 = vmatprep.mubr.bf16.mxu1 %v5138_v23  ;;  %v737_v12 = vmax.f32 %v689_v53, 0.0  ;;  %v557_v14 = vunpack.c.l.bf16 %v504_v46  ;;  %v693_v46 = vadd.f32 %v5097_v3, %v639_v6 }
  0x96   : > { %v1047_v34 = vmul.f32 %v936_v26, %v735_v58  ;;  %v1046_v35 = vmul.f32 %v932_v27, %v734_v62  ;;  %v1117_v39 = vshll.u32 %v5133_v20, 16  ;;  %v1112_v40 = vshll.u32 %v5135_v22, 16  ;;  %v4766_v26 = vld [vmem:[%s6155_s5] sm:$0xff]  }
  0x97   : > { %v1110_v51 = vshrl.u32 %v5135_v22, 16  ;;  %v638_v58 = vmul.f32 %v3869_v31, %v5088_v61  ;;  %v4767_v31 = vld [vmem:[%s6155_s5 + $0x48] sm:$0xff]   ;;  %v611_v41 = vmul.f32 %v5088_v61, %v557_v14 }
  0x98   : > { %v1114_v52 = vrot.slane %v1112_v40, 1  ;;  %v5153_v55 = vpack.c.bf16 %v1047_v34, %v1046_v35  ;;  %v1119_v59 = vrot.slane %v1117_v39, 1  ;;  %v739_v40 = vmax.f32 %v5157_v63, 0.0 }
  0x99   : > { %v812_v47 = vpop.permute.xlu1 %811  ;;  %v940_v48 = vpop.permute.xlu0 %939  ;;  %v692_v27 = vadd.f32 %v5097_v3, %v638_v58  ;;  %v588_v58 = vunpack.c.h.bf16 %v533_v30 }
  0x9a   : > { %v1048_v56 = vmul.f32 %v940_v48, %v736_v36  ;;  %v1115_v62 = vor.u32 %v1114_v52, %v1110_v51  ;;  %v1022_v7 = vmul.f32 %v812_v47, %v710_v42  ;;  %v1368_v19 = vrot.slane %v5153_v55, 1  ;;  %v4769_v52 = vld [vmem:[%s6155_s5 + $0x50] sm:$0xff]  }
  0x9b   : > { %v694_v36 = vadd.f32 %v5097_v3, %v640_v4  ;;  %v559_v42 = vunpack.c.l.bf16 %v505_v24  ;;  %v587_v47 = vunpack.c.l.bf16 %v533_v30  ;;  %v5201_v51 = vadd.f32 %v5097_v3, %v612_v28 }
  0x9c   : > { %v5159_v1 = vpack.c.bf16 %v1048_v56, %v1048_v56  ;;  %v5164_v11 = vsel %vm1096_vm10, %v1115_v62, %v1119_v59  ;;  %v740_v53 = vmax.f32 %v692_v27, 0.0  ;;  %v3969_v59 = vld [vmem:[%s5082_s26 + $0xa8] sm:$0xff]   ;;  %v665_v4 = vadd.f32 %v5097_v3, %v611_v41 }
  0x9d   : > { %v820_v8 = vpop.permute.xlu1 %819  ;;  %v816_v10 = vpop.permute.xlu0 %815  ;;  %1797 = vmatprep.mubr.bf16.mxu0 %v5164_v11  ;;  %v742_v56 = vmax.f32 %v694_v36, 0.0  ;;  %v613_v6 = vmul.f32 %v5088_v61, %v559_v42  ;;  %v642_v27 = vmul.f32 %v5088_v61, %v588_v58  ;;  %v3873_v28 = vunpack.c.l.bf16 %v3969_v59 }
  0x9e   : > { %v1369_v15 = vrot.slane %v5159_v1, 1  ;;  %v1024_v16 = vmul.f32 %v820_v8, %v712_v57  ;;  %v1023_v18 = vmul.f32 %v816_v10, %v711_v49  ;;  %1798 = vmatmul.mubr.bf16.vlgmr.msra.gmra.mrb[0].mxu0 %v5135_v22  ;;  %v589_v57 = vunpack.c.l.bf16 %v535_v43 }
  0x9f   : > { %4394 = vmatpush3.bf16.msra.mxu0 %v4918_v5  ;;  %v4768_v5 = vld [vmem:[%s6155_s5 + $0x8] sm:$0xff]   ;;  %v741_v10 = vmax.f32 %v693_v46, 0.0 }
  0xa0   : > { %v5180_v32 = vpack.c.bf16 %v1024_v16, %v1024_v16  ;;  %v5182_v34 = vpack.c.bf16 %v1023_v18, %v1022_v7  ;;  %v5185_v35 = vsel %vm1337_vm9, %v1368_v19, %v1369_v15  ;;  %4395 = vmatprep.subr.bf16.mxu0 %v4956_v13  ;;  %v714_v16 = vmax.f32 %v5201_v51, 0.0  ;;  %v4771_v19 = vld [vmem:[%s6155_s5 + $0x58] sm:$0xff]  }
  0xa1   : > { %6181 = vst [vmem:[#allocation4_spill] sm:$0xff] %v5185_v35  ;;  %v951_v37 = vpop.permute.xlu1 %950  ;;  %v947_v39 = vpop.permute.xlu0 %946  ;;  %4426 = vmatmul.mubr.bf16.vlgmr.msra.gmra.mrb[0].mxu1 %v5185_v35  ;;  %v3874_v18 = vunpack.c.h.bf16 %v3969_v59  ;;  %v696_v59 = vadd.f32 %v5097_v3, %v642_v27 }
  0xa2   : > { %6180 = vst [vmem:[#allocation3_spill] sm:$0xff] %v5180_v32  ;;  %v1050_v44 = vmul.f32 %v951_v37, %v738_v2  ;;  %v1049_v45 = vmul.f32 %v947_v39, %v737_v12  ;;  %4122 = vmatpush3.bf16.msra.mxu1 %v4766_v26  ;;  %v1129_v48 = vshll.u32 %v5180_v32, 16  ;;  %v1124_v49 = vshll.u32 %v5182_v34, 16 }
  0xa3   : > { %4123 = vmatprep.subr.bf16.mxu1 %v4767_v31  ;;  %4396 = vmatpush3.bf16.msra.mxu0 %v4956_v13  ;;  %v1122_v0 = vshrl.u32 %v5182_v34, 16  ;;  %v641_v12 = vmul.f32 %v5088_v61, %v587_v47  ;;  %v4770_v13 = vld [vmem:[%s6155_s5 + $0x10] sm:$0xff]   ;;  %v643_v26 = vmul.f32 %v5088_v61, %v589_v57  ;;  %v713_v39 = vmax.f32 %v665_v4, 0.0 }
  0xa4   : > { %v1126_v2 = vrot.slane %v1124_v49, 1  ;;  %4397 = vmatprep.subr.bf16.mxu0 %v4970_v17  ;;  %v5212_v7 = vpack.c.bf16 %v1050_v44, %v1049_v45  ;;  %v1131_v14 = vrot.slane %v1129_v48, 1  ;;  %v538_v44 = vld [vmem:[%s5082_s26 + $0xb0] sm:$0x1]  ;;  %v4772_v45 = vld [vmem:[%s6155_s5 + $0x18] sm:$0xff]   ;;  %v645_v47 = vmul.f32 %v3874_v18, %v5088_v61  ;;  %v4775_v18 = vld [vmem:[%s6155_s5 + $0x68] sm:$0xff]  }
  0xa5   : > { %v962_v62 = vpop.permute.xlu1 %961  ;;  %v955_v63 = vpop.permute.xlu0 %954  ;;  %v5241_v46 = vadd.f32 %v5097_v3, %v641_v12  ;;  %v697_v58 = vadd.f32 %v5097_v3, %v643_v26 }
  0xa6   : > { %v1051_v8 = vmul.f32 %v955_v63, %v739_v40  ;;  %4124 = vmatpush3.bf16.msra.mxu1 %v4768_v5  ;;  %v1127_v15 = vor.u32 %v1126_v2, %v1122_v0  ;;  %v1052_v30 = vmul.f32 %v962_v62, %v740_v53  ;;  %v667_v40 = vadd.f32 %v5097_v3, %v613_v6  ;;  %v4773_v5 = vld [vmem:[%s6155_s5 + $0x60] sm:$0xff]   ;;  %v3964_v53 = vld [vmem:[%s5082_s26 + $0x30] sm:$0xff]   ;;  %v508_v6 = vld [vmem:[%s5082_s26 + $0x38] sm:$0x1] }
  0xa7   : > { %4125 = vmatprep.subr.bf16.mxu1 %v4769_v52  ;;  %4398 = vmatpush3.bf16.msra.mxu0 %v4970_v17  ;;  %v1371_v17 = vrot.slane %v5212_v7, 1  ;;  %v644_v52 = vmul.f32 %v3873_v28, %v5088_v61  ;;  %v592_v62 = vunpack.c.l.bf16 %v538_v44 }
  0xa8   : > { %v5222_v24 = vpack.c.bf16 %v1051_v8, %v1051_v8  ;;  %v5228_v37 = vsel %vm1096_vm10, %v1127_v15, %v1131_v14  ;;  %4399 = vmatprep.subr.bf16.mxu0 %v4984_v21  ;;  %v715_v4 = vmax.f32 %v667_v40, 0.0  ;;  %v3853_v8 = vunpack.c.l.bf16 %v3964_v53 }
  0xa9   : > { %v970_v31 = vpop.permute.xlu1 %969  ;;  %v966_v36 = vpop.permute.xlu0 %965  ;;  %1805 = vmatprep.mubr.bf16.mxu0 %v5228_v37  ;;  %v5271_v14 = vadd.f32 %v5097_v3, %v645_v47  ;;  %v5274_v15 = vadd.f32 %v5097_v3, %v644_v52  ;;  %v646_v28 = vmul.f32 %v5088_v61, %v592_v62  ;;  %v744_v40 = vmax.f32 %v696_v59, 0.0  ;;  %v4777_v47 = vld [vmem:[%s6155_s5 + $0x70] sm:$0xff]   ;;  %v541_v59 = vld [vmem:[%s5082_s26 + $0xbc] sm:$0x1] }
  0xaa   : > { %v1372_v41 = vrot.slane %v5222_v24, 1  ;;  %v1054_v42 = vmul.f32 %v970_v31, %v742_v56  ;;  %v1053_v43 = vmul.f32 %v966_v36, %v741_v10  ;;  %4126 = vmatpush3.bf16.msra.mxu1 %v4770_v13  ;;  %1806 = vmatmul.mubr.bf16.gmra.mrb[4].mxu0 %v5182_v34  ;;  %v4774_v10 = vld [vmem:[%s6155_s5 + $0x20] sm:$0xff]   ;;  %v743_v13 = vmax.f32 %v5241_v46, 0.0 }
  0xab   : > { %4127 = vmatprep.subr.bf16.mxu1 %v4771_v19  ;;  %4400 = vmatpush3.bf16.msra.mxu0 %v4984_v21  ;;  %v3854_v31 = vunpack.c.h.bf16 %v3964_v53  ;;  %v746_v46 = vmax.f32 %v5274_v15, 0.0  ;;  %v3876_v15 = vld [vmem:[%s456_s25] sm:$0xff]  }
  0xac   : > { %v5247_v48 = vpack.c.bf16 %v1054_v42, %v1054_v42  ;;  %v5249_v49 = vpack.c.bf16 %v1053_v43, %v1052_v30  ;;  %v5252_v51 = vsel %vm1337_vm9, %v1371_v17, %v1372_v41  ;;  %4401 = vmatprep.subr.bf16.mxu0 %v4998_v25  ;;  %v562_v30 = vunpack.c.l.bf16 %v508_v6  ;;  %v4776_v17 = vld [vmem:[%s6155_s5 + $0x28] sm:$0xff]  }
  0xad   : > { %6182 = vst [vmem:[#allocation5_spill] sm:$0xff] %v5252_v51  ;;  %v831_v56 = vpop.permute.xlu1 %830  ;;  %v827_v57 = vpop.permute.xlu0 %826  ;;  %4429 = vmatprep.mubr.bf16.mxu1 %v5252_v51 }
  0xae   : > { %v1375_v63 = vrot.slane %v5247_v48, 1  ;;  %v1026_v0 = vmul.f32 %v831_v56, %v714_v16  ;;  %v1025_v2 = vmul.f32 %v827_v57, %v713_v39  ;;  %4128 = vmatpush3.bf16.msra.mxu1 %v4772_v45  ;;  %v1374_v21 = vrot.slane %v5249_v49, 1  ;;  %v540_v16 = vld [vmem:[%s5082_s26 + $0xb4] sm:$0xff]  }
  0xaf   : > { %4129 = vmatprep.subr.bf16.mxu1 %v4773_v5  ;;  %4402 = vmatpush3.bf16.msra.mxu0 %v4998_v25  ;;  %v745_v39 = vmax.f32 %v697_v58, 0.0  ;;  %v614_v25 = vmul.f32 %v3853_v8, %v5088_v61  ;;  %v594_v42 = vunpack.c.h.bf16 %v540_v16  ;;  %v593_v43 = vunpack.c.l.bf16 %v540_v16  ;;  %v4778_v8 = vld [vmem:[%s6155_s5 + $0x30] sm:$0xff]  }
  0xb0   : > { %v5267_v12 = vpack.c.bf16 %v1026_v0, %v1025_v2  ;;  %v5282_v27 = vsel %vm1337_vm9, %v1374_v21, %v1375_v63  ;;  %4403 = vmatprep.subr.bf16.mxu0 %v5012_v29  ;;  %v747_v45 = vmax.f32 %v5271_v14, 0.0  ;;  %v700_v56 = vadd.f32 %v5097_v3, %v646_v28 }
  0xb1   : > { %v977_v19 = vpop.permute.xlu1 %976  ;;  %v835_v26 = vpop.permute.xlu0 %834  ;;  %6183 = vst [vmem:[#allocation6_spill] sm:$0xff] %v5282_v27  ;;  %4430 = vmatmul.mubr.bf16.gmra.mrb[4].mxu1 %v5282_v27  ;;  %v616_v57 = vmul.f32 %v5088_v61, %v562_v30  ;;  %v615_v58 = vmul.f32 %v3854_v31, %v5088_v61  ;;  %v648_v6 = vmul.f32 %v5088_v61, %v594_v42  ;;  %v595_v16 = vunpack.c.l.bf16 %v541_v59  ;;  %v3844_v42 = vld [vmem:[%s5082_s26] sm:$0xff]  }
  0xb2   : > { %v1027_v36 = vmul.f32 %v835_v26, %v715_v4  ;;  %v1136_v41 = vshll.u32 %v5267_v12, 16  ;;  %4130 = vmatpush3.bf16.msra.mxu1 %v4774_v10  ;;  %v1055_v62 = vmul.f32 %v977_v19, %v743_v13  ;;  %v1134_v2 = vshrl.u32 %v5267_v12, 16 }
  0xb3   : > { %4131 = vmatprep.subr.bf16.mxu1 %v4775_v18  ;;  %4404 = vmatpush3.bf16.msra.mxu0 %v5012_v29  ;;  %v5312_v4 = vadd.f32 %v5097_v3, %v614_v25  ;;  %v647_v21 = vmul.f32 %v5088_v61, %v593_v43  ;;  %v4779_v18 = vld [vmem:[%s6155_s5 + $0x78] sm:$0xff]   ;;  %v670_v30 = vadd.f32 %v5097_v3, %v616_v57  ;;  %v748_v25 = vmax.f32 %v700_v56, 0.0  ;;  %v5347_v56 = vld [vmem:[%s6155_s5 + $0x80] sm:$0xff]  }
  0xb4   : > { %v5293_v44 = vpack.c.bf16 %v1027_v36, %v1027_v36  ;;  %v1138_v53 = vrot.slane %v1136_v41, 1  ;;  %4405 = vmatprep.subr.bf16.mxu0 %v5026_v33  ;;  %v669_v31 = vadd.f32 %v5097_v3, %v615_v58  ;;  %v544_v36 = vld [vmem:[%s456_s25 + $0x8] sm:$0x1] }
  0xb5   : > { %v985_v5 = vpop.permute.xlu1 %984  ;;  %v981_v52 = vpop.permute.xlu0 %980 }
  0xb6   : > { %6184 = vst [vmem:[#allocation7_spill] sm:$0xff] %v5293_v44  ;;  %v1141_v63 = vshll.u32 %v5293_v44, 16  ;;  %v1057_v29 = vmul.f32 %v985_v5, %v745_v39  ;;  %v1056_v0 = vmul.f32 %v981_v52, %v744_v40  ;;  %4132 = vmatpush3.bf16.msra.mxu1 %v4776_v17  ;;  %v1139_v28 = vor.u32 %v1138_v53, %v1134_v2  ;;  %v4780_v5 = vld [vmem:[%s6155_s5 + $0x38] sm:$0xff]  }
  0xb7   : > { %4133 = vmatprep.subr.bf16.mxu1 %v4777_v47  ;;  %4406 = vmatpush3.bf16.msra.mxu0 %v5026_v33  ;;  %v702_v17 = vadd.f32 %v5097_v3, %v648_v6  ;;  %v3877_v47 = vunpack.c.l.bf16 %v3876_v15  ;;  %v649_v52 = vmul.f32 %v5088_v61, %v595_v16  ;;  %v1404_v53 = vunpack.c.l.bf16 %v544_v36 }
  0xb8   : > { %v1143_v10 = vrot.slane %v1141_v63, 1  ;;  %v5319_v13 = vpack.c.bf16 %v1057_v29, %v1057_v29  ;;  %v5321_v14 = vpack.c.bf16 %v1056_v0, %v1055_v62  ;;  %4407 = vmatprep.subr.bf16.mxu0 %v5040_v38  ;;  %v3878_v62 = vunpack.c.h.bf16 %v3876_v15 }
  0xb9   : > { %v996_v19 = vpop.permute.xlu1 %995  ;;  %v992_v26 = vpop.permute.xlu0 %991  ;;  %v3846_v63 = vunpack.c.h.bf16 %v3844_v42  ;;  %v3845_v29 = vunpack.c.l.bf16 %v3844_v42  ;;  %v717_v6 = vmax.f32 %v669_v31, 0.0 }
  0xba   : > { %v1378_v39 = vrot.slane %v5319_v13, 1  ;;  %v1059_v40 = vmul.f32 %v996_v19, %v747_v45  ;;  %v1058_v41 = vmul.f32 %v992_v26, %v746_v46  ;;  %v5333_v43 = vsel %vm1096_vm10, %v1139_v28, %v1143_v10  ;;  %4134 = vmatpush3.bf16.msra.mxu1 %v4778_v8  ;;  %v510_v26 = vld [vmem:[%s5082_s26 + $0x3c] sm:$0xff]  }
  0xbb   : > { %v1377_v33 = vrot.slane %v5321_v14, 1  ;;  %1813 = vmatprep.mubr.bf16.mxu0 %v5333_v43  ;;  %v716_v45 = vmax.f32 %v5312_v4, 0.0  ;;  %v701_v46 = vadd.f32 %v5097_v3, %v647_v21  ;;  %4135 = vmatprep.subr.bf16.mxu1 %v4779_v18  ;;  %v718_v4 = vmax.f32 %v670_v30, 0.0  ;;  %v4788_v21 = vld [vmem:[%s6155_s5 + $0x1c0] sm:$0xff]  }
  0xbc   : > { %1814 = vmatmul.mubr.bf16.gmra.mrb[8].mxu0 %v5267_v12  ;;  %v5353_v0 = vpack.c.bf16 %v1059_v40, %v1058_v41  ;;  %v750_v8 = vmax.f32 %v702_v17, 0.0  ;;  %v1405_v10 = vmul.f32 %v3877_v47, %v5088_v61  ;;  %v703_v18 = vadd.f32 %v5097_v3, %v649_v52 }
  0xbd   : > { %v842_v57 = vpop.permute.xlu1 %841  ;;  %v1000_v58 = vpop.permute.xlu0 %999  ;;  %v5351_v59 = vsel %vm1337_vm9, %v1377_v33, %v1378_v39  ;;  %4408 = vmatpush3.bf16.msra.mxu0 %v5040_v38  ;;  %v749_v16 = vmax.f32 %v701_v46, 0.0  ;;  %v1407_v19 = vmul.f32 %v5088_v61, %v1404_v53  ;;  %v1406_v31 = vmul.f32 %v3878_v62, %v5088_v61 }
  0xbe   : > { %6185 = vst [vmem:[#allocation8_spill] sm:$0xff] %v5351_v59  ;;  %v1060_v2 = vmul.f32 %v1000_v58, %v748_v25  ;;  %4433 = vmatprep.mubr.bf16.mxu1 %v5351_v59  ;;  %4136 = vmatpush3.bf16.msra.mxu1 %v4780_v5  ;;  %v1028_v38 = vmul.f32 %v842_v57, %v716_v45  ;;  %v1380_v42 = vrot.slane %v5353_v0, 1  ;;  %v564_v33 = vunpack.c.h.bf16 %v510_v26 }
  0xbf   : > { %4441 = vmatprep.subr.bf16.mxu1 %v5347_v56  ;;  %4257 = vmatprep.subr.bf16.mxu0 %v4788_v21  ;;  %v603_v36 = vmul.f32 %v3846_v63, %v5088_v61  ;;  %v602_v39 = vmul.f32 %v3845_v29, %v5088_v61  ;;  %v563_v17 = vunpack.c.l.bf16 %v510_v26  ;;  %v1408_v46 = vadd.f32 %v5097_v3, %v1405_v10  ;;  %v511_v63 = vld [vmem:[%s5082_s26 + $0x44] sm:$0x1]  ;;  %v496_v29 = vld [vmem:[%s5082_s26 + $0x8] sm:$0x1] }
  0xc0   : > { %v5361_v15 = vpack.c.bf16 %v1060_v2, %v1060_v2  ;;  %v751_v57 = vmax.f32 %v703_v18, 0.0  ;;  %v1410_v58 = vadd.f32 %v5097_v3, %v1407_v19  ;;  %v1409_v62 = vadd.f32 %v5097_v3, %v1406_v31 }
  0xc1   : > { %v850_v28 = vpop.permute.xlu1 %849  ;;  %v846_v30 = vpop.permute.xlu0 %845  ;;  %v656_v21 = vadd.f32 %v5097_v3, %v602_v39  ;;  %v617_v18 = vmul.f32 %v5088_v61, %v563_v17  ;;  %v1411_v19 = vmax.f32 %v1408_v46, 0.0 }
  0xc2   : > { %v1381_v40 = vrot.slane %v5361_v15, 1  ;;  %v1030_v41 = vmul.f32 %v850_v28, %v718_v4  ;;  %v1029_v25 = vmul.f32 %v846_v30, %v717_v6  ;;  %v657_v6 = vadd.f32 %v5097_v3, %v603_v36 }
  0xc3   : > { %v565_v28 = vunpack.c.l.bf16 %v511_v63  ;;  %v550_v30 = vunpack.c.l.bf16 %v496_v29  ;;  %v671_v63 = vadd.f32 %v5097_v3, %v617_v18 }
  0xc4   : > { %v5372_v47 = vpack.c.bf16 %v1030_v41, %v1030_v41  ;;  %v5374_v5 = vpack.c.bf16 %v1029_v25, %v1028_v38  ;;  %v5377_v45 = vsel %vm1337_vm9, %v1380_v42, %v1381_v40  ;;  %v618_v38 = vmul.f32 %v5088_v61, %v564_v33  ;;  %v3965_v41 = vld [vmem:[%s5082_s26 + $0x48] sm:$0xff]  }
  0xc5   : > { %6187 = vst [vmem:[#allocation10_spill] sm:$0xff] %v5377_v45  ;;  %v1011_v52 = vpop.permute.xlu1 %1010  ;;  %v1007_v53 = vpop.permute.xlu0 %1006  ;;  %4434 = vmatmul.mubr.bf16.gmra.mrb[8].mxu1 %v5377_v45  ;;  %v1412_v40 = vmax.f32 %v1409_v62, 0.0  ;;  %v704_v33 = vmax.f32 %v656_v21, 0.0  ;;  %v604_v62 = vmul.f32 %v5088_v61, %v550_v30  ;;  %v515_v45 = vld [vmem:[%s5082_s26 + $0x54] sm:$0xff]   ;;  %v3857_v21 = vunpack.c.l.bf16 %v3965_v41 }
  0xc6   : > { %6186 = vst [vmem:[#allocation9_spill] sm:$0xff] %v5372_v47  ;;  %v1062_v2 = vmul.f32 %v1011_v52, %v750_v8  ;;  %v1061_v4 = vmul.f32 %v1007_v53, %v749_v16  ;;  %v1153_v10 = vshll.u32 %v5372_v47, 16  ;;  %v1148_v26 = vshll.u32 %v5374_v5, 16  ;;  %v514_v53 = vld [vmem:[%s5082_s26 + $0x50] sm:$0x1] }
  0xc7   : > { %v1413_v16 = vmax.f32 %v1410_v58, 0.0  ;;  %v1146_v36 = vshrl.u32 %v5374_v5, 16  ;;  %v705_v52 = vmax.f32 %v657_v6, 0.0  ;;  %v672_v46 = vadd.f32 %v5097_v3, %v618_v38 }
  0xc8   : > { %v1150_v39 = vrot.slane %v1148_v26, 1  ;;  %v5393_v25 = vpack.c.bf16 %v1062_v2, %v1061_v4  ;;  %v1155_v9 = vrot.slane %v1153_v10, 1  ;;  %v619_v58 = vmul.f32 %v5088_v61, %v565_v28 }
  0xc9   : > { %v1430_v31 = vpop.permute.xlu1 %1429  ;;  %v1015_v8 = vpop.permute.xlu0 %1014  ;;  %v3858_v26 = vunpack.c.h.bf16 %v3965_v41  ;;  %v568_v10 = vunpack.c.l.bf16 %v514_v53  ;;  %v720_v30 = vmax.f32 %v672_v46, 0.0  ;;  %v658_v53 = vadd.f32 %v5097_v3, %v604_v62 }
  0xca   : > { %v1063_v42 = vmul.f32 %v1015_v8, %v751_v57  ;;  %v1151_v17 = vor.u32 %v1150_v39, %v1146_v36  ;;  %v1439_v2 = vmul.f32 %v1430_v31, %v1411_v19  ;;  %v1383_v28 = vrot.slane %v5393_v25, 1  ;;  %v517_v31 = vld [vmem:[%s5082_s26 + $0x5c] sm:$0x1] }
  0xcb   : > { %v719_v36 = vmax.f32 %v671_v63, 0.0  ;;  %v569_v19 = vunpack.c.l.bf16 %v515_v45  ;;  %v620_v46 = vmul.f32 %v3857_v21, %v5088_v61  ;;  %v622_v63 = vmul.f32 %v5088_v61, %v568_v10 }
  0xcc   : > { %v5398_v29 = vpack.c.bf16 %v1063_v42, %v1063_v42  ;;  %v5404_v6 = vsel %vm1096_vm10, %v1151_v17, %v1155_v9  ;;  %v621_v17 = vmul.f32 %v3858_v26, %v5088_v61  ;;  %v706_v10 = vmax.f32 %v658_v53, 0.0 }
  0xcd   : > { %v1438_v57 = vpop.permute.xlu1 %1437  ;;  %v1434_v4 = vpop.permute.xlu0 %1433  ;;  %1821 = vmatprep.mubr.bf16.mxu0 %v5404_v6 }
  0xce   : > { %v1384_v38 = vrot.slane %v5398_v29, 1  ;;  %v1441_v18 = vmul.f32 %v1438_v57, %v1413_v16  ;;  %v1440_v8 = vmul.f32 %v1434_v4, %v1412_v40  ;;  %1822 = vmatmul.mubr.bf16.gmra.mrb[12].mxu0 %v5374_v5  ;;  %v673_v16 = vadd.f32 %v5097_v3, %v619_v58 }
  0xcf   : > { %v675_v59 = vadd.f32 %v5097_v3, %v621_v17  ;;  %v6190_v17 = vmov 0.0  }
  0xd0   : > { %v5411_v39 = vpack.c.bf16 %v1441_v18, %v1441_v18  ;;  %v5413_v9 = vpack.c.bf16 %v1440_v8, %v1439_v2  ;;  %v5416_v41 = vsel %vm1337_vm9, %v1383_v28, %v1384_v38  ;;  %v571_v38 = vunpack.c.l.bf16 %v517_v31 }
  0xd1   : > { %6188 = vst [vmem:[#allocation11_spill] sm:$0xff] %v5416_v41  ;;  %v786_v40 = vpop.permute.xlu1 %785  ;;  %v782_v42 = vpop.permute.xlu0 %781  ;;  %4437 = vmatprep.mubr.bf16.mxu1 %v5416_v41  ;;  %v623_v18 = vmul.f32 %v5088_v61, %v569_v19  ;;  %v570_v8 = vunpack.c.h.bf16 %v515_v45  ;;  %v721_v62 = vmax.f32 %v673_v16, 0.0  ;;  %v676_v45 = vadd.f32 %v5097_v3, %v622_v63 }
  0xd2   : > { %v1460_v2 = vrot.slane %v5411_v39, 1  ;;  %v1017_v57 = vmul.f32 %v786_v40, %v705_v52  ;;  %v1016_v4 = vmul.f32 %v782_v42, %v704_v33  ;;  %v1459_v58 = vrot.slane %v5413_v9, 1  ;;  %v3966_v33 = vld [vmem:[%s5082_s26 + $0x60] sm:$0xff]  }
  0xd3   : > { %v674_v52 = vadd.f32 %v5097_v3, %v620_v46  ;;  %v625_v19 = vmul.f32 %v5088_v61, %v571_v38  ;;  %v677_v16 = vadd.f32 %v5097_v3, %v623_v18  ;;  %v624_v53 = vmul.f32 %v5088_v61, %v570_v8 }
  0xd4   : > { %v5427_v28 = vpack.c.bf16 %v1017_v57, %v1016_v4  ;;  %v5430_v21 = vsel %vm1337_vm9, %v1459_v58, %v1460_v2  ;;  %v1488_v2 = vrot.slane %v6190_v17, %v5064_v50  ;;  %v723_v57 = vmax.f32 %v675_v59, 0.0 }
  0xd5   : > { %v861_v41 = vpop.permute.xlu1 %860  ;;  %v857_v26 = vpop.permute.xlu0 %856  ;;  %6189 = vst [vmem:[#allocation12_spill] sm:$0xff] %v5430_v21  ;;  %4438 = vmatmul.mubr.bf16.gmra.mrb[12].mxu1 %v5430_v21  ;;  %v722_v4 = vmax.f32 %v674_v52, 0.0  ;;  %v3862_v63 = vunpack.c.h.bf16 %v3966_v33  ;;  %v724_v18 = vmax.f32 %v676_v45, 0.0  ;;  %v520_v21 = vld [vmem:[%s5082_s26 + $0x68] sm:$0x1]  ;;  %v725_v8 = vmax.f32 %v677_v16, 0.0 }
  0xd6   : > { %v1032_v31 = vmul.f32 %v861_v41, %v720_v30  ;;  %v1031_v40 = vmul.f32 %v857_v26, %v719_v36  ;;  %v1100_v42 = vshll.u32 %v5427_v28, 16  ;;  %v3861_v30 = vunpack.c.l.bf16 %v3966_v33  ;;  %1490 = vbcast.lane.b32.xlu1 %v1488_v2, 256  ;;  %1494 = vbcast.lane.b32.xlu0 %v1488_v2, 264 }
  0xd7   : > { %v679_v50 = vadd.f32 %v5097_v3, %v625_v19  ;;  %v574_v45 = vunpack.c.l.bf16 %v520_v21  ;;  %v1338_v16 = vrot.slane %v5427_v28, 1 }
  0xd8   : > { %v5443_v46 = vpack.c.bf16 %v1032_v31, %v1031_v40  ;;  %v1102_v27 = vrot.slane %v1100_v42, 1  ;;  %v678_v31 = vadd.f32 %v5097_v3, %v624_v53  ;;  %v626_v52 = vmul.f32 %v3861_v30, %v5088_v61 }
  0xd9   : > { %v865_v36 = vpop.permute.xlu1 %864  ;;  %v790_v41 = vpop.permute.xlu0 %789  ;;  %v727_v30 = vmax.f32 %v679_v50, 0.0 }
  0xda   : > { %v1033_v38 = vmul.f32 %v865_v36, %v721_v62  ;;  %v1018_v58 = vmul.f32 %v790_v41, %v706_v10  ;;  %v1160_v26 = vshll.u32 %v5443_v46, 16  ;;  %v1098_v62 = vshrl.u32 %v5427_v28, 16  ;;  %1498 = vbcast.lane.b32.xlu1 %v1488_v2, 272 }
  0xdb   : > { %v627_v10 = vmul.f32 %v3862_v63, %v5088_v61  ;;  %v1158_v36 = vshrl.u32 %v5443_v46, 16  ;;  %v726_v44 = vmax.f32 %v678_v31, 0.0 }
  0xdc   : > { %v5449_v40 = vpack.c.bf16 %v1033_v38, %v1033_v38  ;;  %v1065_v17 = vpack.c.bf16 %v1018_v58, %v1018_v58  ;;  %v1162_v59 = vrot.slane %v1160_v26, 1  ;;  %v1103_v58 = vor.u32 %v1102_v27, %v1098_v62 }
  0xdd   : > { %v876_v33 = vpop.permute.xlu1 %875  ;;  %v872_v51 = vpop.permute.xlu0 %871 }
  0xde   : > { %6191 = vst [vmem:[#allocation13_spill] sm:$0xff] %v5449_v40  ;;  %v1165_v19 = vshll.u32 %v5449_v40, 16  ;;  %v1105_v42 = vshll.u32 %v1065_v17, 16  ;;  %v1339_v53 = vrot.slane %v1065_v17, 1  ;;  %v1035_v41 = vmul.f32 %v876_v33, %v723_v57 }
  0xdf   : > { %v1034_v38 = vmul.f32 %v872_v51, %v722_v4  ;;  %v1163_v23 = vor.u32 %v1162_v59, %v1158_v36  ;;  %v680_v40 = vadd.f32 %v5097_v3, %v626_v52  ;;  %v628_v17 = vmul.f32 %v5088_v61, %v574_v45  ;;  %v4782_v4 = vld [vmem:[%s6155_s5 + $0x88] sm:$0xff]  }
  0xe0   : > { %v1167_v26 = vrot.slane %v1165_v19, 1  ;;  %v1107_v35 = vrot.slane %v1105_v42, 1  ;;  %v5458_v47 = vsel %vm1337_vm9, %v1338_v16, %v1339_v53  ;;  %v681_v57 = vadd.f32 %v5097_v3, %v627_v10 }
  0xe1   : > { %v5460_v21 = vpack.c.bf16 %v1035_v41, %v1034_v38  ;;  %v887_v2 = vpop.permute.xlu1 %886  ;;  %v880_v63 = vpop.permute.xlu0 %879  ;;  %v682_v52 = vadd.f32 %v5097_v3, %v628_v17  ;;  %v4784_v38 = vld [vmem:[%s6155_s5 + $0x98] sm:$0xff]  }
  0xe2   : > { %v1036_v32 = vmul.f32 %v880_v63, %v724_v18  ;;  %v5465_v51 = vsel %vm1096_vm10, %v1163_v23, %v1167_v26  ;;  %v1108_v27 = vsel %vm1096_vm10, %v1103_v58, %v1107_v35  ;;  %v1037_v31 = vmul.f32 %v887_v2, %v725_v8 }
  0xe3   : > { %1829 = vmatprep.mubr.bf16.mxu0 %v5465_v51  ;;  %2263 = vmatprep.mubr.bf16.mxu1 %v1108_v27  ;;  %v1172_v50 = vshll.u32 %v5460_v21, 16  ;;  %v728_v35 = vmax.f32 %v680_v40, 0.0  ;;  %v730_v53 = vmax.f32 %v682_v52, 0.0  ;;  %v1208_v52 = vshll.u32 %v5120_v54, 16 }
  0xe4   : > { %v5474_v59 = vpack.c.bf16 %v1036_v32, %v1036_v32  ;;  %1830 = vmatmul.mubr.bf16.gmra.mrb[16].mxu0 %v5443_v46  ;;  %2264 = vmatmul.mubr.bf16.vlgmr.msra.gmra.mrb[16].mxu1 %v5427_v28  ;;  %v729_v32 = vmax.f32 %v681_v57, 0.0  ;;  %v4783_v28 = vld [vmem:[%s6155_s5 + $0x90] sm:$0xff]  }
  0xe5   : > { %4442 = vmatpush3.bf16.msra.mxu1 %v5347_v56  ;;  %v895_v61 = vpop.permute.xlu1 %894  ;;  %v891_v23 = vpop.permute.xlu0 %890  ;;  %2271 = vmatprep.mubr.bf16.mxu1 %v5164_v11  ;;  %v1174_v18 = vrot.slane %v1172_v50, 1  ;;  %v1170_v56 = vshrl.u32 %v5460_v21, 16  ;;  %v4785_v50 = vld [vmem:[%s6155_s5 + $0xa0] sm:$0xff]  }
  0xe6   : > { %v1177_v33 = vshll.u32 %v5474_v59, 16  ;;  %v1039_v62 = vmul.f32 %v895_v61, %v727_v30  ;;  %v1038_v8 = vmul.f32 %v891_v23, %v726_v44  ;;  %4443 = vmatprep.subr.bf16.mxu1 %v4782_v4 }
  0xe7   : > { %v1175_v3 = vor.u32 %v1174_v18, %v1170_v56  ;;  %v4787_v56 = vld [vmem:[%s6155_s5 + $0xb0] sm:$0xff]  }
  0xe8   : > { %v1179_v10 = vrot.slane %v1177_v33, 1  ;;  %v5486_v45 = vpack.c.bf16 %v1039_v62, %v1039_v62  ;;  %v5488_v11 = vpack.c.bf16 %v1038_v8, %v1037_v31  ;;  %v4786_v33 = vld [vmem:[%s6155_s5 + $0xa8] sm:$0xff]   ;;  %v1213_v8 = vshll.u32 %v5123_v60, 16 }
  0xe9   : > { %v902_v40 = vpop.permute.xlu0 %901  ;;  %v906_v16 = vpop.permute.xlu1 %905  ;;  %4444 = vmatpush3.bf16.msra.mxu1 %v4782_v4 }
  0xea   : > { %v1189_v19 = vshll.u32 %v5486_v45, 16  ;;  %v1040_v44 = vmul.f32 %v902_v40, %v728_v35  ;;  %v1041_v42 = vmul.f32 %v906_v16, %v729_v32  ;;  %4445 = vmatprep.subr.bf16.mxu1 %v4783_v28  ;;  %v5492_v36 = vsel %vm1096_vm10, %v1175_v3, %v1179_v10  ;;  %v4796_v3 = vld [vmem:[%s6155_s5 + $0xb8] sm:$0xff]  }
  0xeb   : > { %v1184_v41 = vshll.u32 %v5488_v11, 16  ;;  %1837 = vmatprep.mubr.bf16.mxu0 %v5492_v36  ;;  %v1182_v2 = vshrl.u32 %v5488_v11, 16  ;;  %v1215_v10 = vrot.slane %v1213_v8, 1  ;;  %v1206_v40 = vshrl.u32 %v5120_v54, 16 }
  0xec   : > { %v5498_v58 = vpack.c.bf16 %v1041_v42, %v1040_v44  ;;  %2272 = vmatmul.mubr.bf16.gmra.mrb[20].mxu1 %v5135_v22  ;;  %v1191_v30 = vrot.slane %v1189_v19, 1  ;;  %1838 = vmatmul.mubr.bf16.gmra.mrb[20].mxu0 %v5460_v21  ;;  %v1220_v16 = vshll.u32 %v5153_v55, 16  ;;  %v1225_v19 = vshll.u32 %v5159_v1, 16 }
  0xed   : > { %v910_v26 = vpop.permute.xlu0 %909  ;;  %2279 = vmatprep.mubr.bf16.mxu1 %v5228_v37  ;;  %v1186_v63 = vrot.slane %v1184_v41, 1  ;;  %4446 = vmatpush3.bf16.msra.mxu1 %v4783_v28  ;;  %v1210_v28 = vrot.slane %v1208_v52, 1  ;;  %v1218_v1 = vshrl.u32 %v5153_v55, 16  ;;  %v1256_v52 = vshll.u32 %v5321_v14, 16 }
  0xee   : > { %v1042_v17 = vmul.f32 %v910_v26, %v730_v53  ;;  %v1194_v27 = vshrl.u32 %v5498_v58, 16  ;;  %v1196_v57 = vshll.u32 %v5498_v58, 16  ;;  %4447 = vmatprep.subr.bf16.mxu1 %v4784_v38  ;;  %v1222_v42 = vrot.slane %v1220_v16, 1  ;;  %v5548_v53 = vld [vmem:[%s6155_s5 + $0x200] sm:$0xff]  }
  0xef   : > { %v1187_v4 = vor.u32 %v1186_v63, %v1182_v2  ;;  %v1211_v60 = vor.u32 %v1210_v28, %v1206_v40  ;;  %v1227_v41 = vrot.slane %v1225_v19, 1  ;;  %v1237_v26 = vshll.u32 %v5222_v24, 16 }
  0xf0   : > { %v5510_v31 = vpack.c.bf16 %v1042_v17, %v1042_v17  ;;  %v1198_v61 = vrot.slane %v1196_v57, 1  ;;  %v1244_v57 = vshll.u32 %v5249_v49, 16  ;;  %v1258_v8 = vrot.slane %v1256_v52, 1 }
  0xf1   : > { %v5513_v23 = vsel %vm1096_vm10, %v1187_v4, %v1191_v30  ;;  %4448 = vmatpush3.bf16.msra.mxu1 %v4784_v38  ;;  %v5541_v44 = vsel %vm1096_vm10, %v1211_v60, %v1215_v10  ;;  %v1223_v38 = vor.u32 %v1222_v42, %v1218_v1  ;;  %v1232_v30 = vshll.u32 %v5212_v7, 16 }
  0xf2   : > { %v1201_v35 = vshll.u32 %v5510_v31, 16  ;;  %1845 = vmatprep.mubr.bf16.mxu0 %v5513_v23  ;;  %v1199_v18 = vor.u32 %v1198_v61, %v1194_v27  ;;  %4449 = vmatprep.subr.bf16.mxu1 %v4785_v50  ;;  %v1239_v17 = vrot.slane %v1237_v26, 1  ;;  %v1230_v27 = vshrl.u32 %v5212_v7, 16 }
  0xf3   : > { %v5557_v2 = vsel %vm1096_vm10, %v1223_v38, %v1227_v41  ;;  %v1234_v63 = vrot.slane %v1232_v30, 1  ;;  %v1249_v61 = vshll.u32 %v5247_v48, 16  ;;  %v1261_v48 = vshll.u32 %v5319_v13, 16 }
  0xf4   : > { %v1203_v62 = vrot.slane %v1201_v35, 1  ;;  %2280 = vmatmul.mubr.bf16.gmra.mrb[24].mxu1 %v5182_v34  ;;  %1846 = vmatmul.mubr.bf16.gmra.mrb[24].mxu0 %v5488_v11  ;;  %v1242_v35 = vshrl.u32 %v5249_v49, 16  ;;  %v1254_v28 = vshrl.u32 %v5321_v14, 16  ;;  %v1268_v40 = vshll.u32 %v5353_v0, 16 }
  0xf5   : > { %2287 = vmatprep.mubr.bf16.mxu1 %v5333_v43  ;;  %4450 = vmatpush3.bf16.msra.mxu1 %v4785_v50  ;;  %v1235_v4 = vor.u32 %v1234_v63, %v1230_v27  ;;  %v1246_v50 = vrot.slane %v1244_v57, 1  ;;  %v1263_v10 = vrot.slane %v1261_v48, 1  ;;  %v1273_v60 = vshll.u32 %v5361_v15, 16 }
  0xf6   : > { %v5526_v32 = vsel %vm1096_vm10, %v1199_v18, %v1203_v62  ;;  %4451 = vmatprep.subr.bf16.mxu1 %v4786_v33  ;;  %v1270_v13 = vrot.slane %v1268_v40, 1  ;;  %v1266_v19 = vshrl.u32 %v5353_v0, 16  ;;  %v1280_v41 = vshll.u32 %v5393_v25, 16 }
  0xf7   : > { %1853 = vmatprep.mubr.bf16.mxu0 %v5526_v32  ;;  %v5566_v24 = vsel %vm1096_vm10, %v1235_v4, %v1239_v17  ;;  %v1247_v18 = vor.u32 %v1246_v50, %v1242_v35  ;;  %v1285_v15 = vshll.u32 %v5398_v29, 16  ;;  %v1278_v26 = vshrl.u32 %v5393_v25, 16 }
  0xf8   : > { %v1271_v42 = vor.u32 %v1270_v13, %v1266_v19  ;;  %v1282_v38 = vrot.slane %v1280_v41, 1  ;;  %v1447_v63 = vshll.u32 %v5413_v9, 16  ;;  %v1452_v57 = vshll.u32 %v5411_v39, 16  ;;  %v4791_v13 = vld [vmem:[%s6155_s5 + $0x188] sm:$0xff]   ;;  %v6194_v19 = vld [vmem:[#allocation9_spill] sm:$0xff] }
  0xf9   : > { %4452 = vmatpush3.bf16.msra.mxu1 %v4786_v33  ;;  %v1251_v33 = vrot.slane %v1249_v61, 1  ;;  %v1287_v30 = vrot.slane %v1285_v15, 1  ;;  %v1445_v4 = vshrl.u32 %v5413_v9, 16  ;;  %v1341_v52 = vrot.slane %v5135_v22, 1  ;;  %v6195_v15 = vld [vmem:[#allocation13_spill] sm:$0xff] }
  0xfa   : > { %4453 = vmatprep.subr.bf16.mxu1 %v4787_v56  ;;  %v1283_v17 = vor.u32 %v1282_v38, %v1278_v26  ;;  %v1449_v27 = vrot.slane %v1447_v63, 1  ;;  %v1454_v61 = vrot.slane %v1452_v57, 1  ;;  %v1344_v48 = vrot.slane %v5182_v34, 1  ;;  %v4794_v63 = vld [vmem:[%s6155_s5 + $0x1d8] sm:$0xff]  }
  0xfb   : > { %v5576_v62 = vsel %vm1096_vm10, %v1247_v18, %v1251_v33  ;;  %v1342_v18 = vrot.slane %v5133_v20, 1  ;;  %v6192_v33 = vld [vmem:[#allocation3_spill] sm:$0xff]  ;;  %v4789_v20 = vld [vmem:[%s6155_s5 + $0x180] sm:$0xff]   ;;  %v1347_v22 = vrot.slane %v5267_v12, 1  ;;  %v1350_v41 = vrot.slane %v5374_v5, 1  ;;  %v4795_v57 = vld [vmem:[%s6155_s5 + $0x198] sm:$0xff]  }
  0xfc   : > { %2288 = vmatmul.mubr.bf16.gmra.mrb[28].mxu1 %v5267_v12  ;;  %1854 = vmatmul.mubr.bf16.gmra.mrb[28].mxu0 %v5498_v58  ;;  %v5606_v29 = vsel %vm1096_vm10, %v1283_v17, %v1287_v30  ;;  %v1450_v50 = vor.u32 %v1449_v27, %v1445_v4  ;;  %v1354_v38 = vrot.slane %v6195_v15, 1  ;;  %v4793_v30 = vld [vmem:[%s6155_s5 + $0x190] sm:$0xff]   ;;  %v1353_v26 = vrot.slane %v5443_v46, 1  ;;  %v4797_v4 = vld [vmem:[%s6155_s5 + $0x1e0] sm:$0xff]   ;;  %v4812_v15 = vld [vmem:[%s6155_s5 + $0x238] sm:$0xff]  }
  0xfd   : > { %2295 = vmatprep.mubr.bf16.mxu1 %v5404_v6  ;;  %1861 = vmatprep.mubr.bf16.mxu0 %v5541_v44  ;;  %v5624_v39 = vsel %vm1337_vm9, %v1341_v52, %v1342_v18  ;;  %v1359_v18 = vrot.slane %v5488_v11, 1  ;;  %v1356_v52 = vrot.slane %v5460_v21, 1 }
  0xfe   : > { %4454 = vmatpush3.bf16.msra.mxu1 %v4787_v56  ;;  %v1259_v56 = vor.u32 %v1258_v8, %v1254_v28  ;;  %v5615_v35 = vsel %vm1096_vm10, %v1450_v50, %v1454_v61  ;;  %v1345_v8 = vrot.slane %v6192_v33, 1  ;;  %v6193_v28 = vld [vmem:[#allocation7_spill] sm:$0xff]  ;;  %v5670_v27 = vsel %vm1337_vm9, %v1353_v26, %v1354_v38  ;;  %v4798_v33 = vld [vmem:[%s6155_s5 + $0x1a0] sm:$0xff]  }
  0xff   : > { %4455 = vmatprep.subr.bf16.mxu1 %v4796_v3  ;;  %v1357_v50 = vrot.slane %v5474_v59, 1  ;;  %v1360_v61 = vrot.slane %v5486_v45, 1  ;;  %v4800_v45 = vld [vmem:[%s6155_s5 + $0x1a8] sm:$0xff]  }
 0x100   : > { %v5587_v16 = vsel %vm1096_vm10, %v1259_v56, %v1263_v10  ;;  %v1348_v56 = vrot.slane %v6193_v28, 1  ;;  %v4790_v10 = vld [vmem:[%s6155_s5 + $0x1c8] sm:$0xff]   ;;  %v5639_v40 = vsel %vm1337_vm9, %v1344_v48, %v1345_v8  ;;  %v4801_v28 = vld [vmem:[%s6155_s5 + $0x1f0] sm:$0xff]  }
 0x101   : > { %v4799_v8 = vld [vmem:[%s6155_s5 + $0x1e8] sm:$0xff]   ;;  %v5691_v48 = vsel %vm1337_vm9, %v1356_v52, %v1357_v50  ;;  %v5696_v59 = vsel %vm1337_vm9, %v1359_v18, %v1360_v61 }
 0x102   : > { %4456 = vmatpush3.bf16.msra.mxu1 %v4796_v3  ;;  %v1275_v3 = vrot.slane %v1273_v60, 1  ;;  %v5644_v60 = vsel %vm1337_vm9, %v1347_v22, %v1348_v56  ;;  %v1363_v56 = vrot.slane %v5510_v31, 1  ;;  %v4802_v22 = vld [vmem:[%s6155_s5 + $0x1b0] sm:$0xff]   ;;  %v4804_v31 = vld [vmem:[%s6155_s5 + $0x1b8] sm:$0xff]  }
 0x103   : > { %4489 = vmatprep.subr.bf16.mxu1 %v5548_v53 }
 0x104   : > { %2296 = vmatmul.mubr.bf16.gmra.mrb[32].mxu1 %v5374_v5  ;;  %1862 = vmatmul.mubr.bf16.gmra.mrb[32].mxu0 %v5120_v54  ;;  %v5597_v1 = vsel %vm1096_vm10, %v1271_v42, %v1275_v3  ;;  %v4792_v3 = vld [vmem:[%s6155_s5 + $0x1d0] sm:$0xff]   ;;  %v1351_v42 = vrot.slane %v6194_v19, 1 }
 0x105   : > { %2303 = vmatprep.mubr.bf16.mxu1 %v5465_v51  ;;  %1869 = vmatprep.mubr.bf16.mxu0 %v5557_v2 }
 0x106   : > { %v5665_v17 = vsel %vm1337_vm9, %v1350_v41, %v1351_v42  ;;  %v4811_v41 = vld [vmem:[%s6155_s5 + $0x230] sm:$0xff]  }
 0x10c   : > { %2304 = vmatmul.mubr.bf16.gmra.mrb[36].mxu1 %v5443_v46  ;;  %1870 = vmatmul.mubr.bf16.gmra.mrb[36].mxu0 %v5153_v55 }
 0x10d   : > { %2311 = vmatprep.mubr.bf16.mxu1 %v5492_v36  ;;  %1877 = vmatprep.mubr.bf16.mxu0 %v5566_v24 }
 0x114   : > { %2312 = vmatmul.mubr.bf16.gmra.mrb[40].mxu1 %v5460_v21  ;;  %1878 = vmatmul.mubr.bf16.gmra.mrb[40].mxu0 %v5212_v7 }
 0x115   : > { %2319 = vmatprep.mubr.bf16.mxu1 %v5513_v23  ;;  %1885 = vmatprep.mubr.bf16.mxu0 %v5576_v62 }
 0x11c   : > { %2320 = vmatmul.mubr.bf16.gmra.mrb[44].mxu1 %v5488_v11  ;;  %1886 = vmatmul.mubr.bf16.gmra.mrb[44].mxu0 %v5249_v49 }
 0x11d   : > { %2327 = vmatprep.mubr.bf16.mxu1 %v5526_v32  ;;  %1893 = vmatprep.mubr.bf16.mxu0 %v5587_v16 }
 0x124   : > { %2328 = vmatmul.mubr.bf16.gmra.mrb[48].mxu1 %v5498_v58  ;;  %1894 = vmatmul.mubr.bf16.gmra.mrb[48].mxu0 %v5321_v14 }
 0x125   : > { %2335 = vmatprep.mubr.bf16.mxu1 %v5541_v44  ;;  %1901 = vmatprep.mubr.bf16.mxu0 %v5597_v1 }
 0x12c   : > { %2336 = vmatmul.mubr.bf16.gmra.mrb[52].mxu1 %v5120_v54  ;;  %1902 = vmatmul.mubr.bf16.gmra.mrb[52].mxu0 %v5353_v0 }
 0x12d   : > { %2343 = vmatprep.mubr.bf16.mxu1 %v5557_v2  ;;  %1909 = vmatprep.mubr.bf16.mxu0 %v5606_v29 }
 0x134   : > { %2344 = vmatmul.mubr.bf16.gmra.mrb[56].mxu1 %v5153_v55  ;;  %1910 = vmatmul.mubr.bf16.gmra.mrb[56].mxu0 %v5393_v25 }
 0x135   : > { %2351 = vmatprep.mubr.bf16.mxu1 %v5566_v24  ;;  %1917 = vmatprep.mubr.bf16.mxu0 %v5615_v35 }
 0x13c   : > { %2352 = vmatmul.mubr.bf16.gmra.mrb[60].mxu1 %v5212_v7  ;;  %1918 = vmatmul.mubr.bf16.gmra.mrb[60].mxu0 %v5413_v9 }
 0x13d   : > { %2359 = vmatprep.mubr.bf16.mxu1 %v5576_v62  ;;  %4409 = vmatprep.mubr.bf16.mxu0 %v5624_v39 }
 0x144   : > { %2360 = vmatmul.mubr.bf16.gmra.mrb[64].mxu1 %v5249_v49  ;;  %4410 = vmatmul.mubr.bf16.vlgmr.msra.gmra.mrb[64].mxu0 %v5639_v40 }
 0x145   : > { %2367 = vmatprep.mubr.bf16.mxu1 %v5587_v16  ;;  %4258 = vmatpush3.bf16.msra.mxu0 %v4789_v20  ;;  %v1362_v20 = vrot.slane %v5498_v58, 1 }
 0x146   : > { %4413 = vmatprep.mubr.bf16.mxu0 %v5644_v60  ;;  %4259 = vmatprep.subr.bf16.mxu0 %v4790_v10  ;;  %v4803_v10 = vld [vmem:[%s6155_s5 + $0x1f8] sm:$0xff]  }
 0x149   : > { %4260 = vmatpush3.bf16.msra.mxu0 %v4791_v13  ;;  %v5715_v13 = vsel %vm1337_vm9, %v1362_v20, %v1363_v56 }
 0x14a   : > { %4261 = vmatprep.subr.bf16.mxu0 %v4792_v3  ;;  %v4806_v3 = vld [vmem:[%s6155_s5 + $0x208] sm:$0xff]  }
 0x14c   : > { %2368 = vmatmul.mubr.bf16.gmra.mrb[68].mxu1 %v5321_v14  ;;  %4414 = vmatmul.mubr.bf16.gmra.mrb[68].mxu0 %v5665_v17 }
 0x14d   : > { %2375 = vmatprep.mubr.bf16.mxu1 %v5597_v1  ;;  %4262 = vmatpush3.bf16.msra.mxu0 %v4793_v30 }
 0x14e   : > { %4417 = vmatprep.mubr.bf16.mxu0 %v5670_v27  ;;  %4263 = vmatprep.subr.bf16.mxu0 %v4794_v63 }
 0x151   : > { %4264 = vmatpush3.bf16.msra.mxu0 %v4795_v57  ;;  %v6196_v57 = vld [vmem:[#allocation2_spill] sm:$0xff] }
 0x152   : > { %4265 = vmatprep.subr.bf16.mxu0 %v4797_v4  ;;  %v6198_v4 = vld [vmem:[#allocation5_spill] sm:$0xff] }
 0x154   : > { %2376 = vmatmul.mubr.bf16.gmra.mrb[72].mxu1 %v5353_v0  ;;  %4418 = vmatmul.mubr.bf16.gmra.mrb[72].mxu0 %v5691_v48 }
 0x155   : > { %2383 = vmatprep.mubr.bf16.mxu1 %v5606_v29  ;;  %4266 = vmatpush3.bf16.msra.mxu0 %v4798_v33 }
 0x156   : > { %4421 = vmatprep.mubr.bf16.mxu0 %v5696_v59  ;;  %4267 = vmatprep.subr.bf16.mxu0 %v4799_v8 }
 0x159   : > { %4268 = vmatpush3.bf16.msra.mxu0 %v4800_v45 }
 0x15a   : > { %4269 = vmatprep.subr.bf16.mxu0 %v4801_v28 }
 0x15c   : > { %2384 = vmatmul.mubr.bf16.gmra.mrb[76].mxu1 %v5393_v25  ;;  %4422 = vmatmul.mubr.bf16.gmra.mrb[76].mxu0 %v5715_v13 }
 0x15d   : > { %4457 = vmatprep.mubr.bf16.mxu1 %v5458_v47  ;;  %4270 = vmatpush3.bf16.msra.mxu0 %v4802_v22  ;;  %v4808_v47 = vld [vmem:[%s6155_s5 + $0x218] sm:$0xff]  }
 0x15e   : > { %2778 = vmatprep.mubr.bf16.mxu0 %v5228_v37  ;;  %4271 = vmatprep.subr.bf16.mxu0 %v4803_v10  ;;  %v4807_v37 = vld [vmem:[%s6155_s5 + $0x210] sm:$0xff]  }
 0x161   : > { %4272 = vmatpush3.bf16.msra.mxu0 %v4804_v31 }
 0x164   : > { %4458 = vmatmul.mubr.bf16.vlgmr.msra.gmra.mrb[80].mxu1 %v5624_v39  ;;  %2779 = vmatmul.mubr.bf16.vlgmr.msra.gmra.mrb[80].mxu0 %v5182_v34  ;;  %v4809_v34 = vld [vmem:[%s6155_s5 + $0x220] sm:$0xff]   ;;  %v4810_v39 = vld [vmem:[%s6155_s5 + $0x228] sm:$0xff]  }
 0x165   : > { %4490 = vmatpush3.bf16.msra.mxu1 %v5548_v53  ;;  %4461 = vmatprep.mubr.bf16.mxu1 %v5639_v40 }
 0x166   : > { %2786 = vmatprep.mubr.bf16.mxu0 %v5333_v43  ;;  %4491 = vmatprep.subr.bf16.mxu1 %v4806_v3 }
 0x169   : > { %4492 = vmatpush3.bf16.msra.mxu1 %v4806_v3 }
 0x16a   : > { %4493 = vmatprep.subr.bf16.mxu1 %v4807_v37 }
 0x16c   : > { %4462 = vmatmul.mubr.bf16.gmra.mrb[84].mxu1 %v5644_v60  ;;  %2787 = vmatmul.mubr.bf16.gmra.mrb[84].mxu0 %v5267_v12 }
 0x16d   : > { %4465 = vmatprep.mubr.bf16.mxu1 %v5665_v17  ;;  %2794 = vmatprep.mubr.bf16.mxu0 %v5404_v6 }
 0x16e   : > { %4494 = vmatpush3.bf16.msra.mxu1 %v4807_v37 }
 0x16f   : > { %4495 = vmatprep.subr.bf16.mxu1 %v4808_v47 }
 0x171   : > { %v4001_v43 = vpop.f32.mrb[0].mxu0 }
 0x172   : > { %4496 = vmatpush3.bf16.msra.mxu1 %v4808_v47  ;;  %v4002_v53 = vpop.f32.mrb[1].mxu0 }
 0x173   : > { %4497 = vmatprep.subr.bf16.mxu1 %v4809_v34  ;;  %v5748_v19 = vadd.f32 %v4002_v53, %v4001_v43  ;;  %v4004_v12 = vpop.f32.mrb[2].mxu0 }
 0x174   : > { %4466 = vmatmul.mubr.bf16.gmra.mrb[88].mxu1 %v5670_v27  ;;  %v4005_v6 = vpop.f32.mrb[3].mxu0  ;;  %2795 = vmatmul.mubr.bf16.gmra.mrb[88].mxu0 %v5374_v5 }
 0x175   : > { %4469 = vmatprep.mubr.bf16.mxu1 %v5691_v48  ;;  %v5753_v42 = vadd.f32 %v4005_v6, %v4004_v12  ;;  %2802 = vmatprep.mubr.bf16.mxu0 %v5465_v51 }
 0x176   : > { %4498 = vmatpush3.bf16.msra.mxu1 %v4809_v34 }
 0x177   : > { %4499 = vmatprep.subr.bf16.mxu1 %v4810_v39 }
 0x17a   : > { %4500 = vmatpush3.bf16.msra.mxu1 %v4810_v39 }
 0x17b   : > { %4501 = vmatprep.subr.bf16.mxu1 %v4811_v41 }
 0x17c   : > { %4470 = vmatmul.mubr.bf16.gmra.mrb[92].mxu1 %v5696_v59  ;;  %2803 = vmatmul.mubr.bf16.gmra.mrb[92].mxu0 %v5443_v46  ;;  %v6197_v46 = vld [vmem:[#allocation4_spill] sm:$0xff] }
 0x17d   : > { %4473 = vmatprep.mubr.bf16.mxu1 %v5715_v13  ;;  %v4007_v5 = vpop.f32.mrb[4].mxu0  ;;  %2810 = vmatprep.mubr.bf16.mxu0 %v5492_v36  ;;  %v6199_v36 = vld [vmem:[#allocation6_spill] sm:$0xff] }
 0x17e   : > { %4502 = vmatpush3.bf16.msra.mxu1 %v4811_v41  ;;  %v4008_v51 = vpop.f32.mrb[5].mxu0  ;;  %v1495_v41 = vpop.permute.xlu0 %1494 }
 0x17f   : > { %4503 = vmatprep.subr.bf16.mxu1 %v4812_v15  ;;  %v5766_v38 = vadd.f32 %v4008_v51, %v4007_v5  ;;  %v4010_v30 = vpop.f32.mrb[6].mxu0 }
 0x180   : > { %v4011_v26 = vpop.f32.mrb[7].mxu0 }
 0x181   : > { %v5768_v63 = vadd.f32 %v4011_v26, %v4010_v30 }
 0x182   : > { %4504 = vmatpush3.bf16.msra.mxu1 %v4812_v15 }
 0x184   : > { %4474 = vmatmul.mubr.bf16.gmra.mrb[0].mxu1 %v6196_v57  ;;  %2811 = vmatmul.mubr.bf16.gmra.mrb[96].mxu0 %v5460_v21  ;;  %v6200_v21 = vld [vmem:[#allocation8_spill] sm:$0xff] }
 0x185   : > { %4477 = vmatprep.mubr.bf16.mxu1 %v6197_v46  ;;  %2818 = vmatprep.mubr.bf16.mxu0 %v5513_v23  ;;  %v6201_v23 = vld [vmem:[#allocation10_spill] sm:$0xff] }
 0x18c   : > { %4478 = vmatmul.mubr.bf16.gmra.mrb[4].mxu1 %v6198_v4  ;;  %2819 = vmatmul.mubr.bf16.gmra.mrb[100].mxu0 %v5488_v11  ;;  %v6202_v11 = vld [vmem:[#allocation11_spill] sm:$0xff] }
 0x18d   : > { %4481 = vmatprep.mubr.bf16.mxu1 %v6199_v36  ;;  %2826 = vmatprep.mubr.bf16.mxu0 %v5526_v32 }
 0x18f   : > { %v4013_v50 = vpop.f32.mrb[8].mxu0 }
 0x190   : > { %v4014_v61 = vpop.f32.mrb[9].mxu0 }
 0x191   : > { %v5778_v18 = vadd.f32 %v4014_v61, %v4013_v50  ;;  %v4016_v52 = vpop.f32.mrb[10].mxu0 }
 0x192   : > { %v4017_v33 = vpop.f32.mrb[11].mxu0 }
 0x193   : > { %v5780_v8 = vadd.f32 %v4017_v33, %v4016_v52 }
 0x194   : > { %4482 = vmatmul.mubr.bf16.gmra.mrb[8].mxu1 %v6200_v21  ;;  %2827 = vmatmul.mubr.bf16.gmra.mrb[104].mxu0 %v5498_v58 }
 0x195   : > { %4485 = vmatprep.mubr.bf16.mxu1 %v6201_v23  ;;  %2834 = vmatprep.mubr.bf16.mxu0 %v5541_v44 }
 0x19c   : > { %4486 = vmatmul.mubr.bf16.gmra.mrb[12].mxu1 %v6202_v11  ;;  %2835 = vmatmul.mubr.bf16.gmra.mrb[108].mxu0 %v5120_v54  ;;  %v3880_v54 = vld [vmem:[%s469_s14] sm:$0xff]  }
 0x19d   : > { %4505 = vmatprep.mubr.bf16.mxu1 %v5639_v40  ;;  %2842 = vmatprep.mubr.bf16.mxu0 %v5557_v2  ;;  %v3882_v2 = vunpack.c.h.bf16 %v3880_v54  ;;  %v547_v40 = vld [vmem:[%s469_s14 + $0x8] sm:$0x1] }
 0x19e   : > { %v1465_v20 = vunpack.c.l.bf16 %v547_v40 }
 0x1a1   : > { %v4019_v32 = vpop.f32.mrb[12].mxu0 }
 0x1a2   : > { %v4020_v45 = vpop.f32.mrb[13].mxu0 }
 0x1a3   : > { %v5790_v28 = vadd.f32 %v4020_v45, %v4019_v32  ;;  %v4022_v56 = vpop.f32.mrb[14].mxu0 }
 0x1a4   : > { %4506 = vmatmul.mubr.bf16.vlgmr.msra.gmra.mrb[80].mxu1 %v5644_v60  ;;  %v4023_v58 = vpop.f32.mrb[15].mxu0  ;;  %2843 = vmatmul.mubr.bf16.gmra.mrb[112].mxu0 %v5153_v55  ;;  %v3881_v55 = vunpack.c.l.bf16 %v3880_v54 }
 0x1a5   : > { %4509 = vmatprep.mubr.bf16.mxu1 %v5665_v17  ;;  %v5796_v44 = vadd.f32 %v4023_v58, %v4022_v56  ;;  %2850 = vmatprep.mubr.bf16.mxu0 %v5566_v24  ;;  %v4813_v24 = vld [vmem:[%s6153_s3] ss:$0 sm:$0xff] }
 0x1a6   : > { %v1466_v60 = vmul.f32 %v4813_v24, %v3881_v55  ;;  %v1467_v17 = vmul.f32 %v4813_v24, %v3882_v2  ;;  %v1468_v31 = vmul.f32 %v4813_v24, %v1465_v20 }
 0x1ac   : > { %4510 = vmatmul.mubr.bf16.gmra.mrb[84].mxu1 %v5670_v27  ;;  %2851 = vmatmul.mubr.bf16.gmra.mrb[116].mxu0 %v5212_v7  ;;  %v1491_v7 = vpop.permute.xlu1 %1490 }
 0x1ad   : > { %4513 = vmatprep.mubr.bf16.mxu1 %v5691_v48  ;;  %2858 = vmatprep.mubr.bf16.mxu0 %v5576_v62  ;;  %v4814_v62 = vld [vmem:[%s6154_s4] ss:$0 sm:$0xff] }
 0x1ae   : > { %v1469_v27 = vadd.f32 %v4814_v62, %v1466_v60  ;;  %v1470_v10 = vadd.f32 %v4814_v62, %v1467_v17  ;;  %v1471_v6 = vadd.f32 %v4814_v62, %v1468_v31 }
 0x1b0   : > { %v1472_v43 = vmax.f32 %v1469_v27, 0.0  ;;  %v1473_v12 = vmax.f32 %v1470_v10, 0.0  ;;  %v1499_v30 = vpop.permute.xlu1 %1498  ;;  %v1474_v26 = vmax.f32 %v1471_v6, 0.0 }
 0x1b2   : > { %v1500_v5 = vmul.f32 %v1491_v7, %v1472_v43  ;;  %v1501_v51 = vmul.f32 %v1495_v41, %v1473_v12 }
 0x1b4   : > { %4514 = vmatmul.mubr.bf16.gmra.mrb[88].mxu1 %v5696_v59  ;;  %2859 = vmatmul.mubr.bf16.gmra.mrb[120].mxu0 %v5249_v49 }
 0x1b5   : > { %4517 = vmatprep.mubr.bf16.mxu1 %v5715_v13  ;;  %2866 = vmatprep.mubr.bf16.mxu0 %v5587_v16 }
 0x1b7   : > { %v4025_v48 = vpop.f32.mrb[16].mxu0  ;;  %v4137_v22 = vpop.f32.mrb[16].mxu1 }
 0x1b8   : > { %v4026_v3 = vpop.f32.mrb[17].mxu0  ;;  %v4138_v37 = vpop.f32.mrb[17].mxu1 }
 0x1b9   : > { %v5816_v47 = vadd.f32 %v4026_v3, %v4025_v48  ;;  %v5818_v59 = vadd.f32 %v4138_v37, %v4137_v22  ;;  %v4028_v49 = vpop.f32.mrb[18].mxu0  ;;  %v4140_v13 = vpop.f32.mrb[18].mxu1 }
 0x1ba   : > { %v4029_v34 = vpop.f32.mrb[19].mxu0  ;;  %v4141_v16 = vpop.f32.mrb[19].mxu1 }
 0x1bb   : > { %v5820_v53 = vadd.f32 %v4029_v34, %v4028_v49  ;;  %v5822_v39 = vadd.f32 %v4141_v16, %v4140_v13 }
 0x1bc   : > { %4518 = vmatmul.mubr.bf16.gmra.mrb[92].mxu1 %v6196_v57  ;;  %2867 = vmatmul.mubr.bf16.gmra.mrb[124].mxu0 %v5321_v14 }
 0x1bd   : > { %4521 = vmatprep.mubr.bf16.mxu1 %v6197_v46  ;;  %2874 = vmatprep.mubr.bf16.mxu0 %v5597_v1  ;;  %v1503_v46 = vpack.c.bf16 %v1501_v51, %v1500_v5  ;;  %v1502_v1 = vmul.f32 %v1499_v30, %v1474_v26 }
 0x1bf   : > { %v4143_v15 = vpop.f32.mrb[20].mxu1  ;;  %v4031_v50 = vpop.f32.mrb[20].mxu0  ;;  %v1504_v2 = vpack.c.bf16 %v1502_v1, %v1502_v1  ;;  %v1508_v40 = vshll.u32 %v1503_v46, 16  ;;  %v1520_v30 = vrot.slane %v1503_v46, 1 }
 0x1c0   : > { %v4144_v61 = vpop.f32.mrb[21].mxu1  ;;  %v4032_v52 = vpop.f32.mrb[21].mxu0 }
 0x1c1   : > { %v5828_v33 = vadd.f32 %v4144_v61, %v4143_v15  ;;  %v4146_v32 = vpop.f32.mrb[22].mxu1  ;;  %v5830_v45 = vadd.f32 %v4032_v52, %v4031_v50  ;;  %v4034_v57 = vpop.f32.mrb[22].mxu0  ;;  %v1510_v10 = vrot.slane %v1508_v40, 1  ;;  %v1521_v5 = vrot.slane %v1504_v2, 1 }
 0x1c2   : > { %v4147_v56 = vpop.f32.mrb[23].mxu1  ;;  %v4035_v14 = vpop.f32.mrb[23].mxu0 }
 0x1c3   : > { %v5832_v58 = vadd.f32 %v4147_v56, %v4146_v32  ;;  %v5834_v54 = vadd.f32 %v4035_v14, %v4034_v57 }
 0x1c4   : > { %4522 = vmatmul.mubr.bf16.gmra.mrb[0].mxu1 %v6198_v4  ;;  %2875 = vmatmul.mubr.bf16.gmra.mrb[128].mxu0 %v5353_v0  ;;  %v1513_v0 = vshll.u32 %v1504_v2, 16 }
 0x1c5   : > { %4525 = vmatprep.mubr.bf16.mxu1 %v6199_v36  ;;  %2882 = vmatprep.mubr.bf16.mxu0 %v5606_v29  ;;  %v1506_v36 = vshrl.u32 %v1503_v46, 16 }
 0x1c6   : > { %v1515_v31 = vrot.slane %v1513_v0, 1 }
 0x1c7   : > { %v4149_v55 = vpop.f32.mrb[24].mxu1  ;;  %v4037_v24 = vpop.f32.mrb[24].mxu0  ;;  %v1511_v37 = vor.u32 %v1510_v10, %v1506_v36 }
 0x1c8   : > { %v4150_v60 = vpop.f32.mrb[25].mxu1  ;;  %v4038_v17 = vpop.f32.mrb[25].mxu0 }
 0x1c9   : > { %v5840_v20 = vadd.f32 %v4150_v60, %v4149_v55  ;;  %v4152_v7 = vpop.f32.mrb[26].mxu1  ;;  %v5842_v62 = vadd.f32 %v4038_v17, %v4037_v24  ;;  %v4040_v27 = vpop.f32.mrb[26].mxu0 }
 0x1ca   : > { %v4153_v48 = vpop.f32.mrb[27].mxu1  ;;  %v4041_v4 = vpop.f32.mrb[27].mxu0 }
 0x1cb   : > { %v5844_v22 = vadd.f32 %v4153_v48, %v4152_v7  ;;  %v5846_v29 = vadd.f32 %v4041_v4, %v4040_v27 }
 0x1cc   : > { %4526 = vmatmul.mubr.bf16.gmra.mrb[4].mxu1 %v6200_v21  ;;  %2883 = vmatmul.mubr.bf16.gmra.mrb[132].mxu0 %v5393_v25  ;;  %v1516_v25 = vsel %vm1096_vm10, %v1511_v37, %v1515_v31 }
 0x1cd   : > { %4529 = vmatprep.mubr.bf16.mxu1 %v6201_v23  ;;  %2890 = vmatprep.mubr.bf16.mxu0 %v5615_v35  ;;  %v6203_v35 = vld [vmem:[#allocation12_spill] sm:$0xff] }
 0x1cf   : > { %v4155_v3 = vpop.f32.mrb[28].mxu1  ;;  %v4043_v49 = vpop.f32.mrb[28].mxu0 }
 0x1d0   : > { %v4156_v13 = vpop.f32.mrb[29].mxu1  ;;  %v4044_v34 = vpop.f32.mrb[29].mxu0 }
 0x1d1   : > { %v5852_v16 = vadd.f32 %v4156_v13, %v4155_v3  ;;  %v4158_v43 = vpop.f32.mrb[30].mxu1  ;;  %v5854_v12 = vadd.f32 %v4044_v34, %v4043_v49  ;;  %v4046_v6 = vpop.f32.mrb[30].mxu0 }
 0x1d2   : > { %v4159_v41 = vpop.f32.mrb[31].mxu1  ;;  %v4047_v21 = vpop.f32.mrb[31].mxu0 }
 0x1d3   : > { %v5856_v15 = vadd.f32 %v4159_v41, %v4158_v43  ;;  %v5859_v23 = vadd.f32 %v4047_v21, %v4046_v6 }
 0x1d4   : > { %4530 = vmatmul.mubr.bf16.gmra.mrb[8].mxu1 %v6202_v11  ;;  %2891 = vmatmul.mubr.bf16.gmra.mrb[136].mxu0 %v5413_v9  ;;  %v1522_v9 = vsel %vm1337_vm9, %v1520_v30, %v1521_v5 }
 0x1d5   : > { %4533 = vmatprep.mubr.bf16.mxu1 %v6203_v35  ;;  %2898 = vmatprep.mubr.bf16.mxu0 %v1516_v25 }
 0x1d7   : > { %v4161_v51 = vpop.f32.mrb[32].mxu1  ;;  %v4049_v26 = vpop.f32.mrb[32].mxu0 }
 0x1d8   : > { %v4162_v50 = vpop.f32.mrb[33].mxu1  ;;  %v4050_v61 = vpop.f32.mrb[33].mxu0 }
 0x1d9   : > { %v5864_v52 = vadd.f32 %v4162_v50, %v4161_v51  ;;  %v4164_v32 = vpop.f32.mrb[34].mxu1  ;;  %v4051_v57 = vadd.f32 %v4050_v61, %v4049_v26  ;;  %v4052_v56 = vpop.f32.mrb[34].mxu0 }
 0x1da   : > { %v4165_v14 = vpop.f32.mrb[35].mxu1  ;;  %v4053_v1 = vpop.f32.mrb[35].mxu0 }
 0x1db   : > { %v5866_v55 = vadd.f32 %v4165_v14, %v4164_v32  ;;  %v4054_v11 = vadd.f32 %v4053_v1, %v4052_v56 }
 0x1dc   : > { %4534 = vmatmul.mubr.bf16.gmra.mrb[12].mxu1 %v1522_v9  ;;  %2899 = vmatmul.mubr.bf16.gmra.mrb[140].mxu0 %v1503_v46 }
 0x1df   : > { %v4167_v2 = vpop.f32.mrb[36].mxu1  ;;  %v4055_v40 = vpop.f32.mrb[36].mxu0 }
 0x1e0   : > { %v4168_v24 = vpop.f32.mrb[37].mxu1  ;;  %v4056_v60 = vpop.f32.mrb[37].mxu0 }
 0x1e1   : > { %v5869_v17 = vadd.f32 %v4168_v24, %v4167_v2  ;;  %v4170_v7 = vpop.f32.mrb[38].mxu1  ;;  %v4057_v27 = vadd.f32 %v4056_v60, %v4055_v40  ;;  %v4058_v48 = vpop.f32.mrb[38].mxu0 }
 0x1e2   : > { %v4171_v4 = vpop.f32.mrb[39].mxu1  ;;  %v4059_v0 = vpop.f32.mrb[39].mxu0 }
 0x1e3   : > { %v5871_v36 = vadd.f32 %v4171_v4, %v4170_v7  ;;  %v4060_v10 = vadd.f32 %v4059_v0, %v4058_v48 }
 0x1e7   : > { %v4173_v31 = vpop.f32.mrb[40].mxu1  ;;  %v4061_v3 = vpop.f32.mrb[40].mxu0 }
 0x1e8   : > { %v4174_v37 = vpop.f32.mrb[41].mxu1  ;;  %v4062_v49 = vpop.f32.mrb[41].mxu0 }
 0x1e9   : > { %v5873_v13 = vadd.f32 %v4174_v37, %v4173_v31  ;;  %v4176_v46 = vpop.f32.mrb[42].mxu1  ;;  %v4063_v34 = vadd.f32 %v4062_v49, %v4061_v3  ;;  %v4064_v43 = vpop.f32.mrb[42].mxu0 }
 0x1ea   : > { %v4177_v6 = vpop.f32.mrb[43].mxu1  ;;  %v4065_v41 = vpop.f32.mrb[43].mxu0 }
 0x1eb   : > { %v5875_v21 = vadd.f32 %v4177_v6, %v4176_v46  ;;  %v4066_v25 = vadd.f32 %v4065_v41, %v4064_v43 }
 0x1ef   : > { %v4179_v35 = vpop.f32.mrb[44].mxu1  ;;  %v4067_v5 = vpop.f32.mrb[44].mxu0 }
 0x1f0   : > { %v4180_v51 = vpop.f32.mrb[45].mxu1  ;;  %v4068_v30 = vpop.f32.mrb[45].mxu0 }
 0x1f1   : > { %v5877_v26 = vadd.f32 %v4180_v51, %v4179_v35  ;;  %v4182_v50 = vpop.f32.mrb[46].mxu1  ;;  %v4069_v61 = vadd.f32 %v4068_v30, %v4067_v5  ;;  %v4070_v32 = vpop.f32.mrb[46].mxu0 }
 0x1f2   : > { %v4183_v56 = vpop.f32.mrb[47].mxu1  ;;  %v4071_v14 = vpop.f32.mrb[47].mxu0 }
 0x1f3   : > { %v5879_v1 = vadd.f32 %v4183_v56, %v4182_v50  ;;  %v4072_v9 = vadd.f32 %v4071_v14, %v4070_v32 }
 0x1f7   : > { %v4185_v2 = vpop.f32.mrb[48].mxu1  ;;  %v4073_v40 = vpop.f32.mrb[48].mxu0 }
 0x1f8   : > { %v4186_v24 = vpop.f32.mrb[49].mxu1  ;;  %v4074_v60 = vpop.f32.mrb[49].mxu0 }
 0x1f9   : > { %v4187_v7 = vadd.f32 %v4186_v24, %v4185_v2  ;;  %v4188_v48 = vpop.f32.mrb[50].mxu1  ;;  %v4075_v4 = vadd.f32 %v4074_v60, %v4073_v40  ;;  %v4076_v0 = vpop.f32.mrb[50].mxu0 }
 0x1fa   : > { %v4189_v31 = vpop.f32.mrb[51].mxu1  ;;  %v4077_v37 = vpop.f32.mrb[51].mxu0 }
 0x1fb   : > { %v5881_v3 = vadd.f32 %v4187_v7, %v4051_v57  ;;  %v4190_v49 = vadd.f32 %v4189_v31, %v4188_v48  ;;  %v4078_v46 = vadd.f32 %v4077_v37, %v4076_v0 }
 0x1fd   : > { %v5883_v43 = vadd.f32 %v4190_v49, %v4054_v11 }
 0x1ff   : > { %v4191_v6 = vpop.f32.mrb[52].mxu1  ;;  %v4079_v41 = vpop.f32.mrb[52].mxu0 }
 0x200   : > { %v4192_v35 = vpop.f32.mrb[53].mxu1  ;;  %v4080_v5 = vpop.f32.mrb[53].mxu0 }
 0x201   : > { %v4193_v51 = vadd.f32 %v4192_v35, %v4191_v6  ;;  %v4194_v30 = vpop.f32.mrb[54].mxu1  ;;  %v5885_v50 = vadd.f32 %v4080_v5, %v4079_v41  ;;  %v4082_v32 = vpop.f32.mrb[54].mxu0 }
 0x202   : > { %v4195_v56 = vpop.f32.mrb[55].mxu1  ;;  %v4083_v2 = vpop.f32.mrb[55].mxu0 }
 0x203   : > { %v5887_v14 = vadd.f32 %v4193_v51, %v4057_v27  ;;  %v4196_v57 = vadd.f32 %v4195_v56, %v4194_v30  ;;  %v5889_v40 = vadd.f32 %v4083_v2, %v4082_v32 }
 0x205   : > { %v5891_v24 = vadd.f32 %v4196_v57, %v4060_v10 }
 0x207   : > { %v4197_v11 = vpop.f32.mrb[56].mxu1  ;;  %v4085_v60 = vpop.f32.mrb[56].mxu0 }
 0x208   : > { %v4198_v7 = vpop.f32.mrb[57].mxu1  ;;  %v4086_v48 = vpop.f32.mrb[57].mxu0 }
 0x209   : > { %v4199_v0 = vadd.f32 %v4198_v7, %v4197_v11  ;;  %v4200_v31 = vpop.f32.mrb[58].mxu1  ;;  %v5893_v37 = vadd.f32 %v4086_v48, %v4085_v60  ;;  %v4088_v49 = vpop.f32.mrb[58].mxu0 }
 0x20a   : > { %v4201_v6 = vpop.f32.mrb[59].mxu1  ;;  %v4089_v27 = vpop.f32.mrb[59].mxu0 }
 0x20b   : > { %v5895_v41 = vadd.f32 %v4199_v0, %v4063_v34  ;;  %v4202_v35 = vadd.f32 %v4201_v6, %v4200_v31  ;;  %v5897_v5 = vadd.f32 %v4089_v27, %v4088_v49 }
 0x20d   : > { %6204 = vst [vmem:[#allocation3_spill] sm:$0xff] %v5895_v41  ;;  %v5899_v51 = vadd.f32 %v4202_v35, %v4066_v25 }
 0x20f   : > { %6205 = vst [vmem:[#allocation7_spill] sm:$0xff] %v5899_v51  ;;  %v4203_v10 = vpop.f32.mrb[60].mxu1  ;;  %v4091_v30 = vpop.f32.mrb[60].mxu0 }
 0x210   : > { %v4204_v32 = vpop.f32.mrb[61].mxu1  ;;  %v4092_v56 = vpop.f32.mrb[61].mxu0 }
 0x211   : > { %v4205_v2 = vadd.f32 %v4204_v32, %v4203_v10  ;;  %v4206_v57 = vpop.f32.mrb[62].mxu1  ;;  %v5901_v11 = vadd.f32 %v4092_v56, %v4091_v30  ;;  %v4094_v60 = vpop.f32.mrb[62].mxu0 }
 0x212   : > { %v4207_v7 = vpop.f32.mrb[63].mxu1  ;;  %v4095_v34 = vpop.f32.mrb[63].mxu0 }
 0x213   : > { %v5903_v48 = vadd.f32 %v4205_v2, %v4069_v61  ;;  %v4208_v0 = vadd.f32 %v4207_v7, %v4206_v57  ;;  %v5905_v41 = vadd.f32 %v4095_v34, %v4094_v60 }
 0x215   : > { %v5907_v31 = vadd.f32 %v4208_v0, %v4072_v9 }
 0x217   : > { %v4209_v25 = vpop.f32.mrb[64].mxu1  ;;  %v4411_v49 = vpop.f32.mrb[64].mxu0 }
 0x218   : > { %v4210_v6 = vpop.f32.mrb[65].mxu1  ;;  %v1969_v27 = vadd.f32 %v4411_v49, %v5766_v38  ;;  %v1960_v35 = vpop.f32.mrb[65].mxu0 }
 0x219   : > { %v4211_v10 = vadd.f32 %v4210_v6, %v4209_v25  ;;  %v4212_v32 = vpop.f32.mrb[66].mxu1  ;;  %v1961_v30 = vadd.f32 %v5748_v19, %v1960_v35  ;;  %v4412_v56 = vpop.f32.mrb[66].mxu0 }
 0x21a   : > { %v4213_v51 = vpop.f32.mrb[67].mxu1  ;;  %v5912_v61 = vadd.f32 %v5828_v33, %v1969_v27  ;;  %v1972_v9 = vadd.f32 %v4412_v56, %v5768_v63  ;;  %v1963_v57 = vpop.f32.mrb[67].mxu0 }
 0x21b   : > { %v5914_v2 = vadd.f32 %v4211_v10, %v4075_v4  ;;  %v4214_v60 = vadd.f32 %v4213_v51, %v4212_v32  ;;  %v5918_v7 = vadd.f32 %v5818_v59, %v1961_v30  ;;  %v1964_v38 = vadd.f32 %v5753_v42, %v1963_v57 }
 0x21c   : > { %v5922_v34 = vadd.f32 %v5832_v58, %v1972_v9 }
 0x21d   : > { %v5924_v19 = vadd.f32 %v4214_v60, %v4078_v46  ;;  %v5927_v0 = vadd.f32 %v5822_v39, %v1964_v38 }
 0x21f   : > { %v4215_v33 = vpop.f32.mrb[68].mxu1  ;;  %v4415_v4 = vpop.f32.mrb[68].mxu0 }
 0x220   : > { %v4216_v25 = vpop.f32.mrb[69].mxu1  ;;  %v1985_v63 = vadd.f32 %v4415_v4, %v5790_v28  ;;  %v1976_v49 = vpop.f32.mrb[69].mxu0 }
 0x221   : > { %v4217_v51 = vadd.f32 %v4216_v25, %v4215_v33  ;;  %v4218_v6 = vpop.f32.mrb[70].mxu1  ;;  %v1977_v59 = vadd.f32 %v5778_v18, %v1976_v49  ;;  %v4416_v27 = vpop.f32.mrb[70].mxu0 }
 0x222   : > { %v4219_v42 = vpop.f32.mrb[71].mxu1  ;;  %v5932_v58 = vadd.f32 %v5852_v16, %v1985_v63  ;;  %v1988_v39 = vadd.f32 %v4416_v27, %v5796_v44  ;;  %v1979_v35 = vpop.f32.mrb[71].mxu0 }
 0x223   : > { %v5935_v46 = vadd.f32 %v4217_v51, %v5885_v50  ;;  %v4220_v10 = vadd.f32 %v4219_v42, %v4218_v6  ;;  %v5939_v32 = vadd.f32 %v5840_v20, %v1977_v59  ;;  %v1980_v28 = vadd.f32 %v5780_v8, %v1979_v35 }
 0x224   : > { %v5943_v30 = vadd.f32 %v5856_v15, %v1988_v39 }
 0x225   : > { %v5946_v18 = vadd.f32 %v4220_v10, %v5889_v40  ;;  %v5949_v16 = vadd.f32 %v5844_v22, %v1980_v28 }
 0x227   : > { %v4221_v50 = vpop.f32.mrb[72].mxu1  ;;  %v4419_v56 = vpop.f32.mrb[72].mxu0 }
 0x228   : > { %v4222_v9 = vpop.f32.mrb[73].mxu1  ;;  %v2001_v44 = vadd.f32 %v4419_v56, %v5830_v45  ;;  %v1992_v57 = vpop.f32.mrb[73].mxu0 }
 0x229   : > { %v4223_v60 = vadd.f32 %v4222_v9, %v4221_v50  ;;  %v4224_v20 = vpop.f32.mrb[74].mxu1  ;;  %v1993_v38 = vadd.f32 %v5816_v47, %v1992_v57  ;;  %v4420_v8 = vpop.f32.mrb[74].mxu0 }
 0x22a   : > { %v4225_v33 = vpop.f32.mrb[75].mxu1  ;;  %v5954_v15 = vadd.f32 %v5869_v17, %v2001_v44  ;;  %v2004_v22 = vadd.f32 %v4420_v8, %v5834_v54  ;;  %v1995_v4 = vpop.f32.mrb[75].mxu0 }
 0x22b   : > { %v5957_v40 = vadd.f32 %v4223_v60, %v5893_v37  ;;  %v4226_v25 = vadd.f32 %v4225_v33, %v4224_v20  ;;  %v5961_v63 = vadd.f32 %v5864_v52, %v1993_v38  ;;  %v1996_v45 = vadd.f32 %v5820_v53, %v1995_v4 }
 0x22c   : > { %v5965_v49 = vadd.f32 %v5871_v36, %v2004_v22 }
 0x22d   : > { %v5968_v47 = vadd.f32 %v4226_v25, %v5897_v5  ;;  %v2301_v17 = vadd.f32 %v5866_v55, %v1996_v45 }
 0x22f   : > { %v4227_v51 = vpop.f32.mrb[76].mxu1  ;;  %v4423_v37 = vpop.f32.mrb[76].mxu0 }
 0x230   : > { %v4228_v6 = vpop.f32.mrb[77].mxu1  ;;  %v2017_v54 = vadd.f32 %v4423_v37, %v5854_v12  ;;  %v2008_v59 = vpop.f32.mrb[77].mxu0 }
 0x231   : > { %v4229_v27 = vadd.f32 %v4228_v6, %v4227_v51  ;;  %v4230_v42 = vpop.f32.mrb[78].mxu1  ;;  %v2009_v52 = vadd.f32 %v5842_v62, %v2008_v59  ;;  %v4424_v39 = vpop.f32.mrb[78].mxu0 }
 0x232   : > { %v4231_v53 = vpop.f32.mrb[79].mxu1  ;;  %v5974_v36 = vadd.f32 %v5877_v26, %v2017_v54  ;;  %v2020_v55 = vadd.f32 %v4424_v39, %v5859_v23  ;;  %v2011_v35 = vpop.f32.mrb[79].mxu0 }
 0x233   : > { %v5977_v5 = vadd.f32 %v4229_v27, %v5901_v11  ;;  %v4232_v10 = vadd.f32 %v4231_v53, %v4230_v42  ;;  %v2314_v28 = vadd.f32 %v5873_v13, %v2009_v52  ;;  %v2012_v12 = vadd.f32 %v5846_v29, %v2011_v35 }
 0x234   : > { %v5983_v50 = vadd.f32 %v5879_v1, %v2020_v55 }
 0x235   : > { %v5986_v62 = vadd.f32 %v4232_v10, %v5905_v41  ;;  %v2317_v26 = vadd.f32 %v5875_v21, %v2012_v12 }
 0x237   : > { %v4273_v56 = vpop.f32.mrb[80].mxu0 }
 0x238   : > { %v4274_v9 = vpop.f32.mrb[81].mxu0 }
 0x239   : > { %v4275_v11 = vadd.f32 %v4274_v9, %v4273_v56  ;;  %v4276_v44 = vpop.f32.mrb[82].mxu0 }
 0x23a   : > { %v4277_v57 = vpop.f32.mrb[83].mxu0 }
 0x23b   : > { %v4278_v23 = vadd.f32 %v4277_v57, %v4276_v44  ;;  %v5990_v60 = vadd.f32 %v4275_v11, %v5918_v7 }
 0x23d   : > { %v5993_v13 = vadd.f32 %v4278_v23, %v5927_v0 }
 0x23f   : > { %v4279_v29 = vpop.f32.mrb[84].mxu0 }
 0x240   : > { %v4280_v1 = vpop.f32.mrb[85].mxu0 }
 0x241   : > { %v4281_v20 = vadd.f32 %v4280_v1, %v4279_v29  ;;  %v4282_v38 = vpop.f32.mrb[86].mxu0 }
 0x242   : > { %v4283_v41 = vpop.f32.mrb[87].mxu0 }
 0x243   : > { %v4284_v8 = vadd.f32 %v4283_v41, %v4282_v38  ;;  %v4555_v21 = vadd.f32 %v4281_v20, %v5912_v61 }
 0x245   : > { %v4563_v33 = vadd.f32 %v4284_v8, %v5922_v34 }
 0x247   : > { %v4285_v22 = vpop.f32.mrb[88].mxu0 }
 0x248   : > { %v4286_v4 = vpop.f32.mrb[89].mxu0 }
 0x249   : > { %v4287_v25 = vadd.f32 %v4286_v4, %v4285_v22  ;;  %v4288_v45 = vpop.f32.mrb[90].mxu0 }
 0x24a   : > { %v4289_v51 = vpop.f32.mrb[91].mxu0 }
 0x24b   : > { %v4290_v7 = vadd.f32 %v4289_v51, %v4288_v45  ;;  %v5998_v37 = vadd.f32 %v4287_v25, %v5939_v32 }
 0x24d   : > { %v6001_v0 = vadd.f32 %v4290_v7, %v5949_v16 }
 0x24f   : > { %v4291_v6 = vpop.f32.mrb[92].mxu0 }
 0x250   : > { %v4292_v54 = vpop.f32.mrb[93].mxu0 }
 0x251   : > { %v4293_v59 = vadd.f32 %v4292_v54, %v4291_v6  ;;  %v4294_v27 = vpop.f32.mrb[94].mxu0 }
 0x252   : > { %v4295_v42 = vpop.f32.mrb[95].mxu0 }
 0x253   : > { %v4296_v61 = vadd.f32 %v4295_v42, %v4294_v27  ;;  %v6004_v34 = vadd.f32 %v4293_v59, %v5932_v58 }
 0x255   : > { %v6007_v52 = vadd.f32 %v4296_v61, %v5943_v30 }
 0x257   : > { %v4297_v39 = vpop.f32.mrb[96].mxu0 }
 0x258   : > { %v4298_v53 = vpop.f32.mrb[97].mxu0 }
 0x259   : > { %v4299_v55 = vadd.f32 %v4298_v53, %v4297_v39  ;;  %v4300_v32 = vpop.f32.mrb[98].mxu0 }
 0x25a   : > { %v4301_v35 = vpop.f32.mrb[99].mxu0 }
 0x25b   : > { %v4302_v10 = vadd.f32 %v4301_v35, %v4300_v32  ;;  %v6010_v16 = vadd.f32 %v4299_v55, %v5961_v63 }
 0x25d   : > { %v6012_v12 = vadd.f32 %v4302_v10, %v2301_v17 }
 0x25f   : > { %v4303_v56 = vpop.f32.mrb[100].mxu0 }
 0x260   : > { %v4304_v9 = vpop.f32.mrb[101].mxu0 }
 0x261   : > { %v4305_v11 = vadd.f32 %v4304_v9, %v4303_v56  ;;  %v4306_v44 = vpop.f32.mrb[102].mxu0 }
 0x262   : > { %v4307_v58 = vpop.f32.mrb[103].mxu0 }
 0x263   : > { %v4308_v57 = vadd.f32 %v4307_v58, %v4306_v44  ;;  %v6015_v30 = vadd.f32 %v4305_v11, %v5954_v15 }
 0x265   : > { %v6018_v23 = vadd.f32 %v4308_v57, %v5965_v49 }
 0x267   : > { %v4309_v29 = vpop.f32.mrb[104].mxu0 }
 0x268   : > { %v4310_v1 = vpop.f32.mrb[105].mxu0 }
 0x269   : > { %v4311_v20 = vadd.f32 %v4310_v1, %v4309_v29  ;;  %v4312_v38 = vpop.f32.mrb[106].mxu0 }
 0x26a   : > { %v4313_v63 = vpop.f32.mrb[107].mxu0 }
 0x26b   : > { %v4314_v41 = vadd.f32 %v4313_v63, %v4312_v38  ;;  %v6020_v17 = vadd.f32 %v4311_v20, %v2314_v28  ;;  %v6033_v28 = vld [vmem:[%s6156_s6] ss:$0 sm:$0xff] }
 0x26d   : > { %v6022_v8 = vadd.f32 %v4314_v41, %v2317_v26 }
 0x26f   : > { %v4315_v22 = vpop.f32.mrb[108].mxu0 }
 0x270   : > { %v4316_v4 = vpop.f32.mrb[109].mxu0 }
 0x271   : > { %v4317_v25 = vadd.f32 %v4316_v4, %v4315_v22  ;;  %v4318_v45 = vpop.f32.mrb[110].mxu0 }
 0x272   : > { %v4319_v15 = vpop.f32.mrb[111].mxu0 }
 0x273   : > { %v4320_v51 = vadd.f32 %v4319_v15, %v4318_v45  ;;  %v6025_v49 = vadd.f32 %v4317_v25, %v5974_v36 }
 0x275   : > { %v6028_v7 = vadd.f32 %v4320_v51, %v5983_v50 }
 0x277   : > { %v4507_v6 = vpop.f32.mrb[80].mxu1  ;;  %v4321_v54 = vpop.f32.mrb[112].mxu0 }
 0x278   : > { %v4556_v59 = vadd.f32 %v4555_v21, %v4507_v6  ;;  %v2941_v26 = vpop.f32.mrb[81].mxu1  ;;  %v4322_v27 = vpop.f32.mrb[113].mxu0 }
 0x279   : > { %v4560_v42 = vadd.f32 %v5990_v60, %v2941_v26  ;;  %v4508_v61 = vpop.f32.mrb[82].mxu1  ;;  %v4323_v39 = vadd.f32 %v4322_v27, %v4321_v54  ;;  %v4324_v53 = vpop.f32.mrb[114].mxu0 }
 0x27a   : > { %v4564_v36 = vadd.f32 %v4563_v33, %v4508_v61  ;;  %v2944_v55 = vpop.f32.mrb[83].mxu1  ;;  %v4325_v32 = vpop.f32.mrb[115].mxu0  ;;  %v3109_v35 = vadd.f32 %v4556_v59, %v6033_v28 }
 0x27b   : > { %v3107_v50 = vadd.f32 %v4560_v42, %v6033_v28  ;;  %v4568_v21 = vadd.f32 %v5993_v13, %v2944_v55  ;;  %v4326_v56 = vadd.f32 %v4325_v32, %v4324_v53  ;;  %v6042_v9 = vadd.f32 %v5881_v3, %v4323_v39 }
 0x27c   : > { %v3110_v10 = vadd.f32 %v4564_v36, %v6033_v28  ;;  %v3338_v38 = vmul.f32 %v3109_v35, %v3109_v35 }
 0x27d   : > { %v3108_v60 = vadd.f32 %v4568_v21, %v6033_v28  ;;  %v6051_v13 = vadd.f32 %v5883_v43, %v4326_v56  ;;  %v3336_v11 = vmul.f32 %v3107_v50, %v3107_v50 }
 0x27e   : > { %v3891_v33 = vpack.c.bf16 %v3110_v10, %v3109_v35  ;;  %v3339_v43 = vmul.f32 %v3110_v10, %v3110_v10 }
 0x27f   : > { %v3886_v44 = vpack.c.bf16 %v3108_v60, %v3107_v50  ;;  %v3299_v58 = vadd.f32 %v3108_v60, %v3107_v50  ;;  %v3337_v57 = vmul.f32 %v3108_v60, %v3108_v60  ;;  %v4511_v29 = vpop.f32.mrb[84].mxu1  ;;  %v4327_v3 = vpop.f32.mrb[116].mxu0 }
 0x280   : > { %3970 = vst [vmem:[%s6047_s22 + $0x8] sm:$0xff] %v3891_v33   ;;  %v4572_v1 = vadd.f32 %v6004_v34, %v4511_v29  ;;  %v2957_v20 = vpop.f32.mrb[85].mxu1  ;;  %v4328_v22 = vpop.f32.mrb[117].mxu0 }
 0x281   : > { %3887 = vst [vmem:[%s6047_s22] sm:$0xff] %v3886_v44   ;;  %v3300_v63 = vadd.f32 %v3299_v58, %v3109_v35  ;;  %v3368_v41 = vadd.f32 %v3337_v57, %v3336_v11  ;;  %v4576_v4 = vadd.f32 %v5998_v37, %v2957_v20  ;;  %v4512_v25 = vpop.f32.mrb[86].mxu1  ;;  %v4329_v45 = vadd.f32 %v4328_v22, %v4327_v3  ;;  %v4330_v15 = vpop.f32.mrb[118].mxu0 }
 0x282   : > { %v4580_v51 = vadd.f32 %v6007_v52, %v4512_v25  ;;  %v2960_v6 = vpop.f32.mrb[87].mxu1  ;;  %v4331_v34 = vpop.f32.mrb[119].mxu0  ;;  %v3113_v42 = vadd.f32 %v4572_v1, %v6033_v28 }
 0x283   : > { %v3369_v54 = vadd.f32 %v3368_v41, %v3338_v38  ;;  %v3111_v59 = vadd.f32 %v4576_v4, %v6033_v28  ;;  %v3301_v26 = vadd.f32 %v3300_v63, %v3110_v10  ;;  %v4584_v27 = vadd.f32 %v6001_v0, %v2960_v6 }
 0x284   : > { %v3114_v61 = vadd.f32 %v4580_v51, %v6033_v28  ;;  %v4332_v37 = vadd.f32 %v4331_v34, %v4330_v15  ;;  %v6063_v39 = vadd.f32 %v5887_v14, %v4329_v45  ;;  %v3342_v11 = vmul.f32 %v3113_v42, %v3113_v42  ;;  %v6206_v15 = vld [vmem:[#allocation3_spill] sm:$0xff] }
 0x285   : > { %v3302_v53 = vadd.f32 %v3301_v26, %v3111_v59  ;;  %v3340_v52 = vmul.f32 %v3111_v59, %v3111_v59  ;;  %v3370_v36 = vadd.f32 %v3369_v54, %v3339_v43  ;;  %v3112_v55 = vadd.f32 %v4584_v27, %v6033_v28  ;;  %v6207_v34 = vld [vmem:[#allocation7_spill] sm:$0xff] }
 0x286   : > { %v3901_v50 = vpack.c.bf16 %v3114_v61, %v3113_v42  ;;  %v6067_v32 = vadd.f32 %v5891_v24, %v4332_v37  ;;  %v3343_v24 = vmul.f32 %v3114_v61, %v3114_v61 }
 0x287   : > { %v3371_v0 = vadd.f32 %v3370_v36, %v3340_v52  ;;  %v3896_v21 = vpack.c.bf16 %v3112_v55, %v3111_v59  ;;  %v3303_v35 = vadd.f32 %v3302_v53, %v3112_v55  ;;  %v3341_v10 = vmul.f32 %v3112_v55, %v3112_v55  ;;  %v4515_v56 = vpop.f32.mrb[88].mxu1  ;;  %v4333_v60 = vpop.f32.mrb[120].mxu0 }
 0x288   : > { %3972 = vst [vmem:[%s6047_s22 + $0x18] sm:$0xff] %v3901_v50   ;;  %v4588_v14 = vadd.f32 %v6015_v30, %v4515_v56  ;;  %v2973_v33 = vpop.f32.mrb[89].mxu1  ;;  %v4334_v57 = vpop.f32.mrb[121].mxu0 }
 0x289   : > { %3971 = vst [vmem:[%s6047_s22 + $0x10] sm:$0xff] %v3896_v21   ;;  %v3304_v44 = vadd.f32 %v3303_v35, %v3113_v42  ;;  %v3372_v58 = vadd.f32 %v3371_v0, %v3341_v10  ;;  %v4592_v29 = vadd.f32 %v6010_v16, %v2973_v33  ;;  %v4516_v3 = vpop.f32.mrb[90].mxu1  ;;  %v4335_v1 = vadd.f32 %v4334_v57, %v4333_v60  ;;  %v4336_v20 = vpop.f32.mrb[122].mxu0 }
 0x28a   : > { %v4596_v38 = vadd.f32 %v6018_v23, %v4516_v3  ;;  %v2976_v63 = vpop.f32.mrb[91].mxu1  ;;  %v4337_v30 = vpop.f32.mrb[123].mxu0  ;;  %v3117_v43 = vadd.f32 %v4588_v14, %v6033_v28 }
 0x28b   : > { %v3373_v41 = vadd.f32 %v3372_v58, %v3342_v11  ;;  %v3115_v22 = vadd.f32 %v4592_v29, %v6033_v28  ;;  %v3305_v4 = vadd.f32 %v3304_v44, %v3114_v61  ;;  %v4600_v25 = vadd.f32 %v6012_v12, %v2976_v63 }
 0x28c   : > { %v3118_v45 = vadd.f32 %v4596_v38, %v6033_v28  ;;  %v4338_v16 = vadd.f32 %v4337_v30, %v4336_v20  ;;  %v6079_v51 = vadd.f32 %v6206_v15, %v4335_v1  ;;  %v3346_v50 = vmul.f32 %v3117_v43, %v3117_v43 }
 0x28d   : > { %v3306_v6 = vadd.f32 %v3305_v4, %v3115_v22  ;;  %v3344_v23 = vmul.f32 %v3115_v22, %v3115_v22  ;;  %v3374_v54 = vadd.f32 %v3373_v41, %v3343_v24  ;;  %v3116_v59 = vadd.f32 %v4600_v25, %v6033_v28 }
 0x28e   : > { %v3911_v26 = vpack.c.bf16 %v3118_v45, %v3117_v43  ;;  %v6083_v27 = vadd.f32 %v6207_v34, %v4338_v16  ;;  %v3347_v60 = vmul.f32 %v3118_v45, %v3118_v45 }
 0x28f   : > { %v3375_v12 = vadd.f32 %v3374_v54, %v3344_v23  ;;  %v3906_v42 = vpack.c.bf16 %v3116_v59, %v3115_v22  ;;  %v3307_v61 = vadd.f32 %v3306_v6, %v3116_v59  ;;  %v3345_v37 = vmul.f32 %v3116_v59, %v3116_v59  ;;  %v4519_v53 = vpop.f32.mrb[92].mxu1  ;;  %v4339_v52 = vpop.f32.mrb[124].mxu0 }
 0x290   : > { %3974 = vst [vmem:[%s6047_s22 + $0x28] sm:$0xff] %v3911_v26   ;;  %v4604_v36 = vadd.f32 %v6025_v49, %v4519_v53  ;;  %v2989_v55 = vpop.f32.mrb[93].mxu1  ;;  %v4340_v35 = vpop.f32.mrb[125].mxu0 }
 0x291   : > { %3973 = vst [vmem:[%s6047_s22 + $0x20] sm:$0xff] %v3906_v42   ;;  %v3308_v0 = vadd.f32 %v3307_v61, %v3117_v43  ;;  %v3376_v21 = vadd.f32 %v3375_v12, %v3345_v37  ;;  %v4608_v10 = vadd.f32 %v6020_v17, %v2989_v55  ;;  %v4520_v56 = vpop.f32.mrb[94].mxu1  ;;  %v4341_v14 = vadd.f32 %v4340_v35, %v4339_v52  ;;  %v4342_v33 = vpop.f32.mrb[126].mxu0 }
 0x292   : > { %v4612_v11 = vadd.f32 %v6028_v7, %v4520_v56  ;;  %v2992_v44 = vpop.f32.mrb[95].mxu1  ;;  %v4343_v49 = vpop.f32.mrb[127].mxu0  ;;  %v3121_v24 = vadd.f32 %v4604_v36, %v6033_v28 }
 0x293   : > { %v3377_v58 = vadd.f32 %v3376_v21, %v3346_v50  ;;  %v3119_v57 = vadd.f32 %v4608_v10, %v6033_v28  ;;  %v3309_v29 = vadd.f32 %v3308_v0, %v3118_v45  ;;  %v4616_v3 = vadd.f32 %v6022_v8, %v2992_v44 }
 0x294   : > { %v3122_v1 = vadd.f32 %v4612_v11, %v6033_v28  ;;  %v4344_v17 = vadd.f32 %v4343_v49, %v4342_v33  ;;  %v4630_v20 = vadd.f32 %v5903_v48, %v4341_v14  ;;  %v3350_v48 = vmul.f32 %v3121_v24, %v3121_v24 }
 0x295   : > { %v3310_v38 = vadd.f32 %v3309_v29, %v3119_v57  ;;  %v3348_v63 = vmul.f32 %v3119_v57, %v3119_v57  ;;  %v3378_v7 = vadd.f32 %v3377_v58, %v3347_v60  ;;  %v3120_v41 = vadd.f32 %v4616_v3, %v6033_v28 }
 0x296   : > { %v3921_v22 = vpack.c.bf16 %v3122_v1, %v3121_v24  ;;  %v4636_v4 = vadd.f32 %v5907_v31, %v4344_v17  ;;  %v3351_v12 = vmul.f32 %v3122_v1, %v3122_v1 }
 0x297   : > { %v3379_v30 = vadd.f32 %v3378_v7, %v3348_v63  ;;  %v3916_v25 = vpack.c.bf16 %v3120_v41, %v3119_v57  ;;  %v3311_v8 = vadd.f32 %v3310_v38, %v3120_v41  ;;  %v3349_v43 = vmul.f32 %v3120_v41, %v3120_v41  ;;  %v4523_v45 = vpop.f32.mrb[0].mxu1  ;;  %v4345_v16 = vpop.f32.mrb[128].mxu0 }
 0x298   : > { %3976 = vst [vmem:[%s6047_s22 + $0x38] sm:$0xff] %v3921_v22   ;;  %v4619_v15 = vadd.f32 %v6063_v39, %v4523_v45  ;;  %v3005_v6 = vpop.f32.mrb[1].mxu1  ;;  %v4346_v59 = vpop.f32.mrb[129].mxu0 }
 0x299   : > { %3975 = vst [vmem:[%s6047_s22 + $0x30] sm:$0xff] %v3916_v25   ;;  %v3312_v23 = vadd.f32 %v3311_v8, %v3121_v24  ;;  %v3380_v54 = vadd.f32 %v3379_v30, %v3349_v43  ;;  %v4622_v26 = vadd.f32 %v6042_v9, %v3005_v6  ;;  %v4524_v34 = vpop.f32.mrb[2].mxu1  ;;  %v4347_v31 = vadd.f32 %v4346_v59, %v4345_v16  ;;  %v4348_v42 = vpop.f32.mrb[130].mxu0 }
 0x29a   : > { %v4625_v61 = vadd.f32 %v6067_v32, %v4524_v34  ;;  %v3008_v37 = vpop.f32.mrb[3].mxu1  ;;  %v4349_v39 = vpop.f32.mrb[131].mxu0  ;;  %v3125_v50 = vadd.f32 %v4619_v15, %v6033_v28 }
 0x29b   : > { %v3381_v53 = vadd.f32 %v3380_v54, %v3350_v48  ;;  %v3123_v52 = vadd.f32 %v4622_v26, %v6033_v28  ;;  %v3313_v36 = vadd.f32 %v3312_v23, %v3122_v1  ;;  %v4628_v55 = vadd.f32 %v6051_v13, %v3008_v37 }
 0x29c   : > { %v3126_v0 = vadd.f32 %v4625_v61, %v6033_v28  ;;  %v4350_v9 = vadd.f32 %v4349_v39, %v4348_v42  ;;  %v4645_v21 = vadd.f32 %v5914_v2, %v4347_v31  ;;  %v3354_v3 = vmul.f32 %v3125_v50, %v3125_v50 }
 0x29d   : > { %v3314_v35 = vadd.f32 %v3313_v36, %v3123_v52  ;;  %v3352_v10 = vmul.f32 %v3123_v52, %v3123_v52  ;;  %v3382_v32 = vadd.f32 %v3381_v53, %v3351_v12  ;;  %v3124_v56 = vadd.f32 %v4628_v55, %v6033_v28 }
 0x29e   : > { %v3931_v60 = vpack.c.bf16 %v3126_v0, %v3125_v50  ;;  %v4651_v14 = vadd.f32 %v5924_v19, %v4350_v9  ;;  %v3355_v63 = vmul.f32 %v3126_v0, %v3126_v0 }
 0x29f   : > { %v3383_v33 = vadd.f32 %v3382_v32, %v3352_v10  ;;  %v3926_v11 = vpack.c.bf16 %v3124_v56, %v3123_v52  ;;  %v3315_v13 = vadd.f32 %v3314_v35, %v3124_v56  ;;  %v3353_v44 = vmul.f32 %v3124_v56, %v3124_v56  ;;  %v4527_v58 = vpop.f32.mrb[4].mxu1  ;;  %v4351_v57 = vpop.f32.mrb[132].mxu0 }
 0x2a0   : > { %3978 = vst [vmem:[%s6047_s22 + $0x48] sm:$0xff] %v3931_v60   ;;  %v4631_v29 = vadd.f32 %v4630_v20, %v4527_v58  ;;  %v3021_v49 = vpop.f32.mrb[5].mxu1  ;;  %v4352_v1 = vpop.f32.mrb[133].mxu0 }
 0x2a1   : > { %3977 = vst [vmem:[%s6047_s22 + $0x40] sm:$0xff] %v3926_v11   ;;  %v3316_v2 = vadd.f32 %v3315_v13, %v3125_v50  ;;  %v3384_v24 = vadd.f32 %v3383_v33, %v3353_v44  ;;  %v4634_v17 = vadd.f32 %v6079_v51, %v3021_v49  ;;  %v4528_v38 = vpop.f32.mrb[6].mxu1  ;;  %v4353_v7 = vadd.f32 %v4352_v1, %v4351_v57  ;;  %v4354_v19 = vpop.f32.mrb[134].mxu0 }
 0x2a2   : > { %v4637_v41 = vadd.f32 %v4636_v4, %v4528_v38  ;;  %v3024_v22 = vpop.f32.mrb[7].mxu1  ;;  %v4355_v43 = vpop.f32.mrb[135].mxu0  ;;  %v3129_v45 = vadd.f32 %v4631_v29, %v6033_v28 }
 0x2a3   : > { %v3385_v30 = vadd.f32 %v3384_v24, %v3354_v3  ;;  %v3127_v25 = vadd.f32 %v4634_v17, %v6033_v28  ;;  %v3317_v8 = vadd.f32 %v3316_v2, %v3126_v0  ;;  %v4640_v20 = vadd.f32 %v6083_v27, %v3024_v22 }
 0x2a4   : > { %v3130_v16 = vadd.f32 %v4637_v41, %v6033_v28  ;;  %v4356_v15 = vadd.f32 %v4355_v43, %v4354_v19  ;;  %v4642_v51 = vadd.f32 %v5935_v46, %v4353_v7  ;;  %v3358_v53 = vmul.f32 %v3129_v45, %v3129_v45 }
 0x2a5   : > { %v3318_v6 = vadd.f32 %v3317_v8, %v3127_v25  ;;  %v3356_v48 = vmul.f32 %v3127_v25, %v3127_v25  ;;  %v3386_v4 = vadd.f32 %v3385_v30, %v3355_v63  ;;  %v3128_v23 = vadd.f32 %v4640_v20, %v6033_v28 }
 0x2a6   : > { %v3941_v54 = vpack.c.bf16 %v3130_v16, %v3129_v45  ;;  %v4648_v59 = vadd.f32 %v5946_v18, %v4356_v15  ;;  %v3359_v50 = vmul.f32 %v3130_v16, %v3130_v16 }
 0x2a7   : > { %v3387_v26 = vadd.f32 %v3386_v4, %v3356_v48  ;;  %v3936_v34 = vpack.c.bf16 %v3128_v23, %v3127_v25  ;;  %v3319_v27 = vadd.f32 %v3318_v6, %v3128_v23  ;;  %v3357_v12 = vmul.f32 %v3128_v23, %v3128_v23  ;;  %v4531_v31 = vpop.f32.mrb[8].mxu1  ;;  %v4357_v42 = vpop.f32.mrb[136].mxu0 }
 0x2a8   : > { %3980 = vst [vmem:[%s6047_s22 + $0x58] sm:$0xff] %v3941_v54   ;;  %v4643_v61 = vadd.f32 %v4642_v51, %v4531_v31  ;;  %v3037_v37 = vpop.f32.mrb[9].mxu1  ;;  %v4358_v36 = vpop.f32.mrb[137].mxu0 }
 0x2a9   : > { %3979 = vst [vmem:[%s6047_s22 + $0x50] sm:$0xff] %v3936_v34   ;;  %v3320_v46 = vadd.f32 %v3319_v27, %v3129_v45  ;;  %v3388_v52 = vadd.f32 %v3387_v26, %v3357_v12  ;;  %v4646_v39 = vadd.f32 %v4645_v21, %v3037_v37  ;;  %v4532_v55 = vpop.f32.mrb[10].mxu1  ;;  %v4359_v0 = vadd.f32 %v4358_v36, %v4357_v42  ;;  %v4360_v9 = vpop.f32.mrb[138].mxu0 }
 0x2aa   : > { %v4649_v18 = vadd.f32 %v4648_v59, %v4532_v55  ;;  %v3040_v35 = vpop.f32.mrb[11].mxu1  ;;  %v4361_v60 = vpop.f32.mrb[139].mxu0  ;;  %v3133_v11 = vadd.f32 %v4643_v61, %v6033_v28 }
 0x2ab   : > { %v3389_v10 = vadd.f32 %v3388_v52, %v3358_v53  ;;  %v3131_v32 = vadd.f32 %v4646_v39, %v6033_v28  ;;  %v3321_v56 = vadd.f32 %v3320_v46, %v3130_v16  ;;  %v4652_v33 = vadd.f32 %v4651_v14, %v3040_v35 }
 0x2ac   : > { %v3134_v13 = vadd.f32 %v4649_v18, %v6033_v28  ;;  %v4362_v44 = vadd.f32 %v4361_v60, %v4360_v9  ;;  %v4657_v21 = vadd.f32 %v5957_v40, %v4359_v0  ;;  %v3362_v19 = vmul.f32 %v3133_v11, %v3133_v11 }
 0x2ad   : > { %v3322_v58 = vadd.f32 %v3321_v56, %v3131_v32  ;;  %v3360_v57 = vmul.f32 %v3131_v32, %v3131_v32  ;;  %v3390_v29 = vadd.f32 %v3389_v10, %v3359_v50  ;;  %v3132_v49 = vadd.f32 %v4652_v33, %v6033_v28 }
 0x2ae   : > { %v3951_v3 = vpack.c.bf16 %v3134_v13, %v3133_v11  ;;  %v4663_v2 = vadd.f32 %v5968_v47, %v4362_v44  ;;  %v3363_v8 = vmul.f32 %v3134_v13, %v3134_v13 }
 0x2af   : > { %v3391_v24 = vadd.f32 %v3390_v29, %v3360_v57  ;;  %v3946_v1 = vpack.c.bf16 %v3132_v49, %v3131_v32  ;;  %v3323_v14 = vadd.f32 %v3322_v58, %v3132_v49  ;;  %v3361_v17 = vmul.f32 %v3132_v49, %v3132_v49  ;;  %v4535_v38 = vpop.f32.mrb[12].mxu1  ;;  %v4363_v63 = vpop.f32.mrb[140].mxu0 }
 0x2b0   : > { %3982 = vst [vmem:[%s6047_s22 + $0x68] sm:$0xff] %v3951_v3   ;;  %v3053_v7 = vpop.f32.mrb[13].mxu1  ;;  %v4364_v22 = vpop.f32.mrb[141].mxu0 }
 0x2b1   : > { %3981 = vst [vmem:[%s6047_s22 + $0x60] sm:$0xff] %v3946_v1   ;;  %v3324_v40 = vadd.f32 %v3323_v14, %v3133_v11  ;;  %v3392_v41 = vadd.f32 %v3391_v24, %v3361_v17  ;;  %v4658_v30 = vadd.f32 %v4657_v21, %v3053_v7  ;;  %v4536_v25 = vpop.f32.mrb[14].mxu1  ;;  %v4365_v43 = vadd.f32 %v4364_v22, %v4363_v63  ;;  %v4366_v20 = vpop.f32.mrb[142].mxu0 }
 0x2b2   : > { %v3056_v45 = vpop.f32.mrb[15].mxu1  ;;  %v4367_v51 = vpop.f32.mrb[143].mxu0 }
 0x2b3   : > { %v3393_v47 = vadd.f32 %v3392_v41, %v3362_v19  ;;  %v3135_v16 = vadd.f32 %v4658_v30, %v6033_v28  ;;  %v3325_v15 = vadd.f32 %v3324_v40, %v3134_v13  ;;  %v4664_v6 = vadd.f32 %v4663_v2, %v3056_v45 }
 0x2b4   : > { %v4654_v48 = vadd.f32 %v5977_v5, %v4365_v43  ;;  %v4368_v4 = vadd.f32 %v4367_v51, %v4366_v20 }
 0x2b5   : > { %v3326_v23 = vadd.f32 %v3325_v15, %v3135_v16  ;;  %v3364_v54 = vmul.f32 %v3135_v16, %v3135_v16  ;;  %v3394_v59 = vadd.f32 %v3393_v47, %v3363_v8  ;;  %v3136_v26 = vadd.f32 %v4664_v6, %v6033_v28 }
 0x2b6   : > { %v4655_v34 = vadd.f32 %v4654_v48, %v4535_v38  ;;  %v4660_v27 = vadd.f32 %v5986_v62, %v4368_v4 }
 0x2b7   : > { %v3395_v12 = vadd.f32 %v3394_v59, %v3364_v54  ;;  %v3956_v31 = vpack.c.bf16 %v3136_v26, %v3135_v16  ;;  %v3327_v42 = vadd.f32 %v3326_v23, %v3136_v26  ;;  %v3365_v61 = vmul.f32 %v3136_v26, %v3136_v26 }
 0x2b8   : > { %v3137_v37 = vadd.f32 %v4655_v34, %v6033_v28  ;;  %v4661_v53 = vadd.f32 %v4660_v27, %v4536_v25 }
 0x2b9   : > { %3983 = vst [vmem:[%s6047_s22 + $0x70] sm:$0xff] %v3956_v31   ;;  %v3396_v46 = vadd.f32 %v3395_v12, %v3365_v61 }
 0x2ba   : > { %v3366_v5 = vmul.f32 %v3137_v37, %v3137_v37  ;;  %v3138_v52 = vadd.f32 %v4661_v53, %v6033_v28  ;;  %v3328_v36 = vadd.f32 %v3327_v42, %v3137_v37 }
 0x2bc   : > { %v3961_v39 = vpack.c.bf16 %v3138_v52, %v3137_v37  ;;  %v3367_v55 = vmul.f32 %v3138_v52, %v3138_v52  ;;  %v3329_v50 = vadd.f32 %v3328_v36, %v3138_v52  ;;  %v3397_v0 = vadd.f32 %v3396_v46, %v3366_v5 }
 0x2be   : > { %3984 = vst [vmem:[%s6047_s22 + $0x78] sm:$0xff] %v3961_v39   ;;  %v3330_v62 = vrot.slane %v3329_v50, 4  ;;  %v3398_v9 = vadd.f32 %v3397_v0, %v3367_v55 }
 0x2c0   : > { %v3331_v18 = vadd.f32 %v3330_v62, %v3329_v50  ;;  %v3399_v35 = vrot.slane %v3398_v9, 4 }
 0x2c2   : > { %v3332_v10 = vrot.slane %v3331_v18, 2  ;;  %v3400_v32 = vadd.f32 %v3399_v35, %v3398_v9 }
 0x2c4   : > { %v3333_v56 = vadd.f32 %v3332_v10, %v3331_v18  ;;  %v3401_v60 = vrot.slane %v3400_v32, 2 }
 0x2c6   : > { %v3334_v33 = vrot.slane %v3333_v56, 1  ;;  %v3402_v11 = vadd.f32 %v3401_v60, %v3400_v32 }
 0x2c8   : > { %v3403_v13 = vrot.slane %v3402_v11, 1  ;;  %v3335_v28 = vadd.f32 %v3334_v33, %v3333_v56 }
 0x2ca   : > { %v3404_v44 = vadd.f32 %v3403_v13, %v3402_v11 }
 0x2cc   : > { %v3406_v21 = vsel %vm3405_vm11, %v3335_v28, %v3404_v44 }
 0x2cd   : > { %3407 = vst [vmem:[%s489_s10] sm:$0x3] %v3406_v21 }
 0x2ce PF: > { %s19_s29 = sadd.s32 1, %s4837_s29   ;;  %s6208_s27 = smov %s4833_s28 }
 0x2cf   : > { %p16_p5 = scmp.ge.s32.totalorder %s19_s29, 4   ;;  %s6209_s28 = smov %s6211_s30 }
 0x2d1   :  { %18 = sbr.rel (!%p16_p5) target bundleno = 2 (0x2), region = 98 }

// kernel: up_forward.5
= control target key start
LH: loop header
LB: loop body
LE: loop exit
PB: predicated region body
PF: predicated region fallthrough
CT: control target
= control target key end

     0   :  { %s7918_s13 = smov 0   ;;  %s7920_s14 = smov 0   ;;  %s10067_s0 = inlined_call_operand.vmem [shape: bf16[2,18,18,128], index: 0, kind: input, shape index: {}, may-alias: {0,1,2}]   ;;  %s10068_s1 = inlined_call_operand.vmem [shape: bf16[2,18,18,128], index: 1, kind: input, shape index: {}, may-alias: {0,1,2}]   ;;  %s10069_s2 = inlined_call_operand.vmem [shape: bf16[2,18,18,128], index: 2, kind: input, shape index: {}, may-alias: {0,1,2}]   ;;  %s10070_s3 = inlined_call_operand.vmem [shape: bf16[2,18,18,128], index: 3, kind: input, shape index: {}, may-alias: {3,4,5}]   ;;  %s10071_s4 = inlined_call_operand.vmem [shape: bf16[2,18,18,128], index: 4, kind: input, shape index: {}, may-alias: {3,4,5}]   ;;  %s10072_s5 = inlined_call_operand.vmem [shape: bf16[2,18,18,128], index: 5, kind: input, shape index: {}, may-alias: {3,4,5}]   ;;  %s10073_s6 = inlined_call_operand.vmem [shape: bf16[3,384,128], index: 6, kind: input, shape index: {}]   ;;  %s10074_s7 = inlined_call_operand.vmem [shape: bf16[3,384,128], index: 7, kind: input, shape index: {}]   ;;  %s10075_s8 = inlined_call_operand.vmem [shape: f32[1,128], index: 8, kind: input, shape index: {}]   ;;  %s10076_s9 = inlined_call_operand.vmem [shape: bf16[2,16,16,128], index: 9, kind: output, shape index: {0}]   ;;  %s10077_s10 = inlined_call_operand.vmem [shape: f32[2,1,2,128], index: 10, kind: output, shape index: {1}]  }
   0x1   :  { %s7922_s15 = smov 0  }
   0x2 LB: > { %s33_s16 = sadd.s32 1, %s7857_s14  ;;  %p5521_p0 = scmp.ge.s32.totalorder %s7861_s15, 1  ;;  %s7861_s15 = sphi %s7922_s15, %s21_s15   ;;  %s7857_s14 = sphi %s7920_s14, %s10285_s14   ;;  %s7853_s13 = sphi %s7918_s13, %s10284_s13  }
   0x3   : > { %p35_p1 = scmp.ge.s32.totalorder %s33_s16, 2  ;;  %p473_p2 = scmp.lt.s32.totalorder %s7861_s15, 3 }
   0x5   : > { %s10287_s16 = smov (%p35_p1, %s33_s16), 0  ;;  %p474_p3 = pnand %p5521_p0, %p473_p2 }
   0x7   : > { %477 = sbr.rel (%p474_p3) target bundleno = 860 (0x35c), region = 56 }
   0xe   : > { %v7593_v0 = vld [vmem:[%s10073_s6 + $0x100] sm:$0xff]   ;;  %p598_p4 = scmp.lt.s32.totalorder %s7853_s13, 1  ;;  %v7597_v4 = vld [vmem:[%s10073_s6 + $0x108] sm:$0xff]   ;;  %v7601_v8 = vld [vmem:[%s10073_s6 + $0x110] sm:$0xff]   ;;  %vm903_vm0 = vsmask.f32 7424 }
   0xf   : > { %v7594_v1 = vld [vmem:[%s10073_s6 + $0x40] sm:$0xff]   ;;  %6110 = vmatprep.subr.bf16.mxu0 %v7593_v0  ;;  %v7598_v5 = vld [vmem:[%s10073_s6 + $0x48] sm:$0xff]   ;;  %v7602_v9 = vld [vmem:[%s10073_s6 + $0x50] sm:$0xff]   ;;  %vm1112_vm1 = vcmask 1046528   ;;  %vm5272_vm2 = vcmask 1040384  }
  0x10   : > { %v7595_v2 = vld [vmem:[%s10073_s6 + $0xc0] sm:$0xff]   ;;  %6246 = vmatprep.subr.bf16.mxu1 %v7594_v1  ;;  %s10289_s13 = smov (!%p598_p4, %s7853_s13), 1  ;;  %v7599_v6 = vld [vmem:[%s10073_s6 + $0xc8] sm:$0xff]   ;;  %v7603_v10 = vld [vmem:[%s10073_s6 + $0xd0] sm:$0xff]  }
  0x11   : > { %v7596_v3 = vld [vmem:[%s10073_s6] sm:$0xff]   ;;  %6111 = vmatpush3.bf16.msra.mxu0 %v7595_v2  ;;  %v7600_v7 = vld [vmem:[%s10073_s6 + $0x8] sm:$0xff]   ;;  %v7604_v11 = vld [vmem:[%s10073_s6 + $0x10] sm:$0xff]   ;;  %s8020_s23 = smul.u32 216, %s10289_s13 }
  0x12   : > { %6247 = vmatpush3.bf16.msra.mxu1 %v7596_v3  ;;  %6112 = vmatprep.subr.bf16.mxu0 %v7597_v4  ;;  %v7605_v12 = vld [vmem:[%s10073_s6 + $0x118] sm:$0xff]   ;;  %v7609_v16 = vld [vmem:[%s10073_s6 + $0x120] sm:$0xff]   ;;  %v7613_v20 = vld [vmem:[%s10073_s6 + $0x128] sm:$0xff]  }
  0x13   : > { %6248 = vmatprep.subr.bf16.mxu1 %v7598_v5  ;;  %v7606_v13 = vld [vmem:[%s10073_s6 + $0x58] sm:$0xff]   ;;  %v7610_v17 = vld [vmem:[%s10073_s6 + $0x60] sm:$0xff]   ;;  %v7614_v21 = vld [vmem:[%s10073_s6 + $0x68] sm:$0xff]   ;;  %s8038_s18 = scalar_lea.vmem %s10067_s0, %s8020_s23  ;;  %s5975_s21 = sadd.s32 192, %s8020_s23 }
  0x14   : > { %v7607_v14 = vld [vmem:[%s10073_s6 + $0xd8] sm:$0xff]   ;;  %v7611_v18 = vld [vmem:[%s10073_s6 + $0xe0] sm:$0xff]   ;;  %v7615_v22 = vld [vmem:[%s10073_s6 + $0xe8] sm:$0xff]   ;;  %s8226_s29 = scalar_lea.vmem %s10068_s1, %s5975_s21  ;;  %s5977_s19 = sadd.s32 204, %s8020_s23 }
  0x15   : > { %6113 = vmatpush3.bf16.msra.mxu0 %v7599_v6  ;;  %v7608_v15 = vld [vmem:[%s10073_s6 + $0x18] sm:$0xff]   ;;  %v7612_v19 = vld [vmem:[%s10073_s6 + $0x20] sm:$0xff]   ;;  %v7616_v23 = vld [vmem:[%s10073_s6 + $0x28] sm:$0xff]   ;;  %s8383_s24 = scalar_lea.vmem %s10069_s2, %s5977_s19  ;;  %s8397_s27 = scalar_lea.vmem %s10070_s3, %s8020_s23 }
  0x16   : > { %6249 = vmatpush3.bf16.msra.mxu1 %v7600_v7  ;;  %6114 = vmatprep.subr.bf16.mxu0 %v7601_v8  ;;  %v7617_v24 = vld [vmem:[%s10073_s6 + $0x130] sm:$0xff]   ;;  %v7621_v28 = vld [vmem:[%s10073_s6 + $0x138] sm:$0xff]   ;;  %v8053_v37 = vld [vmem:[%s8038_s18] sm:$0xff]   ;;  %s8731_s25 = scalar_lea.vmem %s10071_s4, %s5975_s21  ;;  %s5982_s23 = sshll.u32 %s10289_s13, 7 }
  0x17   : > { %6250 = vmatprep.subr.bf16.mxu1 %v7602_v9  ;;  %v7618_v25 = vld [vmem:[%s10073_s6 + $0x70] sm:$0xff]   ;;  %v7622_v29 = vld [vmem:[%s10073_s6 + $0x78] sm:$0xff]   ;;  %v8056_v38 = vld [vmem:[%s8038_s18 + $0x8] ss:$0 sps:$4 sm:$0x11]   ;;  %v905_v42 = vshrl.u32 %v8053_v37, 16  ;;  %s9941_s22 = scalar_lea.vmem %s10076_s9, %s5982_s23 }
  0x18   : > { %v7619_v26 = vld [vmem:[%s10073_s6 + $0xf0] sm:$0xff]   ;;  %v7623_v30 = vld [vmem:[%s10073_s6 + $0xf8] sm:$0xff]   ;;  %v7629_v39 = vld [vmem:[%s10073_s6 + $0x140] sm:$0xff]   ;;  %v907_v43 = vshll.u32 %v8053_v37, 16  ;;  %v912_v44 = vshll.u32 %v8056_v38, 16  ;;  %s5530_s21 = sshll.u32 %s10289_s13, 1 }
  0x19   : > { %6115 = vmatpush3.bf16.msra.mxu0 %v7603_v10  ;;  %v7620_v27 = vld [vmem:[%s10073_s6 + $0x30] sm:$0xff]   ;;  %v7624_v31 = vld [vmem:[%s10073_s6 + $0x38] sm:$0xff]   ;;  %v7630_v45 = vld [vmem:[%s10073_s6 + $0x80] sm:$0xff]   ;;  %s703_s30 = scalar_lea.vmem %s10077_s10, %s5530_s21 }
  0x1a   : > { %6251 = vmatpush3.bf16.msra.mxu1 %v7604_v11  ;;  %6116 = vmatprep.subr.bf16.mxu0 %v7605_v12  ;;  %v8044_v32 = vld [vmem:[%s8038_s18 + $0xc] sm:$0xff]   ;;  %v8047_v33 = vld [vmem:[%s8038_s18 + $0x14] ss:$0 sps:$4 sm:$0x11]   ;;  %v909_v47 = vrot.slane %v907_v43, 1  ;;  %v8068_v48 = vld [vmem:[%s8038_s18 + $0x18] sm:$0xff]  }
  0x1b   : > { %6252 = vmatprep.subr.bf16.mxu1 %v7606_v13  ;;  %v917_v34 = vshrl.u32 %v8044_v32, 16  ;;  %v919_v35 = vshll.u32 %v8044_v32, 16  ;;  %v924_v36 = vshll.u32 %v8047_v33, 16  ;;  %v914_v49 = vrot.slane %v912_v44, 1  ;;  %v8078_v56 = vld [vmem:[%s8038_s18 + $0x24] sm:$0xff]   ;;  %v8096_v5 = vld [vmem:[%s8038_s18 + $0x30] sm:$0xff]  }
  0x1c   : > { %v8071_v50 = vld [vmem:[%s8038_s18 + $0x20] ss:$0 sps:$4 sm:$0x11]   ;;  %v910_v52 = vor.u32 %v909_v47, %v905_v42  ;;  %v929_v53 = vshrl.u32 %v8068_v48, 16  ;;  %v931_v54 = vshll.u32 %v8068_v48, 16  ;;  %v7635_v58 = vld [vmem:[%s10073_s6 + $0x148] sm:$0xff]  }
  0x1d   : > { %6117 = vmatpush3.bf16.msra.mxu0 %v7607_v14  ;;  %v921_v40 = vrot.slane %v919_v35, 1  ;;  %v926_v41 = vrot.slane %v924_v36, 1  ;;  %v936_v55 = vshll.u32 %v8071_v50, 16  ;;  %v8081_v57 = vld [vmem:[%s8038_s18 + $0x2c] ss:$0 sps:$4 sm:$0x11]  }
  0x1e   : > { %6253 = vmatpush3.bf16.msra.mxu1 %v7608_v15  ;;  %6118 = vmatprep.subr.bf16.mxu0 %v7609_v16  ;;  %v915_v59 = vsel %vm903_vm0, %v910_v52, %v914_v49  ;;  %v933_v60 = vrot.slane %v931_v54, 1  ;;  %v7636_v61 = vld [vmem:[%s10073_s6 + $0x88] sm:$0xff]   ;;  %v941_v63 = vshrl.u32 %v8078_v56, 16  ;;  %v943_v0 = vshll.u32 %v8078_v56, 16  ;;  %v7641_v8 = vld [vmem:[%s10073_s6 + $0x150] sm:$0xff]   ;;  %v8112_v13 = vld [vmem:[%s8038_s18 + $0x3c] sm:$0xff]  }
  0x1f   : > { %6254 = vmatprep.subr.bf16.mxu1 %v7610_v17  ;;  %v922_v46 = vor.u32 %v921_v40, %v917_v34  ;;  %1968 = vmatprep.mubr.bf16.mxu1 %v915_v59  ;;  %v938_v62 = vrot.slane %v936_v55, 1  ;;  %v948_v1 = vshll.u32 %v8081_v57, 16  ;;  %v8102_v7 = vld [vmem:[%s8038_s18 + $0x38] ss:$0 sps:$4 sm:$0x11]   ;;  %v955_v10 = vshll.u32 %v8096_v5, 16 }
  0x20   : > { %v934_v2 = vor.u32 %v933_v60, %v929_v53  ;;  %v945_v3 = vrot.slane %v943_v0, 1  ;;  %v953_v11 = vshrl.u32 %v8096_v5, 16  ;;  %v960_v12 = vshll.u32 %v8102_v7, 16  ;;  %v7642_v16 = vld [vmem:[%s10073_s6 + $0x90] sm:$0xff]   ;;  %v7653_v34 = vld [vmem:[%s10073_s6 + $0x160] sm:$0xff]   ;;  %v7659_v43 = vld [vmem:[%s10073_s6 + $0x168] sm:$0xff]  }
  0x21   : > { %6119 = vmatpush3.bf16.msra.mxu0 %v7611_v18  ;;  %v927_v51 = vsel %vm903_vm0, %v922_v46, %v926_v41  ;;  %v950_v4 = vrot.slane %v948_v1, 1  ;;  %v957_v15 = vrot.slane %v955_v10, 1  ;;  %v8122_v17 = vld [vmem:[%s8038_s18 + $0x44] ss:$0 sps:$4 sm:$0x11]   ;;  %v8159_v41 = vld [vmem:[%s8038_s18 + $0x54] sm:$0xff]  }
  0x22   : > { %6255 = vmatpush3.bf16.msra.mxu1 %v7612_v19  ;;  %6120 = vmatprep.subr.bf16.mxu0 %v7613_v20  ;;  %v8099_v6 = vsel %vm903_vm0, %v934_v2, %v938_v62  ;;  %v946_v9 = vor.u32 %v945_v3, %v941_v63  ;;  %v962_v19 = vrot.slane %v960_v12, 1  ;;  %v967_v20 = vshll.u32 %v8112_v13, 16  ;;  %v7654_v35 = vld [vmem:[%s10073_s6 + $0xa0] sm:$0xff]   ;;  %v8171_v46 = vld [vmem:[%s8038_s18 + $0x5c] ss:$0 sps:$4 sm:$0x11]  }
  0x23   : > { %6256 = vmatprep.subr.bf16.mxu1 %v7614_v21  ;;  %1502 = vmatprep.mubr.bf16.mxu0 %v927_v51  ;;  %v958_v18 = vor.u32 %v957_v15, %v953_v11  ;;  %v8129_v21 = vld [vmem:[%s8038_s18 + $0x48] sm:$0xff]   ;;  %v991_v47 = vshll.u32 %v8159_v41, 16  ;;  %v989_v52 = vshrl.u32 %v8159_v41, 16  ;;  %v996_v54 = vshll.u32 %v8171_v46, 16  ;;  %v8184_v55 = vld [vmem:[%s8038_s18 + $0x60] sm:$0xff]   ;;  %v7665_v62 = vld [vmem:[%s10073_s6 + $0x170] sm:$0xff]  }
  0x24   : > { %v8115_v14 = vsel %vm903_vm0, %v946_v9, %v950_v4  ;;  %v977_v36 = vshrl.u32 %v8129_v21, 16  ;;  %v7660_v49 = vld [vmem:[%s10073_s6 + $0xa8] sm:$0xff]   ;;  %v7666_v63 = vld [vmem:[%s10073_s6 + $0xb0] sm:$0xff]   ;;  %v1001_v3 = vshrl.u32 %v8184_v55, 16  ;;  %v7671_v9 = vld [vmem:[%s10073_s6 + $0x178] sm:$0xff]  }
  0x25   : > { %6121 = vmatpush3.bf16.msra.mxu0 %v7615_v22  ;;  %v8132_v22 = vsel %vm903_vm0, %v958_v18, %v962_v19  ;;  %v993_v53 = vrot.slane %v991_v47, 1  ;;  %v998_v60 = vrot.slane %v996_v54, 1  ;;  %v8202_v1 = vld [vmem:[%s8038_s18 + $0x6c] sm:$0xff]   ;;  %v7672_v10 = vld [vmem:[%s10073_s6 + $0xb8] sm:$0xff]   ;;  %v1116_v18 = vrot.slane %v8044_v32, 1 }
  0x26   : > { %6257 = vmatpush3.bf16.msra.mxu1 %v7616_v23  ;;  %6122 = vmatprep.subr.bf16.mxu0 %v7617_v24  ;;  %v965_v23 = vshrl.u32 %v8112_v13, 16  ;;  %v969_v24 = vrot.slane %v967_v20, 1  ;;  %v1015_v12 = vshll.u32 %v8202_v1, 16  ;;  %v1117_v19 = vrot.slane %v8047_v33, 1 }
  0x27   : > { %6258 = vmatprep.subr.bf16.mxu1 %v7618_v25  ;;  %v972_v25 = vshll.u32 %v8122_v17, 16  ;;  %v994_v59 = vor.u32 %v993_v53, %v989_v52  ;;  %v1113_v20 = vrot.slane %v8053_v37, 1  ;;  %v8282_v52 = vld [vmem:[%s8038_s18 + $0x98] ss:$0 sps:$4 sm:$0x11]  }
  0x29   : > { %6123 = vmatpush3.bf16.msra.mxu0 %v7619_v26  ;;  %v7647_v26 = vld [vmem:[%s10073_s6 + $0x158] sm:$0xff]   ;;  %v8206_v2 = vsel %vm903_vm0, %v994_v59, %v998_v60 }
  0x2a   : > { %6259 = vmatpush3.bf16.msra.mxu1 %v7620_v27  ;;  %6124 = vmatprep.subr.bf16.mxu0 %v7621_v28  ;;  %v7648_v27 = vld [vmem:[%s10073_s6 + $0x98] sm:$0xff]   ;;  %v8145_v28 = vld [vmem:[%s8038_s18 + $0x50] ss:$0 sps:$4 sm:$0x11]  }
  0x2b   : > { %6260 = vmatprep.subr.bf16.mxu1 %v7622_v29  ;;  %v979_v29 = vshll.u32 %v8129_v21, 16  ;;  %v984_v40 = vshll.u32 %v8145_v28, 16 }
  0x2d   : > { %6125 = vmatpush3.bf16.msra.mxu0 %v7623_v30  ;;  %v970_v30 = vor.u32 %v969_v24, %v965_v23  ;;  %v8235_v23 = vld [vmem:[%s8038_s18 + $0x78] sm:$0xff]   ;;  %v1114_v24 = vrot.slane %v8056_v38, 1 }
  0x2e   : > { %6261 = vmatpush3.bf16.msra.mxu1 %v7624_v31  ;;  %6926 = vmatprep.subr.bf16.mxu0 %v7629_v39  ;;  %v974_v31 = vrot.slane %v972_v25, 1  ;;  %v7675_v25 = vld [vmem:[%s10073_s6 + $0x1c0] sm:$0xff]  }
  0x2f   : > { %6974 = vmatprep.subr.bf16.mxu1 %v7630_v45  ;;  %v8249_v33 = vsel %vm1112_vm1, %v1113_v20, %v1114_v24  ;;  %v8318_v24 = vld [vmem:[%s8038_s18 + $0xb4] sm:$0xff]  }
  0x30   : > { %1503 = vmatmul.mubr.bf16.vlgmr.msra.gmra.mrb[0].mxu0 %v8044_v32  ;;  %v8162_v42 = vsel %vm903_vm0, %v970_v30, %v974_v31  ;;  %v8259_v30 = vld [vmem:[%s8038_s18 + $0x80] ss:$0 sps:$4 sm:$0x11]   ;;  %v1027_v31 = vshll.u32 %v8235_v23, 16 }
  0x31   : > { %6927 = vmatpush3.bf16.msra.mxu0 %v7629_v39  ;;  %1969 = vmatmul.mubr.bf16.vlgmr.msra.gmra.mrb[0].mxu1 %v8053_v37  ;;  %v981_v39 = vrot.slane %v979_v29, 1  ;;  %v8246_v29 = vsel %vm1112_vm1, %v1116_v18, %v1117_v19  ;;  %v8254_v37 = vld [vmem:[%s10073_s6 + $0x200] sm:$0xff]  }
  0x32   : > { %6928 = vmatprep.subr.bf16.mxu0 %v7635_v58  ;;  %6975 = vmatpush3.bf16.msra.mxu1 %v7630_v45  ;;  %v986_v45 = vrot.slane %v984_v40, 1  ;;  %v1029_v40 = vrot.slane %v1027_v31, 1 }
  0x33   : > { %1976 = vmatprep.mubr.bf16.mxu1 %v927_v51  ;;  %6976 = vmatprep.subr.bf16.mxu1 %v7636_v61  ;;  %v982_v44 = vor.u32 %v981_v39, %v977_v36  ;;  %v8267_v36 = vld [vmem:[%s8038_s18 + $0x84] sm:$0xff]  }
  0x34   : > { %1510 = vmatprep.mubr.bf16.mxu0 %v8099_v6  ;;  %v1037_v53 = vshrl.u32 %v8267_v36, 16 }
  0x35   : > { %6929 = vmatpush3.bf16.msra.mxu0 %v7635_v58  ;;  %v8179_v51 = vsel %vm903_vm0, %v982_v44, %v986_v45  ;;  %v8189_v58 = vld [vmem:[%s8038_s18 + $0x68] ss:$0 sps:$4 sm:$0x11]   ;;  %v8274_v44 = vld [vmem:[%s8038_s18 + $0x8c] ss:$0 sps:$4 sm:$0x11]  }
  0x36   : > { %6930 = vmatprep.subr.bf16.mxu0 %v7641_v8  ;;  %6977 = vmatpush3.bf16.msra.mxu1 %v7636_v61  ;;  %v1003_v61 = vshll.u32 %v8184_v55, 16  ;;  %v1008_v0 = vshll.u32 %v8189_v58, 16  ;;  %v1044_v54 = vshll.u32 %v8274_v44, 16 }
  0x37   : > { %6978 = vmatprep.subr.bf16.mxu1 %v7642_v16 }
  0x38   : > { %1511 = vmatmul.mubr.bf16.gmra.mrb[4].mxu0 %v8068_v48  ;;  %v1005_v4 = vrot.slane %v1003_v61, 1  ;;  %v1010_v11 = vrot.slane %v1008_v0, 1  ;;  %v8290_v61 = vld [vmem:[%s8038_s18 + $0x90] sm:$0xff]   ;;  %v1046_v0 = vrot.slane %v1044_v54, 1  ;;  %v1085_v54 = vshrl.u32 %v8318_v24, 16 }
  0x39   : > { %1518 = vmatprep.mubr.bf16.mxu0 %v8115_v14  ;;  %6931 = vmatpush3.bf16.msra.mxu0 %v7641_v8  ;;  %v8210_v8 = vld [vmem:[%s8038_s18 + $0x74] ss:$0 sps:$4 sm:$0x11]   ;;  %v1049_v18 = vshrl.u32 %v8290_v61, 16 }
  0x3a   : > { %1977 = vmatmul.mubr.bf16.gmra.mrb[4].mxu1 %v8044_v32  ;;  %6932 = vmatprep.subr.bf16.mxu0 %v7647_v26  ;;  %v1006_v15 = vor.u32 %v1005_v4, %v1001_v3  ;;  %v1017_v32 = vrot.slane %v1015_v12, 1  ;;  %v1051_v4 = vshll.u32 %v8290_v61, 16 }
  0x3b   : > { %1984 = vmatprep.mubr.bf16.mxu1 %v8099_v6  ;;  %6979 = vmatpush3.bf16.msra.mxu1 %v7642_v16  ;;  %v1020_v16 = vshll.u32 %v8210_v8, 16 }
  0x3c   : > { %6980 = vmatprep.subr.bf16.mxu1 %v7648_v27  ;;  %v1053_v19 = vrot.slane %v1051_v4, 1 }
  0x3d   : > { %6933 = vmatpush3.bf16.msra.mxu0 %v7647_v26  ;;  %v8242_v26 = vsel %vm903_vm0, %v1006_v15, %v1010_v11  ;;  %v1022_v38 = vrot.slane %v1020_v16, 1  ;;  %v8306_v11 = vld [vmem:[%s8038_s18 + $0xa8] sm:$0xff]   ;;  %v8310_v15 = vld [vmem:[%s8038_s18 + $0xb0] ss:$0 sps:$4 sm:$0x11]  }
  0x3e   : > { %6934 = vmatprep.subr.bf16.mxu0 %v7653_v34  ;;  %v1075_v20 = vshll.u32 %v8306_v11, 16  ;;  %v1054_v31 = vor.u32 %v1053_v19, %v1049_v18  ;;  %v8352_v18 = vld [vmem:[%s8226_s29 + $0x8] ss:$0 sps:$4 sm:$0x11]  }
  0x3f   : > { %6981 = vmatpush3.bf16.msra.mxu1 %v7648_v27  ;;  %v1013_v27 = vshrl.u32 %v8202_v1, 16 }
  0x40   : > { %1519 = vmatmul.mubr.bf16.gmra.mrb[8].mxu0 %v8078_v56  ;;  %6982 = vmatprep.subr.bf16.mxu1 %v7654_v35 }
  0x41   : > { %1526 = vmatprep.mubr.bf16.mxu0 %v8132_v22  ;;  %6935 = vmatpush3.bf16.msra.mxu0 %v7653_v34  ;;  %v1018_v34 = vor.u32 %v1017_v32, %v1013_v27 }
  0x42   : > { %1985 = vmatmul.mubr.bf16.gmra.mrb[8].mxu1 %v8068_v48  ;;  %6936 = vmatprep.subr.bf16.mxu0 %v7659_v43 }
  0x43   : > { %1992 = vmatprep.mubr.bf16.mxu1 %v8115_v14  ;;  %6983 = vmatpush3.bf16.msra.mxu1 %v7654_v35  ;;  %v1025_v35 = vshrl.u32 %v8235_v23, 16  ;;  %v8270_v39 = vsel %vm903_vm0, %v1018_v34, %v1022_v38  ;;  %v1073_v34 = vshrl.u32 %v8306_v11, 16 }
  0x44   : > { %6984 = vmatprep.subr.bf16.mxu1 %v7660_v49 }
  0x45   : > { %6937 = vmatpush3.bf16.msra.mxu0 %v7659_v43  ;;  %v1032_v43 = vshll.u32 %v8259_v30, 16  ;;  %v1030_v45 = vor.u32 %v1029_v40, %v1025_v35  ;;  %v1080_v35 = vshll.u32 %v8310_v15, 16  ;;  %v1077_v40 = vrot.slane %v1075_v20, 1 }
  0x46   : > { %6938 = vmatprep.subr.bf16.mxu0 %v7665_v62 }
  0x47   : > { %6985 = vmatpush3.bf16.msra.mxu1 %v7660_v49  ;;  %v1034_v47 = vrot.slane %v1032_v43, 1  ;;  %v1039_v49 = vshll.u32 %v8267_v36, 16  ;;  %v1087_v43 = vshll.u32 %v8318_v24, 16 }
  0x48   : > { %1527 = vmatmul.mubr.bf16.gmra.mrb[12].mxu0 %v8096_v5  ;;  %6986 = vmatprep.subr.bf16.mxu1 %v7666_v63 }
  0x49   : > { %1534 = vmatprep.mubr.bf16.mxu0 %v8162_v42  ;;  %6939 = vmatpush3.bf16.msra.mxu0 %v7665_v62  ;;  %v8287_v59 = vsel %vm903_vm0, %v1030_v45, %v1034_v47  ;;  %v1041_v60 = vrot.slane %v1039_v49, 1  ;;  %v8293_v62 = vld [vmem:[%s8038_s18 + $0xa4] ss:$0 sps:$4 sm:$0x11]  }
  0x4a   : > { %1993 = vmatmul.mubr.bf16.gmra.mrb[12].mxu1 %v8078_v56  ;;  %6940 = vmatprep.subr.bf16.mxu0 %v7671_v9  ;;  %v1068_v12 = vshll.u32 %v8293_v62, 16  ;;  %v8329_v45 = vld [vmem:[%s8038_s18 + $0xbc] ss:$0 sps:$4 sm:$0x11]  }
  0x4b   : > { %2000 = vmatprep.mubr.bf16.mxu1 %v8132_v22  ;;  %6987 = vmatpush3.bf16.msra.mxu1 %v7666_v63  ;;  %v8296_v63 = vld [vmem:[%s8038_s18 + $0x9c] sm:$0xff]   ;;  %v1042_v3 = vor.u32 %v1041_v60, %v1037_v53  ;;  %v1082_v53 = vrot.slane %v1080_v35, 1  ;;  %v1089_v60 = vrot.slane %v1087_v43, 1  ;;  %v1120_v43 = vrot.slane %v8071_v50, 1 }
  0x4c   : > { %6988 = vmatprep.subr.bf16.mxu1 %v7672_v10  ;;  %v1061_v27 = vshrl.u32 %v8296_v63, 16  ;;  %v1070_v38 = vrot.slane %v1068_v12, 1 }
  0x4d   : > { %6941 = vmatpush3.bf16.msra.mxu0 %v7671_v9  ;;  %v1056_v9 = vshll.u32 %v8282_v52, 16  ;;  %v8313_v16 = vsel %vm903_vm0, %v1042_v3, %v1046_v0  ;;  %v1092_v0 = vshll.u32 %v8329_v45, 16  ;;  %v8341_v3 = vld [vmem:[%s8226_s29] sm:$0xff]   ;;  %v1090_v20 = vor.u32 %v1089_v60, %v1085_v54 }
  0x4e   : > { %6382 = vmatprep.subr.bf16.mxu0 %v7675_v25  ;;  %v1189_v12 = vshll.u32 %v8341_v3, 16  ;;  %v1126_v60 = vrot.slane %v8102_v7, 1  ;;  %v7683_v7 = vld [vmem:[%s10073_s6 + $0x210] sm:$0xff]  }
  0x4f   : > { %6989 = vmatpush3.bf16.msra.mxu1 %v7672_v10  ;;  %v1063_v10 = vshll.u32 %v8296_v63, 16  ;;  %v1058_v25 = vrot.slane %v1056_v9, 1  ;;  %v1078_v9 = vor.u32 %v1077_v40, %v1073_v34  ;;  %v1119_v40 = vrot.slane %v8068_v48, 1  ;;  %v7676_v48 = vld [vmem:[%s10073_s6 + $0x180] sm:$0xff]  }
  0x50   : > { %1535 = vmatmul.mubr.bf16.gmra.mrb[16].mxu0 %v8112_v13  ;;  %7022 = vmatprep.subr.bf16.mxu1 %v8254_v37 }
  0x51   : > { %1542 = vmatprep.mubr.bf16.mxu0 %v8179_v51  ;;  %v1065_v32 = vrot.slane %v1063_v10, 1  ;;  %v8332_v47 = vsel %vm903_vm0, %v1054_v31, %v1058_v25  ;;  %v1094_v10 = vrot.slane %v1092_v0, 1  ;;  %v8355_v19 = vsel %vm903_vm0, %v1078_v9, %v1082_v53  ;;  %v7679_v0 = vld [vmem:[%s10073_s6 + $0x188] sm:$0xff]  }
  0x52   : > { %2001 = vmatmul.mubr.bf16.gmra.mrb[16].mxu1 %v8096_v5  ;;  %v1187_v25 = vshrl.u32 %v8341_v3, 16  ;;  %v1123_v53 = vrot.slane %v8081_v57, 1  ;;  %v8400_v54 = vsel %vm1112_vm1, %v1119_v40, %v1120_v43  ;;  %v1125_v57 = vrot.slane %v8096_v5, 1  ;;  %v7690_v40 = vld [vmem:[%s10073_s6 + $0x1e8] sm:$0xff]  }
  0x53   : > { %2008 = vmatprep.mubr.bf16.mxu1 %v8162_v42  ;;  %v1066_v49 = vor.u32 %v1065_v32, %v1061_v27  ;;  %v1191_v27 = vrot.slane %v1189_v12, 1  ;;  %v1194_v32 = vshll.u32 %v8352_v18, 16  ;;  %v1128_v9 = vrot.slane %v8112_v13, 1 }
  0x54   : > { %v1129_v5 = vrot.slane %v8122_v17, 1  ;;  %v7682_v17 = vld [vmem:[%s10073_s6 + $0x190] sm:$0xff]   ;;  %v1137_v43 = vrot.slane %v8184_v55, 1 }
  0x55   : > { %v8344_v4 = vsel %vm903_vm0, %v1066_v49, %v1070_v38  ;;  %v8364_v38 = vsel %vm903_vm0, %v1090_v20, %v1094_v10  ;;  %v1192_v31 = vor.u32 %v1191_v27, %v1187_v25  ;;  %v1196_v34 = vrot.slane %v1194_v32, 1  ;;  %v7681_v10 = vld [vmem:[%s10073_s6 + $0x1d0] sm:$0xff]   ;;  %v7684_v20 = vld [vmem:[%s10073_s6 + $0x1d8] sm:$0xff]   ;;  %v7689_v32 = vld [vmem:[%s10073_s6 + $0x220] sm:$0xff]  }
  0x56   : > { %v1122_v49 = vrot.slane %v8078_v56, 1  ;;  %v7678_v56 = vld [vmem:[%s10073_s6 + $0x1c8] sm:$0xff]   ;;  %v8440_v12 = vsel %vm1112_vm1, %v1128_v9, %v1129_v5  ;;  %v1134_v25 = vrot.slane %v8159_v41, 1  ;;  %v7686_v27 = vld [vmem:[%s10073_s6 + $0x218] sm:$0xff]   ;;  %v1144_v5 = vrot.slane %v8259_v30, 1  ;;  %v7701_v30 = vld [vmem:[%s10074_s7 + $0x80] sm:$0xff]  }
  0x57   : > { %v8371_v35 = vsel %vm903_vm0, %v1192_v31, %v1196_v34  ;;  %v7698_v9 = vld [vmem:[%s10073_s6 + $0x238] sm:$0xff]  }
  0x58   : > { %1543 = vmatmul.mubr.bf16.gmra.mrb[20].mxu0 %v8129_v21  ;;  %v8406_v50 = vsel %vm1112_vm1, %v1122_v49, %v1123_v53  ;;  %v7692_v49 = vld [vmem:[%s10073_s6 + $0x228] sm:$0xff]   ;;  %v1138_v53 = vrot.slane %v8189_v58, 1  ;;  %v7695_v58 = vld [vmem:[%s10073_s6 + $0x230] sm:$0xff]  }
  0x59   : > { %1550 = vmatprep.mubr.bf16.mxu0 %v8206_v2 }
  0x5a   : > { %2009 = vmatmul.mubr.bf16.gmra.mrb[20].mxu1 %v8112_v13  ;;  %v1131_v13 = vrot.slane %v8129_v21, 1 }
  0x5b   : > { %2016 = vmatprep.mubr.bf16.mxu1 %v8179_v51 }
  0x60   : > { %1551 = vmatmul.mubr.bf16.gmra.mrb[24].mxu0 %v8159_v41 }
  0x61   : > { %1558 = vmatprep.mubr.bf16.mxu0 %v8242_v26 }
  0x62   : > { %2017 = vmatmul.mubr.bf16.gmra.mrb[24].mxu1 %v8129_v21  ;;  %v7685_v21 = vld [vmem:[%s10073_s6 + $0x198] sm:$0xff]  }
  0x63   : > { %2024 = vmatprep.mubr.bf16.mxu1 %v8206_v2 }
  0x68   : > { %1559 = vmatmul.mubr.bf16.gmra.mrb[28].mxu0 %v8184_v55 }
  0x69   : > { %1566 = vmatprep.mubr.bf16.mxu0 %v8270_v39 }
  0x6a   : > { %2025 = vmatmul.mubr.bf16.gmra.mrb[28].mxu1 %v8159_v41  ;;  %v7687_v41 = vld [vmem:[%s10073_s6 + $0x1e0] sm:$0xff]  }
  0x6b   : > { %2032 = vmatprep.mubr.bf16.mxu1 %v8242_v26 }
  0x70   : > { %1567 = vmatmul.mubr.bf16.gmra.mrb[32].mxu0 %v8202_v1 }
  0x71   : > { %1574 = vmatprep.mubr.bf16.mxu0 %v8287_v59 }
  0x72   : > { %2033 = vmatmul.mubr.bf16.gmra.mrb[32].mxu1 %v8184_v55  ;;  %v1140_v55 = vrot.slane %v8202_v1, 1 }
  0x73   : > { %2040 = vmatprep.mubr.bf16.mxu1 %v8270_v39 }
  0x78   : > { %1575 = vmatmul.mubr.bf16.gmra.mrb[36].mxu0 %v8235_v23 }
  0x79   : > { %1582 = vmatprep.mubr.bf16.mxu0 %v8313_v16 }
  0x7a   : > { %2041 = vmatmul.mubr.bf16.gmra.mrb[36].mxu1 %v8202_v1  ;;  %v7694_v1 = vld [vmem:[%s10073_s6 + $0x1b0] sm:$0xff]  }
  0x7b   : > { %2048 = vmatprep.mubr.bf16.mxu1 %v8287_v59 }
  0x80   : > { %1583 = vmatmul.mubr.bf16.gmra.mrb[40].mxu0 %v8267_v36 }
  0x81   : > { %1590 = vmatprep.mubr.bf16.mxu0 %v8332_v47 }
  0x82   : > { %2049 = vmatmul.mubr.bf16.gmra.mrb[40].mxu1 %v8235_v23 }
  0x83   : > { %2056 = vmatprep.mubr.bf16.mxu1 %v8313_v16 }
  0x88   : > { %1591 = vmatmul.mubr.bf16.gmra.mrb[44].mxu0 %v8290_v61 }
  0x89   : > { %1598 = vmatprep.mubr.bf16.mxu0 %v8344_v4 }
  0x8a   : > { %2057 = vmatmul.mubr.bf16.gmra.mrb[44].mxu1 %v8267_v36 }
  0x8b   : > { %2064 = vmatprep.mubr.bf16.mxu1 %v8332_v47 }
  0x90   : > { %1599 = vmatmul.mubr.bf16.gmra.mrb[48].mxu0 %v8296_v63 }
  0x91   : > { %1606 = vmatprep.mubr.bf16.mxu0 %v8355_v19 }
  0x92   : > { %2065 = vmatmul.mubr.bf16.gmra.mrb[48].mxu1 %v8290_v61 }
  0x93   : > { %2072 = vmatprep.mubr.bf16.mxu1 %v8344_v4 }
  0x98   : > { %1607 = vmatmul.mubr.bf16.gmra.mrb[52].mxu0 %v8306_v11 }
  0x99   : > { %1614 = vmatprep.mubr.bf16.mxu0 %v8364_v38 }
  0x9a   : > { %2073 = vmatmul.mubr.bf16.gmra.mrb[52].mxu1 %v8296_v63 }
  0x9b   : > { %2080 = vmatprep.mubr.bf16.mxu1 %v8355_v19 }
  0xa0   : > { %1615 = vmatmul.mubr.bf16.gmra.mrb[56].mxu0 %v8318_v24 }
  0xa1   : > { %1622 = vmatprep.mubr.bf16.mxu0 %v8371_v35 }
  0xa2   : > { %2081 = vmatmul.mubr.bf16.gmra.mrb[56].mxu1 %v8306_v11 }
  0xa3   : > { %2088 = vmatprep.mubr.bf16.mxu1 %v8364_v38 }
  0xa8   : > { %1623 = vmatmul.mubr.bf16.gmra.mrb[60].mxu0 %v8341_v3 }
  0xa9   : > { %6942 = vmatprep.mubr.bf16.mxu0 %v8246_v29 }
  0xaa   : > { %2089 = vmatmul.mubr.bf16.gmra.mrb[60].mxu1 %v8318_v24 }
  0xab   : > { %6990 = vmatprep.mubr.bf16.mxu1 %v8249_v33  ;;  %v7680_v33 = vld [vmem:[%s10073_s6 + $0x208] sm:$0xff]  }
  0xb0   : > { %6943 = vmatmul.mubr.bf16.vlgmr.msra.gmra.mrb[64].mxu0 %v8400_v54 }
  0xb1   : > { %6383 = vmatpush3.bf16.msra.mxu0 %v7676_v48  ;;  %6946 = vmatprep.mubr.bf16.mxu0 %v8406_v50  ;;  %v7691_v48 = vld [vmem:[%s10073_s6 + $0x1a8] sm:$0xff]  }
  0xb2   : > { %6991 = vmatmul.mubr.bf16.vlgmr.msra.gmra.mrb[64].mxu1 %v8246_v29  ;;  %6384 = vmatprep.subr.bf16.mxu0 %v7678_v56  ;;  %v8433_v29 = vsel %vm1112_vm1, %v1125_v57, %v1126_v60  ;;  %v1141_v56 = vrot.slane %v8210_v8, 1  ;;  %v7693_v57 = vld [vmem:[%s10073_s6 + $0x1f0] sm:$0xff]   ;;  %v7696_v60 = vld [vmem:[%s10073_s6 + $0x1f8] sm:$0xff]  }
  0xb3   : > { %7023 = vmatpush3.bf16.msra.mxu1 %v8254_v37  ;;  %6994 = vmatprep.mubr.bf16.mxu1 %v8400_v54  ;;  %v1132_v37 = vrot.slane %v8145_v28, 1  ;;  %v1135_v28 = vrot.slane %v8171_v46, 1  ;;  %v7688_v46 = vld [vmem:[%s10073_s6 + $0x1a0] sm:$0xff]  }
  0xb4   : > { %7024 = vmatprep.subr.bf16.mxu1 %v7680_v33  ;;  %v8503_v8 = vsel %vm1112_vm1, %v1140_v55, %v1141_v56  ;;  %v7734_v55 = vld [vmem:[%s10074_s7 + $0x28] sm:$0xff]   ;;  %v7743_v56 = vld [vmem:[%s10074_s7 + $0x70] sm:$0xff]  }
  0xb5   : > { %6385 = vmatpush3.bf16.msra.mxu0 %v7679_v0  ;;  %v8465_v31 = vsel %vm1112_vm1, %v1131_v13, %v1132_v37  ;;  %v8471_v34 = vsel %vm1112_vm1, %v1134_v25, %v1135_v28  ;;  %v1143_v0 = vrot.slane %v8235_v23, 1  ;;  %v1146_v23 = vrot.slane %v8267_v36, 1  ;;  %v7699_v13 = vld [vmem:[%s10074_s7 + $0x40] sm:$0xff]  }
  0xb6   : > { %6386 = vmatprep.subr.bf16.mxu0 %v7681_v10  ;;  %v7697_v10 = vld [vmem:[%s10073_s6 + $0x1b8] sm:$0xff]   ;;  %v1150_v37 = vrot.slane %v8282_v52, 1  ;;  %v1153_v25 = vrot.slane %v8293_v62, 1  ;;  %v1155_v52 = vrot.slane %v8306_v11, 1  ;;  %v1158_v62 = vrot.slane %v8318_v24, 1 }
  0xb7   : > { %7025 = vmatpush3.bf16.msra.mxu1 %v7680_v33  ;;  %v8497_v33 = vsel %vm1112_vm1, %v1137_v43, %v1138_v53  ;;  %v1199_v11 = vrot.slane %v8341_v3, 1  ;;  %v7703_v3 = vld [vmem:[%s10074_s7 + $0x48] sm:$0xff]   ;;  %v7712_v43 = vld [vmem:[%s10074_s7 + $0x18] sm:$0xff]   ;;  %v7722_v53 = vld [vmem:[%s10074_s7 + $0x20] sm:$0xff]  }
  0xb8   : > { %6947 = vmatmul.mubr.bf16.gmra.mrb[68].mxu0 %v8433_v29  ;;  %7026 = vmatprep.subr.bf16.mxu1 %v7683_v7 }
  0xb9   : > { %6950 = vmatprep.mubr.bf16.mxu0 %v8440_v12  ;;  %6387 = vmatpush3.bf16.msra.mxu0 %v7682_v17  ;;  %v8529_v17 = vsel %vm1112_vm1, %v1143_v0, %v1144_v5 }
  0xba   : > { %6995 = vmatmul.mubr.bf16.gmra.mrb[68].mxu1 %v8406_v50  ;;  %6388 = vmatprep.subr.bf16.mxu0 %v7684_v20  ;;  %v1152_v20 = vrot.slane %v8296_v63, 1  ;;  %v1159_v63 = vrot.slane %v8329_v45, 1  ;;  %v7700_v45 = vld [vmem:[%s10074_s7] sm:$0xff]  }
  0xbb   : > { %6998 = vmatprep.mubr.bf16.mxu1 %v8433_v29  ;;  %7027 = vmatpush3.bf16.msra.mxu1 %v7683_v7  ;;  %v1147_v7 = vrot.slane %v8274_v44, 1  ;;  %v1149_v44 = vrot.slane %v8290_v61, 1  ;;  %v1156_v61 = vrot.slane %v8310_v15, 1  ;;  %v1200_v15 = vrot.slane %v8352_v18, 1  ;;  %v7809_v18 = vld [vmem:[%s8038_s18 + $0x18] sm:$0xff]  }
  0xbc   : > { %7028 = vmatprep.subr.bf16.mxu1 %v7686_v27 }
  0xbd   : > { %6389 = vmatpush3.bf16.msra.mxu0 %v7685_v21  ;;  %v8532_v36 = vsel %vm1112_vm1, %v1146_v23, %v1147_v7  ;;  %v8543_v21 = vsel %vm1112_vm1, %v1149_v44, %v1150_v37  ;;  %v8557_v28 = vsel %vm1112_vm1, %v1155_v52, %v1156_v61  ;;  %v8569_v24 = vsel %vm1112_vm1, %v1199_v11, %v1200_v15  ;;  %v7716_v44 = vld [vmem:[%s10074_s7 + $0xb8] sm:$0xff]  }
  0xbe   : > { %6390 = vmatprep.subr.bf16.mxu0 %v7687_v41  ;;  %v8560_v41 = vsel %vm1112_vm1, %v1158_v62, %v1159_v63 }
  0xbf   : > { %7029 = vmatpush3.bf16.msra.mxu1 %v7686_v27  ;;  %v8546_v27 = vsel %vm1112_vm1, %v1152_v20, %v1153_v25  ;;  %v7758_v20 = vld [vmem:[%s10074_s7 + $0x38] sm:$0xff]   ;;  %v7765_v25 = vld [vmem:[%s10074_s7 + $0x100] sm:$0xff]  }
  0xc0   : > { %6951 = vmatmul.mubr.bf16.gmra.mrb[72].mxu0 %v8465_v31  ;;  %7030 = vmatprep.subr.bf16.mxu1 %v7689_v32 }
  0xc1   : > { %6954 = vmatprep.mubr.bf16.mxu0 %v8471_v34  ;;  %6391 = vmatpush3.bf16.msra.mxu0 %v7688_v46  ;;  %v7705_v46 = vld [vmem:[%s10074_s7 + $0x90] sm:$0xff]  }
  0xc2   : > { %6999 = vmatmul.mubr.bf16.gmra.mrb[72].mxu1 %v8440_v12  ;;  %6392 = vmatprep.subr.bf16.mxu0 %v7690_v40  ;;  %v7810_v40 = vld [vmem:[%s8038_s18 + $0x24] sm:$0xff]  }
  0xc3   : > { %7002 = vmatprep.mubr.bf16.mxu1 %v8465_v31  ;;  %7031 = vmatpush3.bf16.msra.mxu1 %v7689_v32  ;;  %v7702_v32 = vld [vmem:[%s10074_s7 + $0x88] sm:$0xff]  }
  0xc4   : > { %7032 = vmatprep.subr.bf16.mxu1 %v7692_v49 }
  0xc5   : > { %6393 = vmatpush3.bf16.msra.mxu0 %v7691_v48  ;;  %v7811_v48 = vld [vmem:[%s8038_s18 + $0x30] sm:$0xff]  }
  0xc6   : > { %6394 = vmatprep.subr.bf16.mxu0 %v7693_v57 }
  0xc7   : > { %7033 = vmatpush3.bf16.msra.mxu1 %v7692_v49  ;;  %v7719_v49 = vld [vmem:[%s10074_s7 + $0x60] sm:$0xff]  }
  0xc8   : > { %6955 = vmatmul.mubr.bf16.gmra.mrb[76].mxu0 %v8497_v33  ;;  %7034 = vmatprep.subr.bf16.mxu1 %v7695_v58 }
  0xc9   : > { %6958 = vmatprep.mubr.bf16.mxu0 %v8503_v8  ;;  %6395 = vmatpush3.bf16.msra.mxu0 %v7694_v1 }
  0xca   : > { %7003 = vmatmul.mubr.bf16.gmra.mrb[76].mxu1 %v8471_v34  ;;  %6396 = vmatprep.subr.bf16.mxu0 %v7696_v60 }
  0xcb   : > { %7006 = vmatprep.mubr.bf16.mxu1 %v8497_v33  ;;  %7035 = vmatpush3.bf16.msra.mxu1 %v7695_v58 }
  0xcc   : > { %7036 = vmatprep.subr.bf16.mxu1 %v7698_v9 }
  0xcd   : > { %6397 = vmatpush3.bf16.msra.mxu0 %v7697_v10 }
  0xce   : > { %6518 = vmatprep.subr.bf16.mxu0 %v7699_v13 }
  0xcf   : > { %7037 = vmatpush3.bf16.msra.mxu1 %v7698_v9 }
  0xd0   : > { %6959 = vmatmul.mubr.bf16.gmra.mrb[80].mxu0 %v8529_v17  ;;  %7070 = vmatprep.subr.bf16.mxu1 %v7701_v30 }
  0xd1   : > { %6962 = vmatprep.mubr.bf16.mxu0 %v8532_v36 }
  0xd2   : > { %7007 = vmatmul.mubr.bf16.gmra.mrb[80].mxu1 %v8503_v8 }
  0xd3   : > { %7010 = vmatprep.mubr.bf16.mxu1 %v8529_v17 }
  0xd8   : > { %6963 = vmatmul.mubr.bf16.gmra.mrb[84].mxu0 %v8543_v21 }
  0xd9   : > { %6966 = vmatprep.mubr.bf16.mxu0 %v8546_v27 }
  0xda   : > { %7011 = vmatmul.mubr.bf16.gmra.mrb[84].mxu1 %v8532_v36 }
  0xdb   : > { %7014 = vmatprep.mubr.bf16.mxu1 %v8543_v21 }
  0xe0   : > { %6967 = vmatmul.mubr.bf16.gmra.mrb[88].mxu0 %v8557_v28 }
  0xe1   : > { %6970 = vmatprep.mubr.bf16.mxu0 %v8560_v41 }
  0xe2   : > { %7015 = vmatmul.mubr.bf16.gmra.mrb[88].mxu1 %v8546_v27 }
  0xe3   : > { %7018 = vmatprep.mubr.bf16.mxu1 %v8557_v28 }
  0xe8   : > { %6971 = vmatmul.mubr.bf16.gmra.mrb[92].mxu0 %v8569_v24 }
  0xe9   : > { %2483 = vmatprep.mubr.bf16.mxu0 %v8099_v6  ;;  %v7704_v6 = vld [vmem:[%s10074_s7 + $0x8] sm:$0xff]  }
  0xea   : > { %7019 = vmatmul.mubr.bf16.gmra.mrb[92].mxu1 %v8560_v41 }
  0xeb   : > { %7038 = vmatprep.mubr.bf16.mxu1 %v8400_v54  ;;  %v7707_v54 = vld [vmem:[%s10074_s7 + $0x50] sm:$0xff]  }
  0xf0   : > { %2484 = vmatmul.mubr.bf16.vlgmr.msra.gmra.mrb[96].mxu0 %v7809_v18 }
  0xf1   : > { %6519 = vmatpush3.bf16.msra.mxu0 %v7700_v45  ;;  %2491 = vmatprep.mubr.bf16.mxu0 %v8115_v14  ;;  %v7708_v14 = vld [vmem:[%s10074_s7 + $0x10] sm:$0xff]  }
  0xf2   : > { %7039 = vmatmul.mubr.bf16.vlgmr.msra.gmra.mrb[64].mxu1 %v8406_v50  ;;  %6520 = vmatprep.subr.bf16.mxu0 %v7703_v3  ;;  %v7711_v50 = vld [vmem:[%s10074_s7 + $0x58] sm:$0xff]  }
  0xf3   : > { %7071 = vmatpush3.bf16.msra.mxu1 %v7701_v30  ;;  %7042 = vmatprep.mubr.bf16.mxu1 %v8433_v29  ;;  %v7706_v29 = vld [vmem:[%s10074_s7 + $0x98] sm:$0xff]  }
  0xf4   : > { %7072 = vmatprep.subr.bf16.mxu1 %v7702_v32  ;;  %v7812_v30 = vld [vmem:[%s8038_s18 + $0x3c] sm:$0xff]  }
  0xf5   : > { %6521 = vmatpush3.bf16.msra.mxu0 %v7704_v6 }
  0xf6   : > { %6522 = vmatprep.subr.bf16.mxu0 %v7707_v54 }
  0xf7   : > { %7073 = vmatpush3.bf16.msra.mxu1 %v7702_v32  ;;  %v7813_v32 = vld [vmem:[%s8038_s18 + $0x48] sm:$0xff]  }
  0xf8   : > { %2492 = vmatmul.mubr.bf16.gmra.mrb[100].mxu0 %v7810_v40  ;;  %7074 = vmatprep.subr.bf16.mxu1 %v7705_v46 }
  0xf9   : > { %2499 = vmatprep.mubr.bf16.mxu0 %v8132_v22  ;;  %6523 = vmatpush3.bf16.msra.mxu0 %v7708_v14  ;;  %v7709_v22 = vld [vmem:[%s10074_s7 + $0xa0] sm:$0xff]  }
  0xfa   : > { %7043 = vmatmul.mubr.bf16.gmra.mrb[68].mxu1 %v8440_v12  ;;  %6524 = vmatprep.subr.bf16.mxu0 %v7711_v50  ;;  %v7731_v12 = vld [vmem:[%s10074_s7 + $0x68] sm:$0xff]  }
  0xfb   : > { %7046 = vmatprep.mubr.bf16.mxu1 %v8465_v31  ;;  %7075 = vmatpush3.bf16.msra.mxu1 %v7705_v46  ;;  %v7710_v31 = vld [vmem:[%s10074_s7 + $0xa8] sm:$0xff]  }
  0xfc   : > { %7076 = vmatprep.subr.bf16.mxu1 %v7706_v29 }
  0xfd   : > { %6525 = vmatpush3.bf16.msra.mxu0 %v7712_v43 }
  0xfe   : > { %6526 = vmatprep.subr.bf16.mxu0 %v7719_v49 }
  0xff   : > { %7077 = vmatpush3.bf16.msra.mxu1 %v7706_v29 }
 0x100   : > { %2500 = vmatmul.mubr.bf16.gmra.mrb[104].mxu0 %v7811_v48  ;;  %7078 = vmatprep.subr.bf16.mxu1 %v7709_v22 }
 0x101   : > { %2507 = vmatprep.mubr.bf16.mxu0 %v8162_v42  ;;  %6527 = vmatpush3.bf16.msra.mxu0 %v7722_v53  ;;  %v7713_v42 = vld [vmem:[%s10074_s7 + $0xb0] sm:$0xff]  }
 0x102   : > { %7047 = vmatmul.mubr.bf16.gmra.mrb[72].mxu1 %v8471_v34  ;;  %6528 = vmatprep.subr.bf16.mxu0 %v7731_v12  ;;  %v7746_v34 = vld [vmem:[%s10074_s7 + $0x30] sm:$0xff]  }
 0x103   : > { %v6126_v57 = vpop.f32.mrb[0].mxu0  ;;  %7050 = vmatprep.mubr.bf16.mxu1 %v8497_v33  ;;  %7079 = vmatpush3.bf16.msra.mxu1 %v7709_v22  ;;  %v7755_v33 = vld [vmem:[%s10074_s7 + $0x78] sm:$0xff]  }
 0x104   : > { %v6127_v58 = vpop.f32.mrb[1].mxu0  ;;  %7080 = vmatprep.subr.bf16.mxu1 %v7710_v31  ;;  %v6262_v1 = vpop.f32.mrb[0].mxu1 }
 0x105   : > { %v6129_v60 = vpop.f32.mrb[2].mxu0  ;;  %6529 = vmatpush3.bf16.msra.mxu0 %v7734_v55  ;;  %v8644_v0 = vadd.f32 %v6127_v58, %v6126_v57  ;;  %v6263_v9 = vpop.f32.mrb[1].mxu1 }
 0x106   : > { %v6130_v5 = vpop.f32.mrb[3].mxu0  ;;  %6530 = vmatprep.subr.bf16.mxu0 %v7743_v56  ;;  %v8649_v10 = vadd.f32 %v6263_v9, %v6262_v1  ;;  %v6265_v23 = vpop.f32.mrb[2].mxu1  ;;  %v8712_v9 = vld [vmem:[%s8397_s27] sm:$0xff]  }
 0x107   : > { %7081 = vmatpush3.bf16.msra.mxu1 %v7710_v31  ;;  %v8651_v7 = vadd.f32 %v6130_v5, %v6129_v60  ;;  %v6266_v13 = vpop.f32.mrb[3].mxu1  ;;  %v8703_v60 = vld [vmem:[%s8383_s24] sm:$0xff]   ;;  %v8715_v5 = vld [vmem:[%s8397_s27 + $0x8] ss:$0 sps:$4 sm:$0x11]  }
 0x108   : > { %2508 = vmatmul.mubr.bf16.gmra.mrb[108].mxu0 %v7812_v30  ;;  %7082 = vmatprep.subr.bf16.mxu1 %v7713_v42  ;;  %v8657_v37 = vadd.f32 %v6266_v13, %v6265_v23  ;;  %v1225_v13 = vrot.slane %v8703_v60, 1 }
 0x109   : > { %2515 = vmatprep.mubr.bf16.mxu0 %v8179_v51  ;;  %6531 = vmatpush3.bf16.msra.mxu0 %v7746_v34  ;;  %v8671_v51 = vld [vmem:[%s10074_s7 + $0x140] sm:$0xff]  }
 0x10a   : > { %7051 = vmatmul.mubr.bf16.gmra.mrb[76].mxu1 %v8503_v8  ;;  %6532 = vmatprep.subr.bf16.mxu0 %v7755_v33 }
 0x10b   : > { %v6132_v52 = vpop.f32.mrb[4].mxu0  ;;  %7054 = vmatprep.mubr.bf16.mxu1 %v8529_v17  ;;  %7083 = vmatpush3.bf16.msra.mxu1 %v7713_v42 }
 0x10c   : > { %v6133_v61 = vpop.f32.mrb[5].mxu0  ;;  %7084 = vmatprep.subr.bf16.mxu1 %v7716_v44 }
 0x10d   : > { %v6268_v62 = vpop.f32.mrb[4].mxu1  ;;  %v6135_v63 = vpop.f32.mrb[6].mxu0  ;;  %6533 = vmatpush3.bf16.msra.mxu0 %v7758_v20  ;;  %v8673_v8 = vadd.f32 %v6133_v61, %v6132_v52  ;;  %v3211_v20 = vrot.slane %v8712_v9, 1 }
 0x10e   : > { %v6269_v11 = vpop.f32.mrb[5].mxu1  ;;  %v6136_v15 = vpop.f32.mrb[7].mxu0  ;;  %6654 = vmatprep.subr.bf16.mxu0 %v7765_v25  ;;  %v3212_v25 = vrot.slane %v8715_v5, 1 }
 0x10f   : > { %v8675_v45 = vadd.f32 %v6269_v11, %v6268_v62  ;;  %v6271_v17 = vpop.f32.mrb[6].mxu1  ;;  %7085 = vmatpush3.bf16.msra.mxu1 %v7716_v44  ;;  %v8677_v3 = vadd.f32 %v6136_v15, %v6135_v63  ;;  %v8739_v15 = vld [vmem:[%s8397_s27 + $0xc] sm:$0xff]  }
 0x110   : > { %v6272_v18 = vpop.f32.mrb[7].mxu1  ;;  %2516 = vmatmul.mubr.bf16.gmra.mrb[112].mxu0 %v7813_v32  ;;  %7118 = vmatprep.subr.bf16.mxu1 %v8671_v51 }
 0x111   : > { %v8681_v6 = vadd.f32 %v6272_v18, %v6271_v17  ;;  %2523 = vmatprep.mubr.bf16.mxu0 %v8206_v2  ;;  %v7814_v2 = vld [vmem:[%s8038_s18 + $0x54] sm:$0xff]  }
 0x112   : > { %7055 = vmatmul.mubr.bf16.gmra.mrb[80].mxu1 %v8532_v36  ;;  %v8742_v17 = vld [vmem:[%s8397_s27 + $0x14] ss:$0 sps:$4 sm:$0x11]  }
 0x113   : > { %v6138_v54 = vpop.f32.mrb[8].mxu0  ;;  %7058 = vmatprep.mubr.bf16.mxu1 %v8543_v21 }
 0x114   : > { %v6139_v46 = vpop.f32.mrb[9].mxu0 }
 0x115   : > { %v6274_v14 = vpop.f32.mrb[8].mxu1  ;;  %v6141_v50 = vpop.f32.mrb[10].mxu0  ;;  %v8686_v40 = vadd.f32 %v6139_v46, %v6138_v54  ;;  %v7816_v54 = vld [vmem:[%s8038_s18 + $0x6c] sm:$0xff]   ;;  %v3213_v46 = vsel %vm1112_vm1, %v3211_v20, %v3212_v25  ;;  %v7817_v20 = vld [vmem:[%s8038_s18 + $0x78] sm:$0xff]  }
 0x116   : > { %v6275_v29 = vpop.f32.mrb[9].mxu1  ;;  %v6142_v43 = vpop.f32.mrb[11].mxu0 }
 0x117   : > { %v8688_v49 = vadd.f32 %v6275_v29, %v6274_v14  ;;  %v6277_v22 = vpop.f32.mrb[10].mxu1  ;;  %v8690_v53 = vadd.f32 %v6142_v43, %v6141_v50  ;;  %v8749_v14 = vld [vmem:[%s8397_s27 + $0x18] sm:$0xff]   ;;  %v8752_v50 = vld [vmem:[%s8397_s27 + $0x20] ss:$0 sps:$4 sm:$0x11]  }
 0x118   : > { %v6278_v12 = vpop.f32.mrb[11].mxu1  ;;  %2524 = vmatmul.mubr.bf16.gmra.mrb[116].mxu0 %v7814_v2 }
 0x119   : > { %v8693_v36 = vadd.f32 %v6278_v12, %v6277_v22  ;;  %2531 = vmatprep.mubr.bf16.mxu0 %v8242_v26  ;;  %v8706_v26 = vld [vmem:[%s8383_s24 + $0x8] ss:$0 sps:$4 sm:$0x11]   ;;  %v3214_v22 = vrot.slane %v8739_v15, 1  ;;  %v3215_v12 = vrot.slane %v8742_v17, 1  ;;  %s9295_s24 = scalar_lea.vmem %s10072_s5, %s5977_s19 }
 0x11a   : > { %7059 = vmatmul.mubr.bf16.gmra.mrb[84].mxu1 %v8546_v27  ;;  %v1226_v30 = vrot.slane %v8706_v26, 1 }
 0x11b   : > { %v6144_v21 = vpop.f32.mrb[12].mxu0  ;;  %7062 = vmatprep.mubr.bf16.mxu1 %v8557_v28  ;;  %v7815_v28 = vld [vmem:[%s8038_s18 + $0x60] sm:$0xff]  }
 0x11c   : > { %v6145_v48 = vpop.f32.mrb[13].mxu0  ;;  %v1227_v11 = vsel %vm1112_vm1, %v1225_v13, %v1226_v30  ;;  %v8772_v13 = vld [vmem:[%s8397_s27 + $0x2c] ss:$0 sps:$4 sm:$0x11]  }
 0x11d   : > { %v6280_v31 = vpop.f32.mrb[12].mxu1  ;;  %v6147_v55 = vpop.f32.mrb[14].mxu0  ;;  %v8698_v56 = vadd.f32 %v6145_v48, %v6144_v21  ;;  %v3217_v21 = vrot.slane %v8749_v14, 1  ;;  %v3218_v48 = vrot.slane %v8752_v50, 1 }
 0x11e   : > { %v6281_v57 = vpop.f32.mrb[13].mxu1  ;;  %v6148_v58 = vpop.f32.mrb[15].mxu0 }
 0x11f   : > { %v8700_v42 = vadd.f32 %v6281_v57, %v6280_v31  ;;  %v6283_v1 = vpop.f32.mrb[14].mxu1  ;;  %v8708_v27 = vadd.f32 %v6148_v58, %v6147_v55  ;;  %v8778_v25 = vsel %vm1112_vm1, %v3217_v21, %v3218_v48 }
 0x120   : > { %v6284_v34 = vpop.f32.mrb[15].mxu1  ;;  %2532 = vmatmul.mubr.bf16.gmra.mrb[120].mxu0 %v7815_v28  ;;  %v8766_v28 = vsel %vm1112_vm1, %v3214_v22, %v3215_v12  ;;  %10132 = vst [vmem:[#allocation9_spill] sm:$0xff] %v8778_v25 }
 0x121   : > { %v8717_v33 = vadd.f32 %v6284_v34, %v6283_v1  ;;  %2539 = vmatprep.mubr.bf16.mxu0 %v8270_v39 }
 0x122   : > { %7063 = vmatmul.mubr.bf16.gmra.mrb[88].mxu1 %v8560_v41 }
 0x123   : > { %v6150_v23 = vpop.f32.mrb[16].mxu0  ;;  %7066 = vmatprep.mubr.bf16.mxu1 %v8569_v24 }
 0x124   : > { %v6151_v44 = vpop.f32.mrb[17].mxu0 }
 0x125   : > { %v6286_v39 = vpop.f32.mrb[16].mxu1  ;;  %v6153_v41 = vpop.f32.mrb[18].mxu0  ;;  %v8733_v24 = vadd.f32 %v6151_v44, %v6150_v23  ;;  %v8769_v23 = vld [vmem:[%s8397_s27 + $0x24] sm:$0xff]  }
 0x126   : > { %v6287_v52 = vpop.f32.mrb[17].mxu1  ;;  %v6154_v61 = vpop.f32.mrb[19].mxu0 }
 0x127   : > { %10125 = vst [vmem:[#allocation2_spill] sm:$0xff] %v8733_v24  ;;  %v8735_v62 = vadd.f32 %v6287_v52, %v6286_v39  ;;  %v6289_v63 = vpop.f32.mrb[18].mxu1  ;;  %v8744_v18 = vadd.f32 %v6154_v61, %v6153_v41  ;;  %v7728_v39 = vld [vmem:[%s10074_s7 + $0x148] sm:$0xff]   ;;  %v8784_v41 = vld [vmem:[%s8397_s27 + $0x30] sm:$0xff]  }
 0x128   : > { %v6290_v32 = vpop.f32.mrb[19].mxu1  ;;  %2540 = vmatmul.mubr.bf16.gmra.mrb[124].mxu0 %v7816_v54  ;;  %v8787_v52 = vld [vmem:[%s8397_s27 + $0x38] ss:$0 sps:$4 sm:$0x11]  }
 0x129   : > { %10126 = vst [vmem:[#allocation3_spill] sm:$0xff] %v8735_v62  ;;  %10127 = vst [vmem:[#allocation4_spill] sm:$0xff] %v8744_v18  ;;  %v8754_v29 = vadd.f32 %v6290_v32, %v6289_v63  ;;  %2547 = vmatprep.mubr.bf16.mxu0 %v8287_v59  ;;  %v3221_v32 = vrot.slane %v8772_v13, 1 }
 0x12a   : > { %7067 = vmatmul.mubr.bf16.gmra.mrb[92].mxu1 %v1227_v11  ;;  %v3220_v11 = vrot.slane %v8769_v23, 1 }
 0x12b   : > { %10128 = vst [vmem:[#allocation5_spill] sm:$0xff] %v8754_v29  ;;  %v6156_v43 = vpop.f32.mrb[20].mxu0  ;;  %7086 = vmatprep.mubr.bf16.mxu1 %v3213_v46  ;;  %v3223_v46 = vrot.slane %v8784_v41, 1  ;;  %v8850_v29 = vld [vmem:[%s8397_s27 + $0x54] sm:$0xff]  }
 0x12c   : > { %v6157_v2 = vpop.f32.mrb[21].mxu0 }
 0x12d   : > { %v6292_v31 = vpop.f32.mrb[20].mxu1  ;;  %v6159_v55 = vpop.f32.mrb[22].mxu0  ;;  %v8761_v59 = vadd.f32 %v6157_v2, %v6156_v43  ;;  %v7735_v43 = vld [vmem:[%s10074_s7 + $0x150] sm:$0xff]  }
 0x12e   : > { %v6293_v57 = vpop.f32.mrb[21].mxu1  ;;  %v6160_v58 = vpop.f32.mrb[23].mxu0 }
 0x12f   : > { %10129 = vst [vmem:[#allocation6_spill] sm:$0xff] %v8761_v59  ;;  %v8763_v1 = vadd.f32 %v6293_v57, %v6292_v31  ;;  %v6295_v34 = vpop.f32.mrb[22].mxu1  ;;  %v8774_v30 = vadd.f32 %v6160_v58, %v6159_v55  ;;  %v8807_v55 = vsel %vm1112_vm1, %v3220_v11, %v3221_v32  ;;  %v8810_v57 = vld [vmem:[%s8397_s27 + $0x3c] sm:$0xff]   ;;  %v8813_v58 = vld [vmem:[%s8397_s27 + $0x44] ss:$0 sps:$4 sm:$0x11]  }
 0x130   : > { %v6296_v44 = vpop.f32.mrb[23].mxu1  ;;  %2548 = vmatmul.mubr.bf16.gmra.mrb[128].mxu0 %v7817_v20  ;;  %10136 = vst [vmem:[#allocation13_spill] sm:$0xff] %v8807_v55  ;;  %v7818_v20 = vld [vmem:[%s8038_s18 + $0x84] sm:$0xff]   ;;  %v7822_v59 = vld [vmem:[%s8038_s18 + $0xb4] sm:$0xff]  }
 0x131   : > { %10130 = vst [vmem:[#allocation7_spill] sm:$0xff] %v8763_v1  ;;  %10131 = vst [vmem:[#allocation8_spill] sm:$0xff] %v8774_v30  ;;  %v8789_v61 = vadd.f32 %v6296_v44, %v6295_v34  ;;  %2555 = vmatprep.mubr.bf16.mxu0 %v8313_v16  ;;  %v3224_v16 = vrot.slane %v8787_v52, 1  ;;  %v7819_v30 = vld [vmem:[%s8038_s18 + $0x90] sm:$0xff]  }
 0x132   : > { %7087 = vmatmul.mubr.bf16.vlgmr.msra.gmra.mrb[64].mxu1 %v8766_v28  ;;  %v8895_v1 = vld [vmem:[%s8397_s27 + $0x74] ss:$0 sps:$4 sm:$0x11]  }
 0x133   : > { %10133 = vst [vmem:[#allocation10_spill] sm:$0xff] %v8789_v61  ;;  %v6162_v63 = vpop.f32.mrb[24].mxu0  ;;  %7119 = vmatpush3.bf16.msra.mxu1 %v8671_v51  ;;  %7090 = vmatprep.mubr.bf16.mxu1 %v8778_v25  ;;  %v8853_v61 = vld [vmem:[%s8397_s27 + $0x5c] ss:$0 sps:$4 sm:$0x11]   ;;  %10154 = vst [vmem:[#allocation31_spill] sm:$0xff] %v8895_v1 }
 0x134   : > { %v6163_v54 = vpop.f32.mrb[25].mxu0  ;;  %7120 = vmatprep.subr.bf16.mxu1 %v7728_v39  ;;  %10143 = vst [vmem:[#allocation20_spill] sm:$0xff] %v8853_v61 }
 0x135   : > { %v6298_v51 = vpop.f32.mrb[24].mxu1  ;;  %v6165_v22 = vpop.f32.mrb[26].mxu0  ;;  %v8802_v12 = vadd.f32 %v6163_v54, %v6162_v63  ;;  %v8819_v63 = vsel %vm1112_vm1, %v3223_v46, %v3224_v16  ;;  %v8822_v54 = vld [vmem:[%s8397_s27 + $0x48] sm:$0xff]   ;;  %v3226_v46 = vrot.slane %v8810_v57, 1  ;;  %v3227_v16 = vrot.slane %v8813_v58, 1 }
 0x136   : > { %v6299_v2 = vpop.f32.mrb[25].mxu1  ;;  %v6166_v21 = vpop.f32.mrb[27].mxu0  ;;  %10138 = vst [vmem:[#allocation15_spill] sm:$0xff] %v8819_v63 }
 0x137   : > { %10134 = vst [vmem:[#allocation11_spill] sm:$0xff] %v8802_v12  ;;  %v8804_v48 = vadd.f32 %v6299_v2, %v6298_v51  ;;  %v6301_v31 = vpop.f32.mrb[26].mxu1  ;;  %7121 = vmatpush3.bf16.msra.mxu1 %v7728_v39  ;;  %v8815_v34 = vadd.f32 %v6166_v21, %v6165_v22  ;;  %v8825_v51 = vld [vmem:[%s8397_s27 + $0x50] ss:$0 sps:$4 sm:$0x11]   ;;  %v7740_v39 = vld [vmem:[%s10074_s7 + $0x158] sm:$0xff]   ;;  %v8847_v12 = vsel %vm1112_vm1, %v3226_v46, %v3227_v16 }
 0x138   : > { %v6302_v44 = vpop.f32.mrb[27].mxu1  ;;  %2556 = vmatmul.mubr.bf16.gmra.mrb[132].mxu0 %v7818_v20  ;;  %7122 = vmatprep.subr.bf16.mxu1 %v7735_v43  ;;  %v3229_v2 = vrot.slane %v8822_v54, 1  ;;  %v3230_v21 = vrot.slane %v8825_v51, 1  ;;  %10142 = vst [vmem:[#allocation19_spill] sm:$0xff] %v8847_v12  ;;  %v7752_v46 = vld [vmem:[%s10074_s7 + $0x168] sm:$0xff]  }
 0x139   : > { %10135 = vst [vmem:[#allocation12_spill] sm:$0xff] %v8804_v48  ;;  %10137 = vst [vmem:[#allocation14_spill] sm:$0xff] %v8815_v34  ;;  %v8830_v11 = vadd.f32 %v6302_v44, %v6301_v31  ;;  %2563 = vmatprep.mubr.bf16.mxu0 %v8332_v47  ;;  %v7747_v47 = vld [vmem:[%s10074_s7 + $0x160] sm:$0xff]  }
 0x13a   : > { %7091 = vmatmul.mubr.bf16.gmra.mrb[68].mxu1 %v8807_v55 }
 0x13b   : > { %10139 = vst [vmem:[#allocation16_spill] sm:$0xff] %v8830_v11  ;;  %v6168_v32 = vpop.f32.mrb[28].mxu0  ;;  %7094 = vmatprep.mubr.bf16.mxu1 %v8819_v63  ;;  %7123 = vmatpush3.bf16.msra.mxu1 %v7735_v43 }
 0x13c   : > { %v6169_v22 = vpop.f32.mrb[29].mxu0  ;;  %7124 = vmatprep.subr.bf16.mxu1 %v7740_v39 }
 0x13d   : > { %v6304_v31 = vpop.f32.mrb[28].mxu1  ;;  %v6171_v44 = vpop.f32.mrb[30].mxu0  ;;  %v8842_v20 = vadd.f32 %v6169_v22, %v6168_v32  ;;  %v8859_v32 = vsel %vm1112_vm1, %v3229_v2, %v3230_v21  ;;  %v8862_v22 = vld [vmem:[%s8397_s27 + $0x60] sm:$0xff]  }
 0x13e   : > { %v6305_v11 = vpop.f32.mrb[29].mxu1  ;;  %v6172_v34 = vpop.f32.mrb[31].mxu0  ;;  %10145 = vst [vmem:[#allocation22_spill] sm:$0xff] %v8859_v32  ;;  %10146 = vst [vmem:[#allocation23_spill] sm:$0xff] %v8862_v22  ;;  %v3235_v21 = vrot.slane %v8862_v22, 1  ;;  %v8892_v22 = vld [vmem:[%s8397_s27 + $0x6c] sm:$0xff]  }
 0x13f   : > { %10140 = vst [vmem:[#allocation17_spill] sm:$0xff] %v8842_v20  ;;  %v8844_v43 = vadd.f32 %v6305_v11, %v6304_v31  ;;  %v6307_v48 = vpop.f32.mrb[30].mxu1  ;;  %7125 = vmatpush3.bf16.msra.mxu1 %v7740_v39  ;;  %v8855_v18 = vadd.f32 %v6172_v34, %v6171_v44  ;;  %v8865_v11 = vld [vmem:[%s8397_s27 + $0x68] ss:$0 sps:$4 sm:$0x11]   ;;  %v3233_v39 = vrot.slane %v8853_v61, 1 }
 0x140   : > { %v6308_v62 = vpop.f32.mrb[31].mxu1  ;;  %2564 = vmatmul.mubr.bf16.gmra.mrb[136].mxu0 %v7819_v30  ;;  %10147 = vst [vmem:[#allocation24_spill] sm:$0xff] %v8865_v11  ;;  %7126 = vmatprep.subr.bf16.mxu1 %v7747_v47  ;;  %v3232_v30 = vrot.slane %v8850_v29, 1  ;;  %10153 = vst [vmem:[#allocation30_spill] sm:$0xff] %v8892_v22 }
 0x141   : > { %10141 = vst [vmem:[#allocation18_spill] sm:$0xff] %v8844_v43  ;;  %10144 = vst [vmem:[#allocation21_spill] sm:$0xff] %v8855_v18  ;;  %v8870_v16 = vadd.f32 %v6308_v62, %v6307_v48  ;;  %2571 = vmatprep.mubr.bf16.mxu0 %v8344_v4  ;;  %v3236_v62 = vrot.slane %v8865_v11, 1  ;;  %v7759_v4 = vld [vmem:[%s10074_s7 + $0x170] sm:$0xff]  }
 0x142   : > { %7095 = vmatmul.mubr.bf16.gmra.mrb[72].mxu1 %v8847_v12  ;;  %v8889_v11 = vsel %vm1112_vm1, %v3232_v30, %v3233_v39  ;;  %v7764_v30 = vld [vmem:[%s10074_s7 + $0x178] sm:$0xff]  }
 0x143   : > { %10148 = vst [vmem:[#allocation25_spill] sm:$0xff] %v8870_v16  ;;  %v6174_v34 = vpop.f32.mrb[32].mxu0  ;;  %7098 = vmatprep.mubr.bf16.mxu1 %v8859_v32  ;;  %7127 = vmatpush3.bf16.msra.mxu1 %v7747_v47  ;;  %10152 = vst [vmem:[#allocation29_spill] sm:$0xff] %v8889_v11 }
 0x144   : > { %v6175_v2 = vpop.f32.mrb[33].mxu0  ;;  %7128 = vmatprep.subr.bf16.mxu1 %v7752_v46 }
 0x145   : > { %v6310_v48 = vpop.f32.mrb[32].mxu1  ;;  %v8882_v31 = vadd.f32 %v6175_v2, %v6174_v34  ;;  %v6177_v44 = vpop.f32.mrb[34].mxu0  ;;  %v7820_v34 = vld [vmem:[%s8038_s18 + $0x9c] sm:$0xff]   ;;  %v8899_v2 = vsel %vm1112_vm1, %v3235_v21, %v3236_v62  ;;  %v3238_v21 = vrot.slane %v8892_v22, 1  ;;  %v3239_v62 = vrot.slane %v8895_v1, 1  ;;  %v8932_v1 = vld [vmem:[%s8397_s27 + $0x84] sm:$0xff]  }
 0x146   : > { %v6311_v16 = vpop.f32.mrb[33].mxu1  ;;  %v6178_v47 = vpop.f32.mrb[35].mxu0  ;;  %10155 = vst [vmem:[#allocation32_spill] sm:$0xff] %v8899_v2  ;;  %10163 = vst [vmem:[#allocation40_spill] sm:$0xff] %v8932_v1 }
 0x147   : > { %10149 = vst [vmem:[#allocation26_spill] sm:$0xff] %v8882_v31  ;;  %v8884_v18 = vadd.f32 %v6311_v16, %v6310_v48  ;;  %v6313_v43 = vpop.f32.mrb[34].mxu1  ;;  %v8886_v20 = vadd.f32 %v6178_v47, %v6177_v44  ;;  %7129 = vmatpush3.bf16.msra.mxu1 %v7752_v46  ;;  %v8902_v31 = vld [vmem:[%s8397_s27 + $0x78] sm:$0xff]   ;;  %v8905_v16 = vld [vmem:[%s8397_s27 + $0x80] ss:$0 sps:$4 sm:$0x11]  }
 0x148   : > { %v6314_v61 = vpop.f32.mrb[35].mxu1  ;;  %2572 = vmatmul.mubr.bf16.gmra.mrb[140].mxu0 %v7820_v34  ;;  %10156 = vst [vmem:[#allocation33_spill] sm:$0xff] %v8902_v31  ;;  %10157 = vst [vmem:[#allocation34_spill] sm:$0xff] %v8905_v16  ;;  %7130 = vmatprep.subr.bf16.mxu1 %v7759_v4  ;;  %v3241_v44 = vrot.slane %v8902_v31, 1 }
 0x149   : > { %10150 = vst [vmem:[#allocation27_spill] sm:$0xff] %v8884_v18  ;;  %10151 = vst [vmem:[#allocation28_spill] sm:$0xff] %v8886_v20  ;;  %v8910_v39 = vadd.f32 %v6314_v61, %v6313_v43  ;;  %2579 = vmatprep.mubr.bf16.mxu0 %v8355_v19  ;;  %v3242_v61 = vrot.slane %v8905_v16, 1  ;;  %v7767_v19 = vld [vmem:[%s10074_s7 + $0x1c0] sm:$0xff]   ;;  %v8929_v16 = vsel %vm1112_vm1, %v3238_v21, %v3239_v62  ;;  %v1215_v21 = vshll.u32 %v8703_v60, 16 }
 0x14a   : > { %7099 = vmatmul.mubr.bf16.gmra.mrb[76].mxu1 %v8889_v11  ;;  %10162 = vst [vmem:[#allocation39_spill] sm:$0xff] %v8929_v16  ;;  %v8935_v22 = vld [vmem:[%s8397_s27 + $0x8c] ss:$0 sps:$4 sm:$0x11]   ;;  %v3244_v62 = vrot.slane %v8932_v1, 1  ;;  %v1213_v1 = vshrl.u32 %v8703_v60, 16 }
 0x14b   : > { %10158 = vst [vmem:[#allocation35_spill] sm:$0xff] %v8910_v39  ;;  %v6180_v46 = vpop.f32.mrb[36].mxu0  ;;  %7102 = vmatprep.mubr.bf16.mxu1 %v8899_v2  ;;  %7131 = vmatpush3.bf16.msra.mxu1 %v7759_v4  ;;  %10164 = vst [vmem:[#allocation41_spill] sm:$0xff] %v8935_v22 }
 0x14c   : > { %v6181_v48 = vpop.f32.mrb[37].mxu0  ;;  %7132 = vmatprep.subr.bf16.mxu1 %v7764_v30 }
 0x14d   : > { %v6316_v43 = vpop.f32.mrb[36].mxu1  ;;  %v8922_v47 = vadd.f32 %v6181_v48, %v6180_v46  ;;  %v6183_v34 = vpop.f32.mrb[38].mxu0  ;;  %v7821_v46 = vld [vmem:[%s8038_s18 + $0xa8] sm:$0xff]   ;;  %v8939_v48 = vsel %vm1112_vm1, %v3241_v44, %v3242_v61  ;;  %v3245_v44 = vrot.slane %v8935_v22, 1  ;;  %v1220_v22 = vshll.u32 %v8706_v26, 16 }
 0x14e   : > { %v6317_v39 = vpop.f32.mrb[37].mxu1  ;;  %v6184_v4 = vpop.f32.mrb[39].mxu0  ;;  %10165 = vst [vmem:[#allocation42_spill] sm:$0xff] %v8939_v48  ;;  %v8982_v26 = vld [vmem:[%s8397_s27 + $0xb0] ss:$0 sps:$4 sm:$0x11]  }
 0x14f   : > { %10159 = vst [vmem:[#allocation36_spill] sm:$0xff] %v8922_v47  ;;  %v8924_v20 = vadd.f32 %v6317_v39, %v6316_v43  ;;  %v6319_v18 = vpop.f32.mrb[38].mxu1  ;;  %v8926_v31 = vadd.f32 %v6184_v4, %v6183_v34  ;;  %7133 = vmatpush3.bf16.msra.mxu1 %v7764_v30  ;;  %v8942_v47 = vld [vmem:[%s8397_s27 + $0x90] sm:$0xff]   ;;  %v8945_v39 = vld [vmem:[%s8397_s27 + $0x98] ss:$0 sps:$4 sm:$0x11]  }
 0x150   : > { %v6320_v24 = vpop.f32.mrb[39].mxu1  ;;  %2580 = vmatmul.mubr.bf16.gmra.mrb[144].mxu0 %v7821_v46  ;;  %10166 = vst [vmem:[#allocation43_spill] sm:$0xff] %v8942_v47  ;;  %10167 = vst [vmem:[#allocation44_spill] sm:$0xff] %v8945_v39  ;;  %6790 = vmatprep.subr.bf16.mxu1 %v7767_v19  ;;  %v3247_v19 = vrot.slane %v8942_v47, 1 }
 0x151   : > { %10160 = vst [vmem:[#allocation37_spill] sm:$0xff] %v8924_v20  ;;  %10161 = vst [vmem:[#allocation38_spill] sm:$0xff] %v8926_v31  ;;  %v8947_v43 = vadd.f32 %v6320_v24, %v6319_v18  ;;  %2587 = vmatprep.mubr.bf16.mxu0 %v8364_v38  ;;  %v3248_v24 = vrot.slane %v8945_v39, 1  ;;  %v8966_v39 = vsel %vm1112_vm1, %v3244_v62, %v3245_v44  ;;  %v1222_v44 = vrot.slane %v1220_v22, 1 }
 0x152   : > { %7103 = vmatmul.mubr.bf16.gmra.mrb[80].mxu1 %v8929_v16  ;;  %10172 = vst [vmem:[#allocation49_spill] sm:$0xff] %v8966_v39  ;;  %10177 = vst [vmem:[#allocation54_spill] sm:$0xff] %v8982_v26 }
 0x153   : > { %10168 = vst [vmem:[#allocation45_spill] sm:$0xff] %v8947_v43  ;;  %v6186_v30 = vpop.f32.mrb[40].mxu0  ;;  %7106 = vmatprep.mubr.bf16.mxu1 %v8939_v48  ;;  %v1217_v43 = vrot.slane %v1215_v21, 1  ;;  %v8976_v48 = vsel %vm1112_vm1, %v3247_v19, %v3248_v24  ;;  %v8979_v21 = vld [vmem:[%s8397_s27 + $0xa8] sm:$0xff]  }
 0x154   : > { %v6187_v61 = vpop.f32.mrb[41].mxu0  ;;  %10175 = vst [vmem:[#allocation52_spill] sm:$0xff] %v8976_v48  ;;  %10176 = vst [vmem:[#allocation53_spill] sm:$0xff] %v8979_v21 }
 0x155   : > { %v6322_v38 = vpop.f32.mrb[40].mxu1  ;;  %v8957_v18 = vadd.f32 %v6187_v61, %v6186_v30  ;;  %v6189_v34 = vpop.f32.mrb[42].mxu0  ;;  %v8969_v30 = vld [vmem:[%s8397_s27 + $0x9c] sm:$0xff]   ;;  %v8972_v61 = vld [vmem:[%s8397_s27 + $0xa4] ss:$0 sps:$4 sm:$0x11]   ;;  %v1218_v62 = vor.u32 %v1217_v43, %v1213_v1 }
 0x156   : > { %v6323_v4 = vpop.f32.mrb[41].mxu1  ;;  %v6190_v46 = vpop.f32.mrb[43].mxu0  ;;  %10173 = vst [vmem:[#allocation50_spill] sm:$0xff] %v8969_v30  ;;  %10174 = vst [vmem:[#allocation51_spill] sm:$0xff] %v8972_v61  ;;  %v3251_v19 = vrot.slane %v8972_v61, 1  ;;  %v3011_v61 = vshll.u32 %v8715_v5, 16 }
 0x157   : > { %10169 = vst [vmem:[#allocation46_spill] sm:$0xff] %v8957_v18  ;;  %v8961_v31 = vadd.f32 %v6323_v4, %v6322_v38  ;;  %v6325_v20 = vpop.f32.mrb[42].mxu1  ;;  %v8963_v47 = vadd.f32 %v6190_v46, %v6189_v34  ;;  %v3006_v34 = vshll.u32 %v8712_v9, 16 }
 0x158   : > { %v6326_v18 = vpop.f32.mrb[43].mxu1  ;;  %2588 = vmatmul.mubr.bf16.gmra.mrb[148].mxu0 %v7822_v59  ;;  %v3250_v59 = vrot.slane %v8969_v30, 1  ;;  %v3004_v30 = vshrl.u32 %v8712_v9, 16 }
 0x159   : > { %10170 = vst [vmem:[#allocation47_spill] sm:$0xff] %v8961_v31  ;;  %10171 = vst [vmem:[#allocation48_spill] sm:$0xff] %v8963_v47  ;;  %v8984_v38 = vadd.f32 %v6326_v18, %v6325_v20  ;;  %2595 = vmatprep.mubr.bf16.mxu0 %v8371_v35  ;;  %v3253_v20 = vrot.slane %v8979_v21, 1  ;;  %v3254_v35 = vrot.slane %v8982_v26, 1  ;;  %v3008_v47 = vrot.slane %v3006_v34, 1 }
 0x15a   : > { %7107 = vmatmul.mubr.bf16.gmra.mrb[84].mxu1 %v8966_v39  ;;  %v9004_v26 = vsel %vm1112_vm1, %v3250_v59, %v3251_v19  ;;  %v7823_v39 = vld [vmem:[%s8226_s29] sm:$0xff]   ;;  %v3013_v34 = vrot.slane %v3011_v61, 1  ;;  %v3018_v59 = vshll.u32 %v8739_v15, 16  ;;  %v3023_v61 = vshll.u32 %v8742_v17, 16 }
 0x15b   : > { %10178 = vst [vmem:[#allocation55_spill] sm:$0xff] %v8984_v38  ;;  %v6192_v4 = vpop.f32.mrb[44].mxu0  ;;  %7110 = vmatprep.mubr.bf16.mxu1 %v8976_v48  ;;  %v1223_v38 = vsel %vm903_vm0, %v1218_v62, %v1222_v44  ;;  %10180 = vst [vmem:[#allocation57_spill] sm:$0xff] %v9004_v26  ;;  %v9014_v62 = vsel %vm1112_vm1, %v3253_v20, %v3254_v35  ;;  %v3009_v5 = vor.u32 %v3008_v47, %v3004_v30 }
 0x15c   : > { %v6193_v24 = vpop.f32.mrb[45].mxu0  ;;  %10183 = vst [vmem:[#allocation60_spill] sm:$0xff] %v9014_v62  ;;  %v3016_v47 = vshrl.u32 %v8739_v15, 16  ;;  %v3020_v30 = vrot.slane %v3018_v59, 1  ;;  %v3030_v17 = vshll.u32 %v8749_v14, 16 }
 0x15d   : > { %v6328_v18 = vpop.f32.mrb[44].mxu1  ;;  %v8994_v1 = vadd.f32 %v6193_v24, %v6192_v4  ;;  %v6195_v22 = vpop.f32.mrb[46].mxu0  ;;  %v9007_v4 = vld [vmem:[%s8397_s27 + $0xb4] sm:$0xff]   ;;  %v9010_v24 = vld [vmem:[%s8397_s27 + $0xbc] ss:$0 sps:$4 sm:$0x11]  }
 0x15e   : > { %v6329_v43 = vpop.f32.mrb[45].mxu1  ;;  %v6196_v46 = vpop.f32.mrb[47].mxu0  ;;  %10181 = vst [vmem:[#allocation58_spill] sm:$0xff] %v9007_v4  ;;  %10182 = vst [vmem:[#allocation59_spill] sm:$0xff] %v9010_v24 }
 0x15f   : > { %10179 = vst [vmem:[#allocation56_spill] sm:$0xff] %v8994_v1  ;;  %v8999_v31 = vadd.f32 %v6329_v43, %v6328_v18  ;;  %v6331_v21 = vpop.f32.mrb[46].mxu1  ;;  %v9001_v48 = vadd.f32 %v6196_v46, %v6195_v22  ;;  %v3256_v18 = vrot.slane %v9007_v4, 1  ;;  %v3257_v22 = vrot.slane %v9010_v24, 1 }
 0x160   : > { %v6332_v1 = vpop.f32.mrb[47].mxu1  ;;  %2596 = vmatmul.mubr.bf16.gmra.mrb[152].mxu0 %v7823_v39 }
 0x161   : > { %v9016_v44 = vadd.f32 %v6332_v1, %v6331_v21  ;;  %2603 = vmatprep.mubr.bf16.mxu0 %v1223_v38  ;;  %v3014_v1 = vsel %vm903_vm0, %v3009_v5, %v3013_v34  ;;  %v9033_v24 = vsel %vm1112_vm1, %v3256_v18, %v3257_v22  ;;  %v3021_v5 = vor.u32 %v3020_v30, %v3016_v47 }
 0x162   : > { %7111 = vmatmul.mubr.bf16.gmra.mrb[88].mxu1 %v9004_v26  ;;  %10185 = vst [vmem:[#allocation62_spill] sm:$0xff] %v9033_v24  ;;  %v3025_v34 = vrot.slane %v3023_v61, 1  ;;  %v3032_v47 = vrot.slane %v3030_v17, 1  ;;  %v3035_v30 = vshll.u32 %v8752_v50, 16  ;;  %v7769_v50 = vld [vmem:[%s10074_s7 + $0x1c8] sm:$0xff]  }
 0x163   : > { %10184 = vst [vmem:[#allocation61_spill] sm:$0xff] %v9016_v44  ;;  %v6198_v19 = vpop.f32.mrb[48].mxu0  ;;  %7114 = vmatprep.mubr.bf16.mxu1 %v9014_v62  ;;  %v7772_v17 = vld [vmem:[%s10074_s7 + $0xc8] sm:$0xff]  }
 0x164   : > { %v6199_v39 = vpop.f32.mrb[49].mxu0 }
 0x165   : > { %v6334_v43 = vpop.f32.mrb[48].mxu1  ;;  %v9023_v20 = vadd.f32 %v6199_v39, %v6198_v19  ;;  %v6201_v21 = vpop.f32.mrb[50].mxu0 }
 0x166   : > { %v6335_v35 = vpop.f32.mrb[49].mxu1  ;;  %v6202_v38 = vpop.f32.mrb[51].mxu0 }
 0x167   : > { %v9028_v46 = vadd.f32 %v6335_v35, %v6334_v43  ;;  %v6337_v44 = vpop.f32.mrb[50].mxu1  ;;  %v9030_v4 = vadd.f32 %v6202_v38, %v6201_v21  ;;  %v9047_v38 = vsel %vm903_vm0, %v3021_v5, %v3025_v34 }
 0x168   : > { %v6338_v19 = vpop.f32.mrb[51].mxu1  ;;  %2604 = vmatmul.mubr.bf16.gmra.mrb[156].mxu0 %v8703_v60  ;;  %v7766_v60 = vld [vmem:[%s10074_s7 + $0xc0] sm:$0xff]   ;;  %10187 = vst [vmem:[#allocation64_spill] sm:$0xff] %v9047_v38 }
 0x169   : > { %v9036_v39 = vadd.f32 %v6338_v19, %v6337_v44  ;;  %3551 = vmatprep.mubr.bf16.mxu0 %v3014_v1  ;;  %v3028_v1 = vshrl.u32 %v8749_v14, 16 }
 0x16a   : > { %7115 = vmatmul.mubr.bf16.gmra.mrb[92].mxu1 %v9033_v24 }
 0x16b   : > { %10186 = vst [vmem:[#allocation63_spill] sm:$0xff] %v9036_v39  ;;  %v6204_v59 = vpop.f32.mrb[52].mxu0  ;;  %7134 = vmatprep.mubr.bf16.mxu1 %v8766_v28  ;;  %v7771_v28 = vld [vmem:[%s10074_s7 + $0x108] sm:$0xff]   ;;  %v3047_v39 = vshll.u32 %v8772_v13, 16  ;;  %v7775_v13 = vld [vmem:[%s10074_s7 + $0x1d8] sm:$0xff]  }
 0x16c   : > { %v6205_v43 = vpop.f32.mrb[53].mxu0 }
 0x16d   : > { %v6340_v21 = vpop.f32.mrb[52].mxu1  ;;  %v9041_v35 = vadd.f32 %v6205_v43, %v6204_v59  ;;  %v6207_v18 = vpop.f32.mrb[54].mxu0  ;;  %v7768_v43 = vld [vmem:[%s10074_s7 + $0x180] sm:$0xff]  }
 0x16e   : > { %v6341_v44 = vpop.f32.mrb[53].mxu1  ;;  %v6208_v22 = vpop.f32.mrb[55].mxu0 }
 0x16f   : > { %v9054_v61 = vadd.f32 %v6341_v44, %v6340_v21  ;;  %v6343_v19 = vpop.f32.mrb[54].mxu1  ;;  %v9056_v59 = vadd.f32 %v6208_v22, %v6207_v18  ;;  %v3033_v21 = vor.u32 %v3032_v47, %v3028_v1  ;;  %v3037_v18 = vrot.slane %v3035_v30, 1  ;;  %v7777_v44 = vld [vmem:[%s10074_s7 + $0x110] sm:$0xff]  }
 0x170   : > { %v6344_v5 = vpop.f32.mrb[55].mxu1  ;;  %3552 = vmatmul.mubr.bf16.vlgmr.msra.gmra.mrb[160].mxu0 %v8712_v9  ;;  %v3042_v9 = vshll.u32 %v8769_v23, 16  ;;  %v7773_v1 = vld [vmem:[%s10074_s7 + $0x1d0] sm:$0xff]  }
 0x171   : > { %v9065_v34 = vadd.f32 %v6344_v5, %v6343_v19  ;;  %6655 = vmatpush3.bf16.msra.mxu0 %v7766_v60  ;;  %3559 = vmatprep.mubr.bf16.mxu0 %v9047_v38  ;;  %v7770_v60 = vld [vmem:[%s10074_s7 + $0x188] sm:$0xff]  }
 0x172   : > { %7135 = vmatmul.mubr.bf16.vlgmr.msra.gmra.mrb[64].mxu1 %v8778_v25  ;;  %6656 = vmatprep.subr.bf16.mxu0 %v7771_v28  ;;  %v9089_v25 = vsel %vm903_vm0, %v3033_v21, %v3037_v18  ;;  %v3044_v38 = vrot.slane %v3042_v9, 1  ;;  %v7774_v21 = vld [vmem:[%s10074_s7 + $0x190] sm:$0xff]  }
 0x173   : > { %v6210_v22 = vpop.f32.mrb[56].mxu0  ;;  %6791 = vmatpush3.bf16.msra.mxu1 %v7768_v43  ;;  %7138 = vmatprep.mubr.bf16.mxu1 %v8807_v55  ;;  %v7778_v43 = vld [vmem:[%s10074_s7 + $0xd0] sm:$0xff]  }
 0x174   : > { %v6211_v19 = vpop.f32.mrb[57].mxu0  ;;  %6792 = vmatprep.subr.bf16.mxu1 %v7769_v50  ;;  %v3040_v50 = vshrl.u32 %v8769_v23, 16 }
 0x175   : > { %v6346_v47 = vpop.f32.mrb[56].mxu1  ;;  %v9083_v30 = vadd.f32 %v6211_v19, %v6210_v22  ;;  %v6213_v28 = vpop.f32.mrb[58].mxu0  ;;  %6657 = vmatpush3.bf16.msra.mxu0 %v7772_v17  ;;  %v7783_v22 = vld [vmem:[%s10074_s7 + $0x118] sm:$0xff]  }
 0x176   : > { %v6347_v5 = vpop.f32.mrb[57].mxu1  ;;  %v6214_v55 = vpop.f32.mrb[59].mxu0  ;;  %6658 = vmatprep.subr.bf16.mxu0 %v7777_v44  ;;  %v3045_v44 = vor.u32 %v3044_v38, %v3040_v50 }
 0x177   : > { %10188 = vst [vmem:[#allocation65_spill] sm:$0xff] %v9083_v30  ;;  %v9096_v17 = vadd.f32 %v6347_v5, %v6346_v47  ;;  %v6349_v19 = vpop.f32.mrb[58].mxu1  ;;  %v9098_v30 = vadd.f32 %v6214_v55, %v6213_v28  ;;  %6793 = vmatpush3.bf16.msra.mxu1 %v7770_v60  ;;  %v7784_v55 = vld [vmem:[%s10074_s7 + $0xd8] sm:$0xff]   ;;  %v3049_v60 = vrot.slane %v3047_v39, 1  ;;  %v7779_v39 = vld [vmem:[%s10074_s7 + $0x1e0] sm:$0xff]  }
 0x178   : > { %v6350_v18 = vpop.f32.mrb[59].mxu1  ;;  %3560 = vmatmul.mubr.bf16.gmra.mrb[164].mxu0 %v8739_v15  ;;  %6794 = vmatprep.subr.bf16.mxu1 %v7773_v1  ;;  %v3054_v15 = vshll.u32 %v8784_v41, 16  ;;  %v7791_v1 = vld [vmem:[%s10074_s7 + $0x120] sm:$0xff]   ;;  %v7776_v28 = vld [vmem:[%s10074_s7 + $0x198] sm:$0xff]  }
 0x179   : > { %v9107_v9 = vadd.f32 %v6350_v18, %v6349_v19  ;;  %3567 = vmatprep.mubr.bf16.mxu0 %v9089_v25  ;;  %6659 = vmatpush3.bf16.msra.mxu0 %v7778_v43  ;;  %v9131_v18 = vsel %vm903_vm0, %v3045_v44, %v3049_v60  ;;  %v7780_v44 = vld [vmem:[%s10074_s7 + $0x1a0] sm:$0xff]  }
 0x17a   : > { %7139 = vmatmul.mubr.bf16.gmra.mrb[68].mxu1 %v8819_v63  ;;  %6660 = vmatprep.subr.bf16.mxu0 %v7783_v22  ;;  %v7792_v22 = vld [vmem:[%s10074_s7 + $0xe0] sm:$0xff]   ;;  %v3059_v63 = vshll.u32 %v8787_v52, 16  ;;  %v7781_v52 = vld [vmem:[%s10074_s7 + $0x1e8] sm:$0xff]  }
 0x17b   : > { %10189 = vst [vmem:[#allocation66_spill] sm:$0xff] %v9107_v9  ;;  %v6216_v47 = vpop.f32.mrb[60].mxu0  ;;  %7142 = vmatprep.mubr.bf16.mxu1 %v8847_v12  ;;  %6795 = vmatpush3.bf16.msra.mxu1 %v7774_v21  ;;  %v3056_v12 = vrot.slane %v3054_v15, 1 }
 0x17c   : > { %v6217_v43 = vpop.f32.mrb[61].mxu0  ;;  %6796 = vmatprep.subr.bf16.mxu1 %v7775_v13  ;;  %v3052_v13 = vshrl.u32 %v8784_v41, 16 }
 0x17d   : > { %v6352_v38 = vpop.f32.mrb[60].mxu1  ;;  %v9125_v5 = vadd.f32 %v6217_v43, %v6216_v47  ;;  %v6219_v50 = vpop.f32.mrb[62].mxu0  ;;  %6661 = vmatpush3.bf16.msra.mxu0 %v7784_v55  ;;  %v7794_v47 = vld [vmem:[%s10074_s7 + $0x128] sm:$0xff]  }
 0x17e   : > { %v6353_v19 = vpop.f32.mrb[61].mxu1  ;;  %v6220_v21 = vpop.f32.mrb[63].mxu0  ;;  %6662 = vmatprep.subr.bf16.mxu0 %v7791_v1  ;;  %v3066_v1 = vshll.u32 %v8810_v57, 16 }
 0x17f   : > { %v9138_v55 = vadd.f32 %v6353_v19, %v6352_v38  ;;  %v6355_v43 = vpop.f32.mrb[62].mxu1  ;;  %v9140_v9 = vadd.f32 %v6220_v21, %v6219_v50  ;;  %6797 = vmatpush3.bf16.msra.mxu1 %v7776_v28  ;;  %v7795_v28 = vld [vmem:[%s10074_s7 + $0xe8] sm:$0xff]   ;;  %v3057_v38 = vor.u32 %v3056_v12, %v3052_v13  ;;  %v7785_v12 = vld [vmem:[%s10074_s7 + $0x1f0] sm:$0xff]  }
 0x180   : > { %v6356_v60 = vpop.f32.mrb[63].mxu1  ;;  %3568 = vmatmul.mubr.bf16.gmra.mrb[168].mxu0 %v8749_v14  ;;  %6798 = vmatprep.subr.bf16.mxu1 %v7779_v39  ;;  %v3061_v14 = vrot.slane %v3059_v63, 1  ;;  %v7797_v39 = vld [vmem:[%s10074_s7 + $0x130] sm:$0xff]  }
 0x181   : > { %v9149_v15 = vadd.f32 %v6356_v60, %v6355_v43  ;;  %3575 = vmatprep.mubr.bf16.mxu0 %v9131_v18  ;;  %6663 = vmatpush3.bf16.msra.mxu0 %v7792_v22  ;;  %v7782_v22 = vld [vmem:[%s10074_s7 + $0x1a8] sm:$0xff]   ;;  %v3068_v43 = vrot.slane %v3066_v1, 1  ;;  %v7798_v60 = vld [vmem:[%s10074_s7 + $0xf0] sm:$0xff]  }
 0x182   : > { %7143 = vmatmul.mubr.bf16.gmra.mrb[72].mxu1 %v8859_v32  ;;  %6664 = vmatprep.subr.bf16.mxu0 %v7794_v47  ;;  %v3064_v47 = vshrl.u32 %v8810_v57, 16 }
 0x183   : > { %v6944_v50 = vpop.f32.mrb[64].mxu0  ;;  %7146 = vmatprep.mubr.bf16.mxu1 %v8889_v11  ;;  %6799 = vmatpush3.bf16.msra.mxu1 %v7780_v44  ;;  %v3071_v44 = vshll.u32 %v8813_v58, 16  ;;  %v9179_v11 = vsel %vm903_vm0, %v3057_v38, %v3061_v14 }
 0x184   : > { %v1674_v19 = vadd.f32 %v6944_v50, %v8673_v8  ;;  %v1665_v21 = vpop.f32.mrb[65].mxu0  ;;  %6800 = vmatprep.subr.bf16.mxu1 %v7781_v52 }
 0x185   : > { %v1666_v63 = vadd.f32 %v8644_v0, %v1665_v21  ;;  %v6945_v13 = vpop.f32.mrb[66].mxu0  ;;  %6665 = vmatpush3.bf16.msra.mxu0 %v7795_v28  ;;  %v7800_v0 = vld [vmem:[%s10074_s7 + $0x138] sm:$0xff]   ;;  %v3073_v38 = vrot.slane %v3071_v44, 1 }
 0x186   : > { %v9175_v8 = vadd.f32 %v8675_v45, %v1674_v19  ;;  %v1677_v52 = vadd.f32 %v6945_v13, %v8677_v3  ;;  %v1668_v50 = vpop.f32.mrb[67].mxu0  ;;  %6666 = vmatprep.subr.bf16.mxu0 %v7797_v39  ;;  %v7786_v45 = vld [vmem:[%s10074_s7 + $0x1b0] sm:$0xff]   ;;  %v7789_v28 = vld [vmem:[%s10074_s7 + $0x1f8] sm:$0xff]   ;;  %v9215_v19 = vld [vmem:[%s10074_s7 + $0x200] sm:$0xff]   ;;  %v3076_v13 = vshrl.u32 %v8822_v54, 16 }
 0x187   : > { %v9185_v58 = vadd.f32 %v8649_v10, %v1666_v63  ;;  %v1669_v1 = vadd.f32 %v8651_v7, %v1668_v50  ;;  %6801 = vmatpush3.bf16.msra.mxu1 %v7782_v22  ;;  %v3069_v7 = vor.u32 %v3068_v43, %v3064_v47 }
 0x188   : > { %v9192_v3 = vadd.f32 %v8681_v6, %v1677_v52  ;;  %3576 = vmatmul.mubr.bf16.gmra.mrb[172].mxu0 %v8769_v23  ;;  %6802 = vmatprep.subr.bf16.mxu1 %v7785_v12  ;;  %v7801_v6 = vld [vmem:[%s10074_s7 + $0xf8] sm:$0xff]   ;;  %v3078_v23 = vshll.u32 %v8822_v54, 16 }
 0x189   : > { %v9199_v10 = vadd.f32 %v8657_v37, %v1669_v1  ;;  %3583 = vmatprep.mubr.bf16.mxu0 %v9179_v11  ;;  %6667 = vmatpush3.bf16.msra.mxu0 %v7798_v60  ;;  %v7790_v37 = vld [vmem:[%s10074_s7 + $0x1b8] sm:$0xff]   ;;  %v9219_v63 = vsel %vm903_vm0, %v3069_v7, %v3073_v38  ;;  %v3083_v60 = vshll.u32 %v8825_v51, 16  ;;  %v10190_v51 = vld [vmem:[#allocation42_spill] sm:$0xff] }
 0x18a   : > { %7147 = vmatmul.mubr.bf16.gmra.mrb[76].mxu1 %v8899_v2  ;;  %6668 = vmatprep.subr.bf16.mxu0 %v7800_v0  ;;  %v3080_v44 = vrot.slane %v3078_v23, 1  ;;  %v10191_v1 = vld [vmem:[#allocation49_spill] sm:$0xff]  ;;  %v10194_v23 = vld [vmem:[#allocation20_spill] sm:$0xff]  ;;  %v10218_v2 = vld [vmem:[#allocation31_spill] sm:$0xff] }
 0x18b   : > { %v6948_v14 = vpop.f32.mrb[68].mxu0  ;;  %7150 = vmatprep.mubr.bf16.mxu1 %v8929_v16  ;;  %6803 = vmatpush3.bf16.msra.mxu1 %v7786_v45  ;;  %v3085_v0 = vrot.slane %v3083_v60, 1 }
 0x18c   : > { %v1690_v39 = vadd.f32 %v6948_v14, %v8698_v56  ;;  %v1681_v22 = vpop.f32.mrb[69].mxu0  ;;  %6804 = vmatprep.subr.bf16.mxu1 %v7789_v28  ;;  %v3095_v14 = vshll.u32 %v10194_v23, 16 }
 0x18d   : > { %v1682_v21 = vadd.f32 %v8686_v40, %v1681_v22  ;;  %v6949_v12 = vpop.f32.mrb[70].mxu0  ;;  %6669 = vmatpush3.bf16.msra.mxu0 %v7801_v6  ;;  %v10196_v22 = vld [vmem:[#allocation8_spill] sm:$0xff] }
 0x18e   : > { %v9223_v47 = vadd.f32 %v8700_v42, %v1690_v39  ;;  %v1693_v56 = vadd.f32 %v6949_v12, %v8708_v27  ;;  %v1684_v43 = vpop.f32.mrb[71].mxu0  ;;  %v3090_v27 = vshll.u32 %v8850_v29, 16 }
 0x18f   : > { %v9228_v52 = vadd.f32 %v8688_v49, %v1682_v21  ;;  %v1685_v40 = vadd.f32 %v8690_v53, %v1684_v43  ;;  %6805 = vmatpush3.bf16.msra.mxu1 %v7790_v37  ;;  %v3081_v49 = vor.u32 %v3080_v44, %v3076_v13  ;;  %v10195_v37 = vld [vmem:[#allocation7_spill] sm:$0xff]  ;;  %v10198_v44 = vld [vmem:[#allocation4_spill] sm:$0xff] }
 0x190   : > { %v9232_v50 = vadd.f32 %v8717_v33, %v1693_v56  ;;  %3584 = vmatmul.mubr.bf16.gmra.mrb[176].mxu0 %v8784_v41  ;;  %7166 = vmatprep.subr.bf16.mxu1 %v9215_v19  ;;  %v10192_v33 = vld [vmem:[#allocation6_spill] sm:$0xff]  ;;  %v3092_v6 = vrot.slane %v3090_v27, 1  ;;  %v10197_v56 = vld [vmem:[#allocation3_spill] sm:$0xff]  ;;  %v10200_v27 = vld [vmem:[#allocation5_spill] sm:$0xff] }
 0x191   : > { %v9237_v42 = vadd.f32 %v8693_v36, %v1685_v40  ;;  %3591 = vmatprep.mubr.bf16.mxu0 %v9219_v63  ;;  %v10193_v41 = vld [vmem:[#allocation2_spill] sm:$0xff]  ;;  %v3088_v36 = vshrl.u32 %v8850_v29, 16  ;;  %v9252_v13 = vsel %vm903_vm0, %v3081_v49, %v3085_v0  ;;  %v10202_v49 = vld [vmem:[#allocation23_spill] sm:$0xff] }
 0x192   : > { %7151 = vmatmul.mubr.bf16.gmra.mrb[80].mxu1 %v10190_v51  ;;  %v10199_v40 = vld [vmem:[#allocation10_spill] sm:$0xff]  ;;  %v3102_v0 = vshll.u32 %v10202_v49, 16 }
 0x193   : > { %v6952_v53 = vpop.f32.mrb[72].mxu0  ;;  %7154 = vmatprep.mubr.bf16.mxu1 %v10191_v1 }
 0x194   : > { %v1706_v45 = vadd.f32 %v6952_v53, %v10192_v33  ;;  %v1697_v28 = vpop.f32.mrb[73].mxu0 }
 0x195   : > { %v1698_v7 = vadd.f32 %v10193_v41, %v1697_v28  ;;  %v6953_v38 = vpop.f32.mrb[74].mxu0  ;;  %v3097_v28 = vrot.slane %v3095_v14, 1  ;;  %v10201_v41 = vld [vmem:[#allocation52_spill] sm:$0xff] }
 0x196   : > { %v9248_v39 = vadd.f32 %v10195_v37, %v1706_v45  ;;  %v1709_v21 = vadd.f32 %v6953_v38, %v10196_v22  ;;  %v1700_v12 = vpop.f32.mrb[75].mxu0  ;;  %v3093_v45 = vor.u32 %v3092_v6, %v3088_v36  ;;  %v10203_v38 = vld [vmem:[#allocation17_spill] sm:$0xff]  ;;  %v10204_v37 = vld [vmem:[#allocation11_spill] sm:$0xff]  ;;  %v3100_v36 = vshrl.u32 %v10202_v49, 16  ;;  %v10205_v6 = vld [vmem:[#allocation18_spill] sm:$0xff] }
 0x197   : > { %v9255_v43 = vadd.f32 %v10197_v56, %v1698_v7  ;;  %v1701_v60 = vadd.f32 %v10198_v44, %v1700_v12  ;;  %v10206_v56 = vld [vmem:[#allocation21_spill] sm:$0xff] }
 0x198   : > { %v9259_v53 = vadd.f32 %v10199_v40, %v1709_v21  ;;  %3592 = vmatmul.mubr.bf16.gmra.mrb[180].mxu0 %v8810_v57  ;;  %v9272_v12 = vsel %vm903_vm0, %v3093_v45, %v3097_v28  ;;  %v3104_v40 = vrot.slane %v3102_v0, 1  ;;  %v9288_v45 = vld [vmem:[%s8731_s25 + $0x8] ss:$0 sps:$4 sm:$0x11]   ;;  %v10212_v28 = vld [vmem:[#allocation25_spill] sm:$0xff]  ;;  %v10214_v0 = vld [vmem:[#allocation16_spill] sm:$0xff] }
 0x199   : > { %v9263_v33 = vadd.f32 %v10200_v27, %v1701_v60  ;;  %3599 = vmatprep.mubr.bf16.mxu0 %v9252_v13  ;;  %v10207_v27 = vld [vmem:[#allocation24_spill] sm:$0xff]  ;;  %10211 = vst [vmem:[#allocation2_spill] sm:$0xff] %v9288_v45 }
 0x19a   : > { %7155 = vmatmul.mubr.bf16.gmra.mrb[84].mxu1 %v10201_v41  ;;  %v10208_v41 = vld [vmem:[#allocation12_spill] sm:$0xff] }
 0x19b   : > { %v6956_v7 = vpop.f32.mrb[76].mxu0  ;;  %7158 = vmatprep.mubr.bf16.mxu1 %v9004_v26  ;;  %v3107_v26 = vshll.u32 %v10207_v27, 16 }
 0x19c   : > { %v1722_v23 = vadd.f32 %v6956_v7, %v10203_v38  ;;  %v1713_v57 = vpop.f32.mrb[77].mxu0  ;;  %v10209_v38 = vld [vmem:[#allocation14_spill] sm:$0xff] }
 0x19d   : > { %v1714_v22 = vadd.f32 %v10204_v37, %v1713_v57  ;;  %v6957_v21 = vpop.f32.mrb[78].mxu0  ;;  %v9285_v37 = vld [vmem:[%s8731_s25] sm:$0xff]  }
 0x19e   : > { %v9276_v14 = vadd.f32 %v10205_v6, %v1722_v23  ;;  %v1725_v44 = vadd.f32 %v6957_v21, %v10206_v56  ;;  %v1716_v60 = vpop.f32.mrb[79].mxu0  ;;  %10210 = vst [vmem:[#allocation6_spill] sm:$0xff] %v9285_v37  ;;  %v3105_v6 = vor.u32 %v3104_v40, %v3100_v36  ;;  %v3109_v56 = vrot.slane %v3107_v26, 1  ;;  %v10219_v36 = vld [vmem:[#allocation37_spill] sm:$0xff]  ;;  %v10220_v40 = vld [vmem:[#allocation38_spill] sm:$0xff] }
 0x19f   : > { %v9281_v7 = vadd.f32 %v10208_v41, %v1714_v22  ;;  %v1717_v57 = vadd.f32 %v10209_v38, %v1716_v60  ;;  %v10215_v22 = vld [vmem:[#allocation30_spill] sm:$0xff]  ;;  %v3297_v27 = vrot.slane %v9285_v37, 1  ;;  %v10216_v38 = vld [vmem:[#allocation36_spill] sm:$0xff] }
 0x1a0   : > { %v9298_v23 = vadd.f32 %v10212_v28, %v1725_v44  ;;  %3600 = vmatmul.mubr.bf16.gmra.mrb[184].mxu0 %v8822_v54  ;;  %v3114_v21 = vshll.u32 %v10215_v22, 16  ;;  %v3298_v44 = vrot.slane %v9288_v45, 1  ;;  %v3112_v51 = vshrl.u32 %v10215_v22, 16  ;;  %v10221_v45 = vld [vmem:[#allocation27_spill] sm:$0xff] }
 0x1a1   : > { %v9302_v41 = vadd.f32 %v10214_v0, %v1717_v57  ;;  %3607 = vmatprep.mubr.bf16.mxu0 %v9272_v12  ;;  %v10217_v57 = vld [vmem:[#allocation26_spill] sm:$0xff]  ;;  %v9319_v37 = vsel %vm903_vm0, %v3105_v6, %v3109_v56 }
 0x1a2   : > { %10213 = vst [vmem:[#allocation20_spill] sm:$0xff] %v9298_v23  ;;  %7159 = vmatmul.mubr.bf16.gmra.mrb[88].mxu1 %v9014_v62  ;;  %v3116_v16 = vrot.slane %v3114_v21, 1  ;;  %v3119_v62 = vshll.u32 %v10218_v2, 16  ;;  %v10224_v21 = vld [vmem:[#allocation45_spill] sm:$0xff]  ;;  %v10226_v2 = vld [vmem:[#allocation35_spill] sm:$0xff] }
 0x1a3   : > { %v6960_v60 = vpop.f32.mrb[80].mxu0  ;;  %7162 = vmatprep.mubr.bf16.mxu1 %v9033_v24 }
 0x1a4   : > { %v1738_v54 = vadd.f32 %v6960_v60, %v10216_v38  ;;  %v1729_v28 = vpop.f32.mrb[81].mxu0  ;;  %v10222_v38 = vld [vmem:[#allocation28_spill] sm:$0xff]  ;;  %v3121_v6 = vrot.slane %v3119_v62, 1 }
 0x1a5   : > { %v1730_v0 = vadd.f32 %v10217_v57, %v1729_v28  ;;  %v6961_v1 = vpop.f32.mrb[82].mxu0  ;;  %v9326_v57 = vsel %vm1112_vm1, %v3297_v27, %v3298_v44  ;;  %v10228_v27 = vld [vmem:[#allocation56_spill] sm:$0xff] }
 0x1a6   : > { %v9315_v26 = vadd.f32 %v10219_v36, %v1738_v54  ;;  %v1741_v24 = vadd.f32 %v6961_v1, %v10220_v40  ;;  %v1732_v32 = vpop.f32.mrb[83].mxu0  ;;  %10223 = vst [vmem:[#allocation7_spill] sm:$0xff] %v9326_v57  ;;  %v3117_v1 = vor.u32 %v3116_v16, %v3112_v51 }
 0x1a7   : > { %v9322_v60 = vadd.f32 %v10221_v45, %v1730_v0  ;;  %v1733_v28 = vadd.f32 %v10222_v38, %v1732_v32  ;;  %v10227_v45 = vld [vmem:[#allocation33_spill] sm:$0xff]  ;;  %v10229_v0 = vld [vmem:[#allocation46_spill] sm:$0xff] }
 0x1a8   : > { %v9329_v23 = vadd.f32 %v10224_v21, %v1741_v24  ;;  %3608 = vmatmul.mubr.bf16.gmra.mrb[188].mxu0 %v8850_v29  ;;  %v3126_v56 = vshll.u32 %v10227_v45, 16  ;;  %v9342_v40 = vsel %vm903_vm0, %v3117_v1, %v3121_v6  ;;  %v3124_v16 = vshrl.u32 %v10227_v45, 16  ;;  %v10230_v21 = vld [vmem:[#allocation34_spill] sm:$0xff]  ;;  %v10234_v1 = vld [vmem:[#allocation55_spill] sm:$0xff]  ;;  %v10235_v6 = vld [vmem:[#allocation40_spill] sm:$0xff] }
 0x1a9   : > { %v9333_v54 = vadd.f32 %v10226_v2, %v1733_v28  ;;  %3615 = vmatprep.mubr.bf16.mxu0 %v9319_v37  ;;  %v3131_v2 = vshll.u32 %v10230_v21, 16 }
 0x1aa   : > { %10225 = vst [vmem:[#allocation8_spill] sm:$0xff] %v9329_v23  ;;  %7163 = vmatmul.mubr.bf16.gmra.mrb[92].mxu1 %v9326_v57  ;;  %v3128_v28 = vrot.slane %v3126_v56, 1  ;;  %v10233_v57 = vld [vmem:[#allocation61_spill] sm:$0xff]  ;;  %v3138_v56 = vshll.u32 %v10235_v6, 16 }
 0x1ab   : > { %v6964_v32 = vpop.f32.mrb[84].mxu0  ;;  %4645 = vmatprep.mubr.bf16.mxu1 %v9089_v25 }
 0x1ac   : > { %v1754_v44 = vadd.f32 %v6964_v32, %v10228_v27  ;;  %v1745_v24 = vpop.f32.mrb[85].mxu0  ;;  %v10231_v32 = vld [vmem:[#allocation47_spill] sm:$0xff] }
 0x1ad   : > { %v1746_v36 = vadd.f32 %v10229_v0, %v1745_v24  ;;  %v6965_v29 = vpop.f32.mrb[86].mxu0  ;;  %v10232_v24 = vld [vmem:[#allocation48_spill] sm:$0xff] }
 0x1ae   : > { %v9346_v62 = vadd.f32 %v8999_v31, %v1754_v44  ;;  %v1757_v51 = vadd.f32 %v6965_v29, %v9001_v48  ;;  %v1748_v38 = vpop.f32.mrb[87].mxu0  ;;  %v7796_v31 = vld [vmem:[%s10074_s7 + $0x208] sm:$0xff]   ;;  %v9367_v44 = vld [vmem:[%s8397_s27 + $0x18] sm:$0xff]  }
 0x1af   : > { %v9351_v27 = vadd.f32 %v10231_v32, %v1746_v36  ;;  %v1749_v0 = vadd.f32 %v10232_v24, %v1748_v38  ;;  %v3129_v36 = vor.u32 %v3128_v28, %v3124_v16  ;;  %v7799_v38 = vld [vmem:[%s10074_s7 + $0x210] sm:$0xff]   ;;  %v3136_v24 = vshrl.u32 %v10235_v6, 16  ;;  %v10236_v28 = vld [vmem:[#allocation41_spill] sm:$0xff] }
 0x1b0   : > { %v9355_v23 = vadd.f32 %v10233_v57, %v1757_v51  ;;  %3616 = vmatmul.mubr.bf16.gmra.mrb[192].mxu0 %v10202_v49  ;;  %v3133_v57 = vrot.slane %v3131_v2, 1  ;;  %v3140_v16 = vrot.slane %v3138_v56, 1  ;;  %v3143_v2 = vshll.u32 %v10236_v28, 16 }
 0x1b1   : > { %v9362_v48 = vadd.f32 %v10234_v1, %v1749_v0  ;;  %3623 = vmatprep.mubr.bf16.mxu0 %v9342_v40 }
 0x1b2   : > { %4646 = vmatmul.mubr.bf16.vlgmr.msra.gmra.mrb[96].mxu1 %v9367_v44  ;;  %v9384_v1 = vsel %vm903_vm0, %v3129_v36, %v3133_v57  ;;  %v3145_v36 = vrot.slane %v3143_v2, 1  ;;  %v9402_v57 = vld [vmem:[%s8397_s27 + $0x24] sm:$0xff]  }
 0x1b3   : > { %v6968_v29 = vpop.f32.mrb[88].mxu0  ;;  %7167 = vmatpush3.bf16.msra.mxu1 %v9215_v19  ;;  %4653 = vmatprep.mubr.bf16.mxu1 %v9131_v18 }
 0x1b4   : > { %v1770_v49 = vadd.f32 %v6968_v29, %v9041_v35  ;;  %v1761_v51 = vpop.f32.mrb[89].mxu0  ;;  %7168 = vmatprep.subr.bf16.mxu1 %v7796_v31 }
 0x1b5   : > { %v1762_v21 = vadd.f32 %v9023_v20, %v1761_v51  ;;  %v6969_v32 = vpop.f32.mrb[90].mxu0 }
 0x1b6   : > { %v9380_v19 = vadd.f32 %v9054_v61, %v1770_v49  ;;  %v1773_v35 = vadd.f32 %v6969_v32, %v9056_v59  ;;  %v1764_v0 = vpop.f32.mrb[91].mxu0  ;;  %v7802_v61 = vld [vmem:[%s10074_s7 + $0x218] sm:$0xff]   ;;  %v10237_v59 = vld [vmem:[#allocation63_spill] sm:$0xff] }
 0x1b7   : > { %v9387_v29 = vadd.f32 %v9028_v46, %v1762_v21  ;;  %v1765_v20 = vadd.f32 %v9030_v4, %v1764_v0  ;;  %7169 = vmatpush3.bf16.msra.mxu1 %v7796_v31  ;;  %v3141_v46 = vor.u32 %v3140_v16, %v3136_v24  ;;  %v10238_v4 = vld [vmem:[#allocation43_spill] sm:$0xff]  ;;  %v7803_v21 = vld [vmem:[%s10074_s7 + $0x220] sm:$0xff]   ;;  %v10239_v32 = vld [vmem:[#allocation65_spill] sm:$0xff] }
 0x1b8   : > { %v9391_v56 = vadd.f32 %v9065_v34, %v1773_v35  ;;  %3624 = vmatmul.mubr.bf16.gmra.mrb[196].mxu0 %v10215_v22  ;;  %7170 = vmatprep.subr.bf16.mxu1 %v7799_v38  ;;  %v3150_v34 = vshll.u32 %v10238_v4, 16  ;;  %v3148_v2 = vshrl.u32 %v10238_v4, 16 }
 0x1b9   : > { %v9398_v49 = vadd.f32 %v10237_v59, %v1765_v20  ;;  %3631 = vmatprep.mubr.bf16.mxu0 %v9384_v1  ;;  %v9413_v28 = vsel %vm903_vm0, %v3141_v46, %v3145_v36  ;;  %v10240_v20 = vld [vmem:[#allocation44_spill] sm:$0xff] }
 0x1ba   : > { %4654 = vmatmul.mubr.bf16.gmra.mrb[100].mxu1 %v9402_v57  ;;  %v3152_v0 = vrot.slane %v3150_v34, 1  ;;  %v3155_v59 = vshll.u32 %v10240_v20, 16  ;;  %v10243_v20 = vld [vmem:[#allocation51_spill] sm:$0xff] }
 0x1bb   : > { %v6972_v31 = vpop.f32.mrb[92].mxu0  ;;  %4661 = vmatprep.mubr.bf16.mxu1 %v9179_v11  ;;  %7171 = vmatpush3.bf16.msra.mxu1 %v7799_v38 }
 0x1bc   : > { %v1786_v22 = vadd.f32 %v6972_v31, %v9125_v5  ;;  %v1777_v51 = vpop.f32.mrb[93].mxu0  ;;  %7172 = vmatprep.subr.bf16.mxu1 %v7802_v61 }
 0x1bd   : > { %v1778_v24 = vadd.f32 %v10239_v32, %v1777_v51  ;;  %v6973_v16 = vpop.f32.mrb[94].mxu0  ;;  %v7805_v32 = vld [vmem:[%s10074_s7 + $0x230] sm:$0xff]  }
 0x1be   : > { %v9417_v35 = vadd.f32 %v9138_v55, %v1786_v22  ;;  %v1789_v5 = vadd.f32 %v6973_v16, %v9140_v9  ;;  %v1780_v38 = vpop.f32.mrb[95].mxu0  ;;  %v7804_v9 = vld [vmem:[%s10074_s7 + $0x228] sm:$0xff]   ;;  %v10241_v55 = vld [vmem:[#allocation66_spill] sm:$0xff] }
 0x1bf   : > { %v9422_v31 = vadd.f32 %v9096_v17, %v1778_v24  ;;  %v1781_v51 = vadd.f32 %v9098_v30, %v1780_v38  ;;  %7173 = vmatpush3.bf16.msra.mxu1 %v7802_v61  ;;  %v9437_v17 = vld [vmem:[%s8397_s27 + $0x30] sm:$0xff]   ;;  %v3153_v30 = vor.u32 %v3152_v0, %v3148_v2  ;;  %v3157_v61 = vrot.slane %v3155_v59, 1 }
 0x1c0   : > { %v9426_v46 = vadd.f32 %v9149_v15, %v1789_v5  ;;  %3632 = vmatmul.mubr.bf16.gmra.mrb[200].mxu0 %v10227_v45  ;;  %7174 = vmatprep.subr.bf16.mxu1 %v7803_v21  ;;  %v10242_v15 = vld [vmem:[#allocation50_spill] sm:$0xff]  ;;  %v3167_v59 = vshll.u32 %v10243_v20, 16 }
 0x1c1   : > { %v9433_v36 = vadd.f32 %v10241_v55, %v1781_v51  ;;  %3639 = vmatprep.mubr.bf16.mxu0 %v9413_v28  ;;  %v3162_v34 = vshll.u32 %v10242_v15, 16  ;;  %v9446_v38 = vsel %vm903_vm0, %v3153_v30, %v3157_v61  ;;  %v3160_v2 = vshrl.u32 %v10242_v15, 16  ;;  %v7806_v55 = vld [vmem:[%s10074_s7 + $0x238] sm:$0xff]  }
 0x1c2   : > { %4662 = vmatmul.mubr.bf16.gmra.mrb[104].mxu1 %v9437_v17  ;;  %v9462_v61 = vld [vmem:[%s8397_s27 + $0x3c] sm:$0xff]  }
 0x1c3   : > { %v6398_v22 = vpop.f32.mrb[96].mxu0  ;;  %4669 = vmatprep.mubr.bf16.mxu1 %v9219_v63  ;;  %7175 = vmatpush3.bf16.msra.mxu1 %v7803_v21  ;;  %v3164_v0 = vrot.slane %v3162_v34, 1  ;;  %v3169_v34 = vrot.slane %v3167_v59, 1 }
 0x1c4   : > { %v6399_v45 = vpop.f32.mrb[97].mxu0  ;;  %7176 = vmatprep.subr.bf16.mxu1 %v7804_v9 }
 0x1c5   : > { %v6400_v24 = vadd.f32 %v6399_v45, %v6398_v22  ;;  %v6401_v16 = vpop.f32.mrb[98].mxu0  ;;  %v10245_v22 = vld [vmem:[#allocation53_spill] sm:$0xff] }
 0x1c6   : > { %v6402_v5 = vpop.f32.mrb[99].mxu0  ;;  %v3172_v20 = vshrl.u32 %v10245_v22, 16 }
 0x1c7   : > { %v9451_v21 = vadd.f32 %v6400_v24, %v9185_v58  ;;  %v6403_v51 = vadd.f32 %v6402_v5, %v6401_v16  ;;  %7177 = vmatpush3.bf16.msra.mxu1 %v7804_v9  ;;  %v3165_v58 = vor.u32 %v3164_v0, %v3160_v2  ;;  %v3174_v9 = vshll.u32 %v10245_v22, 16  ;;  %v10246_v2 = vld [vmem:[#allocation54_spill] sm:$0xff] }
 0x1c8   : > { %3640 = vmatmul.mubr.bf16.gmra.mrb[204].mxu0 %v10235_v6  ;;  %7178 = vmatprep.subr.bf16.mxu1 %v7805_v32  ;;  %v3179_v0 = vshll.u32 %v10246_v2, 16  ;;  %v10249_v2 = vld [vmem:[#allocation59_spill] sm:$0xff] }
 0x1c9   : > { %v9458_v30 = vadd.f32 %v6403_v51, %v9199_v10  ;;  %3647 = vmatprep.mubr.bf16.mxu0 %v9446_v38  ;;  %v9468_v5 = vsel %vm903_vm0, %v3165_v58, %v3169_v34  ;;  %v3176_v51 = vrot.slane %v3174_v9, 1  ;;  %v10248_v9 = vld [vmem:[#allocation58_spill] sm:$0xff] }
 0x1ca   : > { %4670 = vmatmul.mubr.bf16.gmra.mrb[108].mxu1 %v9462_v61  ;;  %v3181_v34 = vrot.slane %v3179_v0, 1 }
 0x1cb   : > { %10244 = vst [vmem:[#allocation3_spill] sm:$0xff] %v9458_v30  ;;  %v6404_v45 = vpop.f32.mrb[100].mxu0  ;;  %4677 = vmatprep.mubr.bf16.mxu1 %v9252_v13  ;;  %7179 = vmatpush3.bf16.msra.mxu1 %v7805_v32  ;;  %v3177_v58 = vor.u32 %v3176_v51, %v3172_v20 }
 0x1cc   : > { %v6405_v6 = vpop.f32.mrb[101].mxu0  ;;  %7180 = vmatprep.subr.bf16.mxu1 %v7806_v55 }
 0x1cd   : > { %v6406_v24 = vadd.f32 %v6405_v6, %v6404_v45  ;;  %v6407_v10 = vpop.f32.mrb[102].mxu0  ;;  %v9481_v45 = vld [vmem:[%s8397_s27 + $0x48] sm:$0xff]   ;;  %v3186_v6 = vshll.u32 %v10248_v9, 16 }
 0x1ce   : > { %v6408_v16 = vpop.f32.mrb[103].mxu0 }
 0x1cf   : > { %v9473_v59 = vadd.f32 %v6406_v24, %v9175_v8  ;;  %v6409_v30 = vadd.f32 %v6408_v16, %v6407_v10  ;;  %7181 = vmatpush3.bf16.msra.mxu1 %v7806_v55  ;;  %v3188_v16 = vrot.slane %v3186_v6, 1 }
 0x1d0   : > { %3648 = vmatmul.mubr.bf16.gmra.mrb[208].mxu0 %v10238_v4 }
 0x1d1   : > { %v9477_v32 = vadd.f32 %v6409_v30, %v9192_v3  ;;  %3655 = vmatprep.mubr.bf16.mxu0 %v9468_v5  ;;  %v9487_v3 = vsel %vm903_vm0, %v3177_v58, %v3181_v34  ;;  %v3184_v30 = vshrl.u32 %v10248_v9, 16 }
 0x1d2   : > { %4678 = vmatmul.mubr.bf16.gmra.mrb[112].mxu1 %v9481_v45 }
 0x1d3   : > { %10247 = vst [vmem:[#allocation4_spill] sm:$0xff] %v9477_v32  ;;  %v6410_v8 = vpop.f32.mrb[104].mxu0  ;;  %4685 = vmatprep.mubr.bf16.mxu1 %v9272_v12  ;;  %v3191_v32 = vshll.u32 %v10249_v2, 16  ;;  %v3189_v58 = vor.u32 %v3188_v16, %v3184_v30 }
 0x1d4   : > { %v6411_v55 = vpop.f32.mrb[105].mxu0 }
 0x1d5   : > { %v6412_v24 = vadd.f32 %v6411_v55, %v6410_v8  ;;  %v6413_v4 = vpop.f32.mrb[106].mxu0  ;;  %v9500_v8 = vld [vmem:[%s8397_s27 + $0x54] sm:$0xff]   ;;  %v3193_v34 = vrot.slane %v3191_v32, 1  ;;  %v9516_v32 = vld [vmem:[%s8397_s27 + $0x60] sm:$0xff]  }
 0x1d6   : > { %v6414_v10 = vpop.f32.mrb[107].mxu0 }
 0x1d7   : > { %v9492_v20 = vadd.f32 %v6412_v24, %v9228_v52  ;;  %v6415_v51 = vadd.f32 %v6414_v10, %v6413_v4 }
 0x1d8   : > { %3656 = vmatmul.mubr.bf16.gmra.mrb[212].mxu0 %v10242_v15  ;;  %v9505_v15 = vsel %vm903_vm0, %v3189_v58, %v3193_v34 }
 0x1d9   : > { %v9496_v0 = vadd.f32 %v6415_v51, %v9237_v42  ;;  %3663 = vmatprep.mubr.bf16.mxu0 %v9487_v3 }
 0x1da   : > { %4686 = vmatmul.mubr.bf16.gmra.mrb[116].mxu1 %v9500_v8 }
 0x1db   : > { %v6416_v6 = vpop.f32.mrb[108].mxu0  ;;  %4693 = vmatprep.mubr.bf16.mxu1 %v9319_v37 }
 0x1dc   : > { %v6417_v52 = vpop.f32.mrb[109].mxu0 }
 0x1dd   : > { %v6418_v55 = vadd.f32 %v6417_v52, %v6416_v6  ;;  %v6419_v24 = vpop.f32.mrb[110].mxu0  ;;  %v10250_v6 = vld [vmem:[#allocation64_spill] sm:$0xff] }
 0x1de   : > { %v6420_v4 = vpop.f32.mrb[111].mxu0  ;;  %v9529_v52 = vld [vmem:[%s8397_s27 + $0x6c] sm:$0xff]  }
 0x1df   : > { %v9508_v42 = vadd.f32 %v6418_v55, %v9223_v47  ;;  %v6421_v10 = vadd.f32 %v6420_v4, %v6419_v24 }
 0x1e0   : > { %3664 = vmatmul.mubr.bf16.gmra.mrb[216].mxu0 %v10245_v22 }
 0x1e1   : > { %v9512_v30 = vadd.f32 %v6421_v10, %v9232_v50  ;;  %3671 = vmatprep.mubr.bf16.mxu0 %v9505_v15 }
 0x1e2   : > { %4694 = vmatmul.mubr.bf16.gmra.mrb[120].mxu1 %v9516_v32 }
 0x1e3   : > { %v6422_v16 = vpop.f32.mrb[112].mxu0  ;;  %4701 = vmatprep.mubr.bf16.mxu1 %v9342_v40 }
 0x1e4   : > { %v6423_v2 = vpop.f32.mrb[113].mxu0 }
 0x1e5   : > { %v6424_v51 = vadd.f32 %v6423_v2, %v6422_v16  ;;  %v6425_v47 = vpop.f32.mrb[114].mxu0 }
 0x1e6   : > { %v6426_v58 = vpop.f32.mrb[115].mxu0 }
 0x1e7   : > { %v9521_v22 = vadd.f32 %v6424_v51, %v9255_v43  ;;  %v6427_v34 = vadd.f32 %v6426_v58, %v6425_v47  ;;  %v9542_v51 = vld [vmem:[%s8397_s27 + $0x78] sm:$0xff]  }
 0x1e8   : > { %3672 = vmatmul.mubr.bf16.gmra.mrb[220].mxu0 %v10248_v9 }
 0x1e9   : > { %v9525_v50 = vadd.f32 %v6427_v34, %v9263_v33  ;;  %4098 = vmatprep.mubr.bf16.mxu0 %v10250_v6  ;;  %v7832_v33 = vld [vmem:[%s8397_s27 + $0xc] sm:$0xff]  }
 0x1ea   : > { %4702 = vmatmul.mubr.bf16.gmra.mrb[124].mxu1 %v9529_v52 }
 0x1eb   : > { %v6428_v55 = vpop.f32.mrb[116].mxu0  ;;  %4709 = vmatprep.mubr.bf16.mxu1 %v9384_v1 }
 0x1ec   : > { %v6429_v24 = vpop.f32.mrb[117].mxu0 }
 0x1ed   : > { %v6430_v4 = vadd.f32 %v6429_v24, %v6428_v55  ;;  %v6431_v43 = vpop.f32.mrb[118].mxu0 }
 0x1ee   : > { %v6432_v10 = vpop.f32.mrb[119].mxu0 }
 0x1ef   : > { %v9534_v16 = vadd.f32 %v6430_v4, %v9248_v39  ;;  %v6433_v9 = vadd.f32 %v6432_v10, %v6431_v43 }
 0x1f0   : > { %4099 = vmatmul.mubr.bf16.vlgmr.msra.gmra.mrb[224].mxu0 %v7832_v33 }
 0x1f1   : > { %v9538_v2 = vadd.f32 %v6433_v9, %v9259_v53  ;;  %4106 = vmatprep.mubr.bf16.mxu0 %v9089_v25  ;;  %v9555_v53 = vld [vmem:[%s8397_s27 + $0x84] sm:$0xff]  }
 0x1f2   : > { %4710 = vmatmul.mubr.bf16.gmra.mrb[128].mxu1 %v9542_v51 }
 0x1f3   : > { %v6434_v47 = vpop.f32.mrb[120].mxu0  ;;  %4717 = vmatprep.mubr.bf16.mxu1 %v9413_v28 }
 0x1f4   : > { %v6435_v58 = vpop.f32.mrb[121].mxu0 }
 0x1f5   : > { %v6436_v34 = vadd.f32 %v6435_v58, %v6434_v47  ;;  %v6437_v39 = vpop.f32.mrb[122].mxu0  ;;  %v9568_v47 = vld [vmem:[%s8397_s27 + $0x90] sm:$0xff]  }
 0x1f6   : > { %v6438_v6 = vpop.f32.mrb[123].mxu0 }
 0x1f7   : > { %v9547_v55 = vadd.f32 %v6436_v34, %v9281_v7  ;;  %v6439_v24 = vadd.f32 %v6438_v6, %v6437_v39 }
 0x1f8   : > { %4107 = vmatmul.mubr.bf16.gmra.mrb[228].mxu0 %v9367_v44 }
 0x1f9   : > { %v9551_v25 = vadd.f32 %v6439_v24, %v9302_v41  ;;  %4114 = vmatprep.mubr.bf16.mxu0 %v9131_v18  ;;  %v10251_v41 = vld [vmem:[#allocation20_spill] sm:$0xff] }
 0x1fa   : > { %4718 = vmatmul.mubr.bf16.gmra.mrb[132].mxu1 %v9555_v53 }
 0x1fb   : > { %v6440_v4 = vpop.f32.mrb[124].mxu0  ;;  %4725 = vmatprep.mubr.bf16.mxu1 %v9446_v38 }
 0x1fc   : > { %v6441_v43 = vpop.f32.mrb[125].mxu0 }
 0x1fd   : > { %v6442_v10 = vadd.f32 %v6441_v43, %v6440_v4  ;;  %v6443_v7 = vpop.f32.mrb[126].mxu0 }
 0x1fe   : > { %v6444_v9 = vpop.f32.mrb[127].mxu0 }
 0x1ff   : > { %v9560_v33 = vadd.f32 %v6442_v10, %v9276_v14  ;;  %v6445_v44 = vadd.f32 %v6444_v9, %v6443_v7 }
 0x200   : > { %4115 = vmatmul.mubr.bf16.gmra.mrb[232].mxu0 %v9402_v57 }
 0x201   : > { %v9564_v18 = vadd.f32 %v6445_v44, %v10251_v41  ;;  %4122 = vmatprep.mubr.bf16.mxu0 %v9179_v11  ;;  %v9581_v11 = vld [vmem:[%s8397_s27 + $0x9c] sm:$0xff]  }
 0x202   : > { %4726 = vmatmul.mubr.bf16.gmra.mrb[136].mxu1 %v9568_v47 }
 0x203   : > { %v6446_v58 = vpop.f32.mrb[128].mxu0  ;;  %4733 = vmatprep.mubr.bf16.mxu1 %v9468_v5 }
 0x204   : > { %v6447_v34 = vpop.f32.mrb[129].mxu0 }
 0x205   : > { %v6448_v39 = vadd.f32 %v6447_v34, %v6446_v58  ;;  %v6449_v14 = vpop.f32.mrb[130].mxu0  ;;  %v10254_v34 = vld [vmem:[#allocation2_spill] sm:$0xff] }
 0x206   : > { %v6450_v6 = vpop.f32.mrb[131].mxu0 }
 0x207   : > { %v9573_v24 = vadd.f32 %v6448_v39, %v9322_v60  ;;  %v6451_v57 = vadd.f32 %v6450_v6, %v6449_v14  ;;  %v10252_v60 = vld [vmem:[#allocation6_spill] sm:$0xff]  ;;  %v3292_v39 = vshll.u32 %v10254_v34, 16  ;;  %v10255_v6 = vld [vmem:[#allocation8_spill] sm:$0xff] }
 0x208   : > { %4123 = vmatmul.mubr.bf16.gmra.mrb[236].mxu0 %v9437_v17  ;;  %v3287_v7 = vshll.u32 %v10252_v60, 16  ;;  %v3285_v41 = vshrl.u32 %v10252_v60, 16  ;;  %v9593_v14 = vld [vmem:[%s9295_s24] sm:$0xff]  }
 0x209   : > { %v9577_v4 = vadd.f32 %v6451_v57, %v9333_v54  ;;  %4130 = vmatprep.mubr.bf16.mxu0 %v9219_v63 }
 0x20a   : > { %4734 = vmatmul.mubr.bf16.gmra.mrb[140].mxu1 %v9581_v11  ;;  %v3289_v58 = vrot.slane %v3287_v7, 1  ;;  %v3294_v7 = vrot.slane %v3292_v39, 1 }
 0x20b   : > { %v6452_v43 = vpop.f32.mrb[132].mxu0  ;;  %4741 = vmatprep.mubr.bf16.mxu1 %v9487_v3 }
 0x20c   : > { %v6453_v10 = vpop.f32.mrb[133].mxu0 }
 0x20d   : > { %v6454_v9 = vadd.f32 %v6453_v10, %v6452_v43  ;;  %v6455_v44 = vpop.f32.mrb[134].mxu0  ;;  %v9600_v43 = vld [vmem:[%s8397_s27 + $0xa8] sm:$0xff]   ;;  %v3290_v10 = vor.u32 %v3289_v58, %v3285_v41  ;;  %v3311_v41 = vshrl.u32 %v9593_v14, 16 }
 0x20e   : > { %v6456_v17 = vpop.f32.mrb[135].mxu0 }
 0x20f   : > { %v9587_v54 = vadd.f32 %v6454_v9, %v9315_v26  ;;  %v6457_v63 = vadd.f32 %v6456_v17, %v6455_v44  ;;  %v9605_v9 = vld [vmem:[%s9295_s24 + $0x8] ss:$0 sps:$4 sm:$0x11]   ;;  %v3313_v44 = vshll.u32 %v9593_v14, 16 }
 0x210   : > { %4131 = vmatmul.mubr.bf16.gmra.mrb[240].mxu0 %v9462_v61  ;;  %v3318_v39 = vshll.u32 %v9605_v9, 16 }
 0x211   : > { %10253 = vst [vmem:[#allocation10_spill] sm:$0xff] %v9587_v54  ;;  %v9596_v57 = vadd.f32 %v6457_v63, %v10255_v6  ;;  %4138 = vmatprep.mubr.bf16.mxu0 %v9252_v13  ;;  %v3315_v58 = vrot.slane %v3313_v44, 1 }
 0x212   : > { %4742 = vmatmul.mubr.bf16.gmra.mrb[144].mxu1 %v9600_v43 }
 0x213   : > { %10256 = vst [vmem:[#allocation5_spill] sm:$0xff] %v9596_v57  ;;  %v6458_v26 = vpop.f32.mrb[136].mxu0  ;;  %4749 = vmatprep.mubr.bf16.mxu1 %v9505_v15  ;;  %v9613_v57 = vsel %vm903_vm0, %v3290_v10, %v3294_v7  ;;  %v3320_v10 = vrot.slane %v3318_v39, 1 }
 0x214   : > { %v6459_v61 = vpop.f32.mrb[137].mxu0 }
 0x215   : > { %v6460_v17 = vadd.f32 %v6459_v61, %v6458_v26  ;;  %v6461_v63 = vpop.f32.mrb[138].mxu0  ;;  %v9622_v26 = vld [vmem:[%s8397_s27 + $0xb4] sm:$0xff]   ;;  %v3316_v61 = vor.u32 %v3315_v58, %v3311_v41 }
 0x216   : > { %v6462_v34 = vpop.f32.mrb[139].mxu0 }
 0x217   : > { %v9609_v13 = vadd.f32 %v6460_v17, %v9351_v27  ;;  %v6463_v6 = vadd.f32 %v6462_v34, %v6461_v63 }
 0x218   : > { %4139 = vmatmul.mubr.bf16.gmra.mrb[244].mxu0 %v9481_v45 }
 0x219   : > { %v9618_v54 = vadd.f32 %v6463_v6, %v9362_v48  ;;  %4146 = vmatprep.mubr.bf16.mxu0 %v9272_v12  ;;  %v3321_v12 = vsel %vm903_vm0, %v3316_v61, %v3320_v10 }
 0x21a   : > { %4750 = vmatmul.mubr.bf16.gmra.mrb[148].mxu1 %v9622_v26 }
 0x21b   : > { %v6464_v27 = vpop.f32.mrb[140].mxu0  ;;  %4757 = vmatprep.mubr.bf16.mxu1 %v9613_v57 }
 0x21c   : > { %v6465_v45 = vpop.f32.mrb[141].mxu0 }
 0x21d   : > { %v6466_v7 = vadd.f32 %v6465_v45, %v6464_v27  ;;  %v6467_v17 = vpop.f32.mrb[142].mxu0 }
 0x21e   : > { %v6468_v44 = vpop.f32.mrb[143].mxu0 }
 0x21f   : > { %v9627_v63 = vadd.f32 %v6466_v7, %v9346_v62  ;;  %v6469_v48 = vadd.f32 %v6468_v44, %v6467_v17 }
 0x220   : > { %4147 = vmatmul.mubr.bf16.gmra.mrb[248].mxu0 %v9500_v8 }
 0x221   : > { %v9632_v34 = vadd.f32 %v6469_v48, %v9355_v23  ;;  %4154 = vmatprep.mubr.bf16.mxu0 %v9319_v37  ;;  %v10257_v23 = vld [vmem:[#allocation9_spill] sm:$0xff]  ;;  %v10259_v48 = vld [vmem:[#allocation15_spill] sm:$0xff] }
 0x222   : > { %4758 = vmatmul.mubr.bf16.gmra.mrb[152].mxu1 %v10252_v60 }
 0x223   : > { %v6470_v6 = vpop.f32.mrb[144].mxu0  ;;  %4765 = vmatprep.mubr.bf16.mxu1 %v3321_v12 }
 0x224   : > { %v6471_v41 = vpop.f32.mrb[145].mxu0 }
 0x225   : > { %v6472_v58 = vadd.f32 %v6471_v41, %v6470_v6  ;;  %v6473_v39 = vpop.f32.mrb[146].mxu0 }
 0x226   : > { %v6474_v27 = vpop.f32.mrb[147].mxu0 }
 0x227   : > { %v9637_v62 = vadd.f32 %v6472_v58, %v9387_v29  ;;  %v6475_v45 = vadd.f32 %v6474_v27, %v6473_v39  ;;  %v10261_v27 = vld [vmem:[#allocation22_spill] sm:$0xff] }
 0x228   : > { %4155 = vmatmul.mubr.bf16.gmra.mrb[252].mxu0 %v9516_v32 }
 0x229   : > { %v9641_v8 = vadd.f32 %v6475_v45, %v9398_v49  ;;  %4162 = vmatprep.mubr.bf16.mxu0 %v9342_v40  ;;  %v10258_v40 = vld [vmem:[#allocation13_spill] sm:$0xff] }
 0x22a   : > { %4766 = vmatmul.mubr.bf16.gmra.mrb[156].mxu1 %v9593_v14 }
 0x22b   : > { %v6476_v37 = vpop.f32.mrb[148].mxu0  ;;  %7182 = vmatprep.mubr.bf16.mxu1 %v10257_v23 }
 0x22c   : > { %v6477_v61 = vpop.f32.mrb[149].mxu0 }
 0x22d   : > { %v6478_v10 = vadd.f32 %v6477_v61, %v6476_v37  ;;  %v6479_v7 = vpop.f32.mrb[150].mxu0 }
 0x22e   : > { %v6480_v17 = vpop.f32.mrb[151].mxu0 }
 0x22f   : > { %v9647_v29 = vadd.f32 %v6478_v10, %v9380_v19  ;;  %v6481_v44 = vadd.f32 %v6480_v17, %v6479_v7  ;;  %v10263_v7 = vld [vmem:[#allocation32_spill] sm:$0xff] }
 0x230   : > { %4163 = vmatmul.mubr.bf16.gmra.mrb[0].mxu0 %v9529_v52 }
 0x231   : > { %v9651_v49 = vadd.f32 %v6481_v44, %v9391_v56  ;;  %4170 = vmatprep.mubr.bf16.mxu0 %v9384_v1  ;;  %v10260_v1 = vld [vmem:[#allocation19_spill] sm:$0xff] }
 0x232   : > { %7183 = vmatmul.mubr.bf16.vlgmr.msra.gmra.mrb[64].mxu1 %v10258_v40 }
 0x233   : > { %v6482_v32 = vpop.f32.mrb[152].mxu0  ;;  %7186 = vmatprep.mubr.bf16.mxu1 %v10259_v48 }
 0x234   : > { %v6483_v12 = vpop.f32.mrb[153].mxu0 }
 0x235   : > { %v6484_v6 = vadd.f32 %v6483_v12, %v6482_v32  ;;  %v6485_v41 = vpop.f32.mrb[154].mxu0 }
 0x236   : > { %v6486_v58 = vpop.f32.mrb[155].mxu0 }
 0x237   : > { %v9657_v19 = vadd.f32 %v6484_v6, %v9422_v31  ;;  %v6487_v39 = vadd.f32 %v6486_v58, %v6485_v41  ;;  %v10266_v6 = vld [vmem:[#allocation42_spill] sm:$0xff] }
 0x238   : > { %4171 = vmatmul.mubr.bf16.gmra.mrb[4].mxu0 %v9542_v51 }
 0x239   : > { %v9661_v56 = vadd.f32 %v6487_v39, %v9433_v36  ;;  %4178 = vmatprep.mubr.bf16.mxu0 %v9413_v28  ;;  %v10262_v28 = vld [vmem:[#allocation29_spill] sm:$0xff] }
 0x23a   : > { %7187 = vmatmul.mubr.bf16.gmra.mrb[68].mxu1 %v10260_v1 }
 0x23b   : > { %v6488_v52 = vpop.f32.mrb[156].mxu0  ;;  %7190 = vmatprep.mubr.bf16.mxu1 %v10261_v27 }
 0x23c   : > { %v6489_v45 = vpop.f32.mrb[157].mxu0 }
 0x23d   : > { %v6490_v37 = vadd.f32 %v6489_v45, %v6488_v52  ;;  %v6491_v23 = vpop.f32.mrb[158].mxu0 }
 0x23e   : > { %v6492_v61 = vpop.f32.mrb[159].mxu0 }
 0x23f   : > { %v9667_v31 = vadd.f32 %v6490_v37, %v9417_v35  ;;  %v6493_v10 = vadd.f32 %v6492_v61, %v6491_v23  ;;  %v10269_v37 = vld [vmem:[#allocation52_spill] sm:$0xff] }
 0x240   : > { %4179 = vmatmul.mubr.bf16.gmra.mrb[8].mxu0 %v9555_v53  ;;  %v10264_v53 = vld [vmem:[#allocation3_spill] sm:$0xff] }
 0x241   : > { %v9671_v36 = vadd.f32 %v6493_v10, %v9426_v46  ;;  %4186 = vmatprep.mubr.bf16.mxu0 %v9446_v38  ;;  %v10265_v38 = vld [vmem:[#allocation39_spill] sm:$0xff] }
 0x242   : > { %7191 = vmatmul.mubr.bf16.gmra.mrb[72].mxu1 %v10262_v28 }
 0x243   : > { %v6534_v51 = vpop.f32.mrb[160].mxu0  ;;  %7194 = vmatprep.mubr.bf16.mxu1 %v10263_v7 }
 0x244   : > { %v6535_v17 = vpop.f32.mrb[161].mxu0 }
 0x245   : > { %v6536_v44 = vadd.f32 %v6535_v17, %v6534_v51  ;;  %v6537_v40 = vpop.f32.mrb[162].mxu0  ;;  %v10271_v17 = vld [vmem:[#allocation60_spill] sm:$0xff] }
 0x246   : > { %v6538_v32 = vpop.f32.mrb[163].mxu0 }
 0x247   : > { %v9677_v35 = vadd.f32 %v9451_v21, %v6536_v44  ;;  %v6539_v48 = vadd.f32 %v6538_v32, %v6537_v40 }
 0x248   : > { %4187 = vmatmul.mubr.bf16.gmra.mrb[12].mxu0 %v9568_v47  ;;  %v10267_v47 = vld [vmem:[#allocation4_spill] sm:$0xff] }
 0x249   : > { %v9681_v46 = vadd.f32 %v10264_v53, %v6539_v48  ;;  %4194 = vmatprep.mubr.bf16.mxu0 %v9468_v5  ;;  %v10268_v5 = vld [vmem:[#allocation49_spill] sm:$0xff] }
 0x24a   : > { %7195 = vmatmul.mubr.bf16.gmra.mrb[76].mxu1 %v10265_v38  ;;  %v10273_v38 = vld [vmem:[#allocation7_spill] sm:$0xff] }
 0x24b   : > { %v6540_v12 = vpop.f32.mrb[164].mxu0  ;;  %7198 = vmatprep.mubr.bf16.mxu1 %v10266_v6  ;;  %v3324_v6 = vrot.slane %v9605_v9, 1 }
 0x24c   : > { %v6541_v41 = vpop.f32.mrb[165].mxu0 }
 0x24d   : > { %v6542_v58 = vadd.f32 %v6541_v41, %v6540_v12  ;;  %v6543_v39 = vpop.f32.mrb[166].mxu0  ;;  %v3323_v12 = vrot.slane %v9593_v14, 1 }
 0x24e   : > { %v6544_v1 = vpop.f32.mrb[167].mxu0 }
 0x24f   : > { %v9687_v21 = vadd.f32 %v9473_v59, %v6542_v58  ;;  %v6545_v52 = vadd.f32 %v6544_v1, %v6543_v39  ;;  %v3325_v1 = vsel %vm1112_vm1, %v3323_v12, %v3324_v6 }
 0x250   : > { %4195 = vmatmul.mubr.bf16.gmra.mrb[16].mxu0 %v9581_v11 }
 0x251   : > { %v9691_v27 = vadd.f32 %v10267_v47, %v6545_v52  ;;  %4202 = vmatprep.mubr.bf16.mxu0 %v9487_v3  ;;  %v10270_v3 = vld [vmem:[#allocation57_spill] sm:$0xff] }
 0x252   : > { %7199 = vmatmul.mubr.bf16.gmra.mrb[80].mxu1 %v10268_v5 }
 0x253   : > { %v6546_v45 = vpop.f32.mrb[168].mxu0  ;;  %7202 = vmatprep.mubr.bf16.mxu1 %v10269_v37 }
 0x254   : > { %v6547_v23 = vpop.f32.mrb[169].mxu0 }
 0x255   : > { %v6548_v61 = vadd.f32 %v6547_v23, %v6546_v45  ;;  %v6549_v10 = vpop.f32.mrb[170].mxu0 }
 0x256   : > { %v6550_v28 = vpop.f32.mrb[171].mxu0 }
 0x257   : > { %v9697_v59 = vadd.f32 %v9492_v20, %v6548_v61  ;;  %v6551_v51 = vadd.f32 %v6550_v28, %v6549_v10 }
 0x258   : > { %4203 = vmatmul.mubr.bf16.gmra.mrb[20].mxu0 %v9600_v43 }
 0x259   : > { %v9701_v11 = vadd.f32 %v9496_v0, %v6551_v51  ;;  %4210 = vmatprep.mubr.bf16.mxu0 %v9505_v15  ;;  %v10272_v15 = vld [vmem:[#allocation62_spill] sm:$0xff] }
 0x25a   : > { %7203 = vmatmul.mubr.bf16.gmra.mrb[84].mxu1 %v10270_v3 }
 0x25b   : > { %v6552_v7 = vpop.f32.mrb[172].mxu0  ;;  %7206 = vmatprep.mubr.bf16.mxu1 %v10271_v17 }
 0x25c   : > { %v6553_v44 = vpop.f32.mrb[173].mxu0 }
 0x25d   : > { %v6554_v40 = vadd.f32 %v6553_v44, %v6552_v7  ;;  %v6555_v32 = vpop.f32.mrb[174].mxu0 }
 0x25e   : > { %v6556_v48 = vpop.f32.mrb[175].mxu0 }
 0x25f   : > { %v9707_v20 = vadd.f32 %v9508_v42, %v6554_v40  ;;  %v6557_v53 = vadd.f32 %v6556_v48, %v6555_v32 }
 0x260   : > { %4211 = vmatmul.mubr.bf16.gmra.mrb[24].mxu0 %v9622_v26 }
 0x261   : > { %v9711_v0 = vadd.f32 %v9512_v30, %v6557_v53  ;;  %4218 = vmatprep.mubr.bf16.mxu0 %v9613_v57 }
 0x262   : > { %7207 = vmatmul.mubr.bf16.gmra.mrb[88].mxu1 %v10272_v15 }
 0x263   : > { %v6558_v43 = vpop.f32.mrb[176].mxu0  ;;  %7210 = vmatprep.mubr.bf16.mxu1 %v10273_v38 }
 0x264   : > { %v6559_v41 = vpop.f32.mrb[177].mxu0 }
 0x265   : > { %v6560_v42 = vadd.f32 %v6559_v41, %v6558_v43  ;;  %v6561_v58 = vpop.f32.mrb[178].mxu0 }
 0x266   : > { %v6562_v39 = vpop.f32.mrb[179].mxu0 }
 0x267   : > { %v9719_v26 = vadd.f32 %v9521_v22, %v6560_v42  ;;  %v6563_v30 = vadd.f32 %v6562_v39, %v6561_v58 }
 0x268   : > { %4219 = vmatmul.mubr.bf16.gmra.mrb[28].mxu0 %v10252_v60 }
 0x269   : > { %v9724_v57 = vadd.f32 %v9525_v50, %v6563_v30 }
 0x26a   : > { %7211 = vmatmul.mubr.bf16.gmra.mrb[92].mxu1 %v3325_v1 }
 0x26b   : > { %v6564_v52 = vpop.f32.mrb[180].mxu0 }
 0x26c   : > { %v6565_v14 = vpop.f32.mrb[181].mxu0 }
 0x26d   : > { %v6566_v47 = vadd.f32 %v6565_v14, %v6564_v52  ;;  %v6567_v9 = vpop.f32.mrb[182].mxu0 }
 0x26e   : > { %v6568_v5 = vpop.f32.mrb[183].mxu0 }
 0x26f   : > { %v9727_v45 = vadd.f32 %v9534_v16, %v6566_v47  ;;  %v6569_v37 = vadd.f32 %v6568_v5, %v6567_v9 }
 0x271   : > { %v9730_v22 = vadd.f32 %v9538_v2, %v6569_v37  ;;  %v10274_v37 = vld [vmem:[#allocation10_spill] sm:$0xff] }
 0x273   : > { %v6570_v23 = vpop.f32.mrb[184].mxu0 }
 0x274   : > { %v6571_v61 = vpop.f32.mrb[185].mxu0 }
 0x275   : > { %v6572_v10 = vadd.f32 %v6571_v61, %v6570_v23  ;;  %v6573_v60 = vpop.f32.mrb[186].mxu0 }
 0x276   : > { %v6574_v28 = vpop.f32.mrb[187].mxu0 }
 0x277   : > { %v9733_v50 = vadd.f32 %v9547_v55, %v6572_v10  ;;  %v6575_v51 = vadd.f32 %v6574_v28, %v6573_v60  ;;  %v10275_v28 = vld [vmem:[#allocation5_spill] sm:$0xff] }
 0x279   : > { %v9736_v3 = vadd.f32 %v9551_v25, %v6575_v51 }
 0x27b   : > { %v6576_v7 = vpop.f32.mrb[188].mxu0 }
 0x27c   : > { %v6577_v17 = vpop.f32.mrb[189].mxu0 }
 0x27d   : > { %v6578_v16 = vadd.f32 %v6577_v17, %v6576_v7  ;;  %v6579_v44 = vpop.f32.mrb[190].mxu0 }
 0x27e   : > { %v6580_v40 = vpop.f32.mrb[191].mxu0 }
 0x27f   : > { %v9739_v2 = vadd.f32 %v9560_v33, %v6578_v16  ;;  %v6581_v32 = vadd.f32 %v6580_v40, %v6579_v44 }
 0x281   : > { %v9742_v48 = vadd.f32 %v9564_v18, %v6581_v32 }
 0x283   : > { %v6582_v53 = vpop.f32.mrb[192].mxu0 }
 0x284   : > { %v6583_v15 = vpop.f32.mrb[193].mxu0 }
 0x285   : > { %v6806_v55 = vpop.f32.mrb[96].mxu1  ;;  %v6584_v43 = vadd.f32 %v6583_v15, %v6582_v53  ;;  %v6585_v38 = vpop.f32.mrb[194].mxu0 }
 0x286   : > { %v6807_v12 = vpop.f32.mrb[97].mxu1  ;;  %v6586_v25 = vpop.f32.mrb[195].mxu0 }
 0x287   : > { %v9745_v6 = vadd.f32 %v9573_v24, %v6584_v43  ;;  %v9747_v41 = vadd.f32 %v6807_v12, %v6806_v55  ;;  %v6809_v42 = vpop.f32.mrb[98].mxu1  ;;  %v6587_v58 = vadd.f32 %v6586_v25, %v6585_v38 }
 0x288   : > { %v6810_v33 = vpop.f32.mrb[99].mxu1 }
 0x289   : > { %v9750_v39 = vadd.f32 %v9577_v4, %v6587_v58  ;;  %v9752_v18 = vadd.f32 %v6810_v33, %v6809_v42 }
 0x28b   : > { %v6588_v30 = vpop.f32.mrb[196].mxu0 }
 0x28c   : > { %v6589_v1 = vpop.f32.mrb[197].mxu0 }
 0x28d   : > { %v6812_v52 = vpop.f32.mrb[100].mxu1  ;;  %v6590_v14 = vadd.f32 %v6589_v1, %v6588_v30  ;;  %v6591_v47 = vpop.f32.mrb[198].mxu0 }
 0x28e   : > { %v6813_v9 = vpop.f32.mrb[101].mxu1  ;;  %v6592_v5 = vpop.f32.mrb[199].mxu0 }
 0x28f   : > { %v9755_v24 = vadd.f32 %v10274_v37, %v6590_v14  ;;  %v9757_v23 = vadd.f32 %v6813_v9, %v6812_v52  ;;  %v6815_v61 = vpop.f32.mrb[102].mxu1  ;;  %v6593_v10 = vadd.f32 %v6592_v5, %v6591_v47 }
 0x290   : > { %v6816_v60 = vpop.f32.mrb[103].mxu1 }
 0x291   : > { %v9760_v4 = vadd.f32 %v10275_v28, %v6593_v10  ;;  %v9762_v51 = vadd.f32 %v6816_v60, %v6815_v61 }
 0x293   : > { %v6594_v7 = vpop.f32.mrb[200].mxu0 }
 0x294   : > { %v6595_v17 = vpop.f32.mrb[201].mxu0 }
 0x295   : > { %v6818_v16 = vpop.f32.mrb[104].mxu1  ;;  %v6596_v44 = vadd.f32 %v6595_v17, %v6594_v7  ;;  %v6597_v40 = vpop.f32.mrb[202].mxu0 }
 0x296   : > { %v6819_v32 = vpop.f32.mrb[105].mxu1  ;;  %v6598_v53 = vpop.f32.mrb[203].mxu0 }
 0x297   : > { %v9765_v15 = vadd.f32 %v9609_v13, %v6596_v44  ;;  %v9767_v55 = vadd.f32 %v6819_v32, %v6818_v16  ;;  %v6821_v43 = vpop.f32.mrb[106].mxu1  ;;  %v6599_v38 = vadd.f32 %v6598_v53, %v6597_v40 }
 0x298   : > { %v6822_v12 = vpop.f32.mrb[107].mxu1 }
 0x299   : > { %v9770_v25 = vadd.f32 %v9618_v54, %v6599_v38  ;;  %v9772_v42 = vadd.f32 %v6822_v12, %v6821_v43 }
 0x29b   : > { %v6600_v58 = vpop.f32.mrb[204].mxu0 }
 0x29c   : > { %v6601_v33 = vpop.f32.mrb[205].mxu0 }
 0x29d   : > { %v6824_v30 = vpop.f32.mrb[108].mxu1  ;;  %v6602_v1 = vadd.f32 %v6601_v33, %v6600_v58  ;;  %v6603_v52 = vpop.f32.mrb[206].mxu0 }
 0x29e   : > { %v6825_v14 = vpop.f32.mrb[109].mxu1  ;;  %v6604_v47 = vpop.f32.mrb[207].mxu0 }
 0x29f   : > { %v9775_v13 = vadd.f32 %v9627_v63, %v6602_v1  ;;  %v9777_v9 = vadd.f32 %v6825_v14, %v6824_v30  ;;  %v6827_v5 = vpop.f32.mrb[110].mxu1  ;;  %v6605_v37 = vadd.f32 %v6604_v47, %v6603_v52 }
 0x2a0   : > { %v6828_v61 = vpop.f32.mrb[111].mxu1 }
 0x2a1   : > { %v9780_v54 = vadd.f32 %v9632_v34, %v6605_v37  ;;  %v9782_v10 = vadd.f32 %v6828_v61, %v6827_v5 }
 0x2a3   : > { %v6606_v60 = vpop.f32.mrb[208].mxu0 }
 0x2a4   : > { %v6607_v28 = vpop.f32.mrb[209].mxu0 }
 0x2a5   : > { %v6830_v7 = vpop.f32.mrb[112].mxu1  ;;  %v6608_v17 = vadd.f32 %v6607_v28, %v6606_v60  ;;  %v6609_v16 = vpop.f32.mrb[210].mxu0 }
 0x2a6   : > { %v6831_v44 = vpop.f32.mrb[113].mxu1  ;;  %v6610_v40 = vpop.f32.mrb[211].mxu0 }
 0x2a7   : > { %v9785_v63 = vadd.f32 %v9637_v62, %v6608_v17  ;;  %v9787_v32 = vadd.f32 %v6831_v44, %v6830_v7  ;;  %v6833_v53 = vpop.f32.mrb[114].mxu1  ;;  %v6611_v43 = vadd.f32 %v6610_v40, %v6609_v16 }
 0x2a8   : > { %v6834_v38 = vpop.f32.mrb[115].mxu1 }
 0x2a9   : > { %v9790_v34 = vadd.f32 %v9641_v8, %v6611_v43  ;;  %v9792_v12 = vadd.f32 %v6834_v38, %v6833_v53 }
 0x2ab   : > { %v6612_v58 = vpop.f32.mrb[212].mxu0 }
 0x2ac   : > { %v6613_v33 = vpop.f32.mrb[213].mxu0 }
 0x2ad   : > { %v6836_v30 = vpop.f32.mrb[116].mxu1  ;;  %v6614_v1 = vadd.f32 %v6613_v33, %v6612_v58  ;;  %v6615_v52 = vpop.f32.mrb[214].mxu0 }
 0x2ae   : > { %v6837_v14 = vpop.f32.mrb[117].mxu1  ;;  %v6616_v47 = vpop.f32.mrb[215].mxu0 }
 0x2af   : > { %v9795_v62 = vadd.f32 %v9647_v29, %v6614_v1  ;;  %v9797_v5 = vadd.f32 %v6837_v14, %v6836_v30  ;;  %v6839_v37 = vpop.f32.mrb[118].mxu1  ;;  %v6617_v61 = vadd.f32 %v6616_v47, %v6615_v52 }
 0x2b0   : > { %v6840_v60 = vpop.f32.mrb[119].mxu1 }
 0x2b1   : > { %v9800_v8 = vadd.f32 %v9651_v49, %v6617_v61  ;;  %v9802_v28 = vadd.f32 %v6840_v60, %v6839_v37 }
 0x2b3   : > { %v6618_v7 = vpop.f32.mrb[216].mxu0 }
 0x2b4   : > { %v6619_v17 = vpop.f32.mrb[217].mxu0 }
 0x2b5   : > { %v6842_v16 = vpop.f32.mrb[120].mxu1  ;;  %v6620_v44 = vadd.f32 %v6619_v17, %v6618_v7  ;;  %v6621_v40 = vpop.f32.mrb[218].mxu0 }
 0x2b6   : > { %v6843_v53 = vpop.f32.mrb[121].mxu1  ;;  %v6622_v43 = vpop.f32.mrb[219].mxu0 }
 0x2b7   : > { %v9805_v29 = vadd.f32 %v9657_v19, %v6620_v44  ;;  %v9807_v38 = vadd.f32 %v6843_v53, %v6842_v16  ;;  %v6845_v58 = vpop.f32.mrb[122].mxu1  ;;  %v6623_v33 = vadd.f32 %v6622_v43, %v6621_v40 }
 0x2b8   : > { %v6846_v30 = vpop.f32.mrb[123].mxu1 }
 0x2b9   : > { %v9810_v49 = vadd.f32 %v9661_v56, %v6623_v33  ;;  %v9812_v1 = vadd.f32 %v6846_v30, %v6845_v58 }
 0x2bb   : > { %10276 = vst [vmem:[#allocation23_spill] sm:$0xff] %v9810_v49  ;;  %v6624_v52 = vpop.f32.mrb[220].mxu0 }
 0x2bc   : > { %v6625_v14 = vpop.f32.mrb[221].mxu0 }
 0x2bd   : > { %v6848_v47 = vpop.f32.mrb[124].mxu1  ;;  %v6626_v37 = vadd.f32 %v6625_v14, %v6624_v52  ;;  %v6627_v61 = vpop.f32.mrb[222].mxu0 }
 0x2be   : > { %v6849_v60 = vpop.f32.mrb[125].mxu1  ;;  %v6628_v7 = vpop.f32.mrb[223].mxu0 }
 0x2bf   : > { %v9815_v19 = vadd.f32 %v9667_v31, %v6626_v37  ;;  %v9817_v17 = vadd.f32 %v6849_v60, %v6848_v47  ;;  %v6851_v16 = vpop.f32.mrb[126].mxu1  ;;  %v6629_v44 = vadd.f32 %v6628_v7, %v6627_v61 }
 0x2c0   : > { %v6852_v40 = vpop.f32.mrb[127].mxu1 }
 0x2c1   : > { %v9820_v56 = vadd.f32 %v9671_v36, %v6629_v44  ;;  %v9822_v53 = vadd.f32 %v6852_v40, %v6851_v16 }
 0x2c3   : > { %10277 = vst [vmem:[#allocation17_spill] sm:$0xff] %v9820_v56  ;;  %v6670_v43 = vpop.f32.mrb[224].mxu0 }
 0x2c4   : > { %v6671_v58 = vpop.f32.mrb[225].mxu0 }
 0x2c5   : > { %v6854_v33 = vpop.f32.mrb[128].mxu1  ;;  %v6672_v30 = vadd.f32 %v6671_v58, %v6670_v43  ;;  %v6673_v52 = vpop.f32.mrb[226].mxu0 }
 0x2c6   : > { %v6855_v14 = vpop.f32.mrb[129].mxu1  ;;  %v6674_v49 = vpop.f32.mrb[227].mxu0 }
 0x2c7   : > { %v7225_v31 = vadd.f32 %v9677_v35, %v6672_v30  ;;  %v9825_v37 = vadd.f32 %v6855_v14, %v6854_v33  ;;  %v6857_v47 = vpop.f32.mrb[130].mxu1  ;;  %v6675_v60 = vadd.f32 %v6674_v49, %v6673_v52 }
 0x2c8   : > { %v6858_v61 = vpop.f32.mrb[131].mxu1 }
 0x2c9   : > { %v7239_v7 = vadd.f32 %v9681_v46, %v6675_v60  ;;  %v9828_v36 = vadd.f32 %v6858_v61, %v6857_v47  ;;  %v9831_v16 = vadd.f32 %v7225_v31, %v9747_v41 }
 0x2cb   : > { %v6676_v44 = vpop.f32.mrb[228].mxu0  ;;  %v9834_v40 = vadd.f32 %v7239_v7, %v9752_v18 }
 0x2cc   : > { %v6677_v43 = vpop.f32.mrb[229].mxu0 }
 0x2cd   : > { %v6860_v58 = vpop.f32.mrb[132].mxu1  ;;  %v6678_v56 = vadd.f32 %v6677_v43, %v6676_v44  ;;  %v6679_v35 = vpop.f32.mrb[230].mxu0 }
 0x2ce   : > { %v6861_v33 = vpop.f32.mrb[133].mxu1  ;;  %v6680_v30 = vpop.f32.mrb[231].mxu0 }
 0x2cf   : > { %v7218_v49 = vadd.f32 %v9687_v21, %v6678_v56  ;;  %v9837_v52 = vadd.f32 %v6861_v33, %v6860_v58  ;;  %v6863_v46 = vpop.f32.mrb[134].mxu1  ;;  %v6681_v14 = vadd.f32 %v6680_v30, %v6679_v35 }
 0x2d0   : > { %v6864_v47 = vpop.f32.mrb[135].mxu1 }
 0x2d1   : > { %v7232_v41 = vadd.f32 %v9691_v27, %v6681_v14  ;;  %v9840_v31 = vadd.f32 %v6864_v47, %v6863_v46  ;;  %v9843_v18 = vadd.f32 %v7218_v49, %v9757_v23 }
 0x2d3   : > { %v6682_v60 = vpop.f32.mrb[232].mxu0  ;;  %v9846_v61 = vadd.f32 %v7232_v41, %v9762_v51 }
 0x2d4   : > { %v6683_v7 = vpop.f32.mrb[233].mxu0 }
 0x2d5   : > { %v6866_v44 = vpop.f32.mrb[136].mxu1  ;;  %v6684_v43 = vadd.f32 %v6683_v7, %v6682_v60  ;;  %v6685_v21 = vpop.f32.mrb[234].mxu0 }
 0x2d6   : > { %v6867_v56 = vpop.f32.mrb[137].mxu1  ;;  %v6686_v58 = vpop.f32.mrb[235].mxu0 }
 0x2d7   : > { %v7253_v35 = vadd.f32 %v9697_v59, %v6684_v43  ;;  %v9849_v33 = vadd.f32 %v6867_v56, %v6866_v44  ;;  %v6869_v27 = vpop.f32.mrb[138].mxu1  ;;  %v6687_v30 = vadd.f32 %v6686_v58, %v6685_v21 }
 0x2d8   : > { %v6870_v46 = vpop.f32.mrb[139].mxu1 }
 0x2d9   : > { %v7267_v23 = vadd.f32 %v9701_v11, %v6687_v30  ;;  %v9852_v49 = vadd.f32 %v6870_v46, %v6869_v27  ;;  %v9855_v51 = vadd.f32 %v7253_v35, %v9767_v55 }
 0x2db   : > { %v6688_v14 = vpop.f32.mrb[236].mxu0  ;;  %v9858_v47 = vadd.f32 %v7267_v23, %v9772_v42 }
 0x2dc   : > { %v6689_v41 = vpop.f32.mrb[237].mxu0 }
 0x2dd   : > { %v6872_v60 = vpop.f32.mrb[140].mxu1  ;;  %v6690_v7 = vadd.f32 %v6689_v41, %v6688_v14  ;;  %v6691_v59 = vpop.f32.mrb[238].mxu0 }
 0x2de   : > { %v6873_v44 = vpop.f32.mrb[141].mxu1  ;;  %v6692_v43 = vpop.f32.mrb[239].mxu0 }
 0x2df   : > { %v7246_v21 = vadd.f32 %v9707_v20, %v6690_v7  ;;  %v9861_v56 = vadd.f32 %v6873_v44, %v6872_v60  ;;  %v6875_v11 = vpop.f32.mrb[142].mxu1  ;;  %v6693_v58 = vadd.f32 %v6692_v43, %v6691_v59 }
 0x2e0   : > { %v6876_v27 = vpop.f32.mrb[143].mxu1 }
 0x2e1   : > { %v7260_v55 = vadd.f32 %v9711_v0, %v6693_v58  ;;  %v9864_v35 = vadd.f32 %v6876_v27, %v6875_v11  ;;  %v9867_v42 = vadd.f32 %v7246_v21, %v9777_v9 }
 0x2e3   : > { %v6694_v30 = vpop.f32.mrb[240].mxu0  ;;  %v9870_v46 = vadd.f32 %v7260_v55, %v9782_v10 }
 0x2e4   : > { %v6695_v23 = vpop.f32.mrb[241].mxu0 }
 0x2e5   : > { %v6878_v14 = vpop.f32.mrb[144].mxu1  ;;  %v6696_v41 = vadd.f32 %v6695_v23, %v6694_v30  ;;  %v6697_v20 = vpop.f32.mrb[242].mxu0 }
 0x2e6   : > { %v6879_v60 = vpop.f32.mrb[145].mxu1  ;;  %v6698_v7 = vpop.f32.mrb[243].mxu0 }
 0x2e7   : > { %v7281_v59 = vadd.f32 %v9719_v26, %v6696_v41  ;;  %v9873_v44 = vadd.f32 %v6879_v60, %v6878_v14  ;;  %v6881_v0 = vpop.f32.mrb[146].mxu1  ;;  %v6699_v43 = vadd.f32 %v6698_v7, %v6697_v20 }
 0x2e8   : > { %v6882_v11 = vpop.f32.mrb[147].mxu1 }
 0x2e9   : > { %v7295_v9 = vadd.f32 %v9724_v57, %v6699_v43  ;;  %v9876_v21 = vadd.f32 %v6882_v11, %v6881_v0  ;;  %v9879_v10 = vadd.f32 %v7281_v59, %v9787_v32 }
 0x2eb   : > { %v6700_v58 = vpop.f32.mrb[244].mxu0  ;;  %v9882_v27 = vadd.f32 %v7295_v9, %v9792_v12 }
 0x2ec   : > { %v6701_v55 = vpop.f32.mrb[245].mxu0 }
 0x2ed   : > { %v6884_v30 = vpop.f32.mrb[148].mxu1  ;;  %v6702_v23 = vadd.f32 %v6701_v55, %v6700_v58  ;;  %v6703_v26 = vpop.f32.mrb[246].mxu0 }
 0x2ee   : > { %v6885_v14 = vpop.f32.mrb[149].mxu1  ;;  %v6704_v41 = vpop.f32.mrb[247].mxu0 }
 0x2ef   : > { %v7274_v20 = vadd.f32 %v9727_v45, %v6702_v23  ;;  %v9885_v60 = vadd.f32 %v6885_v14, %v6884_v30  ;;  %v6887_v57 = vpop.f32.mrb[150].mxu1  ;;  %v6705_v7 = vadd.f32 %v6704_v41, %v6703_v26 }
 0x2f0   : > { %v6888_v0 = vpop.f32.mrb[151].mxu1 }
 0x2f1   : > { %v7288_v32 = vadd.f32 %v9730_v22, %v6705_v7  ;;  %v9888_v59 = vadd.f32 %v6888_v0, %v6887_v57  ;;  %v9891_v12 = vadd.f32 %v7274_v20, %v9797_v5 }
 0x2f3   : > { %v6706_v43 = vpop.f32.mrb[248].mxu0  ;;  %v9894_v11 = vadd.f32 %v7288_v32, %v9802_v28 }
 0x2f4   : > { %v6707_v9 = vpop.f32.mrb[249].mxu0 }
 0x2f5   : > { %v6890_v58 = vpop.f32.mrb[152].mxu1  ;;  %v6708_v55 = vadd.f32 %v6707_v9, %v6706_v43  ;;  %v6709_v45 = vpop.f32.mrb[250].mxu0 }
 0x2f6   : > { %v6891_v30 = vpop.f32.mrb[153].mxu1  ;;  %v6710_v23 = vpop.f32.mrb[251].mxu0 }
 0x2f7   : > { %v7309_v26 = vadd.f32 %v9733_v50, %v6708_v55  ;;  %v9897_v14 = vadd.f32 %v6891_v30, %v6890_v58  ;;  %v6893_v22 = vpop.f32.mrb[154].mxu1  ;;  %v6711_v41 = vadd.f32 %v6710_v23, %v6709_v45 }
 0x2f8   : > { %v6894_v57 = vpop.f32.mrb[155].mxu1 }
 0x2f9   : > { %v7323_v5 = vadd.f32 %v9736_v3, %v6711_v41  ;;  %v9900_v20 = vadd.f32 %v6894_v57, %v6893_v22  ;;  %v9903_v28 = vadd.f32 %v7309_v26, %v9807_v38 }
 0x2fb   : > { %v6712_v7 = vpop.f32.mrb[252].mxu0  ;;  %v9906_v0 = vadd.f32 %v7323_v5, %v9812_v1 }
 0x2fc   : > { %v6713_v32 = vpop.f32.mrb[253].mxu0 }
 0x2fd   : > { %v6896_v43 = vpop.f32.mrb[156].mxu1  ;;  %v6714_v9 = vadd.f32 %v6713_v32, %v6712_v7  ;;  %v6715_v50 = vpop.f32.mrb[254].mxu0 }
 0x2fe   : > { %v6897_v58 = vpop.f32.mrb[157].mxu1  ;;  %v6716_v55 = vpop.f32.mrb[255].mxu0 }
 0x2ff   : > { %v7302_v45 = vadd.f32 %v9739_v2, %v6714_v9  ;;  %v9909_v30 = vadd.f32 %v6897_v58, %v6896_v43  ;;  %v6899_v3 = vpop.f32.mrb[158].mxu1  ;;  %v6717_v23 = vadd.f32 %v6716_v55, %v6715_v50 }
 0x300   : > { %v6900_v22 = vpop.f32.mrb[159].mxu1 }
 0x301   : > { %10278 = vst [vmem:[#allocation11_spill] sm:$0xff] %v9909_v30  ;;  %v7316_v38 = vadd.f32 %v9742_v48, %v6717_v23  ;;  %v9912_v26 = vadd.f32 %v6900_v22, %v6899_v3  ;;  %v9915_v1 = vadd.f32 %v7302_v45, %v9817_v17  ;;  %v9924_v48 = vld [vmem:[%s10075_s8] ss:$0 sm:$0xff] }
 0x303   : > { %10279 = vst [vmem:[#allocation18_spill] sm:$0xff] %v9912_v26  ;;  %v6718_v41 = vpop.f32.mrb[0].mxu0  ;;  %v9918_v57 = vadd.f32 %v7316_v38, %v9822_v53 }
 0x304   : > { %v6719_v5 = vpop.f32.mrb[1].mxu0 }
 0x305   : > { %v7184_v7 = vpop.f32.mrb[64].mxu1  ;;  %v6720_v2 = vadd.f32 %v6719_v5, %v6718_v41  ;;  %v6721_v32 = vpop.f32.mrb[2].mxu0 }
 0x306   : > { %v7220_v43 = vadd.f32 %v9843_v18, %v7184_v7  ;;  %v4808_v9 = vpop.f32.mrb[65].mxu1  ;;  %v6722_v50 = vpop.f32.mrb[3].mxu0 }
 0x307   : > { %v7337_v17 = vadd.f32 %v9745_v6, %v6720_v2  ;;  %v7227_v58 = vadd.f32 %v9831_v16, %v4808_v9  ;;  %v7185_v55 = vpop.f32.mrb[66].mxu1  ;;  %v6723_v53 = vadd.f32 %v6722_v50, %v6721_v32 }
 0x308   : > { %v7234_v45 = vadd.f32 %v9846_v61, %v7185_v55  ;;  %v4811_v3 = vpop.f32.mrb[67].mxu1  ;;  %v4976_v41 = vadd.f32 %v7220_v43, %v9924_v48 }
 0x309   : > { %v4974_v23 = vadd.f32 %v7227_v58, %v9924_v48  ;;  %v7351_v18 = vadd.f32 %v9750_v39, %v6723_v53  ;;  %v7241_v22 = vadd.f32 %v9834_v40, %v4811_v3  ;;  %v9934_v38 = vadd.f32 %v7337_v17, %v9825_v37 }
 0x30a   : > { %v4977_v6 = vadd.f32 %v7234_v45, %v9924_v48  ;;  %v5205_v17 = vmul.f32 %v4976_v41, %v4976_v41 }
 0x30b   : > { %v4975_v16 = vadd.f32 %v7241_v22, %v9924_v48  ;;  %v6724_v61 = vpop.f32.mrb[4].mxu0  ;;  %v9945_v39 = vadd.f32 %v7351_v18, %v9828_v36  ;;  %v5203_v40 = vmul.f32 %v4974_v23, %v4974_v23 }
 0x30c   : > { %v6023_v37 = vpack.c.bf16 %v4977_v6, %v4976_v41  ;;  %v6725_v5 = vpop.f32.mrb[5].mxu0  ;;  %v5206_v26 = vmul.f32 %v4977_v6, %v4977_v6 }
 0x30d   : > { %v6018_v7 = vpack.c.bf16 %v4975_v16, %v4974_v23  ;;  %v5166_v2 = vadd.f32 %v4975_v16, %v4974_v23  ;;  %v5204_v32 = vmul.f32 %v4975_v16, %v4975_v16  ;;  %v7188_v43 = vpop.f32.mrb[68].mxu1  ;;  %v6726_v9 = vadd.f32 %v6725_v5, %v6724_v61  ;;  %v6727_v50 = vpop.f32.mrb[6].mxu0 }
 0x30e   : > { %6095 = vst [vmem:[%s9941_s22 + $0x8] sm:$0xff] %v6023_v37   ;;  %v7248_v58 = vadd.f32 %v9867_v42, %v7188_v43  ;;  %v4824_v55 = vpop.f32.mrb[69].mxu1  ;;  %v6728_v53 = vpop.f32.mrb[7].mxu0 }
 0x30f   : > { %6019 = vst [vmem:[%s9941_s22] sm:$0xff] %v6018_v7   ;;  %v5167_v45 = vadd.f32 %v5166_v2, %v4976_v41  ;;  %v5235_v3 = vadd.f32 %v5204_v32, %v5203_v40  ;;  %v7330_v36 = vadd.f32 %v9755_v24, %v6726_v9  ;;  %v7255_v18 = vadd.f32 %v9855_v51, %v4824_v55  ;;  %v7189_v22 = vpop.f32.mrb[70].mxu1 }
 0x310   : > { %v7262_v23 = vadd.f32 %v9870_v46, %v7189_v22  ;;  %v6729_v16 = vadd.f32 %v6728_v53, %v6727_v50  ;;  %v4827_v61 = vpop.f32.mrb[71].mxu1  ;;  %v4980_v7 = vadd.f32 %v7248_v58, %v9924_v48 }
 0x311   : > { %v5236_v5 = vadd.f32 %v5235_v3, %v5205_v17  ;;  %v4978_v37 = vadd.f32 %v7255_v18, %v9924_v48  ;;  %v5168_v30 = vadd.f32 %v5167_v45, %v4977_v6  ;;  %v7269_v42 = vadd.f32 %v9858_v47, %v4827_v61 }
 0x312   : > { %v4981_v41 = vadd.f32 %v7262_v23, %v9924_v48  ;;  %v7344_v24 = vadd.f32 %v9760_v4, %v6729_v16  ;;  %v9959_v51 = vadd.f32 %v7330_v36, %v9837_v52  ;;  %v5209_v53 = vmul.f32 %v4980_v7, %v4980_v7 }
 0x313   : > { %v5169_v40 = vadd.f32 %v5168_v30, %v4978_v37  ;;  %v5207_v46 = vmul.f32 %v4978_v37, %v4978_v37  ;;  %v5237_v2 = vadd.f32 %v5236_v5, %v5206_v26  ;;  %v4979_v32 = vadd.f32 %v7269_v42, %v9924_v48  ;;  %v6730_v43 = vpop.f32.mrb[8].mxu0 }
 0x314   : > { %v6033_v6 = vpack.c.bf16 %v4981_v41, %v4980_v7  ;;  %v6731_v9 = vpop.f32.mrb[9].mxu0  ;;  %v9963_v47 = vadd.f32 %v7344_v24, %v9840_v31  ;;  %v5210_v16 = vmul.f32 %v4981_v41, %v4981_v41 }
 0x315   : > { %v5238_v50 = vadd.f32 %v5237_v2, %v5207_v46  ;;  %v6028_v17 = vpack.c.bf16 %v4979_v32, %v4978_v37  ;;  %v5170_v58 = vadd.f32 %v5169_v40, %v4979_v32  ;;  %v5208_v4 = vmul.f32 %v4979_v32, %v4979_v32  ;;  %v7192_v55 = vpop.f32.mrb[72].mxu1  ;;  %v6733_v52 = vpop.f32.mrb[10].mxu0 }
 0x316   : > { %6097 = vst [vmem:[%s9941_s22 + $0x18] sm:$0xff] %v6033_v6   ;;  %v7276_v30 = vadd.f32 %v9891_v12, %v7192_v55  ;;  %v6732_v26 = vadd.f32 %v6731_v9, %v6730_v43  ;;  %v4840_v45 = vpop.f32.mrb[73].mxu1  ;;  %v6734_v3 = vpop.f32.mrb[11].mxu0 }
 0x317   : > { %6096 = vst [vmem:[%s9941_s22 + $0x10] sm:$0xff] %v6028_v17   ;;  %v5171_v36 = vadd.f32 %v5170_v58, %v4980_v7  ;;  %v5239_v18 = vadd.f32 %v5238_v50, %v5208_v4  ;;  %v7283_v22 = vadd.f32 %v9879_v10, %v4840_v45  ;;  %v7193_v31 = vpop.f32.mrb[74].mxu1  ;;  %v6735_v23 = vadd.f32 %v6734_v3, %v6733_v52 }
 0x318   : > { %v7365_v61 = vadd.f32 %v9765_v15, %v6732_v26  ;;  %v7290_v5 = vadd.f32 %v9894_v11, %v7193_v31  ;;  %v4843_v37 = vpop.f32.mrb[75].mxu1  ;;  %v4984_v46 = vadd.f32 %v7276_v30, %v9924_v48 }
 0x319   : > { %v5240_v42 = vadd.f32 %v5239_v18, %v5209_v53  ;;  %v4982_v24 = vadd.f32 %v7283_v22, %v9924_v48  ;;  %v5172_v12 = vadd.f32 %v5171_v36, %v4981_v41  ;;  %v7379_v40 = vadd.f32 %v9770_v25, %v6735_v23 }
 0x31a   : > { %v4985_v7 = vadd.f32 %v7290_v5, %v9924_v48  ;;  %v7297_v10 = vadd.f32 %v9882_v27, %v4843_v37  ;;  %v9977_v2 = vadd.f32 %v7365_v61, %v9849_v33  ;;  %v5213_v26 = vmul.f32 %v4984_v46, %v4984_v46 }
 0x31b   : > { %v5173_v15 = vadd.f32 %v5172_v12, %v4982_v24  ;;  %v5211_v32 = vmul.f32 %v4982_v24, %v4982_v24  ;;  %v5241_v11 = vadd.f32 %v5240_v42, %v5210_v16  ;;  %v6736_v43 = vpop.f32.mrb[12].mxu0  ;;  %v9980_v6 = vadd.f32 %v7379_v40, %v9852_v49 }
 0x31c   : > { %v6043_v41 = vpack.c.bf16 %v4985_v7, %v4984_v46  ;;  %v4983_v25 = vadd.f32 %v7297_v10, %v9924_v48  ;;  %v6737_v9 = vpop.f32.mrb[13].mxu0  ;;  %v5214_v18 = vmul.f32 %v4985_v7, %v4985_v7 }
 0x31d   : > { %v5242_v50 = vadd.f32 %v5241_v11, %v5211_v32  ;;  %v7196_v17 = vpop.f32.mrb[76].mxu1  ;;  %v6738_v58 = vadd.f32 %v6737_v9, %v6736_v43  ;;  %v6739_v4 = vpop.f32.mrb[14].mxu0 }
 0x31e   : > { %6099 = vst [vmem:[%s9941_s22 + $0x28] sm:$0xff] %v6043_v41   ;;  %v6038_v27 = vpack.c.bf16 %v4983_v25, %v4982_v24  ;;  %v5174_v33 = vadd.f32 %v5173_v15, %v4983_v25  ;;  %v5212_v55 = vmul.f32 %v4983_v25, %v4983_v25  ;;  %v7304_v52 = vadd.f32 %v9915_v1, %v7196_v17  ;;  %v4856_v53 = vpop.f32.mrb[77].mxu1  ;;  %v6740_v30 = vpop.f32.mrb[15].mxu0 }
 0x31f   : > { %v7358_v49 = vadd.f32 %v9775_v13, %v6738_v58  ;;  %v7311_v45 = vadd.f32 %v9903_v28, %v4856_v53  ;;  %v7197_v3 = vpop.f32.mrb[78].mxu1  ;;  %v6741_v36 = vadd.f32 %v6740_v30, %v6739_v4 }
 0x320   : > { %6098 = vst [vmem:[%s9941_s22 + $0x20] sm:$0xff] %v6038_v27   ;;  %v5175_v22 = vadd.f32 %v5174_v33, %v4984_v46  ;;  %v5243_v31 = vadd.f32 %v5242_v50, %v5212_v55  ;;  %v7318_v23 = vadd.f32 %v9918_v57, %v7197_v3  ;;  %v4859_v16 = vpop.f32.mrb[79].mxu1  ;;  %v4988_v28 = vadd.f32 %v7304_v52, %v9924_v48 }
 0x321   : > { %v4986_v61 = vadd.f32 %v7311_v45, %v9924_v48  ;;  %v7372_v1 = vadd.f32 %v9780_v54, %v6741_v36  ;;  %v7325_v5 = vadd.f32 %v9906_v0, %v4859_v16  ;;  %v7359_v37 = vadd.f32 %v7358_v49, %v9861_v56 }
 0x322   : > { %v5244_v13 = vadd.f32 %v5243_v31, %v5213_v26  ;;  %v5176_v42 = vadd.f32 %v5175_v22, %v4985_v7  ;;  %v4989_v24 = vadd.f32 %v7318_v23, %v9924_v48  ;;  %v5217_v58 = vmul.f32 %v4988_v28, %v4988_v28 }
 0x323   : > { %v5215_v12 = vmul.f32 %v4986_v61, %v4986_v61  ;;  %v4987_v40 = vadd.f32 %v7325_v5, %v9924_v48  ;;  %v6742_v57 = vpop.f32.mrb[16].mxu0  ;;  %v9997_v46 = vadd.f32 %v7372_v1, %v9864_v35 }
 0x324   : > { %v5177_v10 = vadd.f32 %v5176_v42, %v4986_v61  ;;  %v5245_v54 = vadd.f32 %v5244_v13, %v5214_v18  ;;  %v6053_v0 = vpack.c.bf16 %v4989_v24, %v4988_v28  ;;  %v6743_v15 = vpop.f32.mrb[17].mxu0  ;;  %v5218_v55 = vmul.f32 %v4989_v24, %v4989_v24 }
 0x325   : > { %v6048_v56 = vpack.c.bf16 %v4987_v40, %v4986_v61  ;;  %v5216_v32 = vmul.f32 %v4987_v40, %v4987_v40  ;;  %v7200_v11 = vpop.f32.mrb[80].mxu1  ;;  %v6744_v43 = vadd.f32 %v6743_v15, %v6742_v57  ;;  %v6745_v7 = vpop.f32.mrb[18].mxu0 }
 0x326   : > { %v5246_v41 = vadd.f32 %v5245_v54, %v5215_v12  ;;  %6101 = vst [vmem:[%s9941_s22 + $0x38] sm:$0xff] %v6053_v0   ;;  %v5178_v25 = vadd.f32 %v5177_v10, %v4987_v40  ;;  %v7332_v9 = vadd.f32 %v9959_v51, %v7200_v11  ;;  %v4872_v50 = vpop.f32.mrb[81].mxu1  ;;  %v6746_v17 = vpop.f32.mrb[19].mxu0 }
 0x327   : > { %6100 = vst [vmem:[%s9941_s22 + $0x30] sm:$0xff] %v6048_v56   ;;  %v7393_v35 = vadd.f32 %v9785_v63, %v6744_v43  ;;  %v7339_v4 = vadd.f32 %v9934_v38, %v4872_v50  ;;  %v7201_v27 = vpop.f32.mrb[82].mxu1  ;;  %v6747_v33 = vadd.f32 %v6746_v17, %v6745_v7 }
 0x328   : > { %v5179_v52 = vadd.f32 %v5178_v25, %v4988_v28  ;;  %v5247_v53 = vadd.f32 %v5246_v41, %v5216_v32  ;;  %v7346_v30 = vadd.f32 %v9963_v47, %v7201_v27  ;;  %v4875_v26 = vpop.f32.mrb[83].mxu1  ;;  %v4992_v38 = vadd.f32 %v7332_v9, %v9924_v48 }
 0x329   : > { %v4990_v49 = vadd.f32 %v7339_v4, %v9924_v48  ;;  %v7407_v51 = vadd.f32 %v9790_v34, %v6747_v33  ;;  %v7353_v45 = vadd.f32 %v9945_v39, %v4875_v26  ;;  %v10009_v3 = vadd.f32 %v7393_v35, %v9873_v44 }
 0x32a   : > { %v5248_v63 = vadd.f32 %v5247_v53, %v5217_v58  ;;  %v5180_v36 = vadd.f32 %v5179_v52, %v4989_v24  ;;  %v4993_v18 = vadd.f32 %v7346_v30, %v9924_v48  ;;  %v5221_v10 = vmul.f32 %v4992_v38, %v4992_v38 }
 0x32b   : > { %v5219_v22 = vmul.f32 %v4990_v49, %v4990_v49  ;;  %v4991_v47 = vadd.f32 %v7353_v45, %v9924_v48  ;;  %v6748_v31 = vpop.f32.mrb[20].mxu0  ;;  %v10015_v23 = vadd.f32 %v7407_v51, %v9876_v21 }
 0x32c   : > { %v5181_v34 = vadd.f32 %v5180_v36, %v4990_v49  ;;  %v5249_v39 = vadd.f32 %v5248_v63, %v5218_v55  ;;  %v6063_v16 = vpack.c.bf16 %v4993_v18, %v4992_v38  ;;  %v6749_v44 = vpop.f32.mrb[21].mxu0  ;;  %v5222_v56 = vmul.f32 %v4993_v18, %v4993_v18 }
 0x32d   : > { %v6058_v61 = vpack.c.bf16 %v4991_v47, %v4990_v49  ;;  %v5220_v1 = vmul.f32 %v4991_v47, %v4991_v47  ;;  %v7204_v5 = vpop.f32.mrb[84].mxu1  ;;  %v6750_v13 = vadd.f32 %v6749_v44, %v6748_v31  ;;  %v6751_v28 = vpop.f32.mrb[22].mxu0 }
 0x32e   : > { %v5250_v42 = vadd.f32 %v5249_v39, %v5219_v22  ;;  %6103 = vst [vmem:[%s9941_s22 + $0x48] sm:$0xff] %v6063_v16   ;;  %v5182_v24 = vadd.f32 %v5181_v34, %v4991_v47  ;;  %v7360_v12 = vadd.f32 %v7359_v37, %v7204_v5  ;;  %v4888_v40 = vpop.f32.mrb[85].mxu1  ;;  %v6752_v57 = vpop.f32.mrb[23].mxu0 }
 0x32f   : > { %6102 = vst [vmem:[%s9941_s22 + $0x40] sm:$0xff] %v6058_v61   ;;  %v7386_v21 = vadd.f32 %v9795_v62, %v6750_v13  ;;  %v7367_v54 = vadd.f32 %v9977_v2, %v4888_v40  ;;  %v7205_v0 = vpop.f32.mrb[86].mxu1  ;;  %v6753_v15 = vadd.f32 %v6752_v57, %v6751_v28  ;;  %v10280_v61 = vld [vmem:[#allocation23_spill] sm:$0xff] }
 0x330   : > { %v5183_v32 = vadd.f32 %v5182_v24, %v4992_v38  ;;  %v5251_v11 = vadd.f32 %v5250_v42, %v5220_v1  ;;  %v7374_v43 = vadd.f32 %v9997_v46, %v7205_v0  ;;  %v4891_v7 = vpop.f32.mrb[87].mxu1  ;;  %v4996_v62 = vadd.f32 %v7360_v12, %v9924_v48 }
 0x331   : > { %v4994_v41 = vadd.f32 %v7367_v54, %v9924_v48  ;;  %v7400_v37 = vadd.f32 %v9800_v8, %v6753_v15  ;;  %v7381_v25 = vadd.f32 %v9980_v6, %v4891_v7  ;;  %v7387_v9 = vadd.f32 %v7386_v21, %v9885_v60 }
 0x332   : > { %v5252_v50 = vadd.f32 %v5251_v11, %v5221_v10  ;;  %v5184_v2 = vadd.f32 %v5183_v32, %v4993_v18  ;;  %v4997_v17 = vadd.f32 %v7374_v43, %v9924_v48  ;;  %v5225_v38 = vmul.f32 %v4996_v62, %v4996_v62 }
 0x333   : > { %v5223_v58 = vmul.f32 %v4994_v41, %v4994_v41  ;;  %v4995_v35 = vadd.f32 %v7381_v25, %v9924_v48  ;;  %v6754_v46 = vpop.f32.mrb[24].mxu0  ;;  %v7401_v4 = vadd.f32 %v7400_v37, %v9888_v59 }
 0x334   : > { %v5185_v27 = vadd.f32 %v5184_v2, %v4994_v41  ;;  %v5253_v8 = vadd.f32 %v5252_v50, %v5222_v56  ;;  %v6073_v33 = vpack.c.bf16 %v4997_v17, %v4996_v62  ;;  %v6755_v6 = vpop.f32.mrb[25].mxu0  ;;  %v5226_v47 = vmul.f32 %v4997_v17, %v4997_v17 }
 0x335   : > { %v6068_v55 = vpack.c.bf16 %v4995_v35, %v4994_v41  ;;  %v5224_v60 = vmul.f32 %v4995_v35, %v4995_v35  ;;  %v7208_v52 = vpop.f32.mrb[88].mxu1  ;;  %v6756_v53 = vadd.f32 %v6755_v6, %v6754_v46  ;;  %v6757_v30 = vpop.f32.mrb[26].mxu0 }
 0x336   : > { %v5254_v26 = vadd.f32 %v5253_v8, %v5223_v58  ;;  %6105 = vst [vmem:[%s9941_s22 + $0x58] sm:$0xff] %v6073_v33   ;;  %v5186_v49 = vadd.f32 %v5185_v27, %v4995_v35  ;;  %v7388_v51 = vadd.f32 %v7387_v9, %v7208_v52  ;;  %v4904_v45 = vpop.f32.mrb[89].mxu1  ;;  %v6758_v63 = vpop.f32.mrb[27].mxu0  ;;  %v10281_v58 = vld [vmem:[#allocation11_spill] sm:$0xff]  ;;  %v10283_v52 = vld [vmem:[#allocation18_spill] sm:$0xff] }
 0x337   : > { %6104 = vst [vmem:[%s9941_s22 + $0x50] sm:$0xff] %v6068_v55   ;;  %v7421_v59 = vadd.f32 %v9805_v29, %v6756_v53  ;;  %v7395_v36 = vadd.f32 %v10009_v3, %v4904_v45  ;;  %v7209_v18 = vpop.f32.mrb[90].mxu1  ;;  %v6759_v22 = vadd.f32 %v6758_v63, %v6757_v30 }
 0x338   : > { %v5187_v31 = vadd.f32 %v5186_v49, %v4996_v62  ;;  %v5255_v34 = vadd.f32 %v5254_v26, %v5224_v60  ;;  %v7402_v39 = vadd.f32 %v7401_v4, %v7209_v18  ;;  %v4907_v16 = vpop.f32.mrb[91].mxu1  ;;  %v5000_v29 = vadd.f32 %v7388_v51, %v9924_v48  ;;  %v10282_v4 = vld [vmem:[#allocation17_spill] sm:$0xff] }
 0x339   : > { %v4998_v44 = vadd.f32 %v7395_v36, %v9924_v48  ;;  %v7435_v1 = vadd.f32 %v10280_v61, %v6759_v22  ;;  %v7409_v5 = vadd.f32 %v10015_v23, %v4907_v16  ;;  %v7422_v13 = vadd.f32 %v7421_v59, %v9897_v14 }
 0x33a   : > { %v5256_v28 = vadd.f32 %v5255_v34, %v5225_v38  ;;  %v5188_v42 = vadd.f32 %v5187_v31, %v4997_v17  ;;  %v5001_v3 = vadd.f32 %v7402_v39, %v9924_v48  ;;  %v5229_v50 = vmul.f32 %v5000_v29, %v5000_v29 }
 0x33b   : > { %v5227_v24 = vmul.f32 %v4998_v44, %v4998_v44  ;;  %v4999_v12 = vadd.f32 %v7409_v5, %v9924_v48  ;;  %v6760_v40 = vpop.f32.mrb[28].mxu0  ;;  %v7436_v57 = vadd.f32 %v7435_v1, %v9900_v20 }
 0x33c   : > { %v5189_v10 = vadd.f32 %v5188_v42, %v4998_v44  ;;  %v5257_v21 = vadd.f32 %v5256_v28, %v5226_v47  ;;  %v6083_v54 = vpack.c.bf16 %v5001_v3, %v5000_v29  ;;  %v6761_v23 = vpop.f32.mrb[29].mxu0  ;;  %v5230_v33 = vmul.f32 %v5001_v3, %v5001_v3 }
 0x33d   : > { %v6078_v0 = vpack.c.bf16 %v4999_v12, %v4998_v44  ;;  %v5228_v14 = vmul.f32 %v4999_v12, %v4999_v12  ;;  %v7212_v15 = vpop.f32.mrb[92].mxu1  ;;  %v6762_v56 = vadd.f32 %v6761_v23, %v6760_v40  ;;  %v6763_v32 = vpop.f32.mrb[30].mxu0 }
 0x33e   : > { %v5258_v11 = vadd.f32 %v5257_v21, %v5227_v24  ;;  %6107 = vst [vmem:[%s9941_s22 + $0x68] sm:$0xff] %v6083_v54   ;;  %v5190_v43 = vadd.f32 %v5189_v10, %v4999_v12  ;;  %v4920_v7 = vpop.f32.mrb[93].mxu1  ;;  %v6764_v41 = vpop.f32.mrb[31].mxu0 }
 0x33f   : > { %6106 = vst [vmem:[%s9941_s22 + $0x60] sm:$0xff] %v6078_v0   ;;  %v7414_v37 = vadd.f32 %v9815_v19, %v6762_v56  ;;  %v7423_v25 = vadd.f32 %v7422_v13, %v4920_v7  ;;  %v7213_v9 = vpop.f32.mrb[94].mxu1  ;;  %v6765_v20 = vadd.f32 %v6764_v41, %v6763_v32 }
 0x340   : > { %v5191_v62 = vadd.f32 %v5190_v43, %v5000_v29  ;;  %v5259_v2 = vadd.f32 %v5258_v11, %v5228_v14  ;;  %v4923_v17 = vpop.f32.mrb[95].mxu1 }
 0x341   : > { %v7415_v35 = vadd.f32 %v7414_v37, %v10281_v58  ;;  %v5002_v46 = vadd.f32 %v7423_v25, %v9924_v48  ;;  %v7428_v27 = vadd.f32 %v10282_v4, %v6765_v20  ;;  %v7437_v8 = vadd.f32 %v7436_v57, %v4923_v17 }
 0x342   : > { %v5260_v6 = vadd.f32 %v5259_v2, %v5229_v50  ;;  %v5192_v55 = vadd.f32 %v5191_v62, %v5001_v3 }
 0x343   : > { %v7416_v60 = vadd.f32 %v7415_v35, %v7212_v15  ;;  %v5231_v19 = vmul.f32 %v5002_v46, %v5002_v46  ;;  %v7429_v53 = vadd.f32 %v7428_v27, %v10283_v52  ;;  %v5003_v30 = vadd.f32 %v7437_v8, %v9924_v48 }
 0x344   : > { %v5193_v26 = vadd.f32 %v5192_v55, %v5002_v46  ;;  %v5261_v49 = vadd.f32 %v5260_v6, %v5230_v33 }
 0x345   : > { %v5004_v51 = vadd.f32 %v7416_v60, %v9924_v48  ;;  %v7430_v45 = vadd.f32 %v7429_v53, %v7213_v9  ;;  %v6088_v63 = vpack.c.bf16 %v5003_v30, %v5002_v46  ;;  %v5232_v38 = vmul.f32 %v5003_v30, %v5003_v30 }
 0x346   : > { %v5262_v59 = vadd.f32 %v5261_v49, %v5231_v19  ;;  %v5194_v36 = vadd.f32 %v5193_v26, %v5003_v30 }
 0x347   : > { %v5005_v18 = vadd.f32 %v7430_v45, %v9924_v48  ;;  %6108 = vst [vmem:[%s9941_s22 + $0x70] sm:$0xff] %v6088_v63   ;;  %v5233_v22 = vmul.f32 %v5004_v51, %v5004_v51 }
 0x348   : > { %v5195_v47 = vadd.f32 %v5194_v36, %v5004_v51  ;;  %v5263_v31 = vadd.f32 %v5262_v59, %v5232_v38 }
 0x349   : > { %v6093_v34 = vpack.c.bf16 %v5005_v18, %v5004_v51  ;;  %v5234_v39 = vmul.f32 %v5005_v18, %v5005_v18 }
 0x34a   : > { %v5196_v16 = vadd.f32 %v5195_v47, %v5005_v18  ;;  %v5264_v44 = vadd.f32 %v5263_v31, %v5233_v22 }
 0x34b   : > { %6109 = vst [vmem:[%s9941_s22 + $0x78] sm:$0xff] %v6093_v34  }
 0x34c   : > { %v5197_v61 = vrot.slane %v5196_v16, 4  ;;  %v5265_v1 = vadd.f32 %v5264_v44, %v5234_v39 }
 0x34e   : > { %v5198_v5 = vadd.f32 %v5197_v61, %v5196_v16  ;;  %v5266_v13 = vrot.slane %v5265_v1, 4 }
 0x350   : > { %v5199_v28 = vrot.slane %v5198_v5, 2  ;;  %v5267_v29 = vadd.f32 %v5266_v13, %v5265_v1 }
 0x352   : > { %v5200_v42 = vadd.f32 %v5199_v28, %v5198_v5  ;;  %v5268_v3 = vrot.slane %v5267_v29, 2 }
 0x354   : > { %v5201_v24 = vrot.slane %v5200_v42, 1  ;;  %v5269_v48 = vadd.f32 %v5268_v3, %v5267_v29 }
 0x356   : > { %v5270_v12 = vrot.slane %v5269_v48, 1  ;;  %v5202_v40 = vadd.f32 %v5201_v24, %v5200_v42 }
 0x358   : > { %v5271_v57 = vadd.f32 %v5270_v12, %v5269_v48 }
 0x35a   : > { %v5273_v10 = vsel %vm5272_vm2, %v5202_v40, %v5271_v57 }
 0x35b   : > { %5274 = vst [vmem:[%s703_s30] sm:$0x3] %v5273_v10 }
 0x35c PF: > { %s21_s15 = sadd.s32 1, %s7861_s15   ;;  %s10284_s13 = smov %s7857_s14 }
 0x35d   : > { %p18_p5 = scmp.ge.s32.totalorder %s21_s15, 4   ;;  %s10285_s14 = smov %s10287_s16 }
 0x35f   :  { %20 = sbr.rel (!%p18_p5) target bundleno = 2 (0x2), region = 117 }

</bundles_post_ra>
